<compile_context>
chip_gen: v6e
topology: v6e:2x2x1
jax: 0.10.0
libtpu: 0.0.40
codegen_flags: <defaults>
</compile_context>

<pallas_src>
import functools

import numpy as np
import jax
import jax.numpy as jnp
from jax import lax
from jax.experimental import pallas as pl
from jax.experimental.pallas import tpu as pltpu


def _stable_softplus(x):
    """softplus(x) = max(x, 0) + log1p(exp(-|x|)); never overflows."""
    return jnp.maximum(x, 0.0) + jnp.log1p(jnp.exp(-jnp.abs(x)))


def reader_seq_kernel(x_ref, wdec_ref, bdec_ref, mem_ref, memth_ref,
                      shiftcat_ref, prev_w_ref, out_ref):
    # Per grid step (bi,):
    #   x_ref:        (T, bb, C)   controller outputs for this batch block
    #   wdec_ref:     (C, M+6)     decoder weight (pre-transposed), VMEM-resident
    #   bdec_ref:     (1, M+6)     decoder bias, VMEM-resident
    #   mem_ref:      (N, M)       memory matrix (used for the read)
    #   memth_ref:    (M, N)       memory^T pre-scaled by 1/max(||row||, 1e-8)
    #   shiftcat_ref: (N, 2N)      fused [-1 | +1] circular-shift permutations
    #   prev_w_ref:   (bb, N)      initial weighting from Head.reset()
    #   out_ref:      (T, bb, OW)  lane-dense slab: [:, :, :M]=r, [:, :, M:M+N]=w_t
    T, bb, _ = x_ref.shape
    N, M = mem_ref.shape
    OW = out_ref.shape[2]

    # Loop-invariant operands: load once, reuse across the unrolled T loop.
    wdec = wdec_ref[...]
    bdec = bdec_ref[...]
    mem = mem_ref[...]
    mem_t_hat = memth_ref[...]
    shift_cat = shiftcat_ref[...]
    pad = jnp.zeros((bb, OW - M - N), jnp.float32)

    def step(t, w_prev):
        x = x_ref[t]                                               # [bb, C]

        # ----- address_param_decoder (Linear) -----
        params = jnp.dot(x, wdec, preferred_element_type=jnp.float32) + bdec

        # ----- _split_cols with lengths [M, 1, 1, 3, 1] -----
        k = params[:, 0:M]
        beta = _stable_softplus(params[:, M:M + 1])                # softplus
        g = jax.nn.sigmoid(params[:, M + 1:M + 2])                 # exact sigmoid
        s = jax.nn.softmax(params[:, M + 2:M + 5], axis=-1)        # exact softmax(3)
        gamma = jnp.maximum(params[:, M + 5:M + 6], 0.0) + 1.0     # relu + 1

        # ----- content addressing (memory-side norm pre-folded) -----
        k_norm = jnp.maximum(
            jnp.sqrt(jnp.sum(k * k, axis=-1, keepdims=True)), 1e-8)
        sim = jnp.dot(k, mem_t_hat, preferred_element_type=jnp.float32)  # [bb, N]
        sim = sim * pl.reciprocal(k_norm, approx=True)             # non-recurrent
        w_c = jax.nn.softmax(beta * sim, axis=-1)                  # [bb, N]

        # ----- interpolation with previous weighting -----
        w_g = g * w_c + (1.0 - g) * w_prev

        # ----- circular shift: ONE fused permutation matmul on the MXU -----
        w_both = jnp.dot(w_g, shift_cat,
                         preferred_element_type=jnp.float32)       # [bb, 2N]
        w_sh = (s[:, 0:1] * w_both[:, 0:N]
                + s[:, 1:2] * w_g
                + s[:, 2:3] * w_both[:, N:2 * N])

        # ----- sharpening (exact divide: this value is the recurrent carry) ---
        w_pow = jnp.power(w_sh + 1e-16, gamma)
        w_t = w_pow / (jnp.sum(w_pow, axis=-1, keepdims=True) + 1e-16)

        # ----- reading: r = w_t @ memory -----
        r = jnp.dot(w_t, mem, preferred_element_type=jnp.float32)  # [bb, M]

        # Single lane-dense, zero-padded store per timestep.
        out_ref[t] = jnp.concatenate([r, w_t, pad], axis=-1)
        return w_t

    lax.fori_loop(0, T, step, prev_w_ref[...], unroll=True)


@functools.partial(jax.jit, static_argnames=("batch_block",))
def reader_forward_sequence(controller_seq, w_dec_t, b_dec, memory, prev_w,
                            *, batch_block=None):
    """Runs T sequential Reader.forward steps (prev_w carried in-kernel).

    controller_seq: [T, B, C]; returns (r_seq [T, B, M], w_seq [T, B, N]).
    batch_block: B (default) on single-TC chips (v5e/v6e); B//2 on v7x to use
    both TensorCores via the parallel batch-block grid axis.
    """
    T, B, C = controller_seq.shape
    N, M = memory.shape
    P = w_dec_t.shape[1]
    assert P == M + 6
    OW = 128                                  # lane-dense output slab width
    assert M + N <= OW

    bb = B if batch_block is None else batch_block
    assert B % bb == 0
    GB = B // bb

    # Loop-invariant memory-side cosine norm folded into mem^T (hoisted).
    m_norm = jnp.maximum(
        jnp.sqrt(jnp.sum(memory * memory, axis=-1, keepdims=True)), 1e-8)  # [N,1]
    mem_t_hat = (memory / m_norm).T                                        # [M,N]

    # Constant fused permutation matrix for the +/-1 circular shifts.
    eye = np.eye(N, dtype=np.float32)
    shift_cat = jnp.asarray(
        np.concatenate([np.roll(eye, 1, axis=1),      # (w @ .)[j] = w[(j-1)%N]
                        np.roll(eye, -1, axis=1)],    # (w @ .)[j] = w[(j+1)%N]
                       axis=1))                       # (N, 2N)

    cost = pl.CostEstimate(
        flops=int(T * B * (2 * C * P + 2 * N * M + 4 * N * N + 30 * N)),
        transcendentals=int(T * B * (2 * N + 10)),
        bytes_accessed=int(4 * (T * B * C + T * B * OW + C * P + P
                                + 2 * N * M + 2 * N * N + B * N)),
    )

    out_slab = pl.pallas_call(
        reader_seq_kernel,
        out_shape=jax.ShapeDtypeStruct((T, B, OW), jnp.float32),
        grid=(GB,),
        in_specs=[
            pl.BlockSpec((T, bb, C), lambda bi: (0, bi, 0)),   # controller_seq
            pl.BlockSpec((C, P), lambda bi: (0, 0)),           # w_dec_t (resident)
            pl.BlockSpec((1, P), lambda bi: (0, 0)),           # b_dec   (resident)
            pl.BlockSpec((N, M), lambda bi: (0, 0)),           # memory  (resident)
            pl.BlockSpec((M, N), lambda bi: (0, 0)),           # memory^T / norms
            pl.BlockSpec((N, 2 * N), lambda bi: (0, 0)),       # fused shift mats
            pl.BlockSpec((bb, N), lambda bi: (bi, 0)),         # prev_w (reset state)
        ],
        out_specs=pl.BlockSpec((T, bb, OW), lambda bi: (0, bi, 0)),
        compiler_params=pltpu.CompilerParams(
            dimension_semantics=("parallel",)),                # v7x: 2 TCs if GB=2
        cost_estimate=cost,
    )(controller_seq, w_dec_t, b_dec, memory, mem_t_hat, shift_cat, prev_w)

    r_seq = out_slab[:, :, 0:M]
    w_seq = out_slab[:, :, M:M + N]
    return r_seq, w_seq


def reader_forward_step(controller_out, w_dec_t, b_dec, memory, prev_w):
    """Single Reader.forward: controller_out [B, C] -> (r [B, M], w_t [B, N])."""
    r, w = reader_forward_sequence(controller_out[None], w_dec_t, b_dec,
                                   memory, prev_w)
    return r[0], w[0]


def reader_reference(controller_seq, w_dec_t, b_dec, memory, prev_w):
    """Pure-JAX reference (exact divides) mirroring the kernel math."""
    N, M = memory.shape

    def step(w_prev, x):
        params = x @ w_dec_t + b_dec
        k = params[:, 0:M]
        beta = jax.nn.softplus(params[:, M:M + 1])
        g = jax.nn.sigmoid(params[:, M + 1:M + 2])
        s = jax.nn.softmax(params[:, M + 2:M + 5], axis=-1)
        gamma = jax.nn.relu(params[:, M + 5:M + 6]) + 1.0
        eps = 1e-8
        k_norm = jnp.maximum(jnp.linalg.norm(k, axis=-1, keepdims=True), eps)
        m_norm = jnp.maximum(jnp.linalg.norm(memory, axis=-1, keepdims=True), eps)
        sim = (k @ memory.T) / (k_norm * m_norm.T)
        w_c = jax.nn.softmax(beta * sim, axis=-1)
        w_g = g * w_c + (1.0 - g) * w_prev
        w_m1 = jnp.roll(w_g, 1, axis=-1)
        w_p1 = jnp.roll(w_g, -1, axis=-1)
        w_sh = s[:, 0:1] * w_m1 + s[:, 1:2] * w_g + s[:, 2:3] * w_p1
        w_pow = jnp.power(w_sh + 1e-16, gamma)
        w_t = w_pow / (jnp.sum(w_pow, axis=-1, keepdims=True) + 1e-16)
        r = w_t @ memory
        return w_t, (r, w_t)

    _, (r_seq, w_seq) = lax.scan(step, prev_w, controller_seq)
    return r_seq, w_seq


if __name__ == "__main__":
    # Small shapes consistent with the module's forward.
    T = 8      # timesteps, all folded into one grid step
    B = 16     # batch (fills two sublane groups of a vreg)
    C = 32     # controller_size
    N = 16     # memory slots (memory.N)
    M = 8      # memory width (memory.M)
    P = M + 1 + 1 + 3 + 1   # decoder output width = M + 6

    key = jax.random.PRNGKey(0)
    k_x, k_w, k_mem = jax.random.split(key, 3)

    # Deterministic parameter init matching __init__: xavier_uniform weight
    # [P, C], zero bias.  Weight is passed pre-transposed as [C, P].
    bound = (6.0 / (C + P)) ** 0.5
    w_dec = jax.random.uniform(k_w, (P, C), jnp.float32, -bound, bound)
    w_dec_t = w_dec.T
    b_dec = jnp.zeros((1, P), jnp.float32)

    # Memory matrix (synthetic deterministic state) and prev_w from reset().
    memory = jax.random.normal(k_mem, (N, M), jnp.float32) * 0.1
    prev_w = jnp.ones((B, N), jnp.float32) / N

    controller_seq = jax.random.normal(k_x, (T, B, C), jnp.float32)

    # Default batch_block=None -> bb = B (GB = 1): best for v5e/v6e.
    # On v7x, use batch_block=B // 2 to split the parallel axis over the 2 TCs.
    r_seq, w_seq = reader_forward_sequence(controller_seq, w_dec_t, b_dec,
                                           memory, prev_w)
    jax.block_until_ready((r_seq, w_seq))

    assert r_seq.shape == (T, B, M) and w_seq.shape == (T, B, N)
    assert bool(jnp.all(jnp.isfinite(r_seq))) and bool(jnp.all(jnp.isfinite(w_seq)))
    # Read weightings must be (approximately) distributions over the N slots.
    assert bool(jnp.all(w_seq >= -1e-6))
    assert bool(jnp.max(jnp.abs(jnp.sum(w_seq, axis=-1) - 1.0)) < 1e-3)

    # Numerical parity with the pure-JAX reference.
    r_ref, w_ref = reader_reference(controller_seq, w_dec_t, b_dec, memory, prev_w)
    np.testing.assert_allclose(np.asarray(r_seq), np.asarray(r_ref),
                               rtol=5e-2, atol=1e-2)
    np.testing.assert_allclose(np.asarray(w_seq), np.asarray(w_ref),
                               rtol=5e-2, atol=1e-2)

    # Also exercise the single-step entry point (one Reader.forward call).
    r1, w1 = reader_forward_step(controller_seq[0], w_dec_t, b_dec, memory, prev_w)
    jax.block_until_ready((r1, w1))
    assert r1.shape == (B, M) and w1.shape == (B, N)

    print("KERNEL_OK")
</pallas_src>

<mosaic_0001>
module attributes {stable_mosaic.version = 11 : i64} {
  func.func @reader_seq_kernel(%arg0: i32, %arg1: memref<8x16x32xf32, #tpu.memory_space<vmem>>, %arg2: memref<32x14xf32, #tpu.memory_space<vmem>>, %arg3: memref<1x14xf32, #tpu.memory_space<vmem>>, %arg4: memref<16x8xf32, #tpu.memory_space<vmem>>, %arg5: memref<8x16xf32, #tpu.memory_space<vmem>>, %arg6: memref<16x32xf32, #tpu.memory_space<vmem>>, %arg7: memref<16x16xf32, #tpu.memory_space<vmem>>, %arg8: memref<8x16x128xf32, #tpu.memory_space<vmem>>) attributes {dimension_semantics = [#tpu.dimension_semantics<parallel>], iteration_bounds = array<i64: 1>, scalar_prefetch = 0 : i64, scratch_operands = 0 : i64, tpu.core_type = #tpu.core_type<tc>, window_params = [{transform_indices = @transform_0, window_bounds = array<i64: 8, 16, 32>}, {pipeline_mode = #tpu.pipeline_mode<synchronous>, transform_indices = @transform_1, window_bounds = array<i64: 32, 14>}, {pipeline_mode = #tpu.pipeline_mode<synchronous>, transform_indices = @transform_2, window_bounds = array<i64: 1, 14>}, {pipeline_mode = #tpu.pipeline_mode<synchronous>, transform_indices = @transform_3, window_bounds = array<i64: 16, 8>}, {pipeline_mode = #tpu.pipeline_mode<synchronous>, transform_indices = @transform_4, window_bounds = array<i64: 8, 16>}, {pipeline_mode = #tpu.pipeline_mode<synchronous>, transform_indices = @transform_5, window_bounds = array<i64: 16, 32>}, {transform_indices = @transform_6, window_bounds = array<i64: 16, 16>}, {transform_indices = @transform_7, window_bounds = array<i64: 8, 16, 128>}]} {
    %c0 = arith.constant 0 : index
    %c0_0 = arith.constant 0 : index
    %0 = vector.load %arg2[%c0, %c0_0] : memref<32x14xf32, #tpu.memory_space<vmem>>, vector<32x14xf32>
    %c0_1 = arith.constant 0 : index
    %c0_2 = arith.constant 0 : index
    %1 = vector.load %arg3[%c0_1, %c0_2] : memref<1x14xf32, #tpu.memory_space<vmem>>, vector<1x14xf32>
    %c0_3 = arith.constant 0 : index
    %c0_4 = arith.constant 0 : index
    %2 = vector.load %arg4[%c0_3, %c0_4] : memref<16x8xf32, #tpu.memory_space<vmem>>, vector<16x8xf32>
    %c0_5 = arith.constant 0 : index
    %c0_6 = arith.constant 0 : index
    %3 = vector.load %arg5[%c0_5, %c0_6] : memref<8x16xf32, #tpu.memory_space<vmem>>, vector<8x16xf32>
    %c0_7 = arith.constant 0 : index
    %c0_8 = arith.constant 0 : index
    %4 = vector.load %arg6[%c0_7, %c0_8] : memref<16x32xf32, #tpu.memory_space<vmem>>, vector<16x32xf32>
    %cst = arith.constant 0.000000e+00 : f32
    %5 = vector.broadcast %cst : f32 to vector<16x104xf32>
    %c0_9 = arith.constant 0 : index
    %c0_10 = arith.constant 0 : index
    %6 = vector.load %arg7[%c0_9, %c0_10] : memref<16x16xf32, #tpu.memory_space<vmem>>, vector<16x16xf32>
    %c0_i32 = arith.constant 0 : i32
    %7 = arith.index_cast %c0_i32 : i32 to index
    %c0_11 = arith.constant 0 : index
    %c0_12 = arith.constant 0 : index
    %8 = vector.load %arg1[%7, %c0_11, %c0_12] : memref<8x16x32xf32, #tpu.memory_space<vmem>>, vector<1x16x32xf32>
    %9 = vector.shape_cast %8 : vector<1x16x32xf32> to vector<16x32xf32>
    %cst_13 = arith.constant dense<0.000000e+00> : vector<16x14xf32>
    %10 = tpu.matmul %9, %0, %cst_13 {dimension_numbers = #tpu.dot_dimension_numbers<[1], [0], [0], [1], [0, 0, 1, 1], [], []>} : vector<16x32xf32>, vector<32x14xf32>, vector<16x14xf32> -> vector<16x14xf32>
    %11 = vector.broadcast %1 : vector<1x14xf32> to vector<16x14xf32>
    %12 = arith.addf %10, %11 : vector<16x14xf32>
    %13 = vector.extract_strided_slice %12 {offsets = [0, 0], sizes = [16, 8], strides = [1, 1]} : vector<16x14xf32> to vector<16x8xf32>
    %14 = vector.extract_strided_slice %12 {offsets = [0, 8], sizes = [16, 1], strides = [1, 1]} : vector<16x14xf32> to vector<16x1xf32>
    %cst_14 = arith.constant 0.000000e+00 : f32
    %15 = vector.broadcast %cst_14 : f32 to vector<16x1xf32>
    %16 = arith.maximumf %14, %15 : vector<16x1xf32>
    %17 = math.absf %14 : vector<16x1xf32>
    %cst_15 = arith.constant 0.000000e+00 : f32
    %18 = vector.broadcast %cst_15 : f32 to vector<16x1xf32>
    %19 = arith.subf %18, %17 : vector<16x1xf32>
    %20 = math.exp %19 : vector<16x1xf32>
    %21 = math.log1p %20 : vector<16x1xf32>
    %22 = arith.addf %16, %21 : vector<16x1xf32>
    %23 = vector.extract_strided_slice %12 {offsets = [0, 9], sizes = [16, 1], strides = [1, 1]} : vector<16x14xf32> to vector<16x1xf32>
    %24 = arith.negf %23 : vector<16x1xf32>
    %25 = math.exp %24 : vector<16x1xf32>
    %cst_16 = arith.constant 1.000000e+00 : f32
    %26 = vector.broadcast %cst_16 : f32 to vector<16x1xf32>
    %27 = arith.addf %26, %25 : vector<16x1xf32>
    %28 = arith.divf %26, %27 : vector<16x1xf32>
    %29 = vector.extract_strided_slice %12 {offsets = [0, 10], sizes = [16, 3], strides = [1, 1]} : vector<16x14xf32> to vector<16x3xf32>
    %cst_17 = arith.constant dense<0xFF800000> : vector<16xf32>
    %30 = vector.multi_reduction <maximumf>, %29, %cst_17 [1] : vector<16x3xf32> to vector<16xf32>
    %cst_18 = arith.constant 0xFF800000 : f32
    %31 = vector.broadcast %cst_18 : f32 to vector<16xf32>
    %32 = arith.maximumf %31, %30 : vector<16xf32>
    %33 = vector.shape_cast %32 : vector<16xf32> to vector<16x1xf32>
    %34 = vector.broadcast %33 : vector<16x1xf32> to vector<16x3xf32>
    %35 = arith.subf %29, %34 : vector<16x3xf32>
    %36 = math.exp %35 : vector<16x3xf32>
    %cst_19 = arith.constant dense<0.000000e+00> : vector<16xf32>
    %37 = vector.multi_reduction <add>, %36, %cst_19 [1] : vector<16x3xf32> to vector<16xf32>
    %38 = vector.shape_cast %37 : vector<16xf32> to vector<16x1xf32>
    %39 = vector.broadcast %38 : vector<16x1xf32> to vector<16x3xf32>
    %40 = arith.divf %36, %39 : vector<16x3xf32>
    %41 = vector.extract_strided_slice %12 {offsets = [0, 13], sizes = [16, 1], strides = [1, 1]} : vector<16x14xf32> to vector<16x1xf32>
    %cst_20 = arith.constant 0.000000e+00 : f32
    %42 = vector.broadcast %cst_20 : f32 to vector<16x1xf32>
    %43 = arith.maximumf %41, %42 : vector<16x1xf32>
    %cst_21 = arith.constant 1.000000e+00 : f32
    %44 = vector.broadcast %cst_21 : f32 to vector<16x1xf32>
    %45 = arith.addf %43, %44 : vector<16x1xf32>
    %46 = arith.mulf %13, %13 : vector<16x8xf32>
    %cst_22 = arith.constant dense<0.000000e+00> : vector<16xf32>
    %47 = vector.multi_reduction <add>, %46, %cst_22 [1] : vector<16x8xf32> to vector<16xf32>
    %48 = vector.shape_cast %47 : vector<16xf32> to vector<16x1xf32>
    %49 = math.sqrt %48 : vector<16x1xf32>
    %cst_23 = arith.constant 9.99999993E-9 : f32
    %50 = vector.broadcast %cst_23 : f32 to vector<16x1xf32>
    %51 = arith.maximumf %49, %50 : vector<16x1xf32>
    %cst_24 = arith.constant dense<0.000000e+00> : vector<16x16xf32>
    %52 = tpu.matmul %13, %3, %cst_24 {dimension_numbers = #tpu.dot_dimension_numbers<[1], [0], [0], [1], [0, 0, 1, 1], [], []>} : vector<16x8xf32>, vector<8x16xf32>, vector<16x16xf32> -> vector<16x16xf32>
    %53 = tpu.reciprocal %51 {approx = true} : vector<16x1xf32> -> vector<16x1xf32>
    %54 = vector.broadcast %53 : vector<16x1xf32> to vector<16x16xf32>
    %55 = arith.mulf %52, %54 : vector<16x16xf32>
    %56 = vector.broadcast %22 : vector<16x1xf32> to vector<16x16xf32>
    %57 = arith.mulf %56, %55 : vector<16x16xf32>
    %cst_25 = arith.constant dense<0xFF800000> : vector<16xf32>
    %58 = vector.multi_reduction <maximumf>, %57, %cst_25 [1] : vector<16x16xf32> to vector<16xf32>
    %cst_26 = arith.constant 0xFF800000 : f32
    %59 = vector.broadcast %cst_26 : f32 to vector<16xf32>
    %60 = arith.maximumf %59, %58 : vector<16xf32>
    %61 = vector.shape_cast %60 : vector<16xf32> to vector<16x1xf32>
    %62 = vector.broadcast %61 : vector<16x1xf32> to vector<16x16xf32>
    %63 = arith.subf %57, %62 : vector<16x16xf32>
    %64 = math.exp %63 : vector<16x16xf32>
    %cst_27 = arith.constant dense<0.000000e+00> : vector<16xf32>
    %65 = vector.multi_reduction <add>, %64, %cst_27 [1] : vector<16x16xf32> to vector<16xf32>
    %66 = vector.shape_cast %65 : vector<16xf32> to vector<16x1xf32>
    %67 = vector.broadcast %66 : vector<16x1xf32> to vector<16x16xf32>
    %68 = arith.divf %64, %67 : vector<16x16xf32>
    %69 = vector.broadcast %28 : vector<16x1xf32> to vector<16x16xf32>
    %70 = arith.mulf %69, %68 : vector<16x16xf32>
    %cst_28 = arith.constant 1.000000e+00 : f32
    %71 = vector.broadcast %cst_28 : f32 to vector<16x1xf32>
    %72 = arith.subf %71, %28 : vector<16x1xf32>
    %73 = vector.broadcast %72 : vector<16x1xf32> to vector<16x16xf32>
    %74 = arith.mulf %73, %6 : vector<16x16xf32>
    %75 = arith.addf %70, %74 : vector<16x16xf32>
    %cst_29 = arith.constant dense<0.000000e+00> : vector<16x32xf32>
    %76 = tpu.matmul %75, %4, %cst_29 {dimension_numbers = #tpu.dot_dimension_numbers<[1], [0], [0], [1], [0, 0, 1, 1], [], []>} : vector<16x16xf32>, vector<16x32xf32>, vector<16x32xf32> -> vector<16x32xf32>
    %77 = vector.extract_strided_slice %40 {offsets = [0, 0], sizes = [16, 1], strides = [1, 1]} : vector<16x3xf32> to vector<16x1xf32>
    %78 = vector.extract_strided_slice %76 {offsets = [0, 0], sizes = [16, 16], strides = [1, 1]} : vector<16x32xf32> to vector<16x16xf32>
    %79 = vector.broadcast %77 : vector<16x1xf32> to vector<16x16xf32>
    %80 = arith.mulf %79, %78 : vector<16x16xf32>
    %81 = vector.extract_strided_slice %40 {offsets = [0, 1], sizes = [16, 1], strides = [1, 1]} : vector<16x3xf32> to vector<16x1xf32>
    %82 = vector.broadcast %81 : vector<16x1xf32> to vector<16x16xf32>
    %83 = arith.mulf %82, %75 : vector<16x16xf32>
    %84 = arith.addf %80, %83 : vector<16x16xf32>
    %85 = vector.extract_strided_slice %40 {offsets = [0, 2], sizes = [16, 1], strides = [1, 1]} : vector<16x3xf32> to vector<16x1xf32>
    %86 = vector.extract_strided_slice %76 {offsets = [0, 16], sizes = [16, 16], strides = [1, 1]} : vector<16x32xf32> to vector<16x16xf32>
    %87 = vector.broadcast %85 : vector<16x1xf32> to vector<16x16xf32>
    %88 = arith.mulf %87, %86 : vector<16x16xf32>
    %89 = arith.addf %84, %88 : vector<16x16xf32>
    %cst_30 = arith.constant 1.000000e-16 : f32
    %90 = vector.broadcast %cst_30 : f32 to vector<16x16xf32>
    %91 = arith.addf %89, %90 : vector<16x16xf32>
    %92 = vector.broadcast %45 : vector<16x1xf32> to vector<16x16xf32>
    %93 = math.powf %91, %92 : vector<16x16xf32>
    %cst_31 = arith.constant dense<0.000000e+00> : vector<16xf32>
    %94 = vector.multi_reduction <add>, %93, %cst_31 [1] : vector<16x16xf32> to vector<16xf32>
    %95 = vector.shape_cast %94 : vector<16xf32> to vector<16x1xf32>
    %cst_32 = arith.constant 1.000000e-16 : f32
    %96 = vector.broadcast %cst_32 : f32 to vector<16x1xf32>
    %97 = arith.addf %95, %96 : vector<16x1xf32>
    %98 = vector.broadcast %97 : vector<16x1xf32> to vector<16x16xf32>
    %99 = arith.divf %93, %98 : vector<16x16xf32>
    %cst_33 = arith.constant dense<0.000000e+00> : vector<16x8xf32>
    %100 = tpu.matmul %99, %2, %cst_33 {dimension_numbers = #tpu.dot_dimension_numbers<[1], [0], [0], [1], [0, 0, 1, 1], [], []>} : vector<16x16xf32>, vector<16x8xf32>, vector<16x8xf32> -> vector<16x8xf32>
    %101 = tpu.concatenate %100, %99, %5 in 1 : vector<16x8xf32>, vector<16x16xf32>, vector<16x104xf32> -> vector<16x128xf32>
    %102 = arith.index_cast %c0_i32 : i32 to index
    %c0_34 = arith.constant 0 : index
    %c0_35 = arith.constant 0 : index
    %103 = vector.load %arg8[%102, %c0_34, %c0_35] : memref<8x16x128xf32, #tpu.memory_space<vmem>>, vector<1x16x128xf32>
    %104 = vector.shape_cast %103 : vector<1x16x128xf32> to vector<16x128xf32>
    %105 = vector.shape_cast %101 : vector<16x128xf32> to vector<1x16x128xf32>
    tpu.vector_store %arg8[%102, %c0_34, %c0_35], %105 {strides = array<i32>} : memref<8x16x128xf32, #tpu.memory_space<vmem>>, vector<1x16x128xf32>,
    %c1_i32 = arith.constant 1 : i32
    %106 = arith.index_cast %c1_i32 : i32 to index
    %c0_36 = arith.constant 0 : index
    %c0_37 = arith.constant 0 : index
    %107 = vector.load %arg1[%106, %c0_36, %c0_37] : memref<8x16x32xf32, #tpu.memory_space<vmem>>, vector<1x16x32xf32>
    %108 = vector.shape_cast %107 : vector<1x16x32xf32> to vector<16x32xf32>
    %cst_38 = arith.constant dense<0.000000e+00> : vector<16x14xf32>
    %109 = tpu.matmul %108, %0, %cst_38 {dimension_numbers = #tpu.dot_dimension_numbers<[1], [0], [0], [1], [0, 0, 1, 1], [], []>} : vector<16x32xf32>, vector<32x14xf32>, vector<16x14xf32> -> vector<16x14xf32>
    %110 = vector.broadcast %1 : vector<1x14xf32> to vector<16x14xf32>
    %111 = arith.addf %109, %110 : vector<16x14xf32>
    %112 = vector.extract_strided_slice %111 {offsets = [0, 0], sizes = [16, 8], strides = [1, 1]} : vector<16x14xf32> to vector<16x8xf32>
    %113 = vector.extract_strided_slice %111 {offsets = [0, 8], sizes = [16, 1], strides = [1, 1]} : vector<16x14xf32> to vector<16x1xf32>
    %cst_39 = arith.constant 0.000000e+00 : f32
    %114 = vector.broadcast %cst_39 : f32 to vector<16x1xf32>
    %115 = arith.maximumf %113, %114 : vector<16x1xf32>
    %116 = math.absf %113 : vector<16x1xf32>
    %cst_40 = arith.constant 0.000000e+00 : f32
    %117 = vector.broadcast %cst_40 : f32 to vector<16x1xf32>
    %118 = arith.subf %117, %116 : vector<16x1xf32>
    %119 = math.exp %118 : vector<16x1xf32>
    %120 = math.log1p %119 : vector<16x1xf32>
    %121 = arith.addf %115, %120 : vector<16x1xf32>
    %122 = vector.extract_strided_slice %111 {offsets = [0, 9], sizes = [16, 1], strides = [1, 1]} : vector<16x14xf32> to vector<16x1xf32>
    %123 = arith.negf %122 : vector<16x1xf32>
    %124 = math.exp %123 : vector<16x1xf32>
    %cst_41 = arith.constant 1.000000e+00 : f32
    %125 = vector.broadcast %cst_41 : f32 to vector<16x1xf32>
    %126 = arith.addf %125, %124 : vector<16x1xf32>
    %127 = arith.divf %125, %126 : vector<16x1xf32>
    %128 = vector.extract_strided_slice %111 {offsets = [0, 10], sizes = [16, 3], strides = [1, 1]} : vector<16x14xf32> to vector<16x3xf32>
    %cst_42 = arith.constant dense<0xFF800000> : vector<16xf32>
    %129 = vector.multi_reduction <maximumf>, %128, %cst_42 [1] : vector<16x3xf32> to vector<16xf32>
    %cst_43 = arith.constant 0xFF800000 : f32
    %130 = vector.broadcast %cst_43 : f32 to vector<16xf32>
    %131 = arith.maximumf %130, %129 : vector<16xf32>
    %132 = vector.shape_cast %131 : vector<16xf32> to vector<16x1xf32>
    %133 = vector.broadcast %132 : vector<16x1xf32> to vector<16x3xf32>
    %134 = arith.subf %128, %133 : vector<16x3xf32>
    %135 = math.exp %134 : vector<16x3xf32>
    %cst_44 = arith.constant dense<0.000000e+00> : vector<16xf32>
    %136 = vector.multi_reduction <add>, %135, %cst_44 [1] : vector<16x3xf32> to vector<16xf32>
    %137 = vector.shape_cast %136 : vector<16xf32> to vector<16x1xf32>
    %138 = vector.broadcast %137 : vector<16x1xf32> to vector<16x3xf32>
    %139 = arith.divf %135, %138 : vector<16x3xf32>
    %140 = vector.extract_strided_slice %111 {offsets = [0, 13], sizes = [16, 1], strides = [1, 1]} : vector<16x14xf32> to vector<16x1xf32>
    %cst_45 = arith.constant 0.000000e+00 : f32
    %141 = vector.broadcast %cst_45 : f32 to vector<16x1xf32>
    %142 = arith.maximumf %140, %141 : vector<16x1xf32>
    %cst_46 = arith.constant 1.000000e+00 : f32
    %143 = vector.broadcast %cst_46 : f32 to vector<16x1xf32>
    %144 = arith.addf %142, %143 : vector<16x1xf32>
    %145 = arith.mulf %112, %112 : vector<16x8xf32>
    %cst_47 = arith.constant dense<0.000000e+00> : vector<16xf32>
    %146 = vector.multi_reduction <add>, %145, %cst_47 [1] : vector<16x8xf32> to vector<16xf32>
    %147 = vector.shape_cast %146 : vector<16xf32> to vector<16x1xf32>
    %148 = math.sqrt %147 : vector<16x1xf32>
    %cst_48 = arith.constant 9.99999993E-9 : f32
    %149 = vector.broadcast %cst_48 : f32 to vector<16x1xf32>
    %150 = arith.maximumf %148, %149 : vector<16x1xf32>
    %cst_49 = arith.constant dense<0.000000e+00> : vector<16x16xf32>
    %151 = tpu.matmul %112, %3, %cst_49 {dimension_numbers = #tpu.dot_dimension_numbers<[1], [0], [0], [1], [0, 0, 1, 1], [], []>} : vector<16x8xf32>, vector<8x16xf32>, vector<16x16xf32> -> vector<16x16xf32>
    %152 = tpu.reciprocal %150 {approx = true} : vector<16x1xf32> -> vector<16x1xf32>
    %153 = vector.broadcast %152 : vector<16x1xf32> to vector<16x16xf32>
    %154 = arith.mulf %151, %153 : vector<16x16xf32>
    %155 = vector.broadcast %121 : vector<16x1xf32> to vector<16x16xf32>
    %156 = arith.mulf %155, %154 : vector<16x16xf32>
    %cst_50 = arith.constant dense<0xFF800000> : vector<16xf32>
    %157 = vector.multi_reduction <maximumf>, %156, %cst_50 [1] : vector<16x16xf32> to vector<16xf32>
    %cst_51 = arith.constant 0xFF800000 : f32
    %158 = vector.broadcast %cst_51 : f32 to vector<16xf32>
    %159 = arith.maximumf %158, %157 : vector<16xf32>
    %160 = vector.shape_cast %159 : vector<16xf32> to vector<16x1xf32>
    %161 = vector.broadcast %160 : vector<16x1xf32> to vector<16x16xf32>
    %162 = arith.subf %156, %161 : vector<16x16xf32>
    %163 = math.exp %162 : vector<16x16xf32>
    %cst_52 = arith.constant dense<0.000000e+00> : vector<16xf32>
    %164 = vector.multi_reduction <add>, %163, %cst_52 [1] : vector<16x16xf32> to vector<16xf32>
    %165 = vector.shape_cast %164 : vector<16xf32> to vector<16x1xf32>
    %166 = vector.broadcast %165 : vector<16x1xf32> to vector<16x16xf32>
    %167 = arith.divf %163, %166 : vector<16x16xf32>
    %168 = vector.broadcast %127 : vector<16x1xf32> to vector<16x16xf32>
    %169 = arith.mulf %168, %167 : vector<16x16xf32>
    %cst_53 = arith.constant 1.000000e+00 : f32
    %170 = vector.broadcast %cst_53 : f32 to vector<16x1xf32>
    %171 = arith.subf %170, %127 : vector<16x1xf32>
    %172 = vector.broadcast %171 : vector<16x1xf32> to vector<16x16xf32>
    %173 = arith.mulf %172, %99 : vector<16x16xf32>
    %174 = arith.addf %169, %173 : vector<16x16xf32>
    %cst_54 = arith.constant dense<0.000000e+00> : vector<16x32xf32>
    %175 = tpu.matmul %174, %4, %cst_54 {dimension_numbers = #tpu.dot_dimension_numbers<[1], [0], [0], [1], [0, 0, 1, 1], [], []>} : vector<16x16xf32>, vector<16x32xf32>, vector<16x32xf32> -> vector<16x32xf32>
    %176 = vector.extract_strided_slice %139 {offsets = [0, 0], sizes = [16, 1], strides = [1, 1]} : vector<16x3xf32> to vector<16x1xf32>
    %177 = vector.extract_strided_slice %175 {offsets = [0, 0], sizes = [16, 16], strides = [1, 1]} : vector<16x32xf32> to vector<16x16xf32>
    %178 = vector.broadcast %176 : vector<16x1xf32> to vector<16x16xf32>
    %179 = arith.mulf %178, %177 : vector<16x16xf32>
    %180 = vector.extract_strided_slice %139 {offsets = [0, 1], sizes = [16, 1], strides = [1, 1]} : vector<16x3xf32> to vector<16x1xf32>
    %181 = vector.broadcast %180 : vector<16x1xf32> to vector<16x16xf32>
    %182 = arith.mulf %181, %174 : vector<16x16xf32>
    %183 = arith.addf %179, %182 : vector<16x16xf32>
    %184 = vector.extract_strided_slice %139 {offsets = [0, 2], sizes = [16, 1], strides = [1, 1]} : vector<16x3xf32> to vector<16x1xf32>
    %185 = vector.extract_strided_slice %175 {offsets = [0, 16], sizes = [16, 16], strides = [1, 1]} : vector<16x32xf32> to vector<16x16xf32>
    %186 = vector.broadcast %184 : vector<16x1xf32> to vector<16x16xf32>
    %187 = arith.mulf %186, %185 : vector<16x16xf32>
    %188 = arith.addf %183, %187 : vector<16x16xf32>
    %cst_55 = arith.constant 1.000000e-16 : f32
    %189 = vector.broadcast %cst_55 : f32 to vector<16x16xf32>
    %190 = arith.addf %188, %189 : vector<16x16xf32>
    %191 = vector.broadcast %144 : vector<16x1xf32> to vector<16x16xf32>
    %192 = math.powf %190, %191 : vector<16x16xf32>
    %cst_56 = arith.constant dense<0.000000e+00> : vector<16xf32>
    %193 = vector.multi_reduction <add>, %192, %cst_56 [1] : vector<16x16xf32> to vector<16xf32>
    %194 = vector.shape_cast %193 : vector<16xf32> to vector<16x1xf32>
    %cst_57 = arith.constant 1.000000e-16 : f32
    %195 = vector.broadcast %cst_57 : f32 to vector<16x1xf32>
    %196 = arith.addf %194, %195 : vector<16x1xf32>
    %197 = vector.broadcast %196 : vector<16x1xf32> to vector<16x16xf32>
    %198 = arith.divf %192, %197 : vector<16x16xf32>
    %cst_58 = arith.constant dense<0.000000e+00> : vector<16x8xf32>
    %199 = tpu.matmul %198, %2, %cst_58 {dimension_numbers = #tpu.dot_dimension_numbers<[1], [0], [0], [1], [0, 0, 1, 1], [], []>} : vector<16x16xf32>, vector<16x8xf32>, vector<16x8xf32> -> vector<16x8xf32>
    %200 = tpu.concatenate %199, %198, %5 in 1 : vector<16x8xf32>, vector<16x16xf32>, vector<16x104xf32> -> vector<16x128xf32>
    %201 = arith.index_cast %c1_i32 : i32 to index
    %c0_59 = arith.constant 0 : index
    %c0_60 = arith.constant 0 : index
    %202 = vector.load %arg8[%201, %c0_59, %c0_60] : memref<8x16x128xf32, #tpu.memory_space<vmem>>, vector<1x16x128xf32>
    %203 = vector.shape_cast %202 : vector<1x16x128xf32> to vector<16x128xf32>
    %204 = vector.shape_cast %200 : vector<16x128xf32> to vector<1x16x128xf32>
    tpu.vector_store %arg8[%201, %c0_59, %c0_60], %204 {strides = array<i32>} : memref<8x16x128xf32, #tpu.memory_space<vmem>>, vector<1x16x128xf32>,
    %c2_i32 = arith.constant 2 : i32
    %205 = arith.index_cast %c2_i32 : i32 to index
    %c0_61 = arith.constant 0 : index
    %c0_62 = arith.constant 0 : index
    %206 = vector.load %arg1[%205, %c0_61, %c0_62] : memref<8x16x32xf32, #tpu.memory_space<vmem>>, vector<1x16x32xf32>
    %207 = vector.shape_cast %206 : vector<1x16x32xf32> to vector<16x32xf32>
    %cst_63 = arith.constant dense<0.000000e+00> : vector<16x14xf32>
    %208 = tpu.matmul %207, %0, %cst_63 {dimension_numbers = #tpu.dot_dimension_numbers<[1], [0], [0], [1], [0, 0, 1, 1], [], []>} : vector<16x32xf32>, vector<32x14xf32>, vector<16x14xf32> -> vector<16x14xf32>
    %209 = vector.broadcast %1 : vector<1x14xf32> to vector<16x14xf32>
    %210 = arith.addf %208, %209 : vector<16x14xf32>
    %211 = vector.extract_strided_slice %210 {offsets = [0, 0], sizes = [16, 8], strides = [1, 1]} : vector<16x14xf32> to vector<16x8xf32>
    %212 = vector.extract_strided_slice %210 {offsets = [0, 8], sizes = [16, 1], strides = [1, 1]} : vector<16x14xf32> to vector<16x1xf32>
    %cst_64 = arith.constant 0.000000e+00 : f32
    %213 = vector.broadcast %cst_64 : f32 to vector<16x1xf32>
    %214 = arith.maximumf %212, %213 : vector<16x1xf32>
    %215 = math.absf %212 : vector<16x1xf32>
    %cst_65 = arith.constant 0.000000e+00 : f32
    %216 = vector.broadcast %cst_65 : f32 to vector<16x1xf32>
    %217 = arith.subf %216, %215 : vector<16x1xf32>
    %218 = math.exp %217 : vector<16x1xf32>
    %219 = math.log1p %218 : vector<16x1xf32>
    %220 = arith.addf %214, %219 : vector<16x1xf32>
    %221 = vector.extract_strided_slice %210 {offsets = [0, 9], sizes = [16, 1], strides = [1, 1]} : vector<16x14xf32> to vector<16x1xf32>
    %222 = arith.negf %221 : vector<16x1xf32>
    %223 = math.exp %222 : vector<16x1xf32>
    %cst_66 = arith.constant 1.000000e+00 : f32
    %224 = vector.broadcast %cst_66 : f32 to vector<16x1xf32>
    %225 = arith.addf %224, %223 : vector<16x1xf32>
    %226 = arith.divf %224, %225 : vector<16x1xf32>
    %227 = vector.extract_strided_slice %210 {offsets = [0, 10], sizes = [16, 3], strides = [1, 1]} : vector<16x14xf32> to vector<16x3xf32>
    %cst_67 = arith.constant dense<0xFF800000> : vector<16xf32>
    %228 = vector.multi_reduction <maximumf>, %227, %cst_67 [1] : vector<16x3xf32> to vector<16xf32>
    %cst_68 = arith.constant 0xFF800000 : f32
    %229 = vector.broadcast %cst_68 : f32 to vector<16xf32>
    %230 = arith.maximumf %229, %228 : vector<16xf32>
    %231 = vector.shape_cast %230 : vector<16xf32> to vector<16x1xf32>
    %232 = vector.broadcast %231 : vector<16x1xf32> to vector<16x3xf32>
    %233 = arith.subf %227, %232 : vector<16x3xf32>
    %234 = math.exp %233 : vector<16x3xf32>
    %cst_69 = arith.constant dense<0.000000e+00> : vector<16xf32>
    %235 = vector.multi_reduction <add>, %234, %cst_69 [1] : vector<16x3xf32> to vector<16xf32>
    %236 = vector.shape_cast %235 : vector<16xf32> to vector<16x1xf32>
    %237 = vector.broadcast %236 : vector<16x1xf32> to vector<16x3xf32>
    %238 = arith.divf %234, %237 : vector<16x3xf32>
    %239 = vector.extract_strided_slice %210 {offsets = [0, 13], sizes = [16, 1], strides = [1, 1]} : vector<16x14xf32> to vector<16x1xf32>
    %cst_70 = arith.constant 0.000000e+00 : f32
    %240 = vector.broadcast %cst_70 : f32 to vector<16x1xf32>
    %241 = arith.maximumf %239, %240 : vector<16x1xf32>
    %cst_71 = arith.constant 1.000000e+00 : f32
    %242 = vector.broadcast %cst_71 : f32 to vector<16x1xf32>
    %243 = arith.addf %241, %242 : vector<16x1xf32>
    %244 = arith.mulf %211, %211 : vector<16x8xf32>
    %cst_72 = arith.constant dense<0.000000e+00> : vector<16xf32>
    %245 = vector.multi_reduction <add>, %244, %cst_72 [1] : vector<16x8xf32> to vector<16xf32>
    %246 = vector.shape_cast %245 : vector<16xf32> to vector<16x1xf32>
    %247 = math.sqrt %246 : vector<16x1xf32>
    %cst_73 = arith.constant 9.99999993E-9 : f32
    %248 = vector.broadcast %cst_73 : f32 to vector<16x1xf32>
    %249 = arith.maximumf %247, %248 : vector<16x1xf32>
    %cst_74 = arith.constant dense<0.000000e+00> : vector<16x16xf32>
    %250 = tpu.matmul %211, %3, %cst_74 {dimension_numbers = #tpu.dot_dimension_numbers<[1], [0], [0], [1], [0, 0, 1, 1], [], []>} : vector<16x8xf32>, vector<8x16xf32>, vector<16x16xf32> -> vector<16x16xf32>
    %251 = tpu.reciprocal %249 {approx = true} : vector<16x1xf32> -> vector<16x1xf32>
    %252 = vector.broadcast %251 : vector<16x1xf32> to vector<16x16xf32>
    %253 = arith.mulf %250, %252 : vector<16x16xf32>
    %254 = vector.broadcast %220 : vector<16x1xf32> to vector<16x16xf32>
    %255 = arith.mulf %254, %253 : vector<16x16xf32>
    %cst_75 = arith.constant dense<0xFF800000> : vector<16xf32>
    %256 = vector.multi_reduction <maximumf>, %255, %cst_75 [1] : vector<16x16xf32> to vector<16xf32>
    %cst_76 = arith.constant 0xFF800000 : f32
    %257 = vector.broadcast %cst_76 : f32 to vector<16xf32>
    %258 = arith.maximumf %257, %256 : vector<16xf32>
    %259 = vector.shape_cast %258 : vector<16xf32> to vector<16x1xf32>
    %260 = vector.broadcast %259 : vector<16x1xf32> to vector<16x16xf32>
    %261 = arith.subf %255, %260 : vector<16x16xf32>
    %262 = math.exp %261 : vector<16x16xf32>
    %cst_77 = arith.constant dense<0.000000e+00> : vector<16xf32>
    %263 = vector.multi_reduction <add>, %262, %cst_77 [1] : vector<16x16xf32> to vector<16xf32>
    %264 = vector.shape_cast %263 : vector<16xf32> to vector<16x1xf32>
    %265 = vector.broadcast %264 : vector<16x1xf32> to vector<16x16xf32>
    %266 = arith.divf %262, %265 : vector<16x16xf32>
    %267 = vector.broadcast %226 : vector<16x1xf32> to vector<16x16xf32>
    %268 = arith.mulf %267, %266 : vector<16x16xf32>
    %cst_78 = arith.constant 1.000000e+00 : f32
    %269 = vector.broadcast %cst_78 : f32 to vector<16x1xf32>
    %270 = arith.subf %269, %226 : vector<16x1xf32>
    %271 = vector.broadcast %270 : vector<16x1xf32> to vector<16x16xf32>
    %272 = arith.mulf %271, %198 : vector<16x16xf32>
    %273 = arith.addf %268, %272 : vector<16x16xf32>
    %cst_79 = arith.constant dense<0.000000e+00> : vector<16x32xf32>
    %274 = tpu.matmul %273, %4, %cst_79 {dimension_numbers = #tpu.dot_dimension_numbers<[1], [0], [0], [1], [0, 0, 1, 1], [], []>} : vector<16x16xf32>, vector<16x32xf32>, vector<16x32xf32> -> vector<16x32xf32>
    %275 = vector.extract_strided_slice %238 {offsets = [0, 0], sizes = [16, 1], strides = [1, 1]} : vector<16x3xf32> to vector<16x1xf32>
    %276 = vector.extract_strided_slice %274 {offsets = [0, 0], sizes = [16, 16], strides = [1, 1]} : vector<16x32xf32> to vector<16x16xf32>
    %277 = vector.broadcast %275 : vector<16x1xf32> to vector<16x16xf32>
    %278 = arith.mulf %277, %276 : vector<16x16xf32>
    %279 = vector.extract_strided_slice %238 {offsets = [0, 1], sizes = [16, 1], strides = [1, 1]} : vector<16x3xf32> to vector<16x1xf32>
    %280 = vector.broadcast %279 : vector<16x1xf32> to vector<16x16xf32>
    %281 = arith.mulf %280, %273 : vector<16x16xf32>
    %282 = arith.addf %278, %281 : vector<16x16xf32>
    %283 = vector.extract_strided_slice %238 {offsets = [0, 2], sizes = [16, 1], strides = [1, 1]} : vector<16x3xf32> to vector<16x1xf32>
    %284 = vector.extract_strided_slice %274 {offsets = [0, 16], sizes = [16, 16], strides = [1, 1]} : vector<16x32xf32> to vector<16x16xf32>
    %285 = vector.broadcast %283 : vector<16x1xf32> to vector<16x16xf32>
    %286 = arith.mulf %285, %284 : vector<16x16xf32>
    %287 = arith.addf %282, %286 : vector<16x16xf32>
    %cst_80 = arith.constant 1.000000e-16 : f32
    %288 = vector.broadcast %cst_80 : f32 to vector<16x16xf32>
    %289 = arith.addf %287, %288 : vector<16x16xf32>
    %290 = vector.broadcast %243 : vector<16x1xf32> to vector<16x16xf32>
    %291 = math.powf %289, %290 : vector<16x16xf32>
    %cst_81 = arith.constant dense<0.000000e+00> : vector<16xf32>
    %292 = vector.multi_reduction <add>, %291, %cst_81 [1] : vector<16x16xf32> to vector<16xf32>
    %293 = vector.shape_cast %292 : vector<16xf32> to vector<16x1xf32>
    %cst_82 = arith.constant 1.000000e-16 : f32
    %294 = vector.broadcast %cst_82 : f32 to vector<16x1xf32>
    %295 = arith.addf %293, %294 : vector<16x1xf32>
    %296 = vector.broadcast %295 : vector<16x1xf32> to vector<16x16xf32>
    %297 = arith.divf %291, %296 : vector<16x16xf32>
    %cst_83 = arith.constant dense<0.000000e+00> : vector<16x8xf32>
    %298 = tpu.matmul %297, %2, %cst_83 {dimension_numbers = #tpu.dot_dimension_numbers<[1], [0], [0], [1], [0, 0, 1, 1], [], []>} : vector<16x16xf32>, vector<16x8xf32>, vector<16x8xf32> -> vector<16x8xf32>
    %299 = tpu.concatenate %298, %297, %5 in 1 : vector<16x8xf32>, vector<16x16xf32>, vector<16x104xf32> -> vector<16x128xf32>
    %300 = arith.index_cast %c2_i32 : i32 to index
    %c0_84 = arith.constant 0 : index
    %c0_85 = arith.constant 0 : index
    %301 = vector.load %arg8[%300, %c0_84, %c0_85] : memref<8x16x128xf32, #tpu.memory_space<vmem>>, vector<1x16x128xf32>
    %302 = vector.shape_cast %301 : vector<1x16x128xf32> to vector<16x128xf32>
    %303 = vector.shape_cast %299 : vector<16x128xf32> to vector<1x16x128xf32>
    tpu.vector_store %arg8[%300, %c0_84, %c0_85], %303 {strides = array<i32>} : memref<8x16x128xf32, #tpu.memory_space<vmem>>, vector<1x16x128xf32>,
    %c3_i32 = arith.constant 3 : i32
    %304 = arith.index_cast %c3_i32 : i32 to index
    %c0_86 = arith.constant 0 : index
    %c0_87 = arith.constant 0 : index
    %305 = vector.load %arg1[%304, %c0_86, %c0_87] : memref<8x16x32xf32, #tpu.memory_space<vmem>>, vector<1x16x32xf32>
    %306 = vector.shape_cast %305 : vector<1x16x32xf32> to vector<16x32xf32>
    %cst_88 = arith.constant dense<0.000000e+00> : vector<16x14xf32>
    %307 = tpu.matmul %306, %0, %cst_88 {dimension_numbers = #tpu.dot_dimension_numbers<[1], [0], [0], [1], [0, 0, 1, 1], [], []>} : vector<16x32xf32>, vector<32x14xf32>, vector<16x14xf32> -> vector<16x14xf32>
    %308 = vector.broadcast %1 : vector<1x14xf32> to vector<16x14xf32>
    %309 = arith.addf %307, %308 : vector<16x14xf32>
    %310 = vector.extract_strided_slice %309 {offsets = [0, 0], sizes = [16, 8], strides = [1, 1]} : vector<16x14xf32> to vector<16x8xf32>
    %311 = vector.extract_strided_slice %309 {offsets = [0, 8], sizes = [16, 1], strides = [1, 1]} : vector<16x14xf32> to vector<16x1xf32>
    %cst_89 = arith.constant 0.000000e+00 : f32
    %312 = vector.broadcast %cst_89 : f32 to vector<16x1xf32>
    %313 = arith.maximumf %311, %312 : vector<16x1xf32>
    %314 = math.absf %311 : vector<16x1xf32>
    %cst_90 = arith.constant 0.000000e+00 : f32
    %315 = vector.broadcast %cst_90 : f32 to vector<16x1xf32>
    %316 = arith.subf %315, %314 : vector<16x1xf32>
    %317 = math.exp %316 : vector<16x1xf32>
    %318 = math.log1p %317 : vector<16x1xf32>
    %319 = arith.addf %313, %318 : vector<16x1xf32>
    %320 = vector.extract_strided_slice %309 {offsets = [0, 9], sizes = [16, 1], strides = [1, 1]} : vector<16x14xf32> to vector<16x1xf32>
    %321 = arith.negf %320 : vector<16x1xf32>
    %322 = math.exp %321 : vector<16x1xf32>
    %cst_91 = arith.constant 1.000000e+00 : f32
    %323 = vector.broadcast %cst_91 : f32 to vector<16x1xf32>
    %324 = arith.addf %323, %322 : vector<16x1xf32>
    %325 = arith.divf %323, %324 : vector<16x1xf32>
    %326 = vector.extract_strided_slice %309 {offsets = [0, 10], sizes = [16, 3], strides = [1, 1]} : vector<16x14xf32> to vector<16x3xf32>
    %cst_92 = arith.constant dense<0xFF800000> : vector<16xf32>
    %327 = vector.multi_reduction <maximumf>, %326, %cst_92 [1] : vector<16x3xf32> to vector<16xf32>
    %cst_93 = arith.constant 0xFF800000 : f32
    %328 = vector.broadcast %cst_93 : f32 to vector<16xf32>
    %329 = arith.maximumf %328, %327 : vector<16xf32>
    %330 = vector.shape_cast %329 : vector<16xf32> to vector<16x1xf32>
    %331 = vector.broadcast %330 : vector<16x1xf32> to vector<16x3xf32>
    %332 = arith.subf %326, %331 : vector<16x3xf32>
    %333 = math.exp %332 : vector<16x3xf32>
    %cst_94 = arith.constant dense<0.000000e+00> : vector<16xf32>
    %334 = vector.multi_reduction <add>, %333, %cst_94 [1] : vector<16x3xf32> to vector<16xf32>
    %335 = vector.shape_cast %334 : vector<16xf32> to vector<16x1xf32>
    %336 = vector.broadcast %335 : vector<16x1xf32> to vector<16x3xf32>
    %337 = arith.divf %333, %336 : vector<16x3xf32>
    %338 = vector.extract_strided_slice %309 {offsets = [0, 13], sizes = [16, 1], strides = [1, 1]} : vector<16x14xf32> to vector<16x1xf32>
    %cst_95 = arith.constant 0.000000e+00 : f32
    %339 = vector.broadcast %cst_95 : f32 to vector<16x1xf32>
    %340 = arith.maximumf %338, %339 : vector<16x1xf32>
    %cst_96 = arith.constant 1.000000e+00 : f32
    %341 = vector.broadcast %cst_96 : f32 to vector<16x1xf32>
    %342 = arith.addf %340, %341 : vector<16x1xf32>
    %343 = arith.mulf %310, %310 : vector<16x8xf32>
    %cst_97 = arith.constant dense<0.000000e+00> : vector<16xf32>
    %344 = vector.multi_reduction <add>, %343, %cst_97 [1] : vector<16x8xf32> to vector<16xf32>
    %345 = vector.shape_cast %344 : vector<16xf32> to vector<16x1xf32>
    %346 = math.sqrt %345 : vector<16x1xf32>
    %cst_98 = arith.constant 9.99999993E-9 : f32
    %347 = vector.broadcast %cst_98 : f32 to vector<16x1xf32>
    %348 = arith.maximumf %346, %347 : vector<16x1xf32>
    %cst_99 = arith.constant dense<0.000000e+00> : vector<16x16xf32>
    %349 = tpu.matmul %310, %3, %cst_99 {dimension_numbers = #tpu.dot_dimension_numbers<[1], [0], [0], [1], [0, 0, 1, 1], [], []>} : vector<16x8xf32>, vector<8x16xf32>, vector<16x16xf32> -> vector<16x16xf32>
    %350 = tpu.reciprocal %348 {approx = true} : vector<16x1xf32> -> vector<16x1xf32>
    %351 = vector.broadcast %350 : vector<16x1xf32> to vector<16x16xf32>
    %352 = arith.mulf %349, %351 : vector<16x16xf32>
    %353 = vector.broadcast %319 : vector<16x1xf32> to vector<16x16xf32>
    %354 = arith.mulf %353, %352 : vector<16x16xf32>
    %cst_100 = arith.constant dense<0xFF800000> : vector<16xf32>
    %355 = vector.multi_reduction <maximumf>, %354, %cst_100 [1] : vector<16x16xf32> to vector<16xf32>
    %cst_101 = arith.constant 0xFF800000 : f32
    %356 = vector.broadcast %cst_101 : f32 to vector<16xf32>
    %357 = arith.maximumf %356, %355 : vector<16xf32>
    %358 = vector.shape_cast %357 : vector<16xf32> to vector<16x1xf32>
    %359 = vector.broadcast %358 : vector<16x1xf32> to vector<16x16xf32>
    %360 = arith.subf %354, %359 : vector<16x16xf32>
    %361 = math.exp %360 : vector<16x16xf32>
    %cst_102 = arith.constant dense<0.000000e+00> : vector<16xf32>
    %362 = vector.multi_reduction <add>, %361, %cst_102 [1] : vector<16x16xf32> to vector<16xf32>
    %363 = vector.shape_cast %362 : vector<16xf32> to vector<16x1xf32>
    %364 = vector.broadcast %363 : vector<16x1xf32> to vector<16x16xf32>
    %365 = arith.divf %361, %364 : vector<16x16xf32>
    %366 = vector.broadcast %325 : vector<16x1xf32> to vector<16x16xf32>
    %367 = arith.mulf %366, %365 : vector<16x16xf32>
    %cst_103 = arith.constant 1.000000e+00 : f32
    %368 = vector.broadcast %cst_103 : f32 to vector<16x1xf32>
    %369 = arith.subf %368, %325 : vector<16x1xf32>
    %370 = vector.broadcast %369 : vector<16x1xf32> to vector<16x16xf32>
    %371 = arith.mulf %370, %297 : vector<16x16xf32>
    %372 = arith.addf %367, %371 : vector<16x16xf32>
    %cst_104 = arith.constant dense<0.000000e+00> : vector<16x32xf32>
    %373 = tpu.matmul %372, %4, %cst_104 {dimension_numbers = #tpu.dot_dimension_numbers<[1], [0], [0], [1], [0, 0, 1, 1], [], []>} : vector<16x16xf32>, vector<16x32xf32>, vector<16x32xf32> -> vector<16x32xf32>
    %374 = vector.extract_strided_slice %337 {offsets = [0, 0], sizes = [16, 1], strides = [1, 1]} : vector<16x3xf32> to vector<16x1xf32>
    %375 = vector.extract_strided_slice %373 {offsets = [0, 0], sizes = [16, 16], strides = [1, 1]} : vector<16x32xf32> to vector<16x16xf32>
    %376 = vector.broadcast %374 : vector<16x1xf32> to vector<16x16xf32>
    %377 = arith.mulf %376, %375 : vector<16x16xf32>
    %378 = vector.extract_strided_slice %337 {offsets = [0, 1], sizes = [16, 1], strides = [1, 1]} : vector<16x3xf32> to vector<16x1xf32>
    %379 = vector.broadcast %378 : vector<16x1xf32> to vector<16x16xf32>
    %380 = arith.mulf %379, %372 : vector<16x16xf32>
    %381 = arith.addf %377, %380 : vector<16x16xf32>
    %382 = vector.extract_strided_slice %337 {offsets = [0, 2], sizes = [16, 1], strides = [1, 1]} : vector<16x3xf32> to vector<16x1xf32>
    %383 = vector.extract_strided_slice %373 {offsets = [0, 16], sizes = [16, 16], strides = [1, 1]} : vector<16x32xf32> to vector<16x16xf32>
    %384 = vector.broadcast %382 : vector<16x1xf32> to vector<16x16xf32>
    %385 = arith.mulf %384, %383 : vector<16x16xf32>
    %386 = arith.addf %381, %385 : vector<16x16xf32>
    %cst_105 = arith.constant 1.000000e-16 : f32
    %387 = vector.broadcast %cst_105 : f32 to vector<16x16xf32>
    %388 = arith.addf %386, %387 : vector<16x16xf32>
    %389 = vector.broadcast %342 : vector<16x1xf32> to vector<16x16xf32>
    %390 = math.powf %388, %389 : vector<16x16xf32>
    %cst_106 = arith.constant dense<0.000000e+00> : vector<16xf32>
    %391 = vector.multi_reduction <add>, %390, %cst_106 [1] : vector<16x16xf32> to vector<16xf32>
    %392 = vector.shape_cast %391 : vector<16xf32> to vector<16x1xf32>
    %cst_107 = arith.constant 1.000000e-16 : f32
    %393 = vector.broadcast %cst_107 : f32 to vector<16x1xf32>
    %394 = arith.addf %392, %393 : vector<16x1xf32>
    %395 = vector.broadcast %394 : vector<16x1xf32> to vector<16x16xf32>
    %396 = arith.divf %390, %395 : vector<16x16xf32>
    %cst_108 = arith.constant dense<0.000000e+00> : vector<16x8xf32>
    %397 = tpu.matmul %396, %2, %cst_108 {dimension_numbers = #tpu.dot_dimension_numbers<[1], [0], [0], [1], [0, 0, 1, 1], [], []>} : vector<16x16xf32>, vector<16x8xf32>, vector<16x8xf32> -> vector<16x8xf32>
    %398 = tpu.concatenate %397, %396, %5 in 1 : vector<16x8xf32>, vector<16x16xf32>, vector<16x104xf32> -> vector<16x128xf32>
    %399 = arith.index_cast %c3_i32 : i32 to index
    %c0_109 = arith.constant 0 : index
    %c0_110 = arith.constant 0 : index
    %400 = vector.load %arg8[%399, %c0_109, %c0_110] : memref<8x16x128xf32, #tpu.memory_space<vmem>>, vector<1x16x128xf32>
    %401 = vector.shape_cast %400 : vector<1x16x128xf32> to vector<16x128xf32>
    %402 = vector.shape_cast %398 : vector<16x128xf32> to vector<1x16x128xf32>
    tpu.vector_store %arg8[%399, %c0_109, %c0_110], %402 {strides = array<i32>} : memref<8x16x128xf32, #tpu.memory_space<vmem>>, vector<1x16x128xf32>,
    %c4_i32 = arith.constant 4 : i32
    %403 = arith.index_cast %c4_i32 : i32 to index
    %c0_111 = arith.constant 0 : index
    %c0_112 = arith.constant 0 : index
    %404 = vector.load %arg1[%403, %c0_111, %c0_112] : memref<8x16x32xf32, #tpu.memory_space<vmem>>, vector<1x16x32xf32>
    %405 = vector.shape_cast %404 : vector<1x16x32xf32> to vector<16x32xf32>
    %cst_113 = arith.constant dense<0.000000e+00> : vector<16x14xf32>
    %406 = tpu.matmul %405, %0, %cst_113 {dimension_numbers = #tpu.dot_dimension_numbers<[1], [0], [0], [1], [0, 0, 1, 1], [], []>} : vector<16x32xf32>, vector<32x14xf32>, vector<16x14xf32> -> vector<16x14xf32>
    %407 = vector.broadcast %1 : vector<1x14xf32> to vector<16x14xf32>
    %408 = arith.addf %406, %407 : vector<16x14xf32>
    %409 = vector.extract_strided_slice %408 {offsets = [0, 0], sizes = [16, 8], strides = [1, 1]} : vector<16x14xf32> to vector<16x8xf32>
    %410 = vector.extract_strided_slice %408 {offsets = [0, 8], sizes = [16, 1], strides = [1, 1]} : vector<16x14xf32> to vector<16x1xf32>
    %cst_114 = arith.constant 0.000000e+00 : f32
    %411 = vector.broadcast %cst_114 : f32 to vector<16x1xf32>
    %412 = arith.maximumf %410, %411 : vector<16x1xf32>
    %413 = math.absf %410 : vector<16x1xf32>
    %cst_115 = arith.constant 0.000000e+00 : f32
    %414 = vector.broadcast %cst_115 : f32 to vector<16x1xf32>
    %415 = arith.subf %414, %413 : vector<16x1xf32>
    %416 = math.exp %415 : vector<16x1xf32>
    %417 = math.log1p %416 : vector<16x1xf32>
    %418 = arith.addf %412, %417 : vector<16x1xf32>
    %419 = vector.extract_strided_slice %408 {offsets = [0, 9], sizes = [16, 1], strides = [1, 1]} : vector<16x14xf32> to vector<16x1xf32>
    %420 = arith.negf %419 : vector<16x1xf32>
    %421 = math.exp %420 : vector<16x1xf32>
    %cst_116 = arith.constant 1.000000e+00 : f32
    %422 = vector.broadcast %cst_116 : f32 to vector<16x1xf32>
    %423 = arith.addf %422, %421 : vector<16x1xf32>
    %424 = arith.divf %422, %423 : vector<16x1xf32>
    %425 = vector.extract_strided_slice %408 {offsets = [0, 10], sizes = [16, 3], strides = [1, 1]} : vector<16x14xf32> to vector<16x3xf32>
    %cst_117 = arith.constant dense<0xFF800000> : vector<16xf32>
    %426 = vector.multi_reduction <maximumf>, %425, %cst_117 [1] : vector<16x3xf32> to vector<16xf32>
    %cst_118 = arith.constant 0xFF800000 : f32
    %427 = vector.broadcast %cst_118 : f32 to vector<16xf32>
    %428 = arith.maximumf %427, %426 : vector<16xf32>
    %429 = vector.shape_cast %428 : vector<16xf32> to vector<16x1xf32>
    %430 = vector.broadcast %429 : vector<16x1xf32> to vector<16x3xf32>
    %431 = arith.subf %425, %430 : vector<16x3xf32>
    %432 = math.exp %431 : vector<16x3xf32>
    %cst_119 = arith.constant dense<0.000000e+00> : vector<16xf32>
    %433 = vector.multi_reduction <add>, %432, %cst_119 [1] : vector<16x3xf32> to vector<16xf32>
    %434 = vector.shape_cast %433 : vector<16xf32> to vector<16x1xf32>
    %435 = vector.broadcast %434 : vector<16x1xf32> to vector<16x3xf32>
    %436 = arith.divf %432, %435 : vector<16x3xf32>
    %437 = vector.extract_strided_slice %408 {offsets = [0, 13], sizes = [16, 1], strides = [1, 1]} : vector<16x14xf32> to vector<16x1xf32>
    %cst_120 = arith.constant 0.000000e+00 : f32
    %438 = vector.broadcast %cst_120 : f32 to vector<16x1xf32>
    %439 = arith.maximumf %437, %438 : vector<16x1xf32>
    %cst_121 = arith.constant 1.000000e+00 : f32
    %440 = vector.broadcast %cst_121 : f32 to vector<16x1xf32>
    %441 = arith.addf %439, %440 : vector<16x1xf32>
    %442 = arith.mulf %409, %409 : vector<16x8xf32>
    %cst_122 = arith.constant dense<0.000000e+00> : vector<16xf32>
    %443 = vector.multi_reduction <add>, %442, %cst_122 [1] : vector<16x8xf32> to vector<16xf32>
    %444 = vector.shape_cast %443 : vector<16xf32> to vector<16x1xf32>
    %445 = math.sqrt %444 : vector<16x1xf32>
    %cst_123 = arith.constant 9.99999993E-9 : f32
    %446 = vector.broadcast %cst_123 : f32 to vector<16x1xf32>
    %447 = arith.maximumf %445, %446 : vector<16x1xf32>
    %cst_124 = arith.constant dense<0.000000e+00> : vector<16x16xf32>
    %448 = tpu.matmul %409, %3, %cst_124 {dimension_numbers = #tpu.dot_dimension_numbers<[1], [0], [0], [1], [0, 0, 1, 1], [], []>} : vector<16x8xf32>, vector<8x16xf32>, vector<16x16xf32> -> vector<16x16xf32>
    %449 = tpu.reciprocal %447 {approx = true} : vector<16x1xf32> -> vector<16x1xf32>
    %450 = vector.broadcast %449 : vector<16x1xf32> to vector<16x16xf32>
    %451 = arith.mulf %448, %450 : vector<16x16xf32>
    %452 = vector.broadcast %418 : vector<16x1xf32> to vector<16x16xf32>
    %453 = arith.mulf %452, %451 : vector<16x16xf32>
    %cst_125 = arith.constant dense<0xFF800000> : vector<16xf32>
    %454 = vector.multi_reduction <maximumf>, %453, %cst_125 [1] : vector<16x16xf32> to vector<16xf32>
    %cst_126 = arith.constant 0xFF800000 : f32
    %455 = vector.broadcast %cst_126 : f32 to vector<16xf32>
    %456 = arith.maximumf %455, %454 : vector<16xf32>
    %457 = vector.shape_cast %456 : vector<16xf32> to vector<16x1xf32>
    %458 = vector.broadcast %457 : vector<16x1xf32> to vector<16x16xf32>
    %459 = arith.subf %453, %458 : vector<16x16xf32>
    %460 = math.exp %459 : vector<16x16xf32>
    %cst_127 = arith.constant dense<0.000000e+00> : vector<16xf32>
    %461 = vector.multi_reduction <add>, %460, %cst_127 [1] : vector<16x16xf32> to vector<16xf32>
    %462 = vector.shape_cast %461 : vector<16xf32> to vector<16x1xf32>
    %463 = vector.broadcast %462 : vector<16x1xf32> to vector<16x16xf32>
    %464 = arith.divf %460, %463 : vector<16x16xf32>
    %465 = vector.broadcast %424 : vector<16x1xf32> to vector<16x16xf32>
    %466 = arith.mulf %465, %464 : vector<16x16xf32>
    %cst_128 = arith.constant 1.000000e+00 : f32
    %467 = vector.broadcast %cst_128 : f32 to vector<16x1xf32>
    %468 = arith.subf %467, %424 : vector<16x1xf32>
    %469 = vector.broadcast %468 : vector<16x1xf32> to vector<16x16xf32>
    %470 = arith.mulf %469, %396 : vector<16x16xf32>
    %471 = arith.addf %466, %470 : vector<16x16xf32>
    %cst_129 = arith.constant dense<0.000000e+00> : vector<16x32xf32>
    %472 = tpu.matmul %471, %4, %cst_129 {dimension_numbers = #tpu.dot_dimension_numbers<[1], [0], [0], [1], [0, 0, 1, 1], [], []>} : vector<16x16xf32>, vector<16x32xf32>, vector<16x32xf32> -> vector<16x32xf32>
    %473 = vector.extract_strided_slice %436 {offsets = [0, 0], sizes = [16, 1], strides = [1, 1]} : vector<16x3xf32> to vector<16x1xf32>
    %474 = vector.extract_strided_slice %472 {offsets = [0, 0], sizes = [16, 16], strides = [1, 1]} : vector<16x32xf32> to vector<16x16xf32>
    %475 = vector.broadcast %473 : vector<16x1xf32> to vector<16x16xf32>
    %476 = arith.mulf %475, %474 : vector<16x16xf32>
    %477 = vector.extract_strided_slice %436 {offsets = [0, 1], sizes = [16, 1], strides = [1, 1]} : vector<16x3xf32> to vector<16x1xf32>
    %478 = vector.broadcast %477 : vector<16x1xf32> to vector<16x16xf32>
    %479 = arith.mulf %478, %471 : vector<16x16xf32>
    %480 = arith.addf %476, %479 : vector<16x16xf32>
    %481 = vector.extract_strided_slice %436 {offsets = [0, 2], sizes = [16, 1], strides = [1, 1]} : vector<16x3xf32> to vector<16x1xf32>
    %482 = vector.extract_strided_slice %472 {offsets = [0, 16], sizes = [16, 16], strides = [1, 1]} : vector<16x32xf32> to vector<16x16xf32>
    %483 = vector.broadcast %481 : vector<16x1xf32> to vector<16x16xf32>
    %484 = arith.mulf %483, %482 : vector<16x16xf32>
    %485 = arith.addf %480, %484 : vector<16x16xf32>
    %cst_130 = arith.constant 1.000000e-16 : f32
    %486 = vector.broadcast %cst_130 : f32 to vector<16x16xf32>
    %487 = arith.addf %485, %486 : vector<16x16xf32>
    %488 = vector.broadcast %441 : vector<16x1xf32> to vector<16x16xf32>
    %489 = math.powf %487, %488 : vector<16x16xf32>
    %cst_131 = arith.constant dense<0.000000e+00> : vector<16xf32>
    %490 = vector.multi_reduction <add>, %489, %cst_131 [1] : vector<16x16xf32> to vector<16xf32>
    %491 = vector.shape_cast %490 : vector<16xf32> to vector<16x1xf32>
    %cst_132 = arith.constant 1.000000e-16 : f32
    %492 = vector.broadcast %cst_132 : f32 to vector<16x1xf32>
    %493 = arith.addf %491, %492 : vector<16x1xf32>
    %494 = vector.broadcast %493 : vector<16x1xf32> to vector<16x16xf32>
    %495 = arith.divf %489, %494 : vector<16x16xf32>
    %cst_133 = arith.constant dense<0.000000e+00> : vector<16x8xf32>
    %496 = tpu.matmul %495, %2, %cst_133 {dimension_numbers = #tpu.dot_dimension_numbers<[1], [0], [0], [1], [0, 0, 1, 1], [], []>} : vector<16x16xf32>, vector<16x8xf32>, vector<16x8xf32> -> vector<16x8xf32>
    %497 = tpu.concatenate %496, %495, %5 in 1 : vector<16x8xf32>, vector<16x16xf32>, vector<16x104xf32> -> vector<16x128xf32>
    %498 = arith.index_cast %c4_i32 : i32 to index
    %c0_134 = arith.constant 0 : index
    %c0_135 = arith.constant 0 : index
    %499 = vector.load %arg8[%498, %c0_134, %c0_135] : memref<8x16x128xf32, #tpu.memory_space<vmem>>, vector<1x16x128xf32>
    %500 = vector.shape_cast %499 : vector<1x16x128xf32> to vector<16x128xf32>
    %501 = vector.shape_cast %497 : vector<16x128xf32> to vector<1x16x128xf32>
    tpu.vector_store %arg8[%498, %c0_134, %c0_135], %501 {strides = array<i32>} : memref<8x16x128xf32, #tpu.memory_space<vmem>>, vector<1x16x128xf32>,
    %c5_i32 = arith.constant 5 : i32
    %502 = arith.index_cast %c5_i32 : i32 to index
    %c0_136 = arith.constant 0 : index
    %c0_137 = arith.constant 0 : index
    %503 = vector.load %arg1[%502, %c0_136, %c0_137] : memref<8x16x32xf32, #tpu.memory_space<vmem>>, vector<1x16x32xf32>
    %504 = vector.shape_cast %503 : vector<1x16x32xf32> to vector<16x32xf32>
    %cst_138 = arith.constant dense<0.000000e+00> : vector<16x14xf32>
    %505 = tpu.matmul %504, %0, %cst_138 {dimension_numbers = #tpu.dot_dimension_numbers<[1], [0], [0], [1], [0, 0, 1, 1], [], []>} : vector<16x32xf32>, vector<32x14xf32>, vector<16x14xf32> -> vector<16x14xf32>
    %506 = vector.broadcast %1 : vector<1x14xf32> to vector<16x14xf32>
    %507 = arith.addf %505, %506 : vector<16x14xf32>
    %508 = vector.extract_strided_slice %507 {offsets = [0, 0], sizes = [16, 8], strides = [1, 1]} : vector<16x14xf32> to vector<16x8xf32>
    %509 = vector.extract_strided_slice %507 {offsets = [0, 8], sizes = [16, 1], strides = [1, 1]} : vector<16x14xf32> to vector<16x1xf32>
    %cst_139 = arith.constant 0.000000e+00 : f32
    %510 = vector.broadcast %cst_139 : f32 to vector<16x1xf32>
    %511 = arith.maximumf %509, %510 : vector<16x1xf32>
    %512 = math.absf %509 : vector<16x1xf32>
    %cst_140 = arith.constant 0.000000e+00 : f32
    %513 = vector.broadcast %cst_140 : f32 to vector<16x1xf32>
    %514 = arith.subf %513, %512 : vector<16x1xf32>
    %515 = math.exp %514 : vector<16x1xf32>
    %516 = math.log1p %515 : vector<16x1xf32>
    %517 = arith.addf %511, %516 : vector<16x1xf32>
    %518 = vector.extract_strided_slice %507 {offsets = [0, 9], sizes = [16, 1], strides = [1, 1]} : vector<16x14xf32> to vector<16x1xf32>
    %519 = arith.negf %518 : vector<16x1xf32>
    %520 = math.exp %519 : vector<16x1xf32>
    %cst_141 = arith.constant 1.000000e+00 : f32
    %521 = vector.broadcast %cst_141 : f32 to vector<16x1xf32>
    %522 = arith.addf %521, %520 : vector<16x1xf32>
    %523 = arith.divf %521, %522 : vector<16x1xf32>
    %524 = vector.extract_strided_slice %507 {offsets = [0, 10], sizes = [16, 3], strides = [1, 1]} : vector<16x14xf32> to vector<16x3xf32>
    %cst_142 = arith.constant dense<0xFF800000> : vector<16xf32>
    %525 = vector.multi_reduction <maximumf>, %524, %cst_142 [1] : vector<16x3xf32> to vector<16xf32>
    %cst_143 = arith.constant 0xFF800000 : f32
    %526 = vector.broadcast %cst_143 : f32 to vector<16xf32>
    %527 = arith.maximumf %526, %525 : vector<16xf32>
    %528 = vector.shape_cast %527 : vector<16xf32> to vector<16x1xf32>
    %529 = vector.broadcast %528 : vector<16x1xf32> to vector<16x3xf32>
    %530 = arith.subf %524, %529 : vector<16x3xf32>
    %531 = math.exp %530 : vector<16x3xf32>
    %cst_144 = arith.constant dense<0.000000e+00> : vector<16xf32>
    %532 = vector.multi_reduction <add>, %531, %cst_144 [1] : vector<16x3xf32> to vector<16xf32>
    %533 = vector.shape_cast %532 : vector<16xf32> to vector<16x1xf32>
    %534 = vector.broadcast %533 : vector<16x1xf32> to vector<16x3xf32>
    %535 = arith.divf %531, %534 : vector<16x3xf32>
    %536 = vector.extract_strided_slice %507 {offsets = [0, 13], sizes = [16, 1], strides = [1, 1]} : vector<16x14xf32> to vector<16x1xf32>
    %cst_145 = arith.constant 0.000000e+00 : f32
    %537 = vector.broadcast %cst_145 : f32 to vector<16x1xf32>
    %538 = arith.maximumf %536, %537 : vector<16x1xf32>
    %cst_146 = arith.constant 1.000000e+00 : f32
    %539 = vector.broadcast %cst_146 : f32 to vector<16x1xf32>
    %540 = arith.addf %538, %539 : vector<16x1xf32>
    %541 = arith.mulf %508, %508 : vector<16x8xf32>
    %cst_147 = arith.constant dense<0.000000e+00> : vector<16xf32>
    %542 = vector.multi_reduction <add>, %541, %cst_147 [1] : vector<16x8xf32> to vector<16xf32>
    %543 = vector.shape_cast %542 : vector<16xf32> to vector<16x1xf32>
    %544 = math.sqrt %543 : vector<16x1xf32>
    %cst_148 = arith.constant 9.99999993E-9 : f32
    %545 = vector.broadcast %cst_148 : f32 to vector<16x1xf32>
    %546 = arith.maximumf %544, %545 : vector<16x1xf32>
    %cst_149 = arith.constant dense<0.000000e+00> : vector<16x16xf32>
    %547 = tpu.matmul %508, %3, %cst_149 {dimension_numbers = #tpu.dot_dimension_numbers<[1], [0], [0], [1], [0, 0, 1, 1], [], []>} : vector<16x8xf32>, vector<8x16xf32>, vector<16x16xf32> -> vector<16x16xf32>
    %548 = tpu.reciprocal %546 {approx = true} : vector<16x1xf32> -> vector<16x1xf32>
    %549 = vector.broadcast %548 : vector<16x1xf32> to vector<16x16xf32>
    %550 = arith.mulf %547, %549 : vector<16x16xf32>
    %551 = vector.broadcast %517 : vector<16x1xf32> to vector<16x16xf32>
    %552 = arith.mulf %551, %550 : vector<16x16xf32>
    %cst_150 = arith.constant dense<0xFF800000> : vector<16xf32>
    %553 = vector.multi_reduction <maximumf>, %552, %cst_150 [1] : vector<16x16xf32> to vector<16xf32>
    %cst_151 = arith.constant 0xFF800000 : f32
    %554 = vector.broadcast %cst_151 : f32 to vector<16xf32>
    %555 = arith.maximumf %554, %553 : vector<16xf32>
    %556 = vector.shape_cast %555 : vector<16xf32> to vector<16x1xf32>
    %557 = vector.broadcast %556 : vector<16x1xf32> to vector<16x16xf32>
    %558 = arith.subf %552, %557 : vector<16x16xf32>
    %559 = math.exp %558 : vector<16x16xf32>
    %cst_152 = arith.constant dense<0.000000e+00> : vector<16xf32>
    %560 = vector.multi_reduction <add>, %559, %cst_152 [1] : vector<16x16xf32> to vector<16xf32>
    %561 = vector.shape_cast %560 : vector<16xf32> to vector<16x1xf32>
    %562 = vector.broadcast %561 : vector<16x1xf32> to vector<16x16xf32>
    %563 = arith.divf %559, %562 : vector<16x16xf32>
    %564 = vector.broadcast %523 : vector<16x1xf32> to vector<16x16xf32>
    %565 = arith.mulf %564, %563 : vector<16x16xf32>
    %cst_153 = arith.constant 1.000000e+00 : f32
    %566 = vector.broadcast %cst_153 : f32 to vector<16x1xf32>
    %567 = arith.subf %566, %523 : vector<16x1xf32>
    %568 = vector.broadcast %567 : vector<16x1xf32> to vector<16x16xf32>
    %569 = arith.mulf %568, %495 : vector<16x16xf32>
    %570 = arith.addf %565, %569 : vector<16x16xf32>
    %cst_154 = arith.constant dense<0.000000e+00> : vector<16x32xf32>
    %571 = tpu.matmul %570, %4, %cst_154 {dimension_numbers = #tpu.dot_dimension_numbers<[1], [0], [0], [1], [0, 0, 1, 1], [], []>} : vector<16x16xf32>, vector<16x32xf32>, vector<16x32xf32> -> vector<16x32xf32>
    %572 = vector.extract_strided_slice %535 {offsets = [0, 0], sizes = [16, 1], strides = [1, 1]} : vector<16x3xf32> to vector<16x1xf32>
    %573 = vector.extract_strided_slice %571 {offsets = [0, 0], sizes = [16, 16], strides = [1, 1]} : vector<16x32xf32> to vector<16x16xf32>
    %574 = vector.broadcast %572 : vector<16x1xf32> to vector<16x16xf32>
    %575 = arith.mulf %574, %573 : vector<16x16xf32>
    %576 = vector.extract_strided_slice %535 {offsets = [0, 1], sizes = [16, 1], strides = [1, 1]} : vector<16x3xf32> to vector<16x1xf32>
    %577 = vector.broadcast %576 : vector<16x1xf32> to vector<16x16xf32>
    %578 = arith.mulf %577, %570 : vector<16x16xf32>
    %579 = arith.addf %575, %578 : vector<16x16xf32>
    %580 = vector.extract_strided_slice %535 {offsets = [0, 2], sizes = [16, 1], strides = [1, 1]} : vector<16x3xf32> to vector<16x1xf32>
    %581 = vector.extract_strided_slice %571 {offsets = [0, 16], sizes = [16, 16], strides = [1, 1]} : vector<16x32xf32> to vector<16x16xf32>
    %582 = vector.broadcast %580 : vector<16x1xf32> to vector<16x16xf32>
    %583 = arith.mulf %582, %581 : vector<16x16xf32>
    %584 = arith.addf %579, %583 : vector<16x16xf32>
    %cst_155 = arith.constant 1.000000e-16 : f32
    %585 = vector.broadcast %cst_155 : f32 to vector<16x16xf32>
    %586 = arith.addf %584, %585 : vector<16x16xf32>
    %587 = vector.broadcast %540 : vector<16x1xf32> to vector<16x16xf32>
    %588 = math.powf %586, %587 : vector<16x16xf32>
    %cst_156 = arith.constant dense<0.000000e+00> : vector<16xf32>
    %589 = vector.multi_reduction <add>, %588, %cst_156 [1] : vector<16x16xf32> to vector<16xf32>
    %590 = vector.shape_cast %589 : vector<16xf32> to vector<16x1xf32>
    %cst_157 = arith.constant 1.000000e-16 : f32
    %591 = vector.broadcast %cst_157 : f32 to vector<16x1xf32>
    %592 = arith.addf %590, %591 : vector<16x1xf32>
    %593 = vector.broadcast %592 : vector<16x1xf32> to vector<16x16xf32>
    %594 = arith.divf %588, %593 : vector<16x16xf32>
    %cst_158 = arith.constant dense<0.000000e+00> : vector<16x8xf32>
    %595 = tpu.matmul %594, %2, %cst_158 {dimension_numbers = #tpu.dot_dimension_numbers<[1], [0], [0], [1], [0, 0, 1, 1], [], []>} : vector<16x16xf32>, vector<16x8xf32>, vector<16x8xf32> -> vector<16x8xf32>
    %596 = tpu.concatenate %595, %594, %5 in 1 : vector<16x8xf32>, vector<16x16xf32>, vector<16x104xf32> -> vector<16x128xf32>
    %597 = arith.index_cast %c5_i32 : i32 to index
    %c0_159 = arith.constant 0 : index
    %c0_160 = arith.constant 0 : index
    %598 = vector.load %arg8[%597, %c0_159, %c0_160] : memref<8x16x128xf32, #tpu.memory_space<vmem>>, vector<1x16x128xf32>
    %599 = vector.shape_cast %598 : vector<1x16x128xf32> to vector<16x128xf32>
    %600 = vector.shape_cast %596 : vector<16x128xf32> to vector<1x16x128xf32>
    tpu.vector_store %arg8[%597, %c0_159, %c0_160], %600 {strides = array<i32>} : memref<8x16x128xf32, #tpu.memory_space<vmem>>, vector<1x16x128xf32>,
    %c6_i32 = arith.constant 6 : i32
    %601 = arith.index_cast %c6_i32 : i32 to index
    %c0_161 = arith.constant 0 : index
    %c0_162 = arith.constant 0 : index
    %602 = vector.load %arg1[%601, %c0_161, %c0_162] : memref<8x16x32xf32, #tpu.memory_space<vmem>>, vector<1x16x32xf32>
    %603 = vector.shape_cast %602 : vector<1x16x32xf32> to vector<16x32xf32>
    %cst_163 = arith.constant dense<0.000000e+00> : vector<16x14xf32>
    %604 = tpu.matmul %603, %0, %cst_163 {dimension_numbers = #tpu.dot_dimension_numbers<[1], [0], [0], [1], [0, 0, 1, 1], [], []>} : vector<16x32xf32>, vector<32x14xf32>, vector<16x14xf32> -> vector<16x14xf32>
    %605 = vector.broadcast %1 : vector<1x14xf32> to vector<16x14xf32>
    %606 = arith.addf %604, %605 : vector<16x14xf32>
    %607 = vector.extract_strided_slice %606 {offsets = [0, 0], sizes = [16, 8], strides = [1, 1]} : vector<16x14xf32> to vector<16x8xf32>
    %608 = vector.extract_strided_slice %606 {offsets = [0, 8], sizes = [16, 1], strides = [1, 1]} : vector<16x14xf32> to vector<16x1xf32>
    %cst_164 = arith.constant 0.000000e+00 : f32
    %609 = vector.broadcast %cst_164 : f32 to vector<16x1xf32>
    %610 = arith.maximumf %608, %609 : vector<16x1xf32>
    %611 = math.absf %608 : vector<16x1xf32>
    %cst_165 = arith.constant 0.000000e+00 : f32
    %612 = vector.broadcast %cst_165 : f32 to vector<16x1xf32>
    %613 = arith.subf %612, %611 : vector<16x1xf32>
    %614 = math.exp %613 : vector<16x1xf32>
    %615 = math.log1p %614 : vector<16x1xf32>
    %616 = arith.addf %610, %615 : vector<16x1xf32>
    %617 = vector.extract_strided_slice %606 {offsets = [0, 9], sizes = [16, 1], strides = [1, 1]} : vector<16x14xf32> to vector<16x1xf32>
    %618 = arith.negf %617 : vector<16x1xf32>
    %619 = math.exp %618 : vector<16x1xf32>
    %cst_166 = arith.constant 1.000000e+00 : f32
    %620 = vector.broadcast %cst_166 : f32 to vector<16x1xf32>
    %621 = arith.addf %620, %619 : vector<16x1xf32>
    %622 = arith.divf %620, %621 : vector<16x1xf32>
    %623 = vector.extract_strided_slice %606 {offsets = [0, 10], sizes = [16, 3], strides = [1, 1]} : vector<16x14xf32> to vector<16x3xf32>
    %cst_167 = arith.constant dense<0xFF800000> : vector<16xf32>
    %624 = vector.multi_reduction <maximumf>, %623, %cst_167 [1] : vector<16x3xf32> to vector<16xf32>
    %cst_168 = arith.constant 0xFF800000 : f32
    %625 = vector.broadcast %cst_168 : f32 to vector<16xf32>
    %626 = arith.maximumf %625, %624 : vector<16xf32>
    %627 = vector.shape_cast %626 : vector<16xf32> to vector<16x1xf32>
    %628 = vector.broadcast %627 : vector<16x1xf32> to vector<16x3xf32>
    %629 = arith.subf %623, %628 : vector<16x3xf32>
    %630 = math.exp %629 : vector<16x3xf32>
    %cst_169 = arith.constant dense<0.000000e+00> : vector<16xf32>
    %631 = vector.multi_reduction <add>, %630, %cst_169 [1] : vector<16x3xf32> to vector<16xf32>
    %632 = vector.shape_cast %631 : vector<16xf32> to vector<16x1xf32>
    %633 = vector.broadcast %632 : vector<16x1xf32> to vector<16x3xf32>
    %634 = arith.divf %630, %633 : vector<16x3xf32>
    %635 = vector.extract_strided_slice %606 {offsets = [0, 13], sizes = [16, 1], strides = [1, 1]} : vector<16x14xf32> to vector<16x1xf32>
    %cst_170 = arith.constant 0.000000e+00 : f32
    %636 = vector.broadcast %cst_170 : f32 to vector<16x1xf32>
    %637 = arith.maximumf %635, %636 : vector<16x1xf32>
    %cst_171 = arith.constant 1.000000e+00 : f32
    %638 = vector.broadcast %cst_171 : f32 to vector<16x1xf32>
    %639 = arith.addf %637, %638 : vector<16x1xf32>
    %640 = arith.mulf %607, %607 : vector<16x8xf32>
    %cst_172 = arith.constant dense<0.000000e+00> : vector<16xf32>
    %641 = vector.multi_reduction <add>, %640, %cst_172 [1] : vector<16x8xf32> to vector<16xf32>
    %642 = vector.shape_cast %641 : vector<16xf32> to vector<16x1xf32>
    %643 = math.sqrt %642 : vector<16x1xf32>
    %cst_173 = arith.constant 9.99999993E-9 : f32
    %644 = vector.broadcast %cst_173 : f32 to vector<16x1xf32>
    %645 = arith.maximumf %643, %644 : vector<16x1xf32>
    %cst_174 = arith.constant dense<0.000000e+00> : vector<16x16xf32>
    %646 = tpu.matmul %607, %3, %cst_174 {dimension_numbers = #tpu.dot_dimension_numbers<[1], [0], [0], [1], [0, 0, 1, 1], [], []>} : vector<16x8xf32>, vector<8x16xf32>, vector<16x16xf32> -> vector<16x16xf32>
    %647 = tpu.reciprocal %645 {approx = true} : vector<16x1xf32> -> vector<16x1xf32>
    %648 = vector.broadcast %647 : vector<16x1xf32> to vector<16x16xf32>
    %649 = arith.mulf %646, %648 : vector<16x16xf32>
    %650 = vector.broadcast %616 : vector<16x1xf32> to vector<16x16xf32>
    %651 = arith.mulf %650, %649 : vector<16x16xf32>
    %cst_175 = arith.constant dense<0xFF800000> : vector<16xf32>
    %652 = vector.multi_reduction <maximumf>, %651, %cst_175 [1] : vector<16x16xf32> to vector<16xf32>
    %cst_176 = arith.constant 0xFF800000 : f32
    %653 = vector.broadcast %cst_176 : f32 to vector<16xf32>
    %654 = arith.maximumf %653, %652 : vector<16xf32>
    %655 = vector.shape_cast %654 : vector<16xf32> to vector<16x1xf32>
    %656 = vector.broadcast %655 : vector<16x1xf32> to vector<16x16xf32>
    %657 = arith.subf %651, %656 : vector<16x16xf32>
    %658 = math.exp %657 : vector<16x16xf32>
    %cst_177 = arith.constant dense<0.000000e+00> : vector<16xf32>
    %659 = vector.multi_reduction <add>, %658, %cst_177 [1] : vector<16x16xf32> to vector<16xf32>
    %660 = vector.shape_cast %659 : vector<16xf32> to vector<16x1xf32>
    %661 = vector.broadcast %660 : vector<16x1xf32> to vector<16x16xf32>
    %662 = arith.divf %658, %661 : vector<16x16xf32>
    %663 = vector.broadcast %622 : vector<16x1xf32> to vector<16x16xf32>
    %664 = arith.mulf %663, %662 : vector<16x16xf32>
    %cst_178 = arith.constant 1.000000e+00 : f32
    %665 = vector.broadcast %cst_178 : f32 to vector<16x1xf32>
    %666 = arith.subf %665, %622 : vector<16x1xf32>
    %667 = vector.broadcast %666 : vector<16x1xf32> to vector<16x16xf32>
    %668 = arith.mulf %667, %594 : vector<16x16xf32>
    %669 = arith.addf %664, %668 : vector<16x16xf32>
    %cst_179 = arith.constant dense<0.000000e+00> : vector<16x32xf32>
    %670 = tpu.matmul %669, %4, %cst_179 {dimension_numbers = #tpu.dot_dimension_numbers<[1], [0], [0], [1], [0, 0, 1, 1], [], []>} : vector<16x16xf32>, vector<16x32xf32>, vector<16x32xf32> -> vector<16x32xf32>
    %671 = vector.extract_strided_slice %634 {offsets = [0, 0], sizes = [16, 1], strides = [1, 1]} : vector<16x3xf32> to vector<16x1xf32>
    %672 = vector.extract_strided_slice %670 {offsets = [0, 0], sizes = [16, 16], strides = [1, 1]} : vector<16x32xf32> to vector<16x16xf32>
    %673 = vector.broadcast %671 : vector<16x1xf32> to vector<16x16xf32>
    %674 = arith.mulf %673, %672 : vector<16x16xf32>
    %675 = vector.extract_strided_slice %634 {offsets = [0, 1], sizes = [16, 1], strides = [1, 1]} : vector<16x3xf32> to vector<16x1xf32>
    %676 = vector.broadcast %675 : vector<16x1xf32> to vector<16x16xf32>
    %677 = arith.mulf %676, %669 : vector<16x16xf32>
    %678 = arith.addf %674, %677 : vector<16x16xf32>
    %679 = vector.extract_strided_slice %634 {offsets = [0, 2], sizes = [16, 1], strides = [1, 1]} : vector<16x3xf32> to vector<16x1xf32>
    %680 = vector.extract_strided_slice %670 {offsets = [0, 16], sizes = [16, 16], strides = [1, 1]} : vector<16x32xf32> to vector<16x16xf32>
    %681 = vector.broadcast %679 : vector<16x1xf32> to vector<16x16xf32>
    %682 = arith.mulf %681, %680 : vector<16x16xf32>
    %683 = arith.addf %678, %682 : vector<16x16xf32>
    %cst_180 = arith.constant 1.000000e-16 : f32
    %684 = vector.broadcast %cst_180 : f32 to vector<16x16xf32>
    %685 = arith.addf %683, %684 : vector<16x16xf32>
    %686 = vector.broadcast %639 : vector<16x1xf32> to vector<16x16xf32>
    %687 = math.powf %685, %686 : vector<16x16xf32>
    %cst_181 = arith.constant dense<0.000000e+00> : vector<16xf32>
    %688 = vector.multi_reduction <add>, %687, %cst_181 [1] : vector<16x16xf32> to vector<16xf32>
    %689 = vector.shape_cast %688 : vector<16xf32> to vector<16x1xf32>
    %cst_182 = arith.constant 1.000000e-16 : f32
    %690 = vector.broadcast %cst_182 : f32 to vector<16x1xf32>
    %691 = arith.addf %689, %690 : vector<16x1xf32>
    %692 = vector.broadcast %691 : vector<16x1xf32> to vector<16x16xf32>
    %693 = arith.divf %687, %692 : vector<16x16xf32>
    %cst_183 = arith.constant dense<0.000000e+00> : vector<16x8xf32>
    %694 = tpu.matmul %693, %2, %cst_183 {dimension_numbers = #tpu.dot_dimension_numbers<[1], [0], [0], [1], [0, 0, 1, 1], [], []>} : vector<16x16xf32>, vector<16x8xf32>, vector<16x8xf32> -> vector<16x8xf32>
    %695 = tpu.concatenate %694, %693, %5 in 1 : vector<16x8xf32>, vector<16x16xf32>, vector<16x104xf32> -> vector<16x128xf32>
    %696 = arith.index_cast %c6_i32 : i32 to index
    %c0_184 = arith.constant 0 : index
    %c0_185 = arith.constant 0 : index
    %697 = vector.load %arg8[%696, %c0_184, %c0_185] : memref<8x16x128xf32, #tpu.memory_space<vmem>>, vector<1x16x128xf32>
    %698 = vector.shape_cast %697 : vector<1x16x128xf32> to vector<16x128xf32>
    %699 = vector.shape_cast %695 : vector<16x128xf32> to vector<1x16x128xf32>
    tpu.vector_store %arg8[%696, %c0_184, %c0_185], %699 {strides = array<i32>} : memref<8x16x128xf32, #tpu.memory_space<vmem>>, vector<1x16x128xf32>,
    %c7_i32 = arith.constant 7 : i32
    %700 = arith.index_cast %c7_i32 : i32 to index
    %c0_186 = arith.constant 0 : index
    %c0_187 = arith.constant 0 : index
    %701 = vector.load %arg1[%700, %c0_186, %c0_187] : memref<8x16x32xf32, #tpu.memory_space<vmem>>, vector<1x16x32xf32>
    %702 = vector.shape_cast %701 : vector<1x16x32xf32> to vector<16x32xf32>
    %cst_188 = arith.constant dense<0.000000e+00> : vector<16x14xf32>
    %703 = tpu.matmul %702, %0, %cst_188 {dimension_numbers = #tpu.dot_dimension_numbers<[1], [0], [0], [1], [0, 0, 1, 1], [], []>} : vector<16x32xf32>, vector<32x14xf32>, vector<16x14xf32> -> vector<16x14xf32>
    %704 = vector.broadcast %1 : vector<1x14xf32> to vector<16x14xf32>
    %705 = arith.addf %703, %704 : vector<16x14xf32>
    %706 = vector.extract_strided_slice %705 {offsets = [0, 0], sizes = [16, 8], strides = [1, 1]} : vector<16x14xf32> to vector<16x8xf32>
    %707 = vector.extract_strided_slice %705 {offsets = [0, 8], sizes = [16, 1], strides = [1, 1]} : vector<16x14xf32> to vector<16x1xf32>
    %cst_189 = arith.constant 0.000000e+00 : f32
    %708 = vector.broadcast %cst_189 : f32 to vector<16x1xf32>
    %709 = arith.maximumf %707, %708 : vector<16x1xf32>
    %710 = math.absf %707 : vector<16x1xf32>
    %cst_190 = arith.constant 0.000000e+00 : f32
    %711 = vector.broadcast %cst_190 : f32 to vector<16x1xf32>
    %712 = arith.subf %711, %710 : vector<16x1xf32>
    %713 = math.exp %712 : vector<16x1xf32>
    %714 = math.log1p %713 : vector<16x1xf32>
    %715 = arith.addf %709, %714 : vector<16x1xf32>
    %716 = vector.extract_strided_slice %705 {offsets = [0, 9], sizes = [16, 1], strides = [1, 1]} : vector<16x14xf32> to vector<16x1xf32>
    %717 = arith.negf %716 : vector<16x1xf32>
    %718 = math.exp %717 : vector<16x1xf32>
    %cst_191 = arith.constant 1.000000e+00 : f32
    %719 = vector.broadcast %cst_191 : f32 to vector<16x1xf32>
    %720 = arith.addf %719, %718 : vector<16x1xf32>
    %721 = arith.divf %719, %720 : vector<16x1xf32>
    %722 = vector.extract_strided_slice %705 {offsets = [0, 10], sizes = [16, 3], strides = [1, 1]} : vector<16x14xf32> to vector<16x3xf32>
    %cst_192 = arith.constant dense<0xFF800000> : vector<16xf32>
    %723 = vector.multi_reduction <maximumf>, %722, %cst_192 [1] : vector<16x3xf32> to vector<16xf32>
    %cst_193 = arith.constant 0xFF800000 : f32
    %724 = vector.broadcast %cst_193 : f32 to vector<16xf32>
    %725 = arith.maximumf %724, %723 : vector<16xf32>
    %726 = vector.shape_cast %725 : vector<16xf32> to vector<16x1xf32>
    %727 = vector.broadcast %726 : vector<16x1xf32> to vector<16x3xf32>
    %728 = arith.subf %722, %727 : vector<16x3xf32>
    %729 = math.exp %728 : vector<16x3xf32>
    %cst_194 = arith.constant dense<0.000000e+00> : vector<16xf32>
    %730 = vector.multi_reduction <add>, %729, %cst_194 [1] : vector<16x3xf32> to vector<16xf32>
    %731 = vector.shape_cast %730 : vector<16xf32> to vector<16x1xf32>
    %732 = vector.broadcast %731 : vector<16x1xf32> to vector<16x3xf32>
    %733 = arith.divf %729, %732 : vector<16x3xf32>
    %734 = vector.extract_strided_slice %705 {offsets = [0, 13], sizes = [16, 1], strides = [1, 1]} : vector<16x14xf32> to vector<16x1xf32>
    %cst_195 = arith.constant 0.000000e+00 : f32
    %735 = vector.broadcast %cst_195 : f32 to vector<16x1xf32>
    %736 = arith.maximumf %734, %735 : vector<16x1xf32>
    %cst_196 = arith.constant 1.000000e+00 : f32
    %737 = vector.broadcast %cst_196 : f32 to vector<16x1xf32>
    %738 = arith.addf %736, %737 : vector<16x1xf32>
    %739 = arith.mulf %706, %706 : vector<16x8xf32>
    %cst_197 = arith.constant dense<0.000000e+00> : vector<16xf32>
    %740 = vector.multi_reduction <add>, %739, %cst_197 [1] : vector<16x8xf32> to vector<16xf32>
    %741 = vector.shape_cast %740 : vector<16xf32> to vector<16x1xf32>
    %742 = math.sqrt %741 : vector<16x1xf32>
    %cst_198 = arith.constant 9.99999993E-9 : f32
    %743 = vector.broadcast %cst_198 : f32 to vector<16x1xf32>
    %744 = arith.maximumf %742, %743 : vector<16x1xf32>
    %cst_199 = arith.constant dense<0.000000e+00> : vector<16x16xf32>
    %745 = tpu.matmul %706, %3, %cst_199 {dimension_numbers = #tpu.dot_dimension_numbers<[1], [0], [0], [1], [0, 0, 1, 1], [], []>} : vector<16x8xf32>, vector<8x16xf32>, vector<16x16xf32> -> vector<16x16xf32>
    %746 = tpu.reciprocal %744 {approx = true} : vector<16x1xf32> -> vector<16x1xf32>
    %747 = vector.broadcast %746 : vector<16x1xf32> to vector<16x16xf32>
    %748 = arith.mulf %745, %747 : vector<16x16xf32>
    %749 = vector.broadcast %715 : vector<16x1xf32> to vector<16x16xf32>
    %750 = arith.mulf %749, %748 : vector<16x16xf32>
    %cst_200 = arith.constant dense<0xFF800000> : vector<16xf32>
    %751 = vector.multi_reduction <maximumf>, %750, %cst_200 [1] : vector<16x16xf32> to vector<16xf32>
    %cst_201 = arith.constant 0xFF800000 : f32
    %752 = vector.broadcast %cst_201 : f32 to vector<16xf32>
    %753 = arith.maximumf %752, %751 : vector<16xf32>
    %754 = vector.shape_cast %753 : vector<16xf32> to vector<16x1xf32>
    %755 = vector.broadcast %754 : vector<16x1xf32> to vector<16x16xf32>
    %756 = arith.subf %750, %755 : vector<16x16xf32>
    %757 = math.exp %756 : vector<16x16xf32>
    %cst_202 = arith.constant dense<0.000000e+00> : vector<16xf32>
    %758 = vector.multi_reduction <add>, %757, %cst_202 [1] : vector<16x16xf32> to vector<16xf32>
    %759 = vector.shape_cast %758 : vector<16xf32> to vector<16x1xf32>
    %760 = vector.broadcast %759 : vector<16x1xf32> to vector<16x16xf32>
    %761 = arith.divf %757, %760 : vector<16x16xf32>
    %762 = vector.broadcast %721 : vector<16x1xf32> to vector<16x16xf32>
    %763 = arith.mulf %762, %761 : vector<16x16xf32>
    %cst_203 = arith.constant 1.000000e+00 : f32
    %764 = vector.broadcast %cst_203 : f32 to vector<16x1xf32>
    %765 = arith.subf %764, %721 : vector<16x1xf32>
    %766 = vector.broadcast %765 : vector<16x1xf32> to vector<16x16xf32>
    %767 = arith.mulf %766, %693 : vector<16x16xf32>
    %768 = arith.addf %763, %767 : vector<16x16xf32>
    %cst_204 = arith.constant dense<0.000000e+00> : vector<16x32xf32>
    %769 = tpu.matmul %768, %4, %cst_204 {dimension_numbers = #tpu.dot_dimension_numbers<[1], [0], [0], [1], [0, 0, 1, 1], [], []>} : vector<16x16xf32>, vector<16x32xf32>, vector<16x32xf32> -> vector<16x32xf32>
    %770 = vector.extract_strided_slice %733 {offsets = [0, 0], sizes = [16, 1], strides = [1, 1]} : vector<16x3xf32> to vector<16x1xf32>
    %771 = vector.extract_strided_slice %769 {offsets = [0, 0], sizes = [16, 16], strides = [1, 1]} : vector<16x32xf32> to vector<16x16xf32>
    %772 = vector.broadcast %770 : vector<16x1xf32> to vector<16x16xf32>
    %773 = arith.mulf %772, %771 : vector<16x16xf32>
    %774 = vector.extract_strided_slice %733 {offsets = [0, 1], sizes = [16, 1], strides = [1, 1]} : vector<16x3xf32> to vector<16x1xf32>
    %775 = vector.broadcast %774 : vector<16x1xf32> to vector<16x16xf32>
    %776 = arith.mulf %775, %768 : vector<16x16xf32>
    %777 = arith.addf %773, %776 : vector<16x16xf32>
    %778 = vector.extract_strided_slice %733 {offsets = [0, 2], sizes = [16, 1], strides = [1, 1]} : vector<16x3xf32> to vector<16x1xf32>
    %779 = vector.extract_strided_slice %769 {offsets = [0, 16], sizes = [16, 16], strides = [1, 1]} : vector<16x32xf32> to vector<16x16xf32>
    %780 = vector.broadcast %778 : vector<16x1xf32> to vector<16x16xf32>
    %781 = arith.mulf %780, %779 : vector<16x16xf32>
    %782 = arith.addf %777, %781 : vector<16x16xf32>
    %cst_205 = arith.constant 1.000000e-16 : f32
    %783 = vector.broadcast %cst_205 : f32 to vector<16x16xf32>
    %784 = arith.addf %782, %783 : vector<16x16xf32>
    %785 = vector.broadcast %738 : vector<16x1xf32> to vector<16x16xf32>
    %786 = math.powf %784, %785 : vector<16x16xf32>
    %cst_206 = arith.constant dense<0.000000e+00> : vector<16xf32>
    %787 = vector.multi_reduction <add>, %786, %cst_206 [1] : vector<16x16xf32> to vector<16xf32>
    %788 = vector.shape_cast %787 : vector<16xf32> to vector<16x1xf32>
    %cst_207 = arith.constant 1.000000e-16 : f32
    %789 = vector.broadcast %cst_207 : f32 to vector<16x1xf32>
    %790 = arith.addf %788, %789 : vector<16x1xf32>
    %791 = vector.broadcast %790 : vector<16x1xf32> to vector<16x16xf32>
    %792 = arith.divf %786, %791 : vector<16x16xf32>
    %cst_208 = arith.constant dense<0.000000e+00> : vector<16x8xf32>
    %793 = tpu.matmul %792, %2, %cst_208 {dimension_numbers = #tpu.dot_dimension_numbers<[1], [0], [0], [1], [0, 0, 1, 1], [], []>} : vector<16x16xf32>, vector<16x8xf32>, vector<16x8xf32> -> vector<16x8xf32>
    %794 = tpu.concatenate %793, %792, %5 in 1 : vector<16x8xf32>, vector<16x16xf32>, vector<16x104xf32> -> vector<16x128xf32>
    %795 = arith.index_cast %c7_i32 : i32 to index
    %c0_209 = arith.constant 0 : index
    %c0_210 = arith.constant 0 : index
    %796 = vector.load %arg8[%795, %c0_209, %c0_210] : memref<8x16x128xf32, #tpu.memory_space<vmem>>, vector<1x16x128xf32>
    %797 = vector.shape_cast %796 : vector<1x16x128xf32> to vector<16x128xf32>
    %798 = vector.shape_cast %794 : vector<16x128xf32> to vector<1x16x128xf32>
    tpu.vector_store %arg8[%795, %c0_209, %c0_210], %798 {strides = array<i32>} : memref<8x16x128xf32, #tpu.memory_space<vmem>>, vector<1x16x128xf32>,
    %c8_i32 = arith.constant 8 : i32
    return
  }
  func.func @transform_0(%arg0: i32) -> (i32, i32, i32) {
    %c0_i32 = arith.constant 0 : i32
    %c0_i32_0 = arith.constant 0 : i32
    %c0_i32_1 = arith.constant 0 : i32
    return %c0_i32, %arg0, %c0_i32_0 : i32, i32, i32
  }
  func.func @transform_1(%arg0: i32) -> (i32, i32) {
    %c0_i32 = arith.constant 0 : i32
    %c0_i32_0 = arith.constant 0 : i32
    %c0_i32_1 = arith.constant 0 : i32
    return %c0_i32, %c0_i32_0 : i32, i32
  }
  func.func @transform_2(%arg0: i32) -> (i32, i32) {
    %c0_i32 = arith.constant 0 : i32
    %c0_i32_0 = arith.constant 0 : i32
    %c0_i32_1 = arith.constant 0 : i32
    return %c0_i32, %c0_i32_0 : i32, i32
  }
  func.func @transform_3(%arg0: i32) -> (i32, i32) {
    %c0_i32 = arith.constant 0 : i32
    %c0_i32_0 = arith.constant 0 : i32
    %c0_i32_1 = arith.constant 0 : i32
    return %c0_i32, %c0_i32_0 : i32, i32
  }
  func.func @transform_4(%arg0: i32) -> (i32, i32) {
    %c0_i32 = arith.constant 0 : i32
    %c0_i32_0 = arith.constant 0 : i32
    %c0_i32_1 = arith.constant 0 : i32
    return %c0_i32, %c0_i32_0 : i32, i32
  }
  func.func @transform_5(%arg0: i32) -> (i32, i32) {
    %c0_i32 = arith.constant 0 : i32
    %c0_i32_0 = arith.constant 0 : i32
    %c0_i32_1 = arith.constant 0 : i32
    return %c0_i32, %c0_i32_0 : i32, i32
  }
  func.func @transform_6(%arg0: i32) -> (i32, i32) {
    %c0_i32 = arith.constant 0 : i32
    %c0_i32_0 = arith.constant 0 : i32
    return %arg0, %c0_i32 : i32, i32
  }
  func.func @transform_7(%arg0: i32) -> (i32, i32, i32) {
    %c0_i32 = arith.constant 0 : i32
    %c0_i32_0 = arith.constant 0 : i32
    %c0_i32_1 = arith.constant 0 : i32
    return %c0_i32, %arg0, %c0_i32_0 : i32, i32, i32
  }
}

</mosaic_0001>

<bundles_post_ra>
// kernel: reader_forward_sequence.1
= control target key start
LH: loop header
LB: loop body
LE: loop exit
PB: predicated region body
PF: predicated region fallthrough
CT: control target
= control target key end

     0   :  { %12 = vsyncpa [#allocation3], 0  ;;  %s6531_s24 = smov [#allocation2]   ;;  %s9280_s0 = inlined_call_operand.hbm [shape: f32[8,16,32], index: 0, kind: input, shape index: {}]   ;;  %s9281_s1 = inlined_call_operand.vmem [shape: f32[32,14], index: 1, kind: input, shape index: {}]   ;;  %s9282_s2 = inlined_call_operand.vmem [shape: f32[1,14], index: 2, kind: input, shape index: {}]   ;;  %s9283_s3 = inlined_call_operand.vmem [shape: f32[16,8], index: 3, kind: input, shape index: {}]   ;;  %s9284_s4 = inlined_call_operand.vmem [shape: f32[8,16], index: 4, kind: input, shape index: {}]   ;;  %s9285_s5 = inlined_call_operand.vmem [shape: f32[16,32], index: 5, kind: input, shape index: {}]   ;;  %s9286_s6 = inlined_call_operand.vmem [shape: f32[16,16], index: 6, kind: input, shape index: {}]   ;;  %s9287_s7 = inlined_call_operand.vmem [shape: f32[8,16,128], index: 7, kind: output, shape index: {}]  }
   0x1   :  { %s18_s25 = sshll.u32 %s6531_s24, 4  ;;  %s19_s25 = int_to_ptr.vmem [resolvable:$true] %s18_s25 }
   0x2   :  { %s6517_s26 = scalar_lea.vmem %s19_s25, 2048  ;;  %p6522_p1 = scmp.lt.s32.totalorder %s19_s25, %s19_s25 }
   0x3   :  { %p6518_p0 = scmp.ne.s32.totalorder %s19_s25, %s6517_s26  ;;  %p6523_p2 = scmp.lt.s32.totalorder %s6517_s26, %s6517_s26 }
   0x5   :  { %p6524_p3 = por %p6523_p2, %p6522_p1 }
   0x7   :  { %p6525_p4 = pnand %p6524_p3, %p6518_p0 }
   0x9   :  { %6528 = shalt.err (!%p6525_p4)
}
   0xa   :  { %s6532_s27 = smov 128   ;;  %s6533_s28 = smov 8  }
   0xb   :  { %24 = dma.hbm_to_vmem [thread:$0]  %s9280_s0, 2048, %s19_s25, [#allocation3], %s6532_s27, %s6532_s27, %s6533_s28  }
   0xc   :  { %6529 = dma.done.wait [#allocation3], 2048  }
   0xd   :  { %6530 = vsyncadd [#allocation3], 4294965248  ;;  %vm9288_vm0 = vcmask 261120   ;;  %v6591_v0 = vld [vmem:[%s9281_s1 + $0x18] sm:$0xff]  ;;  %v42_v1 = vld [vmem:[%s9281_s1 + $0x10] sm:$0xff]  ;;  %v6534_v7 = vmov 8  }
   0xe   :  { %4890 = vmatprep.subr.mxu0 %v6591_v0  ;;  %v52_v2 = vld [vmem:[#allocation2] sm:$0xff]  ;;  %v41_v3 = vld [vmem:[%s9281_s1 + $0x8] sm:$0xff]  ;;  %5975 = vset.pattern.permute.xlu1 %v6534_v7  ;;  %vm9291_vm1 = vcmask 64512   ;;  %v9316_v45 = vmov 9   ;;  %vm9293_vm8 = vcmask 130048   ;;  %vm9290_vm9 = vcmask 105552  }
   0xf   :  { %4891 = vmatpush3.msra.mxu0 %v6591_v0  ;;  %4898 = vmatprep.mubr.msk.f32.mxu0 %vm9288_vm0, %v52_v2  ;;  %v40_v4 = vld [vmem:[%s9281_s1] sm:$0xff]  ;;  %v53_v5 = vld [vmem:[#allocation2 + $0x8] sm:$0xff]  ;;  %s6536_s19 = smov 118   ;;  %vm9289_vm10 = vcmask 23552  }
  0x10   :  { %4892 = vmatprep.subr.mxu0 %v42_v1  ;;  %v6611_v6 = vld [vmem:[%s9284_s4] sm:$0xff]  ;;  %5976 = vset.pattern.permute.xlu0 %v9316_v45 }
  0x11   :  { %4893 = vmatpush3.msra.mxu0 %v42_v1  ;;  %4901 = vmatprep.subr.mxu1 %v6611_v6  ;;  %v6619_v8 = vld [vmem:[%s9282_s2] ss:$0 sm:$0xff] }
  0x12   :  { %4894 = vmatprep.subr.mxu0 %v41_v3  ;;  %4902 = vmatpush3.msra.mxu1 %v6611_v6 }
  0x13   :  { %4895 = vmatpush3.msra.mxu0 %v41_v3 }
  0x14   :  { %4896 = vmatprep.subr.mxu0 %v40_v4 }
  0x15   :  { %4897 = vmatpush3.msra.mxu0 %v40_v4 }
  0x16   :  { %4899 = vmatmul.mubr.msk.f32.vlgmr.msra.gmra.mxu0 %vm9288_vm0, %v53_v5  ;;  %4920 = vmatprep.subr.mxu0 %v6591_v0 }
  0x17   :  { %4921 = vmatpush3.msra.mxu0 %v6591_v0 }
  0x18   :  { %4922 = vmatprep.subr.mxu0 %v42_v1 }
  0x19   :  { %4923 = vmatpush3.msra.mxu0 %v42_v1 }
  0x1a   :  { %4924 = vmatprep.subr.mxu0 %v41_v3 }
  0x1b   :  { %4925 = vmatpush3.msra.mxu0 %v41_v3 }
  0x1c   :  { %4926 = vmatprep.subr.mxu0 %v40_v4 }
  0x1d   :  { %4927 = vmatpush3.msra.mxu0 %v40_v4 }
  0xd6   :  { %v4900_v9 = vpop.f32.mrf.mxu0 }
  0xd7   :  { %v6622_v10 = vadd.f32 %v4900_v9, %v6619_v8 }
  0xd8   :  { %v133_v11 = vpop.f32.mrf.mxu0 }
  0xd9   :  { %v145_v12 = vand.u32 2147483647, %v6622_v10  ;;  %v6626_v13 = vadd.f32 %v6619_v8, %v133_v11  ;;  %v219_v20 = vmul.f32 %v6622_v10, %v6622_v10  ;;  %v143_v43 = vmax.f32 %v6622_v10, 0.0 }
  0xda   :  { %v4663_v61 = vmul.f32 -1.442695, %v6622_v10 }
  0xdb   :  { %v147_v14 = vsub.f32 0.0, %v145_v12  ;;  %v144_v15 = vand.u32 2147483647, %v6626_v13  ;;  %4903 = vmatprep.mubr.msk.f32.mxu1 %vm9291_vm1, %v6626_v13  ;;  %v218_v16 = vmul.f32 %v6626_v13, %v6626_v13  ;;  %v224_v22 = vsel %vm9291_vm1, %v219_v20, 0.0 }
  0xdc   :  { %4904 = vmatmul.mubr.msk.f32.vlgmr.msra.gmra.mxu1 %vm9291_vm1, %v6622_v10  ;;  %v142_v38 = vmax.f32 %v6626_v13, 0.0  ;;  %v4662_v57 = vmul.f32 -1.442695, %v6626_v13  ;;  %v185_v20 = vsel %vm9290_vm9, %v6626_v13, -inf }
  0xdd   :  { %v150_v17 = vmul.f32 1.442695, %v147_v14  ;;  %v146_v18 = vsub.f32 0.0, %v144_v15  ;;  %v221_v19 = vsel %vm9291_vm1, %v218_v16, 0.0 }
  0xde   :  { %222 = vadd.xlane.f32.xlu0 %v221_v19 }
  0xdf   :  { %6062 = vpow2.f32 %v150_v17  ;;  %v148_v21 = vmul.f32 1.442695, %v146_v18 }
  0xe1   :  { %6064 = vpow2.f32 %v148_v21  ;;  %v188_v21 = vsel %vm9290_vm9, %v6622_v10, -inf }
  0xe2   :  { %225 = vadd.xlane.f32.xlu0 %v224_v22 }
  0xec   :  { %v6063_v23 = vpop.eup %6062 }
  0xed   :  { %v161_v24 = vadd.f32 1.0, %v6063_v23  ;;  %v164_v28 = vmul.f32 -0.5, %v6063_v23  ;;  %v167_v34 = vand.u32 2147483647, %v6063_v23 }
  0xee   :  { %v6065_v25 = vpop.eup %6064 }
  0xef   :  { %v152_v26 = vadd.f32 1.0, %v6065_v25  ;;  %6066 = vlog2.f32 %v161_v24  ;;  %v155_v27 = vmul.f32 -0.5, %v6065_v25  ;;  %v158_v31 = vand.u32 2147483647, %v6065_v25 }
  0xf0   :  { %v165_v32 = vadd.f32 1.0, %v164_v28  ;;  %vm168_vm3 = vcmp.lt.f32.partialorder %v167_v34, 0.0004427343 }
  0xf1   :  { %6068 = vlog2.f32 %v152_v26  ;;  %v156_v29 = vadd.f32 1.0, %v155_v27  ;;  %vm159_vm2 = vcmp.lt.f32.partialorder %v158_v31, 0.0004427343 }
  0xf2   :  { %v166_v40 = vmul.f32 %v6063_v23, %v165_v32 }
  0xf3   :  { %v157_v36 = vmul.f32 %v6065_v25, %v156_v29 }
  0xfc   :  { %v6067_v30 = vpop.eup %6066 }
  0xfd   :  { %v163_v37 = vmul.f32 0.6931472, %v6067_v30 }
  0xfe   :  { %v6069_v33 = vpop.eup %6068 }
  0xff   :  { %v154_v35 = vmul.f32 0.6931472, %v6069_v33  ;;  %v169_v42 = vsel %vm168_vm3, %v166_v40, %v163_v37 }
 0x100   :  { %v171_v44 = vadd.f32 %v169_v42, %v143_v43 }
 0x101   :  { %v160_v39 = vsel %vm159_vm2, %v157_v36, %v154_v35 }
 0x102   :  { %v170_v41 = vadd.f32 %v160_v39, %v142_v38 }
 0x104   :  { %330 = vperm.xlu1 %5975, %v170_v41  }
 0x108   :  { %335 = vperm.xlu1 %5975, %v171_v44  }
 0x10c   :  { %5977 = vset.pattern.permute.xlu1 %v9316_v45 }
 0x167   :  { %v223_v46 = vpop.xlane.xlu0 %222 }
 0x168   :  { %vm229_vm5 = vcmp.eq.f32.partialorder %v223_v46, inf  ;;  %v232_v55 = vand.u32 2147483648, %v223_v46  ;;  %vm231_vm7 = vcmp.eq.f32.partialorder %v223_v46, 0.0 }
 0x16b   :  { %v226_v47 = vpop.xlane.xlu0 %225 }
 0x16c   :  { %6070 = vrsqrt.f32 %v226_v47  ;;  %vm236_vm4 = vcmp.eq.f32.partialorder %v226_v47, inf  ;;  %v239_v53 = vand.u32 2147483648, %v226_v47  ;;  %vm238_vm6 = vcmp.eq.f32.partialorder %v226_v47, 0.0 }
 0x16d   :  { %6072 = vrsqrt.f32 %v223_v46 }
 0x16e   :  { %6074 = vpow2.f32 %v4662_v57 }
 0x179   :  { %v6071_v48 = vpop.eup %6070 }
 0x17a   :  { %v6073_v49 = vpop.eup %6072  ;;  %v235_v50 = vmul.f32 %v6071_v48, %v226_v47  ;;  %v6670_v48 = vld [vmem:[%s9285_s5] sm:$0xff] }
 0x17b   :  { %v228_v51 = vmul.f32 %v6073_v49, %v223_v46  ;;  %v6075_v63 = vpop.eup %6074 }
 0x17c   :  { %v237_v52 = vsel %vm236_vm4, %v226_v47, %v235_v50  ;;  %v178_v4 = vadd.f32 1.0, %v6075_v63  ;;  %v6664_v47 = vld [vmem:[%s9285_s5 + $0x8] sm:$0xff]  ;;  %v50_v63 = vld [vmem:[%s9286_s6] sm:$0xff] }
 0x17d   :  { %v230_v54 = vsel %vm229_vm5, %v223_v46, %v228_v51  ;;  %v240_v56 = vsel %vm238_vm6, %v239_v53, %v237_v52  ;;  %4906 = vmatprep.subr.mxu1 %v6664_v47 }
 0x17e   :  { %v233_v58 = vsel %vm231_vm7, %v232_v55, %v230_v54  ;;  %v242_v59 = vmax.f32 %v240_v56, 1e-08  ;;  %4907 = vmatpush3.msra.mxu1 %v6664_v47  ;;  %v9314_v54 = vmov 12  }
 0x17f   :  { %v241_v60 = vmax.f32 %v233_v58, 1e-08  ;;  %v331_v62 = vpop.permute.xlu1 %330  ;;  %4908 = vmatprep.subr.mxu1 %v6670_v48 }
 0x180   :  { %6076 = vrcp.f32 %v242_v59  ;;  %4909 = vmatpush3.msra.mxu1 %v6670_v48 }
 0x181   :  { %6078 = vrcp.f32 %v241_v60 }
 0x182   :  { %6080 = vpow2.f32 %v4663_v61 }
 0x183   :  { %v336_v9 = vpop.permute.xlu1 %335  ;;  %6082 = vrcp.f32 %v178_v4 }
 0x18d   :  { %v6077_v1 = vpop.eup %6076 }
 0x18e   :  { %v6079_v5 = vpop.eup %6078 }
 0x18f   :  { %v6081_v17 = vpop.eup %6080 }
 0x190   :  { %v179_v19 = vadd.f32 1.0, %v6081_v17  ;;  %v6083_v22 = vpop.eup %6082  ;;  %v217_v17 = vadd.f32 1.0, %v143_v43  ;;  %v638_v43 = vld [vmem:[#allocation2 + $0x18] sm:$0xff] }
 0x191   :  { %v375_v23 = vsub.f32 1.0, %v6083_v22 }
 0x192   :  { %6084 = vrcp.f32 %v179_v19 }
 0x19c   :  { %v4905_v2 = vpop.f32.mrf.mxu1 }
 0x19d   :  { %v327_v3 = vmul.f32 %v6077_v1, %v4905_v2  ;;  %v51_v1 = vld [vmem:[%s9286_s6 + $0x8] sm:$0xff]  ;;  %s6541_s6 = smov 112  }
 0x19e   :  { %v315_v11 = vpop.f32.mrf.mxu1 }
 0x19f   :  { %v326_v12 = vmul.f32 %v6079_v5, %v315_v11  ;;  %v339_v14 = vmul.f32 %v336_v9, %v327_v3  ;;  %v6085_v24 = vpop.eup %6084 }
 0x1a0   :  { %v376_v25 = vsub.f32 1.0, %v6085_v24 }
 0x1a1   :  { %v344_v15 = vsel %vm9293_vm8, %v339_v14, -inf  ;;  %v338_v16 = vmul.f32 %v331_v62, %v326_v12 }
 0x1a2   :  { %345 = vmax.xlane.f32.xlu1 %v344_v15 }
 0x1a3   :  { %v341_v18 = vsel %vm9293_vm8, %v338_v16, -inf }
 0x1a4   :  { %342 = vmax.xlane.f32.xlu0 %v341_v18  ;;  %v6538_v18 = vmov 13  }
 0x1a8   :  { %186 = vmax.xlane.f32.xlu0 %v185_v20 }
 0x1ac   :  { %189 = vmax.xlane.f32.xlu0 %v188_v21 }
 0x1b3   :  { %379 = vperm.xlu1 %5977, %v375_v23   ;;  %v6540_v23 = vmov 11  }
 0x1b7   :  { %370 = vperm.xlu1 %5977, %v6085_v24  }
 0x1bb   :  { %384 = vperm.xlu1 %5977, %v376_v25  }
 0x1bf   :  { %5979 = vset.pattern.permute.xlu1 %v9314_v54 }
 0x22b   :  { %v346_v26 = vpop.xlane.xlu1 %345 }
 0x22c   :  { %v348_v27 = vsub.f32 %v339_v14, %v346_v26 }
 0x22d   :  { %v343_v28 = vpop.xlane.xlu0 %342 }
 0x22e   :  { %v351_v29 = vmul.f32 1.442695, %v348_v27  ;;  %v347_v30 = vsub.f32 %v338_v16, %v343_v28 }
 0x22f   :  { %v380_v49 = vpop.permute.xlu1 %379 }
 0x230   :  { %6086 = vpow2.f32 %v351_v29  ;;  %v349_v31 = vmul.f32 1.442695, %v347_v30  ;;  %v387_v4 = vmul.f32 %v380_v49, %v50_v63  ;;  %v216_v30 = vadd.f32 1.0, %v142_v38 }
 0x231   :  { %v187_v32 = vpop.xlane.xlu0 %186 }
 0x232   :  { %6088 = vpow2.f32 %v349_v31  ;;  %v191_v33 = vsub.f32 %v6626_v13, %v187_v32 }
 0x233   :  { %v371_v50 = vpop.permute.xlu1 %370 }
 0x234   :  { %v193_v34 = vmul.f32 1.442695, %v191_v33 }
 0x235   :  { %v190_v41 = vpop.xlane.xlu0 %189 }
 0x236   :  { %6090 = vpow2.f32 %v193_v34  ;;  %v192_v42 = vsub.f32 %v6622_v10, %v190_v41  ;;  %v637_v10 = vld [vmem:[#allocation2 + $0x10] sm:$0xff] }
 0x237   :  { %v385_v51 = vpop.permute.xlu1 %384  ;;  %4928 = vmatprep.mubr.msk.f32.mxu0 %vm9288_vm0, %v637_v10  ;;  %v6543_v10 = vmov 0  }
 0x238   :  { %v195_v44 = vmul.f32 1.442695, %v192_v42  ;;  %v388_v9 = vmul.f32 %v385_v51, %v51_v1  ;;  %4929 = vmatmul.mubr.msk.f32.vlgmr.msra.gmra.mxu0 %vm9288_vm0, %v638_v43 }
 0x23a   :  { %6092 = vpow2.f32 %v195_v44 }
 0x23d   :  { %v6087_v35 = vpop.eup %6086 }
 0x23e   :  { %v356_v36 = vsel %vm9293_vm8, %v6087_v35, 0.0 }
 0x23f   :  { %v6089_v37 = vpop.eup %6088  ;;  %357 = vadd.xlane.f32.xlu0 %v356_v36 }
 0x240   :  { %v353_v39 = vsel %vm9293_vm8, %v6089_v37, 0.0 }
 0x243   :  { %v6091_v40 = vpop.eup %6090  ;;  %354 = vadd.xlane.f32.xlu0 %v353_v39 }
 0x244   :  { %199 = vrot.lane.b32.xlu1 %v6091_v40, %s6536_s19 }
 0x247   :  { %v6093_v46 = vpop.eup %6092 }
 0x259   :  { %365 = vperm.xlu0 %5976, %v6083_v22   ;;  %v6539_v22 = vmov 10  }
 0x25d   :  { %201 = vrot.lane.b32.xlu0 %v6093_v46, %s6536_s19 }
 0x25e   :  { %5978 = vset.pattern.permute.xlu0 %v9314_v54 }
 0x2b6   :  { %v200_v52 = vpop.permute.xlu1 %199 }
 0x2b7   :  { %v206_v53 = vsel %vm9289_vm10, %v200_v52, 0.0 }
 0x2b8   :  { %207 = vadd.xlane.f32.xlu1 %v206_v53 }
 0x2c8   :  { %v358_v55 = vpop.xlane.xlu0 %357 }
 0x2c9   :  { %6094 = vrcp.f32 %v358_v55 }
 0x2cc   :  { %v355_v56 = vpop.xlane.xlu0 %354 }
 0x2cd   :  { %6096 = vrcp.f32 %v355_v56 }
 0x2d4   :  { %v366_v57 = vpop.permute.xlu0 %365 }
 0x2d6   :  { %v6095_v58 = vpop.eup %6094 }
 0x2d7   :  { %v362_v59 = vmul.f32 %v6095_v58, %v6087_v35 }
 0x2d8   :  { %v202_v60 = vpop.permute.xlu0 %201 }
 0x2d9   :  { %v209_v61 = vsel %vm9289_vm10, %v202_v60, 0.0  ;;  %v374_v3 = vmul.f32 %v371_v50, %v362_v59 }
 0x2da   :  { %v6097_v62 = vpop.eup %6096  ;;  %210 = vadd.xlane.f32.xlu0 %v209_v61 }
 0x2db   :  { %v360_v2 = vmul.f32 %v6097_v62, %v6089_v37  ;;  %v390_v12 = vadd.f32 %v388_v9, %v374_v3 }
 0x2dd   :  { %v373_v5 = vmul.f32 %v366_v57, %v360_v2 }
 0x2df   :  { %v389_v11 = vadd.f32 %v387_v4, %v373_v5 }
 0x2e1   :  { %4910 = vmatprep.mubr.msk.f32.mxu1 %vm9293_vm8, %v389_v11 }
 0x2e2   :  { %4911 = vmatmul.mubr.msk.f32.vlgmr.msra.gmra.mxu1 %vm9293_vm8, %v390_v12 }
 0x341   :  { %v208_v14 = vpop.xlane.xlu1 %207 }
 0x342   :  { %6098 = vrcp.f32 %v208_v14 }
 0x34f   :  { %v6099_v15 = vpop.eup %6098 }
 0x350   :  { %v213_v16 = vmul.f32 %v6099_v15, %v6091_v40 }
 0x352   :  { %497 = vperm.xlu0 %5978, %v213_v16  }
 0x356   :  { %5983 = vset.pattern.permute.xlu0 %v6538_v18 }
 0x357   :  { %525 = vperm.xlu0 %5983, %v217_v17  }
 0x35b   :  { %5984 = vset.pattern.permute.xlu0 %v6534_v7 }
 0x363   :  { %v211_v19 = vpop.xlane.xlu0 %210 }
 0x364   :  { %6100 = vrcp.f32 %v211_v19 }
 0x371   :  { %v6101_v20 = vpop.eup %6100 }
 0x372   :  { %v215_v21 = vmul.f32 %v6101_v20, %v6093_v46 }
 0x374   :  { %501 = vperm.xlu1 %5979, %v215_v21  }
 0x378   :  { %5980 = vset.pattern.permute.xlu1 %v6539_v22 }
 0x379   :  { %479 = vperm.xlu1 %5980, %v215_v21  }
 0x37d   :  { %474 = vperm.xlu1 %5980, %v213_v16  }
 0x381   :  { %5981 = vset.pattern.permute.xlu1 %v6540_v23 }
 0x382   :  { %485 = vperm.xlu1 %5981, %v213_v16   ;;  %v6542_v16 = vmov 2139095040  }
 0x386   :  { %489 = vperm.xlu1 %5981, %v215_v21  }
 0x38a   :  { %5982 = vset.pattern.permute.xlu1 %v6538_v18 }
 0x3a2   :  { %v4912_v24 = vpop.f32.mrf.mxu1 }
 0x3a4   :  { %v463_v25 = vpop.f32.mrf.mxu1 }
 0x3cd   :  { %v498_v26 = vpop.permute.xlu0 %497 }
 0x3ce   :  { %v504_v27 = vmul.f32 %v498_v26, %v463_v25 }
 0x3d0   :  { %508 = vrot.lane.b32.xlu1 %v504_v27, %s6541_s6 }
 0x3d2   :  { %v6706_v38 = vpop.permute.xlu0 %525 }
 0x3d3   :  { %v6710_v51 = vand.u32 2147483647, %v6706_v38  ;;  %v5191_v56 = vtrunc.f32 %v6706_v38 }
 0x3d5   :  { %v5195_v55 = vtrunc.f32 %v6710_v51  ;;  %vm9292_vm11 = vcmp.eq.f32.partialorder %v6710_v51, 2139095040  ;;  %vm5192_vm12 = vcmp.ne.f32.partialorder %v6706_v38, %v5191_v56 }
 0x3d6   :  { %vm6732_vm13 = vmor %vm5192_vm12, %vm9292_vm11 }
 0x3d7   :  { %v5196_v57 = vcvt.f32.s32 %v5195_v55  ;;  %vm5199_vm4 = vmneg %vm6732_vm13 }
 0x3d9   :  { %v5197_v62 = vand.u32 1, %v5196_v57 }
 0x3db   :  { %vm5198_vm14 = vcmp.eq.s32.totalorder %v5197_v62, 1 }
 0x3dc   :  { %vm6742_vm5 = vmand %vm5198_vm14, %vm5199_vm4 }
 0x3ef   :  { %v502_v28 = vpop.permute.xlu1 %501 }
 0x3f0   :  { %v505_v29 = vmul.f32 %v4912_v24, %v502_v28 }
 0x3f2   :  { %510 = vrot.lane.b32.xlu1 %v505_v29, %s6541_s6 }
 0x3f4   :  { %v480_v31 = vpop.permute.xlu1 %479 }
 0x3f5   :  { %v483_v13 = vmul.f32 %v4912_v24, %v480_v31 }
 0x3f6   :  { %520 = vperm.xlu1 %5982, %v216_v30  }
 0x3f8   :  { %v475_v32 = vpop.permute.xlu1 %474 }
 0x3f9   :  { %v482_v36 = vmul.f32 %v475_v32, %v463_v25 }
 0x3fa   :  { %5985 = vset.pattern.permute.xlu1 %v6534_v7 }
 0x3fd   :  { %v486_v33 = vpop.permute.xlu1 %485 }
 0x3fe   :  { %v492_v35 = vmul.f32 %v486_v33, %v389_v11 }
 0x400   :  { %v494_v39 = vadd.f32 %v492_v35, %v482_v36 }
 0x401   :  { %v490_v34 = vpop.permute.xlu1 %489 }
 0x402   :  { %v493_v42 = vmul.f32 %v490_v34, %v390_v12 }
 0x404   :  { %v495_v46 = vadd.f32 %v493_v42, %v483_v13 }
 0x442   :  { %v509_v37 = vpop.permute.xlu1 %508 }
 0x443   :  { %v514_v40 = vadd.f32 %v509_v37, %v494_v39 }
 0x445   :  { %v6701_v41 = vadd.f32 1e-16, %v514_v40  ;;  %v4930_v40 = vpop.f32.mrf.mxu0 }
 0x447   :  { %v6704_v44 = vand.u32 2147483647, %v6701_v41  ;;  %vm5151_vm7 = vcmp.eq.f32.partialorder %v6701_v41, 0  ;;  %vm5150_vm9 = vcmp.lt.f32.partialorder %v6701_v41, 0  ;;  %v711_v56 = vpop.f32.mrf.mxu0 }
 0x449   :  { %6102 = vlog2.f32 %v6704_v44  ;;  %vm5154_vm0 = vcmp.gt.f32.partialorder %v6704_v44, 1065353216 }
 0x456   :  { %v6103_v58 = vpop.eup %6102 }
 0x464   :  { %v511_v49 = vpop.permute.xlu1 %510 }
 0x465   :  { %v515_v50 = vadd.f32 %v511_v49, %v495_v46  ;;  %v6855_v46 = vadd.f32 %v4930_v40, %v6619_v8 }
 0x467   :  { %v6712_v52 = vadd.f32 1e-16, %v515_v50  ;;  %v795_v20 = vmul.f32 %v6855_v46, %v6855_v46 }
 0x469   :  { %v6715_v53 = vand.u32 2147483647, %v6712_v52  ;;  %vm5203_vm8 = vcmp.eq.f32.partialorder %v6712_v52, 0 }
 0x46b   :  { %6104 = vlog2.f32 %v6715_v53 }
 0x471   :  { %v6720_v59 = vpop.permute.xlu1 %520 }
 0x472   :  { %v5132_v60 = vmul.f32 %v6103_v58, %v6720_v59  ;;  %v6725_v61 = vand.u32 2147483647, %v6720_v59  ;;  %v5139_v63 = vtrunc.f32 %v6720_v59  ;;  %vm5138_vm3 = vcmp.lt.f32.partialorder %v6720_v59, 0 }
 0x473   :  { %vm6754_vm10 = vmand %vm5138_vm3, %vm5151_vm7  ;;  %v5170_v17 = vsel %vm5138_vm3, 0, %v6542_v16  ;;  %v5158_v43 = vsel %vm5138_vm3, 2139095040, %v6543_v10 }
 0x474   :  { %6106 = vpow2.f32 %v5132_v60  ;;  %v5143_v1 = vtrunc.f32 %v6725_v61  ;;  %vm5135_vm15 = vcmp.eq.f32.partialorder %v6725_v61, 2139095040  ;;  %vm5140_vm2 = vcmp.ne.f32.partialorder %v6720_v59, %v5139_v63  ;;  %vm6760_vm14 = vmxor %vm5138_vm3, %vm5154_vm0 }
 0x475   :  { %vm5141_vm6 = vmor %vm5140_vm2, %vm5135_vm15  ;;  %vm5142_vm0 = vcmp.lt.f32.partialorder %v6725_v61, 1266679808  ;;  %v5171_v24 = vxor.u32 2147483648, %v5170_v17  ;;  %vm5153_vm3 = vcmp.lt.s32.totalorder %v6701_v41, 0  ;;  %v723_v60 = vand.u32 2147483647, %v6855_v46 }
 0x476   :  { %v5144_v3 = vcvt.f32.s32 %v5143_v1  ;;  %vm5147_vm2 = vmneg %vm5141_vm6  ;;  %v6878_v63 = vadd.f32 %v6619_v8, %v711_v56 }
 0x477   :  { %vm6767_vm1 = vmand %vm5150_vm9, %vm5141_vm6  ;;  %vm5194_vm6 = vcmp.lt.f32.partialorder %v6710_v51, 1266679808 }
 0x478   :  { %v6105_v4 = vpop.eup %6104  ;;  %v5145_v5 = vand.u32 1, %v5144_v3  ;;  %v722_v2 = vand.u32 2147483647, %v6878_v63 }
 0x479   :  { %v5184_v9 = vmul.f32 %v6105_v4, %v6706_v38 }
 0x47a   :  { %vm5146_vm12 = vcmp.eq.s32.totalorder %v5145_v5, 1  ;;  %v725_v5 = vsub.f32 0.0, %v723_v60  ;;  %v724_v11 = vsub.f32 0.0, %v722_v2 }
 0x47b   :  { %6108 = vpow2.f32 %v5184_v9  ;;  %vm5148_vm4 = vmand %vm5146_vm12, %vm5147_vm2  ;;  %vm5206_vm2 = vcmp.gt.f32.partialorder %v6715_v53, 1065353216 }
 0x47c   :  { %vm5165_vm12 = vmor %vm6754_vm10, %vm6760_vm14  ;;  %vm5190_vm10 = vcmp.lt.f32.partialorder %v6706_v38, 0  ;;  %v728_v14 = vmul.f32 1.442695, %v725_v5 }
 0x47d   :  { %vm6780_vm11 = vmand %vm5142_vm0, %vm5148_vm4  ;;  %v5166_v27 = vsel %vm5165_vm12, 2139095040, %v6543_v10  ;;  %vm5167_vm0 = vcmp.eq.f32.partialorder %v6701_v41, 3212836864  ;;  %vm5176_vm12 = vcmp.ne.f32.partialorder %v6720_v59, %v6720_v59  ;;  %v5222_v32 = vsel %vm5190_vm10, 0, %v6542_v16 }
 0x47e   :  { %vm6794_vm14 = vmand %vm5194_vm6, %vm6742_vm5  ;;  %v5172_v30 = vsel %vm6780_vm11, %v5171_v24, %v5170_v17  ;;  %vm5202_vm5 = vcmp.lt.f32.partialorder %v6712_v52, 0  ;;  %v5168_v34 = vsel %vm5167_vm0, 1065353216, %v5166_v27  ;;  %v5210_v35 = vsel %vm5190_vm10, 2139095040, %v6543_v10  ;;  %v6920_v27 = vld [vmem:[%s9283_s3] sm:$0xff] }
 0x47f   :  { %vm5160_vm4 = vmand %vm5153_vm3, %vm6780_vm11  ;;  %vm5155_vm6 = vcmp.eq.f32.partialorder %v6704_v44, 2139095040  ;;  %v5173_v37 = vsel %vm5150_vm9, %v5172_v30, %v5170_v17  ;;  %vm5175_vm3 = vcmp.ne.f32.partialorder %v6701_v41, %v6701_v41  ;;  %v5223_v13 = vxor.u32 2147483648, %v5222_v32 }
 0x480   :  { %vm5177_vm9 = vmor %vm5175_vm3, %vm5176_vm12  ;;  %vm5137_vm0 = vcmp.eq.f32.partialorder %v6720_v59, 1065353216  ;;  %vm5228_vm12 = vcmp.ne.f32.partialorder %v6706_v38, %v6706_v38  ;;  %vm9347_vm3 = vcmp.eq.f32.partialorder %v6710_v51, 2139095040  ;;  %v726_v17 = vmul.f32 1.442695, %v724_v11 }
 0x481   :  { %v6107_v19 = vpop.eup %6106  ;;  %6110 = vpow2.f32 %v728_v14 }
 0x482   :  { %v5157_v21 = vsel %vm6767_vm1, 2143289344, %v6107_v19  ;;  %vm6803_vm1 = vmxor %vm5190_vm10, %vm5206_vm2  ;;  %vm5136_vm2 = vcmp.eq.f32.partialorder %v6720_v59, 0  ;;  %v5224_v59 = vsel %vm6794_vm14, %v5223_v13, %v5222_v32  ;;  %6112 = vpow2.f32 %v726_v17 }
 0x483   :  { %v5159_v26 = vsel %vm5151_vm7, %v5158_v43, %v5157_v21  ;;  %vm6815_vm7 = vmand %vm5190_vm10, %vm5203_vm8  ;;  %v5225_v4 = vsel %vm5202_vm5, %v5224_v59, %v5222_v32  ;;  %v794_v19 = vmul.f32 %v6878_v63, %v6878_v63  ;;  %v4673_v17 = vmul.f32 -1.442695, %v6855_v46 }
 0x484   :  { %v5161_v29 = vxor.u32 2147483648, %v5159_v26  ;;  %vm5217_vm11 = vmor %vm6815_vm7, %vm6803_vm1  ;;  %vm9346_vm1 = vcmask 130048  }
 0x485   :  { %vm6846_vm10 = vmand %vm5202_vm5, %vm6732_vm13  ;;  %v5218_v55 = vsel %vm5217_vm11, 2139095040, %v6543_v10  ;;  %vm5204_vm11 = vcmp.eq.f32.partialorder %v6712_v52, 1065353216 }
 0x486   :  { %v5162_v33 = vsel %vm5160_vm4, %v5161_v29, %v5159_v26  ;;  %vm5152_vm4 = vcmp.eq.f32.partialorder %v6701_v41, 1065353216  ;;  %vm9348_vm5 = vmmov %vm9346_vm1  ;;  %v6915_v26 = vld [vmem:[%s9283_s3 + $0x8] sm:$0xff] }
 0x487   :  { %v5169_v36 = vsel %vm5135_vm15, %v5168_v34, %v5162_v33  ;;  %vm5179_vm13 = vmor %vm5152_vm4, %vm5136_vm2  ;;  %vm5205_vm15 = vcmp.lt.s32.totalorder %v6712_v52, 0  ;;  %vm5227_vm2 = vcmp.ne.f32.partialorder %v6712_v52, %v6712_v52  ;;  %4913 = vmatprep.subr.mxu1 %v6915_v26  ;;  %4943 = vmatprep.subr.mxu0 %v6915_v26 }
 0x488   :  { %v6109_v42 = vpop.eup %6108  ;;  %v5174_v44 = vsel %vm5155_vm6, %v5173_v37, %v5169_v36  ;;  %vm5212_vm7 = vmand %vm5205_vm15, %vm6794_vm14  ;;  %vm5207_vm6 = vcmp.eq.f32.partialorder %v6715_v53, 2139095040  ;;  %vm5188_vm14 = vcmp.eq.f32.partialorder %v6706_v38, 0  ;;  %4914 = vmatpush3.msra.mxu1 %v6915_v26  ;;  %4944 = vmatpush3.msra.mxu0 %v6915_v26  ;;  %v721_v36 = vmax.f32 %v6855_v46, 0.0 }
 0x489   :  { %v5178_v49 = vsel %vm5177_vm9, 2143289344, %v5174_v44  ;;  %v5209_v50 = vsel %vm6846_vm10, 2143289344, %v6109_v42  ;;  %vm5229_vm10 = vmor %vm5227_vm2, %vm5228_vm12  ;;  %vm5189_vm9 = vcmp.eq.f32.partialorder %v6706_v38, 1065353216  ;;  %4915 = vmatprep.subr.mxu1 %v6920_v27  ;;  %4945 = vmatprep.subr.mxu0 %v6920_v27 }
 0x48a   :  { %v5180_v57 = vsel %vm5179_vm13, 1065353216, %v5178_v49  ;;  %v5211_v58 = vsel %vm5203_vm8, %v5210_v35, %v5209_v50  ;;  %vm5219_vm8 = vcmp.eq.f32.partialorder %v6712_v52, 3212836864  ;;  %vm5231_vm4 = vmor %vm5204_vm11, %vm5188_vm14  ;;  %vm9349_vm13 = vcmask 64512   ;;  %4916 = vmatpush3.msra.mxu1 %v6920_v27  ;;  %4946 = vmatpush3.msra.mxu0 %v6920_v27 }
 0x48b   :  { %v6873_v61 = vsel %vm5137_vm0, %v6701_v41, %v5180_v57  ;;  %v5213_v62 = vxor.u32 2147483648, %v5211_v58  ;;  %v5220_v8 = vsel %vm5219_vm8, 1065353216, %v5218_v55  ;;  %v796_v38 = vsel %vm9349_vm13, %v794_v19, 0.0  ;;  %vm9350_vm15 = vmmov %vm9349_vm13  ;;  %4931 = vmatprep.subr.mxu1 %v6611_v6  ;;  %4961 = vmatprep.subr.mxu0 %v6611_v6 }
 0x48c   :  { %v530_v1 = vsel %vm9346_vm1, %v6873_v61, 0.0  ;;  %v799_v21 = vsel %vm9350_vm15, %v795_v20, 0.0  ;;  %v720_v35 = vmax.f32 %v6878_v63, 0.0  ;;  %vm9352_vm8 = vmmov %vm9349_vm13 }
 0x48d   :  { %531 = vadd.xlane.f32.xlu1 %v530_v1  ;;  %v5214_v41 = vsel %vm5212_vm7, %v5213_v62, %v5211_v58  ;;  %vm9351_vm7 = vmmov %vm9346_vm1 }
 0x48e   :  { %v5221_v3 = vsel %vm9347_vm3, %v5220_v8, %v5214_v41  ;;  %vm9353_vm2 = vmmov %vm9352_vm8 }
 0x48f   :  { %v5226_v9 = vsel %vm5207_vm6, %v5225_v4, %v5221_v3  ;;  %vm9358_vm13 = vmmov %vm9346_vm1 }
 0x490   :  { %v5230_v12 = vsel %vm5229_vm10, 2143289344, %v5226_v9  ;;  %vm9354_vm10 = vmmov %vm9346_vm1 }
 0x491   :  { %v5232_v53 = vsel %vm5231_vm4, 1065353216, %v5230_v12  ;;  %800 = vadd.xlane.f32.xlu1 %v799_v21  ;;  %vm9355_vm4 = vmmov %vm9346_vm1 }
 0x492   :  { %v6902_v51 = vsel %vm5189_vm9, %v6712_v52, %v5232_v53  ;;  %v6111_v52 = vpop.eup %6110  ;;  %vm9356_vm9 = vcmask 105552   ;;  %vm9359_vm15 = vmmov %vm9346_vm1 }
 0x493   :  { %v533_v15 = vsel %vm9348_vm5, %v6902_v51, 0.0  ;;  %v6113_v43 = vpop.eup %6112  ;;  %v739_v25 = vadd.f32 1.0, %v6111_v52  ;;  %v742_v29 = vmul.f32 -0.5, %v6111_v52  ;;  %v745_v31 = vand.u32 2147483647, %v6111_v52  ;;  %vm9357_vm5 = vmmov %vm9356_vm9 }
 0x494   :  { %534 = vadd.xlane.f32.xlu0 %v533_v15  ;;  %v730_v24 = vadd.f32 1.0, %v6113_v43  ;;  %v733_v28 = vmul.f32 -0.5, %v6113_v43  ;;  %v736_v30 = vand.u32 2147483647, %v6113_v43 }
 0x495   :  { %v743_v33 = vadd.f32 1.0, %v742_v29  ;;  %vm746_vm12 = vcmp.lt.f32.partialorder %v745_v31, 0.0004427343 }
 0x496   :  { %6114 = vlog2.f32 %v730_v24  ;;  %v734_v32 = vadd.f32 1.0, %v733_v28  ;;  %vm737_vm0 = vcmp.lt.f32.partialorder %v736_v30, 0.0004427343 }
 0x497   :  { %6116 = vlog2.f32 %v739_v25  ;;  %v744_v42 = vmul.f32 %v6111_v52, %v743_v33 }
 0x498   :  { %797 = vadd.xlane.f32.xlu0 %v796_v38  ;;  %v735_v40 = vmul.f32 %v6113_v43, %v734_v32 }
 0x4a3   :  { %v6115_v34 = vpop.eup %6114 }
 0x4a4   :  { %v6117_v37 = vpop.eup %6116  ;;  %v732_v39 = vmul.f32 0.6931472, %v6115_v34  ;;  %v762_v34 = vsel %vm9356_vm9, %v6878_v63, -inf }
 0x4a5   :  { %v741_v44 = vmul.f32 0.6931472, %v6117_v37  ;;  %v765_v37 = vsel %vm9357_vm5, %v6855_v46, -inf }
 0x4a6   :  { %v738_v13 = vsel %vm737_vm0, %v735_v40, %v732_v39  ;;  %vm9360_vm0 = vcmask 23552  }
 0x4a7   :  { %v748_v49 = vadd.f32 %v738_v13, %v720_v35  ;;  %v747_v50 = vsel %vm746_vm12, %v744_v42, %v741_v44  ;;  %vm9361_vm12 = vmmov %vm9360_vm0 }
 0x4a8   :  { %v749_v55 = vadd.f32 %v747_v50, %v721_v36 }
 0x4aa   :  { %910 = vperm.xlu1 %5985, %v749_v55  }
 0x4ae   :  { %905 = vperm.xlu0 %5984, %v748_v49   ;;  %5986 = vset.pattern.permute.xlu1 %v9316_v45 }
 0x4b2   :  { %5987 = vset.pattern.permute.xlu0 %v9316_v45 }
 0x516   :  { %v532_v56 = vpop.xlane.xlu1 %531 }
 0x517   :  { %v536_v57 = vadd.f32 1e-16, %v532_v56 }
 0x519   :  { %6118 = vrcp.f32 %v536_v57 }
 0x51d   :  { %v535_v58 = vpop.xlane.xlu0 %534 }
 0x51e   :  { %v537_v60 = vadd.f32 1e-16, %v535_v58 }
 0x520   :  { %6120 = vrcp.f32 %v537_v60 }
 0x521   :  { %v798_v8 = vpop.xlane.xlu0 %797 }
 0x522   :  { %vm804_vm6 = vcmp.eq.f32.partialorder %v798_v8, inf  ;;  %vm806_vm14 = vcmp.eq.f32.partialorder %v798_v8, 0.0 }
 0x526   :  { %v6119_v62 = vpop.eup %6118 }
 0x527   :  { %v6941_v1 = vmul.f32 %v6119_v62, %v6873_v61  ;;  %v801_v61 = vpop.xlane.xlu1 %800 }
 0x528   :  { %6122 = vrsqrt.f32 %v801_v61  ;;  %vm811_vm11 = vcmp.eq.f32.partialorder %v801_v61, inf  ;;  %v814_v5 = vand.u32 2147483648, %v801_v61  ;;  %vm813_vm3 = vcmp.eq.f32.partialorder %v801_v61, 0.0 }
 0x529   :  { %4917 = vmatprep.mubr.msk.f32.mxu1 %vm9346_vm1, %v6941_v1  ;;  %6124 = vrsqrt.f32 %v798_v8  ;;  %v906_v29 = vpop.permute.xlu0 %905 }
 0x52b   :  { %v911_v52 = vpop.permute.xlu1 %910 }
 0x52d   :  { %v6121_v59 = vpop.eup %6120 }
 0x52e   :  { %v6946_v41 = vmul.f32 %v6121_v59, %v6902_v51  ;;  %v4672_v51 = vmul.f32 -1.442695, %v6878_v63 }
 0x530   :  { %4918 = vmatmul.mubr.msk.f32.vlgmr.msra.gmra.mxu1 %vm9351_vm7, %v6946_v41  ;;  %vm9362_vm7 = vmmov %vm9346_vm1 }
 0x531   :  { %4932 = vmatpush3.msra.mxu1 %v6611_v6  ;;  %4933 = vmatprep.mubr.msk.f32.mxu1 %vm9352_vm8, %v6878_v63  ;;  %vm9363_vm8 = vcmask 261120  }
 0x532   :  { %4936 = vmatprep.subr.mxu1 %v6664_v47 }
 0x534   :  { %4934 = vmatmul.mubr.msk.f32.vlgmr.msra.gmra.mxu1 %vm9353_vm2, %v6855_v46  ;;  %vm9364_vm2 = vmmov %vm9363_vm8 }
 0x535   :  { %4937 = vmatpush3.msra.mxu1 %v6664_v47  ;;  %v6123_v6 = vpop.eup %6122  ;;  %v807_v47 = vand.u32 2147483648, %v798_v8 }
 0x536   :  { %4938 = vmatprep.subr.mxu1 %v6670_v48  ;;  %v6125_v2 = vpop.eup %6124  ;;  %v810_v3 = vmul.f32 %v6123_v6, %v801_v61 }
 0x537   :  { %4939 = vmatpush3.msra.mxu1 %v6670_v48  ;;  %v803_v4 = vmul.f32 %v6125_v2, %v798_v8 }
 0x538   :  { %4950 = vmatprep.subr.mxu1 %v6591_v0  ;;  %v812_v9 = vsel %vm811_vm11, %v801_v61, %v810_v3 }
 0x539   :  { %v805_v11 = vsel %vm804_vm6, %v798_v8, %v803_v4  ;;  %v815_v12 = vsel %vm813_vm3, %v814_v5, %v812_v9 }
 0x53a   :  { %v808_v48 = vsel %vm806_vm14, %v807_v47, %v805_v11  ;;  %v817_v53 = vmax.f32 %v815_v12, 1e-08 }
 0x53b   :  { %v816_v0 = vmax.f32 %v808_v48, 1e-08 }
 0x53c   :  { %6126 = vrcp.f32 %v817_v53 }
 0x53d   :  { %6128 = vrcp.f32 %v816_v0 }
 0x53e   :  { %6130 = vpow2.f32 %v4672_v51 }
 0x53f   :  { %6132 = vpow2.f32 %v4673_v17 }
 0x549   :  { %v6127_v19 = vpop.eup %6126 }
 0x54a   :  { %v6129_v21 = vpop.eup %6128 }
 0x54b   :  { %v6131_v24 = vpop.eup %6130 }
 0x54c   :  { %v756_v32 = vadd.f32 1.0, %v6131_v24  ;;  %v6133_v39 = vpop.eup %6132 }
 0x54d   :  { %v757_v40 = vadd.f32 1.0, %v6133_v39  ;;  %v7005_v39 = vld [vmem:[%s9281_s1 + $0x8] sm:$0xff] }
 0x54e   :  { %6134 = vrcp.f32 %v756_v32 }
 0x54f   :  { %6136 = vrcp.f32 %v757_v40  ;;  %v7012_v40 = vld [vmem:[%s9281_s1] sm:$0xff] }
 0x55b   :  { %v6135_v42 = vpop.eup %6134 }
 0x55c   :  { %v949_v44 = vsub.f32 1.0, %v6135_v42  ;;  %v6137_v13 = vpop.eup %6136 }
 0x55d   :  { %v950_v9 = vsub.f32 1.0, %v6137_v13 }
 0x5f0   :  { %v6961_v14 = vpop.f32.mrf.mxu1 }
 0x5f2   :  { %v6963_v15 = vpop.f32.mrf.mxu1 }
 0x5f4   :  { %v4935_v20 = vpop.f32.mrf.mxu1 }
 0x5f5   :  { %v902_v38 = vmul.f32 %v6127_v19, %v4935_v20 }
 0x5f6   :  { %v890_v43 = vpop.f32.mrf.mxu1 }
 0x5f7   :  { %v901_v25 = vmul.f32 %v6129_v21, %v890_v43  ;;  %v914_v28 = vmul.f32 %v911_v52, %v902_v38 }
 0x5f9   :  { %v918_v30 = vsel %vm9354_vm10, %v914_v28, -inf  ;;  %v913_v31 = vmul.f32 %v906_v29, %v901_v25 }
 0x5fa   :  { %919 = vmax.xlane.f32.xlu0 %v918_v30 }
 0x5fb   :  { %v915_v33 = vsel %vm9355_vm4, %v913_v31, -inf }
 0x5fc   :  { %916 = vmax.xlane.f32.xlu1 %v915_v33 }
 0x600   :  { %763 = vmax.xlane.f32.xlu1 %v762_v34  ;;  %v6992_v34 = vld [vmem:[%s9281_s1 + $0x18] sm:$0xff] }
 0x604   :  { %766 = vmax.xlane.f32.xlu1 %v765_v37  ;;  %v6998_v37 = vld [vmem:[%s9281_s1 + $0x10] sm:$0xff] }
 0x610   :  { %953 = vperm.xlu0 %5987, %v949_v44  }
 0x614   :  { %5989 = vset.pattern.permute.xlu0 %v9314_v54 }
 0x615   :  { %939 = vperm.xlu1 %5986, %v6135_v42  }
 0x619   :  { %944 = vperm.xlu1 %5986, %v6137_v13  }
 0x683   :  { %v920_v49 = vpop.xlane.xlu0 %919 }
 0x684   :  { %v922_v50 = vsub.f32 %v914_v28, %v920_v49 }
 0x685   :  { %v917_v55 = vpop.xlane.xlu1 %916 }
 0x686   :  { %v925_v56 = vmul.f32 1.442695, %v922_v50  ;;  %v921_v57 = vsub.f32 %v913_v31, %v917_v55 }
 0x688   :  { %6138 = vpow2.f32 %v925_v56  ;;  %v923_v58 = vmul.f32 1.442695, %v921_v57  ;;  %v1211_v56 = vld [vmem:[#allocation2 + $0x20] sm:$0xff]  ;;  %v1212_v57 = vld [vmem:[#allocation2 + $0x28] sm:$0xff] }
 0x689   :  { %v764_v62 = vpop.xlane.xlu1 %763 }
 0x68a   :  { %6140 = vpow2.f32 %v923_v58  ;;  %v768_v8 = vsub.f32 %v6878_v63, %v764_v62  ;;  %v7030_v58 = vld [vmem:[%s9284_s4] sm:$0xff] }
 0x68b   :  { %v954_v24 = vpop.permute.xlu0 %953 }
 0x68c   :  { %v770_v3 = vmul.f32 1.442695, %v768_v8  ;;  %v961_v29 = vmul.f32 %v954_v24, %v6941_v1 }
 0x68d   :  { %v767_v2 = vpop.xlane.xlu1 %766 }
 0x68e   :  { %v769_v4 = vsub.f32 %v6855_v46, %v767_v2  ;;  %6142 = vpow2.f32 %v770_v3 }
 0x690   :  { %v772_v5 = vmul.f32 1.442695, %v769_v4 }
 0x691   :  { %v940_v12 = vpop.permute.xlu1 %939 }
 0x692   :  { %6144 = vpow2.f32 %v772_v5 }
 0x695   :  { %v6139_v60 = vpop.eup %6138  ;;  %v945_v48 = vpop.permute.xlu1 %944 }
 0x696   :  { %v930_v59 = vsel %vm9358_vm13, %v6139_v60, 0.0 }
 0x697   :  { %v6141_v61 = vpop.eup %6140  ;;  %931 = vadd.xlane.f32.xlu1 %v930_v59 }
 0x698   :  { %v927_v6 = vsel %vm9359_vm15, %v6141_v61, 0.0 }
 0x69b   :  { %928 = vadd.xlane.f32.xlu1 %v927_v6  ;;  %v6143_v47 = vpop.eup %6142  ;;  %v793_v6 = vadd.f32 1.0, %v721_v36 }
 0x69f   :  { %v6145_v11 = vpop.eup %6144 }
 0x6ac   :  { %958 = vperm.xlu1 %5986, %v950_v9  }
 0x6b0   :  { %776 = vrot.lane.b32.xlu1 %v6143_v47, %s6536_s19 }
 0x6b1   :  { %5988 = vset.pattern.permute.xlu1 %v9314_v54 }
 0x6b4   :  { %778 = vrot.lane.b32.xlu1 %v6145_v11, %s6536_s19 }
 0x720   :  { %v932_v53 = vpop.xlane.xlu1 %931 }
 0x721   :  { %6146 = vrcp.f32 %v932_v53 }
 0x724   :  { %v929_v0 = vpop.xlane.xlu1 %928 }
 0x725   :  { %6148 = vrcp.f32 %v929_v0 }
 0x728   :  { %v959_v51 = vpop.permute.xlu1 %958 }
 0x729   :  { %v962_v31 = vmul.f32 %v959_v51, %v6946_v41 }
 0x72c   :  { %v777_v17 = vpop.permute.xlu1 %776 }
 0x72d   :  { %v782_v19 = vsel %vm9360_vm0, %v777_v17, 0.0 }
 0x72e   :  { %v6147_v20 = vpop.eup %6146  ;;  %783 = vadd.xlane.f32.xlu1 %v782_v19 }
 0x72f   :  { %v936_v38 = vmul.f32 %v6147_v20, %v6139_v60 }
 0x730   :  { %v779_v21 = vpop.permute.xlu1 %778 }
 0x731   :  { %v785_v52 = vsel %vm9361_vm12, %v779_v21, 0.0  ;;  %v948_v28 = vmul.f32 %v945_v48, %v936_v38 }
 0x732   :  { %v6149_v43 = vpop.eup %6148  ;;  %786 = vadd.xlane.f32.xlu0 %v785_v52 }
 0x733   :  { %v934_v25 = vmul.f32 %v6149_v43, %v6141_v61  ;;  %v6984_v33 = vadd.f32 %v962_v31, %v948_v28 }
 0x735   :  { %v947_v30 = vmul.f32 %v940_v12, %v934_v25 }
 0x737   :  { %v963_v32 = vadd.f32 %v961_v29, %v947_v30 }
 0x739   :  { %4940 = vmatprep.mubr.msk.f32.mxu1 %vm9346_vm1, %v963_v32 }
 0x73a   :  { %4941 = vmatmul.mubr.msk.f32.vlgmr.msra.gmra.mxu1 %vm9362_vm7, %v6984_v33 }
 0x73b   :  { %4951 = vmatpush3.msra.mxu1 %v6992_v34  ;;  %4958 = vmatprep.mubr.msk.f32.mxu1 %vm9363_vm8, %v1211_v56 }
 0x73c   :  { %4952 = vmatprep.subr.mxu1 %v6998_v37 }
 0x73d   :  { %4953 = vmatpush3.msra.mxu1 %v6998_v37 }
 0x73e   :  { %4954 = vmatprep.subr.mxu1 %v7005_v39 }
 0x73f   :  { %4955 = vmatpush3.msra.mxu1 %v7005_v39 }
 0x740   :  { %4956 = vmatprep.subr.mxu1 %v7012_v40 }
 0x741   :  { %4957 = vmatpush3.msra.mxu1 %v7012_v40 }
 0x742   :  { %4973 = vmatprep.subr.mxu1 %v6915_v26  ;;  %4959 = vmatmul.mubr.msk.f32.vlgmr.msra.gmra.mxu1 %vm9364_vm2, %v1212_v57 }
 0x743   :  { %4974 = vmatpush3.msra.mxu1 %v6915_v26 }
 0x744   :  { %4975 = vmatprep.subr.mxu1 %v6920_v27 }
 0x745   :  { %4976 = vmatpush3.msra.mxu1 %v6920_v27  ;;  %v792_v27 = vadd.f32 1.0, %v720_v35 }
 0x746   :  { %4991 = vmatprep.subr.mxu1 %v7030_v58 }
 0x7b7   :  { %v784_v42 = vpop.xlane.xlu1 %783 }
 0x7b8   :  { %6150 = vrcp.f32 %v784_v42 }
 0x7bb   :  { %v787_v44 = vpop.xlane.xlu0 %786 }
 0x7bc   :  { %6152 = vrcp.f32 %v787_v44 }
 0x7c5   :  { %v6151_v13 = vpop.eup %6150 }
 0x7c6   :  { %v789_v49 = vmul.f32 %v6151_v13, %v6143_v47 }
 0x7c8   :  { %1071 = vperm.xlu1 %5988, %v789_v49  }
 0x7c9   :  { %v6153_v50 = vpop.eup %6152 }
 0x7ca   :  { %v791_v55 = vmul.f32 %v6153_v50, %v6145_v11 }
 0x7cc   :  { %1075 = vperm.xlu0 %5989, %v791_v55   ;;  %5990 = vset.pattern.permute.xlu1 %v6539_v22 }
 0x7cd   :  { %1048 = vperm.xlu1 %5990, %v789_v49  }
 0x7d0   :  { %5996 = vset.pattern.permute.xlu0 %v6534_v7 }
 0x7d1   :  { %5991 = vset.pattern.permute.xlu1 %v6540_v23 }
 0x7d2   :  { %1059 = vperm.xlu1 %5991, %v789_v49  }
 0x7d6   :  { %5992 = vset.pattern.permute.xlu1 %v6539_v22 }
 0x7d7   :  { %1053 = vperm.xlu1 %5992, %v791_v55  }
 0x7db   :  { %5993 = vset.pattern.permute.xlu1 %v6540_v23 }
 0x7dc   :  { %1063 = vperm.xlu1 %5993, %v791_v55  }
 0x7e0   :  { %5994 = vset.pattern.permute.xlu1 %v6538_v18 }
 0x7fa   :  { %v4942_v60 = vpop.f32.mrf.mxu1 }
 0x7fc   :  { %v1037_v62 = vpop.f32.mrf.mxu1 }
 0x843   :  { %v1072_v59 = vpop.permute.xlu1 %1071 }
 0x844   :  { %v1078_v61 = vmul.f32 %v1072_v59, %v1037_v62 }
 0x846   :  { %1082 = vrot.lane.b32.xlu1 %v1078_v61, %s6541_s6 }
 0x847   :  { %v1076_v26 = vpop.permute.xlu0 %1075 }
 0x848   :  { %v1079_v8 = vmul.f32 %v4942_v60, %v1076_v26  ;;  %v1049_v2 = vpop.permute.xlu1 %1048 }
 0x849   :  { %v1056_v47 = vmul.f32 %v1049_v2, %v1037_v62 }
 0x84a   :  { %1084 = vrot.lane.b32.xlu1 %v1079_v8, %s6541_s6 }
 0x84d   :  { %v1060_v3 = vpop.permute.xlu1 %1059 }
 0x84e   :  { %1094 = vperm.xlu1 %5994, %v792_v27   ;;  %v1066_v5 = vmul.f32 %v1060_v3, %v963_v32 }
 0x850   :  { %v1068_v12 = vadd.f32 %v1066_v5, %v1056_v47 }
 0x852   :  { %1099 = vperm.xlu1 %5994, %v793_v6   ;;  %v1054_v4 = vpop.permute.xlu1 %1053 }
 0x853   :  { %v1057_v53 = vmul.f32 %v4942_v60, %v1054_v4 }
 0x856   :  { %5995 = vset.pattern.permute.xlu1 %v6534_v7 }
 0x857   :  { %v1064_v9 = vpop.permute.xlu1 %1063 }
 0x858   :  { %v1067_v11 = vmul.f32 %v1064_v9, %v6984_v33 }
 0x85a   :  { %v1069_v0 = vadd.f32 %v1067_v11, %v1057_v53 }
 0x8b8   :  { %v1083_v48 = vpop.permute.xlu1 %1082 }
 0x8b9   :  { %v1088_v63 = vadd.f32 %v1083_v48, %v1068_v12 }
 0x8bb   :  { %v7042_v35 = vadd.f32 1e-16, %v1088_v63 }
 0x8bc   :  { %v1085_v46 = vpop.permute.xlu1 %1084 }
 0x8bd   :  { %v1089_v36 = vadd.f32 %v1085_v46, %v1069_v0  ;;  %v7045_v51 = vand.u32 2147483647, %v7042_v35  ;;  %vm9297_vm10 = vcmp.eq.f32.partialorder %v7042_v35, 0 }
 0x8bf   :  { %v7047_v17 = vadd.f32 1e-16, %v1089_v36  ;;  %6154 = vlog2.f32 %v7045_v51  ;;  %vm5258_vm4 = vcmp.gt.f32.partialorder %v7045_v51, 1065353216 }
 0x8c1   :  { %v7051_v19 = vand.u32 2147483647, %v7047_v17 }
 0x8c3   :  { %6156 = vlog2.f32 %v7051_v19 }
 0x8c9   :  { %v7054_v20 = vpop.permute.xlu1 %1094 }
 0x8ca   :  { %v7057_v38 = vand.u32 2147483647, %v7054_v20  ;;  %v5243_v21 = vtrunc.f32 %v7054_v20  ;;  %vm5242_vm6 = vcmp.lt.f32.partialorder %v7054_v20, 0 }
 0x8cb   :  { %vm7082_vm9 = vmand %vm5242_vm6, %vm9297_vm10  ;;  %v5274_v59 = vsel %vm5242_vm6, 0, %v6542_v16  ;;  %v5262_v8 = vsel %vm5242_vm6, 2139095040, %v6543_v10 }
 0x8cc   :  { %v6155_v52 = vpop.eup %6154  ;;  %vm9296_vm11 = vcmp.eq.f32.partialorder %v7057_v38, 2139095040  ;;  %v5247_v43 = vtrunc.f32 %v7057_v38  ;;  %vm5244_vm3 = vcmp.ne.f32.partialorder %v7054_v20, %v5243_v21  ;;  %vm7089_vm5 = vmxor %vm5242_vm6, %vm5258_vm4  ;;  %vm5246_vm7 = vcmp.lt.f32.partialorder %v7057_v38, 1266679808 }
 0x8cd   :  { %v7062_v24 = vpop.permute.xlu1 %1099  ;;  %v5236_v25 = vmul.f32 %v6155_v52, %v7054_v20  ;;  %vm7072_vm14 = vmor %vm5244_vm3, %vm9296_vm11  ;;  %vm9295_vm3 = vcmp.lt.f32.partialorder %v7042_v35, 0  ;;  %vm5310_vm11 = vcmp.gt.f32.partialorder %v7051_v19, 1065353216  ;;  %v5275_v3 = vxor.u32 2147483648, %v5274_v59 }
 0x8ce   :  { %v5248_v28 = vcvt.f32.s32 %v5247_v43  ;;  %v7068_v29 = vand.u32 2147483647, %v7062_v24  ;;  %v5295_v42 = vtrunc.f32 %v7062_v24  ;;  %vm5251_vm15 = vmneg %vm7072_vm14 }
 0x8cf   :  { %6158 = vpow2.f32 %v5236_v25  ;;  %vm5269_vm8 = vmor %vm7082_vm9, %vm7089_vm5  ;;  %vm5306_vm5 = vcmp.lt.f32.partialorder %v7047_v17, 0  ;;  %v4960_v25 = vpop.f32.mrf.mxu1 }
 0x8d0   :  { %v6157_v31 = vpop.eup %6156  ;;  %v5249_v32 = vand.u32 1, %v5248_v28  ;;  %v5299_v49 = vtrunc.f32 %v7068_v29  ;;  %vm9294_vm12 = vcmp.eq.f32.partialorder %v7068_v29, 2139095040  ;;  %vm5296_vm1 = vcmp.ne.f32.partialorder %v7062_v24, %v5295_v42 }
 0x8d1   :  { %v5288_v13 = vmul.f32 %v6157_v31, %v7062_v24  ;;  %vm7111_vm4 = vmor %vm5296_vm1, %vm9294_vm12  ;;  %vm5294_vm1 = vcmp.lt.f32.partialorder %v7062_v24, 0  ;;  %v5270_v2 = vsel %vm5269_vm8, 2139095040, %v6543_v10  ;;  %vm5298_vm6 = vcmp.lt.f32.partialorder %v7068_v29, 1266679808 }
 0x8d2   :  { %vm5250_vm13 = vcmp.eq.s32.totalorder %v5249_v32, 1  ;;  %v5300_v50 = vcvt.f32.s32 %v5299_v49  ;;  %vm5303_vm12 = vmneg %vm7111_vm4  ;;  %v5326_v47 = vsel %vm5294_vm1, 0, %v6542_v16  ;;  %v5314_v46 = vsel %vm5294_vm1, 2139095040, %v6543_v10  ;;  %v1285_v49 = vpop.f32.mrf.mxu1 }
 0x8d3   :  { %vm5252_vm0 = vmand %vm5250_vm13, %vm5251_vm15  ;;  %6160 = vpow2.f32 %v5288_v13  ;;  %vm5257_vm13 = vcmp.lt.s32.totalorder %v7042_v35, 0  ;;  %v5327_v36 = vxor.u32 2147483648, %v5326_v47 }
 0x8d4   :  { %v5301_v55 = vand.u32 1, %v5300_v50  ;;  %vm7104_vm2 = vmand %vm5246_vm7, %vm5252_vm0 }
 0x8d5   :  { %vm7120_vm15 = vmand %vm9295_vm3, %vm7072_vm14  ;;  %vm5307_vm3 = vcmp.eq.f32.partialorder %v7047_v17, 0  ;;  %v5276_v12 = vsel %vm7104_vm2, %v5275_v3, %v5274_v59 }
 0x8d6   :  { %vm5302_vm0 = vcmp.eq.s32.totalorder %v5301_v55, 1  ;;  %vm7126_vm7 = vmand %vm5257_vm13, %vm7104_vm2  ;;  %vm5279_vm13 = vcmp.ne.f32.partialorder %v7042_v35, %v7042_v35 }
 0x8d7   :  { %vm7136_vm14 = vmand %vm5302_vm0, %vm5303_vm12  ;;  %vm9385_vm0 = vcmp.eq.f32.partialorder %v7042_v35, 0 }
 0x8d8   :  { %vm7150_vm10 = vmand %vm5294_vm1, %vm5307_vm3 }
 0x8d9   :  { %vm7165_vm12 = vmxor %vm5294_vm1, %vm5310_vm11  ;;  %vm5280_vm11 = vcmp.ne.f32.partialorder %v7054_v20, %v7054_v20 }
 0x8da   :  { %vm7176_vm9 = vmand %vm5298_vm6, %vm7136_vm14  ;;  %vm5240_vm14 = vcmp.eq.f32.partialorder %v7054_v20, 0  ;;  %vm5259_vm6 = vcmp.eq.f32.partialorder %v7045_v51, 2139095040 }
 0x8db   :  { %vm5321_vm8 = vmor %vm7150_vm10, %vm7165_vm12  ;;  %vm9388_vm10 = vcmp.eq.f32.partialorder %v7057_v38, 2139095040  ;;  %vm9389_vm12 = vcmp.lt.f32.partialorder %v7042_v35, 0  ;;  %v5328_v30 = vsel %vm7176_vm9, %v5327_v36, %v5326_v47 }
 0x8dc   :  { %v6159_v26 = vpop.eup %6158  ;;  %vm5312_vm2 = vmand %vm5306_vm5, %vm7111_vm4  ;;  %v5277_v21 = vsel %vm9389_vm12, %v5276_v12, %v5274_v59  ;;  %v5322_v43 = vsel %vm5321_vm8, 2139095040, %v6543_v10  ;;  %vm5332_vm8 = vcmp.ne.f32.partialorder %v7062_v24, %v7062_v24  ;;  %v5329_v13 = vsel %vm5306_vm5, %v5328_v30, %v5326_v47 }
 0x8dd   :  { %v5261_v6 = vsel %vm7120_vm15, 2143289344, %v6159_v26  ;;  %vm5271_vm15 = vcmp.eq.f32.partialorder %v7042_v35, 3212836864  ;;  %vm5281_vm4 = vmor %vm5279_vm13, %vm5280_vm11  ;;  %vm5241_vm13 = vcmp.eq.f32.partialorder %v7054_v20, 1065353216  ;;  %vm5331_vm11 = vcmp.ne.f32.partialorder %v7047_v17, %v7047_v17 }
 0x8de   :  { %v5263_v5 = vsel %vm9385_vm0, %v5262_v8, %v5261_v6  ;;  %v5272_v53 = vsel %vm5271_vm15, 1065353216, %v5270_v2  ;;  %vm5309_vm0 = vcmp.lt.s32.totalorder %v7047_v17, 0  ;;  %vm5323_vm15 = vcmp.eq.f32.partialorder %v7047_v17, 3212836864 }
 0x8df   :  { %v5265_v11 = vxor.u32 2147483648, %v5263_v5  ;;  %v5324_v42 = vsel %vm5323_vm15, 1065353216, %v5322_v43  ;;  %vm5293_vm5 = vcmp.eq.f32.partialorder %v7062_v24, 1065353216 }
 0x8e0   :  { %v6161_v48 = vpop.eup %6160 }
 0x8e1   :  { %v5266_v63 = vsel %vm7126_vm7, %v5265_v11, %v5263_v5  ;;  %v5313_v0 = vsel %vm5312_vm2, 2143289344, %v6161_v48  ;;  %vm9390_vm7 = vcmp.eq.f32.partialorder %v7042_v35, 1065353216  ;;  %vm9391_vm2 = vcmp.eq.f32.partialorder %v7068_v29, 2139095040 }
 0x8e2   :  { %v5273_v51 = vsel %vm9388_vm10, %v5272_v53, %v5266_v63  ;;  %v5315_v52 = vsel %vm5307_vm3, %v5314_v46, %v5313_v0  ;;  %vm5283_vm1 = vmor %vm9390_vm7, %vm5240_vm14  ;;  %vm5292_vm14 = vcmp.eq.f32.partialorder %v7062_v24, 0  ;;  %vm9394_vm7 = vcmask 64512  }
 0x8e3   :  { %v5278_v28 = vsel %vm5259_vm6, %v5277_v21, %v5273_v51  ;;  %v5317_v38 = vxor.u32 2147483648, %v5315_v52  ;;  %vm5316_vm3 = vmand %vm5309_vm0, %vm7176_vm9  ;;  %vm5311_vm6 = vcmp.eq.f32.partialorder %v7051_v19, 2139095040  ;;  %vm9392_vm9 = vcmask 130048  }
 0x8e4   :  { %v5282_v31 = vsel %vm5281_vm4, 2143289344, %v5278_v28  ;;  %vm5308_vm0 = vcmp.eq.f32.partialorder %v7047_v17, 1065353216  ;;  %vm5333_vm10 = vmor %vm5331_vm11, %vm5332_vm8 }
 0x8e5   :  { %v5284_v32 = vsel %vm5283_vm1, 1065353216, %v5282_v31  ;;  %v5318_v33 = vsel %vm5316_vm3, %v5317_v38, %v5315_v52  ;;  %vm5335_vm12 = vmor %vm5308_vm0, %vm5292_vm14 }
 0x8e6   :  { %v7235_v44 = vsel %vm5241_vm13, %v7042_v35, %v5284_v32  ;;  %v5325_v20 = vsel %vm9391_vm2, %v5324_v42, %v5318_v33  ;;  %v7248_v35 = vld [vmem:[%s9282_s2] ss:$0 sm:$0xff]  ;;  %vm9393_vm4 = vmmov %vm9392_vm9 }
 0x8e7   :  { %v1104_v50 = vsel %vm9392_vm9, %v7235_v44, 0.0  ;;  %v5330_v55 = vsel %vm5311_vm6, %v5329_v13, %v5325_v20  ;;  %v7251_v19 = vadd.f32 %v7248_v35, %v4960_v25  ;;  %v7255_v57 = vadd.f32 %v7248_v35, %v1285_v49  ;;  %vm9395_vm1 = vmmov %vm9394_vm7 }
 0x8e8   :  { %1105 = vadd.xlane.f32.xlu1 %v1104_v50  ;;  %v5334_v56 = vsel %vm5333_vm10, 2143289344, %v5330_v55  ;;  %vm9396_vm3 = vmmov %vm9393_vm4 }
 0x8e9   :  { %v5336_v29 = vsel %vm5335_vm12, 1065353216, %v5334_v56  ;;  %v1297_v59 = vand.u32 2147483647, %v7251_v19  ;;  %v1296_v61 = vand.u32 2147483647, %v7255_v57  ;;  %v1369_v24 = vmul.f32 %v7251_v19, %v7251_v19  ;;  %vm9397_vm11 = vmmov %vm9396_vm3 }
 0x8ea   :  { %v5337_v60 = vsel %vm5293_vm5, %v7047_v17, %v5336_v29  ;;  %v1368_v2 = vmul.f32 %v7255_v57, %v7255_v57  ;;  %v1294_v51 = vmax.f32 %v7255_v57, 0.0  ;;  %v1295_v25 = vmax.f32 %v7251_v19, 0.0  ;;  %vm9398_vm8 = vmmov %vm9395_vm1  ;;  %v7290_v29 = vld [vmem:[%s9285_s5 + $0x8] sm:$0xff] }
 0x8eb   :  { %v1107_v62 = vsel %vm9393_vm4, %v5337_v60, 0.0  ;;  %v1299_v26 = vsub.f32 0.0, %v1297_v59  ;;  %v1298_v8 = vsub.f32 0.0, %v1296_v61  ;;  %v1373_v17 = vsel %vm9394_vm7, %v1369_v24, 0.0  ;;  %vm9399_vm14 = vmmov %vm9395_vm1 }
 0x8ec   :  { %1108 = vadd.xlane.f32.xlu0 %v1107_v62  ;;  %v1370_v3 = vsel %vm9395_vm1, %v1368_v2, 0.0  ;;  %vm9400_vm10 = vmmov %vm9396_vm3  ;;  %vm9402_vm5 = vcmask 105552  }
 0x8ed   :  { %v1302_v27 = vmul.f32 1.442695, %v1299_v26  ;;  %v1300_v6 = vmul.f32 1.442695, %v1298_v8  ;;  %1371 = vadd.xlane.f32.xlu1 %v1370_v3  ;;  %vm9401_vm12 = vmmov %vm9396_vm3 }
 0x8ee   :  { %vm9403_vm4 = vmmov %vm9402_vm5 }
 0x8ef   :  { %6162 = vpow2.f32 %v1302_v27  ;;  %vm9404_vm7 = vmmov %vm9396_vm3 }
 0x8f0   :  { %6164 = vpow2.f32 %v1300_v6  ;;  %1374 = vadd.xlane.f32.xlu0 %v1373_v17  ;;  %vm9405_vm1 = vmmov %vm9396_vm3 }
 0x8fc   :  { %v6163_v4 = vpop.eup %6162 }
 0x8fd   :  { %v6165_v5 = vpop.eup %6164  ;;  %v1313_v47 = vadd.f32 1.0, %v6163_v4  ;;  %v1316_v12 = vmul.f32 -0.5, %v6163_v4  ;;  %v1319_v0 = vand.u32 2147483647, %v6163_v4 }
 0x8fe   :  { %v1304_v9 = vadd.f32 1.0, %v6165_v5  ;;  %v1307_v11 = vmul.f32 -0.5, %v6165_v5  ;;  %v1310_v53 = vand.u32 2147483647, %v6165_v5 }
 0x8ff   :  { %v1317_v63 = vadd.f32 1.0, %v1316_v12  ;;  %vm1320_vm13 = vcmp.lt.f32.partialorder %v1319_v0, 0.0004427343  ;;  %v4685_v12 = vmul.f32 -1.442695, %v7251_v19 }
 0x900   :  { %6166 = vlog2.f32 %v1304_v9  ;;  %v1308_v48 = vadd.f32 1.0, %v1307_v11  ;;  %vm1311_vm15 = vcmp.lt.f32.partialorder %v1310_v53, 0.0004427343  ;;  %v4684_v9 = vmul.f32 -1.442695, %v7255_v57 }
 0x901   :  { %6168 = vlog2.f32 %v1313_v47  ;;  %v1318_v52 = vmul.f32 %v6163_v4, %v1317_v63 }
 0x902   :  { %v1309_v46 = vmul.f32 %v6165_v5, %v1308_v48 }
 0x90d   :  { %v6167_v36 = vpop.eup %6166 }
 0x90e   :  { %v1306_v21 = vmul.f32 0.6931472, %v6167_v36  ;;  %v6169_v43 = vpop.eup %6168 }
 0x90f   :  { %v1315_v38 = vmul.f32 0.6931472, %v6169_v43 }
 0x910   :  { %v1312_v28 = vsel %vm1311_vm15, %v1309_v46, %v1306_v21  ;;  %vm9406_vm15 = vcmask 23552  }
 0x911   :  { %v1322_v30 = vadd.f32 %v1312_v28, %v1294_v51  ;;  %v1321_v31 = vsel %vm1320_vm13, %v1318_v52, %v1315_v38  ;;  %vm9407_vm13 = vmmov %vm9406_vm15 }
 0x912   :  { %v1323_v32 = vadd.f32 %v1321_v31, %v1295_v25 }
 0x913   :  { %1479 = vperm.xlu1 %5995, %v1322_v30  }
 0x914   :  { %1484 = vperm.xlu0 %5996, %v1323_v32  }
 0x917   :  { %5997 = vset.pattern.permute.xlu1 %v9316_v45 }
 0x918   :  { %5998 = vset.pattern.permute.xlu0 %v9316_v45 }
 0x971   :  { %v1106_v33 = vpop.xlane.xlu1 %1105 }
 0x972   :  { %v1110_v42 = vadd.f32 1e-16, %v1106_v33  ;;  %v1336_v33 = vsel %vm9402_vm5, %v7255_v57, -inf }
 0x974   :  { %6170 = vrcp.f32 %v1110_v42  ;;  %v1339_v42 = vsel %vm9403_vm4, %v7251_v19, -inf }
 0x975   :  { %v1109_v20 = vpop.xlane.xlu0 %1108 }
 0x976   :  { %v1111_v13 = vadd.f32 1e-16, %v1109_v20  ;;  %v1372_v62 = vpop.xlane.xlu1 %1371 }
 0x977   :  { %vm1378_vm2 = vcmp.eq.f32.partialorder %v1372_v62, inf  ;;  %v1381_v24 = vand.u32 2147483648, %v1372_v62  ;;  %vm1380_vm0 = vcmp.eq.f32.partialorder %v1372_v62, 0.0 }
 0x978   :  { %6172 = vrcp.f32 %v1111_v13 }
 0x981   :  { %v6171_v49 = vpop.eup %6170 }
 0x982   :  { %v7276_v50 = vmul.f32 %v6171_v49, %v7235_v44  ;;  %v7299_v44 = vld [vmem:[%s9285_s5] sm:$0xff] }
 0x984   :  { %4947 = vmatprep.mubr.msk.f32.mxu0 %vm9396_vm3, %v7276_v50  ;;  %vm9408_vm3 = vmmov %vm9405_vm1 }
 0x985   :  { %v6173_v55 = vpop.eup %6172 }
 0x986   :  { %v7280_v56 = vmul.f32 %v6173_v55, %v5337_v60  ;;  %v1375_v60 = vpop.xlane.xlu0 %1374 }
 0x987   :  { %6174 = vrsqrt.f32 %v1375_v60  ;;  %vm1385_vm6 = vcmp.eq.f32.partialorder %v1375_v60, inf  ;;  %v1388_v27 = vand.u32 2147483648, %v1375_v60  ;;  %vm1387_vm9 = vcmp.eq.f32.partialorder %v1375_v60, 0.0 }
 0x988   :  { %4948 = vmatmul.mubr.msk.f32.vlgmr.msra.gmra.mxu0 %vm9397_vm11, %v7280_v56  ;;  %6176 = vrsqrt.f32 %v1372_v62  ;;  %vm9409_vm11 = vmmov %vm9405_vm1 }
 0x989   :  { %4962 = vmatpush3.msra.mxu0 %v7030_v58  ;;  %4963 = vmatprep.mubr.msk.f32.mxu0 %vm9398_vm8, %v7255_v57  ;;  %vm9410_vm8 = vcmask 261120  }
 0x98a   :  { %4966 = vmatprep.subr.mxu0 %v7290_v29 }
 0x98c   :  { %4964 = vmatmul.mubr.msk.f32.vlgmr.msra.gmra.mxu0 %vm9399_vm14, %v7251_v19  ;;  %vm9411_vm14 = vmmov %vm9410_vm8 }
 0x98d   :  { %4967 = vmatpush3.msra.mxu0 %v7290_v29 }
 0x98e   :  { %4968 = vmatprep.subr.mxu0 %v7299_v44  ;;  %v1480_v28 = vpop.permute.xlu1 %1479 }
 0x98f   :  { %4969 = vmatpush3.msra.mxu0 %v7299_v44  ;;  %v1485_v46 = vpop.permute.xlu0 %1484 }
 0x990   :  { %4980 = vmatprep.subr.mxu0 %v6992_v34 }
 0x994   :  { %v6175_v59 = vpop.eup %6174 }
 0x995   :  { %v6177_v61 = vpop.eup %6176  ;;  %v1384_v26 = vmul.f32 %v6175_v59, %v1375_v60 }
 0x996   :  { %v1377_v8 = vmul.f32 %v6177_v61, %v1372_v62 }
 0x997   :  { %v1386_v6 = vsel %vm1385_vm6, %v1375_v60, %v1384_v26 }
 0x998   :  { %v1379_v2 = vsel %vm1378_vm2, %v1372_v62, %v1377_v8  ;;  %v1389_v17 = vsel %vm1387_vm9, %v1388_v27, %v1386_v6 }
 0x999   :  { %v1382_v3 = vsel %vm1380_vm0, %v1381_v24, %v1379_v2  ;;  %v1391_v4 = vmax.f32 %v1389_v17, 1e-08 }
 0x99a   :  { %v1390_v5 = vmax.f32 %v1382_v3, 1e-08 }
 0x99b   :  { %6178 = vrcp.f32 %v1391_v4 }
 0x99c   :  { %6180 = vrcp.f32 %v1390_v5 }
 0x99d   :  { %6182 = vpow2.f32 %v4684_v9 }
 0x99e   :  { %6184 = vpow2.f32 %v4685_v12 }
 0x9a8   :  { %v6179_v48 = vpop.eup %6178 }
 0x9a9   :  { %v6181_v0 = vpop.eup %6180 }
 0x9aa   :  { %v6183_v21 = vpop.eup %6182 }
 0x9ab   :  { %v1330_v31 = vadd.f32 1.0, %v6183_v21  ;;  %v6185_v20 = vpop.eup %6184 }
 0x9ac   :  { %v1331_v13 = vadd.f32 1.0, %v6185_v20 }
 0x9ad   :  { %6186 = vrcp.f32 %v1330_v31 }
 0x9ae   :  { %6188 = vrcp.f32 %v1331_v13 }
 0x9ba   :  { %v6187_v49 = vpop.eup %6186 }
 0x9bb   :  { %v1523_v55 = vsub.f32 1.0, %v6187_v49  ;;  %v6189_v60 = vpop.eup %6188 }
 0xa48   :  { %v7305_v47 = vpop.f32.mrf.mxu0 }
 0xa4a   :  { %v7307_v11 = vpop.f32.mrf.mxu0 }
 0xa4c   :  { %v4965_v53 = vpop.f32.mrf.mxu0 }
 0xa4d   :  { %v1476_v63 = vmul.f32 %v6179_v48, %v4965_v53  ;;  %v1524_v53 = vsub.f32 1.0, %v6189_v60 }
 0xa4e   :  { %v1464_v36 = vpop.f32.mrf.mxu0 }
 0xa4f   :  { %v1475_v52 = vmul.f32 %v6181_v0, %v1464_v36  ;;  %v1488_v43 = vmul.f32 %v1485_v46, %v1476_v63 }
 0xa51   :  { %v1492_v38 = vsel %vm9400_vm10, %v1488_v43, -inf  ;;  %v1487_v30 = vmul.f32 %v1480_v28, %v1475_v52 }
 0xa52   :  { %1493 = vmax.xlane.f32.xlu0 %v1492_v38 }
 0xa53   :  { %v1489_v32 = vsel %vm9401_vm12, %v1487_v30, -inf }
 0xa54   :  { %1490 = vmax.xlane.f32.xlu1 %v1489_v32 }
 0xa58   :  { %1337 = vmax.xlane.f32.xlu1 %v1336_v33 }
 0xa5c   :  { %1340 = vmax.xlane.f32.xlu1 %v1339_v42 }
 0xa68   :  { %1527 = vperm.xlu0 %5998, %v1523_v55  }
 0xa6c   :  { %6000 = vset.pattern.permute.xlu0 %v9314_v54 }
 0xa6d   :  { %1513 = vperm.xlu1 %5997, %v6187_v49  }
 0xa71   :  { %1518 = vperm.xlu1 %5997, %v6189_v60  }
 0xadb   :  { %v1494_v62 = vpop.xlane.xlu0 %1493 }
 0xadc   :  { %v1496_v59 = vsub.f32 %v1488_v43, %v1494_v62 }
 0xadd   :  { %v1491_v61 = vpop.xlane.xlu1 %1490 }
 0xade   :  { %v1499_v26 = vmul.f32 1.442695, %v1496_v59  ;;  %v1495_v8 = vsub.f32 %v1487_v30, %v1491_v61 }
 0xae0   :  { %6190 = vpow2.f32 %v1499_v26  ;;  %v1497_v27 = vmul.f32 1.442695, %v1495_v8  ;;  %v7340_v26 = vld [vmem:[%s9283_s3 + $0x8] sm:$0xff] }
 0xae1   :  { %v1338_v24 = vpop.xlane.xlu1 %1337 }
 0xae2   :  { %6192 = vpow2.f32 %v1497_v27  ;;  %v1342_v3 = vsub.f32 %v7255_v57, %v1338_v24  ;;  %v1786_v24 = vld [vmem:[#allocation2 + $0x38] sm:$0xff] }
 0xae3   :  { %v1528_v20 = vpop.permute.xlu0 %1527 }
 0xae4   :  { %v1344_v9 = vmul.f32 1.442695, %v1342_v3  ;;  %v1535_v55 = vmul.f32 %v1528_v20, %v7276_v50 }
 0xae5   :  { %v1341_v5 = vpop.xlane.xlu1 %1340 }
 0xae6   :  { %v1343_v12 = vsub.f32 %v7251_v19, %v1341_v5  ;;  %6194 = vpow2.f32 %v1344_v9 }
 0xae8   :  { %v1346_v48 = vmul.f32 1.442695, %v1343_v12 }
 0xae9   :  { %v1514_v46 = vpop.permute.xlu1 %1513 }
 0xaea   :  { %6196 = vpow2.f32 %v1346_v48  ;;  %v1366_v48 = vadd.f32 1.0, %v1294_v51 }
 0xaed   :  { %v6191_v6 = vpop.eup %6190  ;;  %v1519_v36 = vpop.permute.xlu1 %1518 }
 0xaee   :  { %v1504_v2 = vsel %vm9404_vm7, %v6191_v6, 0.0 }
 0xaef   :  { %v6193_v17 = vpop.eup %6192  ;;  %1505 = vadd.xlane.f32.xlu1 %v1504_v2  ;;  %v7354_v2 = vld [vmem:[%s9283_s3] sm:$0xff] }
 0xaf0   :  { %v1501_v4 = vsel %vm9405_vm1, %v6193_v17, 0.0 }
 0xaf3   :  { %1502 = vadd.xlane.f32.xlu1 %v1501_v4  ;;  %v6195_v63 = vpop.eup %6194 }
 0xaf7   :  { %v6197_v0 = vpop.eup %6196 }
 0xb04   :  { %1532 = vperm.xlu1 %5997, %v1524_v53   ;;  %v1367_v53 = vadd.f32 1.0, %v1295_v25 }
 0xb08   :  { %1350 = vrot.lane.b32.xlu1 %v6195_v63, %s6536_s19 }
 0xb09   :  { %5999 = vset.pattern.permute.xlu1 %v9314_v54 }
 0xb0c   :  { %1352 = vrot.lane.b32.xlu1 %v6197_v0, %s6536_s19 }
 0xb78   :  { %v1506_v21 = vpop.xlane.xlu1 %1505 }
 0xb79   :  { %6198 = vrcp.f32 %v1506_v21 }
 0xb7c   :  { %v1503_v52 = vpop.xlane.xlu1 %1502 }
 0xb7d   :  { %6200 = vrcp.f32 %v1503_v52 }
 0xb80   :  { %v1533_v43 = vpop.permute.xlu1 %1532 }
 0xb81   :  { %v1536_v62 = vmul.f32 %v1533_v43, %v7280_v56 }
 0xb84   :  { %v1351_v28 = vpop.permute.xlu1 %1350 }
 0xb85   :  { %v1356_v38 = vsel %vm9406_vm15, %v1351_v28, 0.0 }
 0xb86   :  { %v6199_v30 = vpop.eup %6198  ;;  %1357 = vadd.xlane.f32.xlu1 %v1356_v38 }
 0xb87   :  { %v1510_v31 = vmul.f32 %v6199_v30, %v6191_v6 }
 0xb88   :  { %v1353_v32 = vpop.permute.xlu1 %1352 }
 0xb89   :  { %v1359_v33 = vsel %vm9407_vm13, %v1353_v32, 0.0  ;;  %v1522_v49 = vmul.f32 %v1519_v36, %v1510_v31 }
 0xb8a   :  { %v6201_v42 = vpop.eup %6200  ;;  %1360 = vadd.xlane.f32.xlu0 %v1359_v33 }
 0xb8b   :  { %v1508_v13 = vmul.f32 %v6201_v42, %v6193_v17  ;;  %v1538_v61 = vadd.f32 %v1536_v62, %v1522_v49 }
 0xb8d   :  { %v1521_v60 = vmul.f32 %v1514_v46, %v1508_v13 }
 0xb8f   :  { %v1537_v59 = vadd.f32 %v1535_v55, %v1521_v60 }
 0xb91   :  { %4970 = vmatprep.mubr.msk.f32.mxu0 %vm9408_vm3, %v1537_v59 }
 0xb92   :  { %4971 = vmatmul.mubr.msk.f32.vlgmr.msra.gmra.mxu0 %vm9409_vm11, %v1538_v61 }
 0xb93   :  { %4981 = vmatpush3.msra.mxu0 %v6992_v34 }
 0xb94   :  { %4982 = vmatprep.subr.mxu0 %v6998_v37 }
 0xb95   :  { %4983 = vmatpush3.msra.mxu0 %v6998_v37 }
 0xb96   :  { %4984 = vmatprep.subr.mxu0 %v7005_v39 }
 0xb97   :  { %4985 = vmatpush3.msra.mxu0 %v7005_v39 }
 0xb98   :  { %4986 = vmatprep.subr.mxu0 %v7012_v40 }
 0xb99   :  { %4987 = vmatpush3.msra.mxu0 %v7012_v40  ;;  %v1785_v40 = vld [vmem:[#allocation2 + $0x30] sm:$0xff] }
 0xb9a   :  { %5003 = vmatprep.subr.mxu0 %v7340_v26  ;;  %4988 = vmatprep.mubr.msk.f32.mxu0 %vm9410_vm8, %v1785_v40 }
 0xb9b   :  { %4989 = vmatmul.mubr.msk.f32.vlgmr.msra.gmra.mxu0 %vm9411_vm14, %v1786_v24 }
 0xb9c   :  { %5004 = vmatpush3.msra.mxu0 %v7340_v26 }
 0xb9d   :  { %5005 = vmatprep.subr.mxu0 %v7354_v2 }
 0xb9e   :  { %5006 = vmatpush3.msra.mxu0 %v7354_v2 }
 0xb9f   :  { %5021 = vmatprep.subr.mxu0 %v7030_v58 }
 0xc0f   :  { %v1358_v34 = vpop.xlane.xlu1 %1357 }
 0xc10   :  { %6202 = vrcp.f32 %v1358_v34 }
 0xc13   :  { %v1361_v8 = vpop.xlane.xlu0 %1360 }
 0xc14   :  { %6204 = vrcp.f32 %v1361_v8 }
 0xc1d   :  { %v6203_v37 = vpop.eup %6202 }
 0xc1e   :  { %v1363_v27 = vmul.f32 %v6203_v37, %v6195_v63 }
 0xc20   :  { %1645 = vperm.xlu1 %5999, %v1363_v27  }
 0xc21   :  { %v6205_v6 = vpop.eup %6204 }
 0xc22   :  { %v1365_v39 = vmul.f32 %v6205_v6, %v6197_v0 }
 0xc24   :  { %1649 = vperm.xlu0 %6000, %v1365_v39   ;;  %6001 = vset.pattern.permute.xlu1 %v6539_v22 }
 0xc25   :  { %1622 = vperm.xlu1 %6001, %v1363_v27  }
 0xc28   :  { %6007 = vset.pattern.permute.xlu0 %v6534_v7 }
 0xc29   :  { %6002 = vset.pattern.permute.xlu1 %v6540_v23 }
 0xc2a   :  { %1633 = vperm.xlu1 %6002, %v1363_v27  }
 0xc2e   :  { %6003 = vset.pattern.permute.xlu1 %v6539_v22 }
 0xc2f   :  { %1627 = vperm.xlu1 %6003, %v1365_v39  }
 0xc33   :  { %6004 = vset.pattern.permute.xlu1 %v6540_v23 }
 0xc34   :  { %1637 = vperm.xlu1 %6004, %v1365_v39  }
 0xc38   :  { %6005 = vset.pattern.permute.xlu1 %v6538_v18 }
 0xc52   :  { %v4972_v17 = vpop.f32.mrf.mxu0 }
 0xc54   :  { %v1611_v3 = vpop.f32.mrf.mxu0 }
 0xc9b   :  { %v1646_v4 = vpop.permute.xlu1 %1645 }
 0xc9c   :  { %v1652_v5 = vmul.f32 %v1646_v4, %v1611_v3 }
 0xc9e   :  { %1656 = vrot.lane.b32.xlu1 %v1652_v5, %s6541_s6 }
 0xc9f   :  { %v1650_v9 = vpop.permute.xlu0 %1649 }
 0xca0   :  { %v1653_v12 = vmul.f32 %v4972_v17, %v1650_v9  ;;  %v1623_v58 = vpop.permute.xlu1 %1622 }
 0xca1   :  { %v1630_v21 = vmul.f32 %v1623_v58, %v1611_v3 }
 0xca2   :  { %1658 = vrot.lane.b32.xlu1 %v1653_v12, %s6541_s6 }
 0xca5   :  { %v1634_v63 = vpop.permute.xlu1 %1633 }
 0xca6   :  { %1668 = vperm.xlu1 %6005, %v1366_v48   ;;  %v1640_v46 = vmul.f32 %v1634_v63, %v1537_v59 }
 0xca8   :  { %v1642_v43 = vadd.f32 %v1640_v46, %v1630_v21 }
 0xcaa   :  { %1673 = vperm.xlu1 %6005, %v1367_v53   ;;  %v1628_v0 = vpop.permute.xlu1 %1627 }
 0xcab   :  { %v1631_v38 = vmul.f32 %v4972_v17, %v1628_v0 }
 0xcae   :  { %6006 = vset.pattern.permute.xlu1 %v6534_v7 }
 0xcaf   :  { %v1638_v36 = vpop.permute.xlu1 %1637 }
 0xcb0   :  { %v1641_v52 = vmul.f32 %v1638_v36, %v1538_v61 }
 0xcb2   :  { %v1643_v51 = vadd.f32 %v1641_v52, %v1631_v38 }
 0xd10   :  { %v1657_v28 = vpop.permute.xlu1 %1656 }
 0xd11   :  { %v1662_v30 = vadd.f32 %v1657_v28, %v1642_v43 }
 0xd13   :  { %v7367_v57 = vadd.f32 1e-16, %v1662_v30 }
 0xd14   :  { %v1659_v31 = vpop.permute.xlu1 %1658 }
 0xd15   :  { %v1663_v19 = vadd.f32 %v1659_v31, %v1643_v51  ;;  %v7370_v25 = vand.u32 2147483647, %v7367_v57  ;;  %vm9301_vm10 = vcmp.eq.f32.partialorder %v7367_v57, 0 }
 0xd17   :  { %v7372_v32 = vadd.f32 1e-16, %v1663_v19  ;;  %6206 = vlog2.f32 %v7370_v25  ;;  %vm5362_vm12 = vcmp.gt.f32.partialorder %v7370_v25, 1065353216 }
 0xd19   :  { %v7376_v33 = vand.u32 2147483647, %v7372_v32 }
 0xd1b   :  { %6208 = vlog2.f32 %v7376_v33 }
 0xd21   :  { %v7379_v42 = vpop.permute.xlu1 %1668 }
 0xd22   :  { %v7382_v20 = vand.u32 2147483647, %v7379_v42  ;;  %v5347_v13 = vtrunc.f32 %v7379_v42  ;;  %vm5346_vm2 = vcmp.lt.f32.partialorder %v7379_v42, 0 }
 0xd23   :  { %vm7407_vm5 = vmand %vm5346_vm2, %vm9301_vm10  ;;  %v5378_v48 = vsel %vm5346_vm2, 0, %v6542_v16  ;;  %v5366_v63 = vsel %vm5346_vm2, 2139095040, %v6543_v10 }
 0xd24   :  { %v6207_v49 = vpop.eup %6206  ;;  %vm9300_vm6 = vcmp.eq.f32.partialorder %v7382_v20, 2139095040  ;;  %v5351_v55 = vtrunc.f32 %v7382_v20  ;;  %vm5348_vm9 = vcmp.ne.f32.partialorder %v7379_v42, %v5347_v13  ;;  %vm7414_vm4 = vmxor %vm5346_vm2, %vm5362_vm12  ;;  %vm5350_vm11 = vcmp.lt.f32.partialorder %v7382_v20, 1266679808 }
 0xd25   :  { %v7387_v60 = vpop.permute.xlu1 %1673  ;;  %v5340_v62 = vmul.f32 %v6207_v49, %v7379_v42  ;;  %vm7397_vm0 = vmor %vm5348_vm9, %vm9300_vm6  ;;  %vm9299_vm9 = vcmp.lt.f32.partialorder %v7367_v57, 0  ;;  %vm5414_vm6 = vcmp.gt.f32.partialorder %v7376_v33, 1065353216  ;;  %v5379_v21 = vxor.u32 2147483648, %v5378_v48 }
 0xd26   :  { %v5352_v59 = vcvt.f32.s32 %v5351_v55  ;;  %v7393_v61 = vand.u32 2147483647, %v7387_v60  ;;  %v5399_v6 = vtrunc.f32 %v7387_v60  ;;  %vm5355_vm1 = vmneg %vm7397_vm0 }
 0xd27   :  { %6210 = vpow2.f32 %v5340_v62  ;;  %vm5373_vm8 = vmor %vm7407_vm5, %vm7414_vm4  ;;  %vm5410_vm4 = vcmp.lt.f32.partialorder %v7372_v32, 0 }
 0xd28   :  { %v6209_v8 = vpop.eup %6208  ;;  %v5353_v37 = vand.u32 1, %v5352_v59  ;;  %v5403_v24 = vtrunc.f32 %v7393_v61  ;;  %vm9298_vm13 = vcmp.eq.f32.partialorder %v7393_v61, 2139095040  ;;  %vm5400_vm3 = vcmp.ne.f32.partialorder %v7387_v60, %v5399_v6 }
 0xd29   :  { %v5392_v40 = vmul.f32 %v6209_v8, %v7387_v60  ;;  %vm7436_vm12 = vmor %vm5400_vm3, %vm9298_vm13  ;;  %vm5398_vm3 = vcmp.lt.f32.partialorder %v7387_v60, 0  ;;  %v5374_v36 = vsel %vm5373_vm8, 2139095040, %v6543_v10  ;;  %vm5402_vm2 = vcmp.lt.f32.partialorder %v7393_v61, 1266679808 }
 0xd2a   :  { %vm5354_vm7 = vcmp.eq.s32.totalorder %v5353_v37, 1  ;;  %v5404_v17 = vcvt.f32.s32 %v5403_v24  ;;  %vm5407_vm13 = vmneg %vm7436_vm12  ;;  %v5430_v38 = vsel %vm5398_vm3, 0, %v6542_v16  ;;  %v5418_v55 = vsel %vm5398_vm3, 2139095040, %v6543_v10  ;;  %v4990_v37 = vpop.f32.mrf.mxu0 }
 0xd2b   :  { %vm5356_vm15 = vmand %vm5354_vm7, %vm5355_vm1  ;;  %6212 = vpow2.f32 %v5392_v40  ;;  %vm5361_vm7 = vcmp.lt.s32.totalorder %v7367_v57, 0  ;;  %v5431_v62 = vxor.u32 2147483648, %v5430_v38 }
 0xd2c   :  { %v5405_v3 = vand.u32 1, %v5404_v17  ;;  %vm7429_vm14 = vmand %vm5350_vm11, %vm5356_vm15  ;;  %v1859_v5 = vpop.f32.mrf.mxu0 }
 0xd2d   :  { %vm7445_vm1 = vmand %vm9299_vm9, %vm7397_vm0  ;;  %vm5411_vm9 = vcmp.eq.f32.partialorder %v7372_v32, 0  ;;  %v5380_v51 = vsel %vm7429_vm14, %v5379_v21, %v5378_v48 }
 0xd2e   :  { %vm5406_vm15 = vcmp.eq.s32.totalorder %v5405_v3, 1  ;;  %vm7451_vm11 = vmand %vm5361_vm7, %vm7429_vm14  ;;  %vm5383_vm7 = vcmp.ne.f32.partialorder %v7367_v57, %v7367_v57 }
 0xd2f   :  { %vm7461_vm0 = vmand %vm5406_vm15, %vm5407_vm13  ;;  %vm9432_vm15 = vcmp.eq.f32.partialorder %v7367_v57, 0 }
 0xd30   :  { %vm7475_vm10 = vmand %vm5398_vm3, %vm5411_vm9 }
 0xd31   :  { %vm7490_vm13 = vmxor %vm5398_vm3, %vm5414_vm6  ;;  %vm5384_vm6 = vcmp.ne.f32.partialorder %v7379_v42, %v7379_v42 }
 0xd32   :  { %vm7501_vm5 = vmand %vm5402_vm2, %vm7461_vm0  ;;  %vm5344_vm0 = vcmp.eq.f32.partialorder %v7379_v42, 0  ;;  %vm5363_vm2 = vcmp.eq.f32.partialorder %v7370_v25, 2139095040 }
 0xd33   :  { %vm5425_vm8 = vmor %vm7475_vm10, %vm7490_vm13  ;;  %vm9435_vm10 = vcmp.eq.f32.partialorder %v7382_v20, 2139095040  ;;  %vm9436_vm13 = vcmp.lt.f32.partialorder %v7367_v57, 0  ;;  %v5432_v6 = vsel %vm7501_vm5, %v5431_v62, %v5430_v38 }
 0xd34   :  { %v6211_v58 = vpop.eup %6210  ;;  %vm5416_vm14 = vmand %vm5410_vm4, %vm7436_vm12  ;;  %v5381_v59 = vsel %vm9436_vm13, %v5380_v51, %v5378_v48  ;;  %v5426_v8 = vsel %vm5425_vm8, 2139095040, %v6543_v10  ;;  %vm5436_vm8 = vcmp.ne.f32.partialorder %v7387_v60, %v7387_v60  ;;  %v5433_v4 = vsel %vm5410_vm4, %v5432_v6, %v5430_v38 }
 0xd35   :  { %v5365_v46 = vsel %vm7445_vm1, 2143289344, %v6211_v58  ;;  %vm5375_vm1 = vcmp.eq.f32.partialorder %v7367_v57, 3212836864  ;;  %vm5385_vm12 = vmor %vm5383_vm7, %vm5384_vm6  ;;  %vm5345_vm7 = vcmp.eq.f32.partialorder %v7379_v42, 1065353216  ;;  %vm5435_vm6 = vcmp.ne.f32.partialorder %v7372_v32, %v7372_v32 }
 0xd36   :  { %v5367_v43 = vsel %vm9432_vm15, %v5366_v63, %v5365_v46  ;;  %v5376_v19 = vsel %vm5375_vm1, 1065353216, %v5374_v36  ;;  %vm5413_vm15 = vcmp.lt.s32.totalorder %v7372_v32, 0  ;;  %vm5427_vm1 = vcmp.eq.f32.partialorder %v7372_v32, 3212836864 }
 0xd37   :  { %v5369_v30 = vxor.u32 2147483648, %v5367_v43  ;;  %v5428_v17 = vsel %vm5427_vm1, 1065353216, %v5426_v8 }
 0xd38   :  { %v6213_v31 = vpop.eup %6212 }
 0xd39   :  { %v5370_v13 = vsel %vm7451_vm11, %v5369_v30, %v5367_v43  ;;  %v5417_v49 = vsel %vm5416_vm14, 2143289344, %v6213_v31  ;;  %vm9437_vm11 = vcmp.eq.f32.partialorder %v7367_v57, 1065353216  ;;  %vm9438_vm14 = vcmp.eq.f32.partialorder %v7393_v61, 2139095040 }
 0xd3a   :  { %v5377_v25 = vsel %vm9435_vm10, %v5376_v19, %v5370_v13  ;;  %v5419_v34 = vsel %vm5411_vm9, %v5418_v55, %v5417_v49  ;;  %vm5387_vm3 = vmor %vm9437_vm11, %vm5344_vm0  ;;  %vm5396_vm0 = vcmp.eq.f32.partialorder %v7387_v60, 0  ;;  %v7575_v61 = vadd.f32 %v7248_v35, %v1859_v5 }
 0xd3b   :  { %v5382_v27 = vsel %vm5363_vm2, %v5381_v59, %v5377_v25  ;;  %v5421_v20 = vxor.u32 2147483648, %v5419_v34  ;;  %vm5420_vm9 = vmand %vm5413_vm15, %vm7501_vm5  ;;  %vm5415_vm2 = vcmp.eq.f32.partialorder %v7376_v33, 2139095040  ;;  %vm9439_vm5 = vcmask 130048  }
 0xd3c   :  { %v5386_v39 = vsel %vm5385_vm12, 2143289344, %v5382_v27  ;;  %vm5412_vm15 = vcmp.eq.f32.partialorder %v7372_v32, 1065353216  ;;  %vm5437_vm10 = vmor %vm5435_vm6, %vm5436_vm8  ;;  %vm5397_vm12 = vcmp.eq.f32.partialorder %v7387_v60, 1065353216  ;;  %v1870_v0 = vand.u32 2147483647, %v7575_v61 }
 0xd3d   :  { %v5388_v40 = vsel %vm5387_vm3, 1065353216, %v5386_v39  ;;  %v5422_v24 = vsel %vm5420_vm9, %v5421_v20, %v5419_v34  ;;  %vm5439_vm13 = vmor %vm5412_vm15, %vm5396_vm0  ;;  %vm9441_vm11 = vcmask 64512   ;;  %v1868_v34 = vmax.f32 %v7575_v61, 0.0 }
 0xd3e   :  { %v7560_v3 = vsel %vm5345_vm7, %v7367_v57, %v5388_v40  ;;  %v5429_v42 = vsel %vm9438_vm14, %v5428_v17, %v5422_v24  ;;  %v7571_v57 = vadd.f32 %v7248_v35, %v4990_v37  ;;  %vm9440_vm4 = vmmov %vm9439_vm5  ;;  %v1872_v36 = vsub.f32 0.0, %v1870_v0 }
 0xd3f   :  { %v1678_v9 = vsel %vm9439_vm5, %v7560_v3, 0.0  ;;  %v5434_v12 = vsel %vm5415_vm2, %v5433_v4, %v5429_v42  ;;  %v1942_v35 = vmul.f32 %v7575_v61, %v7575_v61  ;;  %vm9442_vm3 = vmmov %vm9441_vm11 }
 0xd40   :  { %1679 = vadd.xlane.f32.xlu1 %v1678_v9  ;;  %v5438_v48 = vsel %vm5437_vm10, 2143289344, %v5434_v12  ;;  %v1871_v63 = vand.u32 2147483647, %v7571_v57  ;;  %v1874_v52 = vmul.f32 1.442695, %v1872_v36  ;;  %v1943_v60 = vmul.f32 %v7571_v57, %v7571_v57  ;;  %vm9443_vm9 = vmmov %vm9440_vm4 }
 0xd41   :  { %v5440_v33 = vsel %vm5439_vm13, 1065353216, %v5438_v48  ;;  %v1944_v43 = vsel %vm9442_vm3, %v1942_v35, 0.0  ;;  %v1869_v20 = vmax.f32 %v7571_v57, 0.0  ;;  %vm9444_vm6 = vmmov %vm9440_vm4 }
 0xd42   :  { %v5441_v53 = vsel %vm5397_vm12, %v7372_v32, %v5440_v33  ;;  %v1873_v46 = vsub.f32 0.0, %v1871_v63  ;;  %v1947_v32 = vsel %vm9441_vm11, %v1943_v60, 0.0  ;;  %v7607_v63 = vld [vmem:[%s9284_s4] sm:$0xff]  ;;  %vm9445_vm8 = vmmov %vm9442_vm3  ;;  %vm9449_vm12 = vcmask 105552  }
 0xd43   :  { %v1681_v58 = vsel %vm9440_vm4, %v5441_v53, 0.0  ;;  %vm9446_vm0 = vmmov %vm9442_vm3 }
 0xd44   :  { %1682 = vadd.xlane.f32.xlu0 %v1681_v58  ;;  %v1876_v21 = vmul.f32 1.442695, %v1873_v46  ;;  %1945 = vadd.xlane.f32.xlu1 %v1944_v43  ;;  %vm9447_vm10 = vmmov %vm9440_vm4 }
 0xd45   :  { %vm9448_vm13 = vmmov %vm9440_vm4 }
 0xd46   :  { %6214 = vpow2.f32 %v1876_v21  ;;  %vm9450_vm4 = vmmov %vm9449_vm12 }
 0xd47   :  { %6216 = vpow2.f32 %v1874_v52  ;;  %vm9451_vm11 = vmmov %vm9444_vm6 }
 0xd48   :  { %1948 = vadd.xlane.f32.xlu0 %v1947_v32  ;;  %vm9452_vm3 = vmmov %vm9444_vm6 }
 0xd53   :  { %v6215_v28 = vpop.eup %6214 }
 0xd54   :  { %v6217_v38 = vpop.eup %6216  ;;  %v1887_v51 = vadd.f32 1.0, %v6215_v28  ;;  %v1890_v19 = vmul.f32 -0.5, %v6215_v28  ;;  %v1893_v62 = vand.u32 2147483647, %v6215_v28 }
 0xd55   :  { %v1878_v30 = vadd.f32 1.0, %v6217_v38  ;;  %v1881_v31 = vmul.f32 -0.5, %v6217_v38  ;;  %v1884_v49 = vand.u32 2147483647, %v6217_v38 }
 0xd56   :  { %v1891_v55 = vadd.f32 1.0, %v1890_v19  ;;  %vm1894_vm7 = vcmp.lt.f32.partialorder %v1893_v62, 0.0004427343  ;;  %v4697_v19 = vmul.f32 -1.442695, %v7571_v57 }
 0xd57   :  { %6218 = vlog2.f32 %v1878_v30  ;;  %v1882_v13 = vadd.f32 1.0, %v1881_v31  ;;  %vm1885_vm1 = vcmp.lt.f32.partialorder %v1884_v49, 0.0004427343  ;;  %v4696_v30 = vmul.f32 -1.442695, %v7575_v61 }
 0xd58   :  { %6220 = vlog2.f32 %v1887_v51  ;;  %v1892_v37 = vmul.f32 %v6215_v28, %v1891_v55 }
 0xd59   :  { %v1883_v25 = vmul.f32 %v6217_v38, %v1882_v13 }
 0xd64   :  { %v6219_v59 = vpop.eup %6218 }
 0xd65   :  { %v1880_v8 = vmul.f32 0.6931472, %v6219_v59  ;;  %v6221_v27 = vpop.eup %6220 }
 0xd66   :  { %v1889_v39 = vmul.f32 0.6931472, %v6221_v27 }
 0xd67   :  { %v1886_v6 = vsel %vm1885_vm1, %v1883_v25, %v1880_v8  ;;  %vm9453_vm1 = vcmask 23552  }
 0xd68   :  { %v1896_v40 = vadd.f32 %v1886_v6, %v1868_v34  ;;  %v1895_v24 = vsel %vm1894_vm7, %v1892_v37, %v1889_v39  ;;  %vm9454_vm7 = vmmov %vm9453_vm1 }
 0xd69   :  { %v1897_v17 = vadd.f32 %v1895_v24, %v1869_v20 }
 0xd6a   :  { %2053 = vperm.xlu1 %6006, %v1896_v40  }
 0xd6b   :  { %2058 = vperm.xlu0 %6007, %v1897_v17  }
 0xd6e   :  { %6008 = vset.pattern.permute.xlu1 %v9316_v45 }
 0xd6f   :  { %6009 = vset.pattern.permute.xlu0 %v9316_v45 }
 0xdc9   :  { %v1680_v42 = vpop.xlane.xlu1 %1679 }
 0xdca   :  { %v1684_v4 = vadd.f32 1e-16, %v1680_v42  ;;  %v1910_v42 = vsel %vm9449_vm12, %v7575_v61, -inf }
 0xdcc   :  { %6222 = vrcp.f32 %v1684_v4  ;;  %v1913_v4 = vsel %vm9450_vm4, %v7571_v57, -inf }
 0xdcd   :  { %v1683_v5 = vpop.xlane.xlu0 %1682  ;;  %v1946_v0 = vpop.xlane.xlu1 %1945 }
 0xdce   :  { %v1685_v9 = vadd.f32 1e-16, %v1683_v5  ;;  %vm1952_vm14 = vcmp.eq.f32.partialorder %v1946_v0, inf  ;;  %vm1954_vm15 = vcmp.eq.f32.partialorder %v1946_v0, 0.0 }
 0xdd0   :  { %6224 = vrcp.f32 %v1685_v9 }
 0xdd9   :  { %v6223_v12 = vpop.eup %6222 }
 0xdda   :  { %v7596_v48 = vmul.f32 %v6223_v12, %v7560_v3  ;;  %v7621_v3 = vld [vmem:[%s9281_s1 + $0x18] sm:$0xff] }
 0xddc   :  { %4977 = vmatprep.mubr.msk.f32.mxu1 %vm9443_vm9, %v7596_v48  ;;  %vm9455_vm9 = vmmov %vm9452_vm3 }
 0xddd   :  { %v6225_v33 = vpop.eup %6224 }
 0xdde   :  { %v7600_v58 = vmul.f32 %v6225_v33, %v5441_v53  ;;  %v1949_v53 = vpop.xlane.xlu0 %1948 }
 0xddf   :  { %6226 = vrsqrt.f32 %v1949_v53  ;;  %vm1959_vm2 = vcmp.eq.f32.partialorder %v1949_v53, inf  ;;  %v1962_v52 = vand.u32 2147483648, %v1949_v53  ;;  %vm1961_vm5 = vcmp.eq.f32.partialorder %v1949_v53, 0.0 }
 0xde0   :  { %4978 = vmatmul.mubr.msk.f32.vlgmr.msra.gmra.mxu1 %vm9444_vm6, %v7600_v58  ;;  %6228 = vrsqrt.f32 %v1946_v0  ;;  %vm9456_vm6 = vmmov %vm9452_vm3 }
 0xde1   :  { %4992 = vmatpush3.msra.mxu1 %v7607_v63  ;;  %4993 = vmatprep.mubr.msk.f32.mxu1 %vm9445_vm8, %v7575_v61  ;;  %vm9457_vm8 = vcmask 261120  }
 0xde2   :  { %4996 = vmatprep.subr.mxu1 %v7290_v29 }
 0xde4   :  { %4994 = vmatmul.mubr.msk.f32.vlgmr.msra.gmra.mxu1 %vm9446_vm0, %v7571_v57  ;;  %vm9458_vm0 = vmmov %vm9457_vm8 }
 0xde5   :  { %4997 = vmatpush3.msra.mxu1 %v7290_v29  ;;  %v2054_v6 = vpop.permute.xlu1 %2053 }
 0xde6   :  { %4998 = vmatprep.subr.mxu1 %v7299_v44  ;;  %v2059_v25 = vpop.permute.xlu0 %2058 }
 0xde7   :  { %4999 = vmatpush3.msra.mxu1 %v7299_v44  ;;  %v1955_v44 = vand.u32 2147483648, %v1946_v0 }
 0xde8   :  { %5010 = vmatprep.subr.mxu1 %v7621_v3 }
 0xdec   :  { %v6227_v46 = vpop.eup %6226 }
 0xded   :  { %v6229_v36 = vpop.eup %6228  ;;  %v1958_v21 = vmul.f32 %v6227_v46, %v1949_v53 }
 0xdee   :  { %v1951_v29 = vmul.f32 %v6229_v36, %v1946_v0 }
 0xdef   :  { %v1960_v60 = vsel %vm1959_vm2, %v1949_v53, %v1958_v21 }
 0xdf0   :  { %v1953_v35 = vsel %vm1952_vm14, %v1946_v0, %v1951_v29  ;;  %v1963_v32 = vsel %vm1961_vm5, %v1962_v52, %v1960_v60 }
 0xdf1   :  { %v1956_v43 = vsel %vm1954_vm15, %v1955_v44, %v1953_v35  ;;  %v1965_v28 = vmax.f32 %v1963_v32, 1e-08 }
 0xdf2   :  { %v1964_v38 = vmax.f32 %v1956_v43, 1e-08 }
 0xdf3   :  { %6230 = vrcp.f32 %v1965_v28 }
 0xdf4   :  { %6232 = vrcp.f32 %v1964_v38 }
 0xdf5   :  { %6234 = vpow2.f32 %v4696_v30 }
 0xdf6   :  { %6236 = vpow2.f32 %v4697_v19 }
 0xe00   :  { %v6231_v13 = vpop.eup %6230 }
 0xe01   :  { %v6233_v62 = vpop.eup %6232 }
 0xe02   :  { %v6235_v8 = vpop.eup %6234 }
 0xe03   :  { %v1904_v24 = vadd.f32 1.0, %v6235_v8  ;;  %v6237_v5 = vpop.eup %6236 }
 0xe04   :  { %v1905_v9 = vadd.f32 1.0, %v6237_v5 }
 0xe05   :  { %6238 = vrcp.f32 %v1904_v24 }
 0xe06   :  { %6240 = vrcp.f32 %v1905_v9 }
 0xe12   :  { %v6239_v12 = vpop.eup %6238 }
 0xe13   :  { %v2097_v33 = vsub.f32 1.0, %v6239_v12  ;;  %v6241_v53 = vpop.eup %6240 }
 0xea0   :  { %v7625_v51 = vpop.f32.mrf.mxu1 }
 0xea2   :  { %v7627_v31 = vpop.f32.mrf.mxu1 }
 0xea4   :  { %v4995_v49 = vpop.f32.mrf.mxu1 }
 0xea5   :  { %v2050_v55 = vmul.f32 %v6231_v13, %v4995_v49  ;;  %v2098_v49 = vsub.f32 1.0, %v6241_v53 }
 0xea6   :  { %v2038_v59 = vpop.f32.mrf.mxu1 }
 0xea7   :  { %v2049_v37 = vmul.f32 %v6233_v62, %v2038_v59  ;;  %v2062_v27 = vmul.f32 %v2059_v25, %v2050_v55 }
 0xea9   :  { %v2061_v39 = vmul.f32 %v2054_v6, %v2049_v37  ;;  %v2066_v40 = vsel %vm9447_vm10, %v2062_v27, -inf }
 0xeaa   :  { %2067 = vmax.xlane.f32.xlu0 %v2066_v40 }
 0xeab   :  { %v2063_v17 = vsel %vm9448_vm13, %v2061_v39, -inf }
 0xeac   :  { %2064 = vmax.xlane.f32.xlu1 %v2063_v17 }
 0xeb0   :  { %1911 = vmax.xlane.f32.xlu1 %v1910_v42 }
 0xeb4   :  { %1914 = vmax.xlane.f32.xlu1 %v1913_v4 }
 0xec0   :  { %2101 = vperm.xlu0 %6009, %v2097_v33  }
 0xec4   :  { %6011 = vset.pattern.permute.xlu0 %v9314_v54 }
 0xec5   :  { %2087 = vperm.xlu1 %6008, %v6239_v12  }
 0xec9   :  { %2092 = vperm.xlu1 %6008, %v6241_v53  }
 0xf33   :  { %v2068_v0 = vpop.xlane.xlu0 %2067 }
 0xf34   :  { %v2070_v46 = vsub.f32 %v2062_v27, %v2068_v0 }
 0xf35   :  { %v2065_v36 = vpop.xlane.xlu1 %2064 }
 0xf36   :  { %v2073_v21 = vmul.f32 1.442695, %v2070_v46  ;;  %v2069_v29 = vsub.f32 %v2061_v39, %v2065_v36 }
 0xf38   :  { %6242 = vpow2.f32 %v2073_v21  ;;  %v2071_v52 = vmul.f32 1.442695, %v2069_v29  ;;  %v7654_v21 = vld [vmem:[%s9281_s1 + $0x10] sm:$0xff]  ;;  %v7661_v29 = vld [vmem:[%s9281_s1 + $0x8] sm:$0xff] }
 0xf39   :  { %v1912_v44 = vpop.xlane.xlu1 %1911 }
 0xf3a   :  { %6244 = vpow2.f32 %v2071_v52  ;;  %v1916_v43 = vsub.f32 %v7575_v61, %v1912_v44  ;;  %v7668_v52 = vld [vmem:[%s9281_s1] sm:$0xff] }
 0xf3b   :  { %v2102_v5 = vpop.permute.xlu0 %2101 }
 0xf3c   :  { %v1918_v30 = vmul.f32 1.442695, %v1916_v43  ;;  %v2109_v33 = vmul.f32 %v2102_v5, %v7596_v48 }
 0xf3d   :  { %v1915_v38 = vpop.xlane.xlu1 %1914 }
 0xf3e   :  { %v1917_v19 = vsub.f32 %v7571_v57, %v1915_v38  ;;  %6246 = vpow2.f32 %v1918_v30  ;;  %v2359_v38 = vld [vmem:[#allocation2 + $0x40] sm:$0xff]  ;;  %v2360_v30 = vld [vmem:[#allocation2 + $0x48] sm:$0xff] }
 0xf40   :  { %v1920_v13 = vmul.f32 1.442695, %v1917_v19 }
 0xf41   :  { %v2088_v25 = vpop.permute.xlu1 %2087 }
 0xf42   :  { %6248 = vpow2.f32 %v1920_v13 }
 0xf45   :  { %v6243_v60 = vpop.eup %6242  ;;  %v2093_v59 = vpop.permute.xlu1 %2092 }
 0xf46   :  { %v2078_v35 = vsel %vm9451_vm11, %v6243_v60, 0.0 }
 0xf47   :  { %v6245_v32 = vpop.eup %6244  ;;  %2079 = vadd.xlane.f32.xlu1 %v2078_v35 }
 0xf48   :  { %v2075_v28 = vsel %vm9452_vm3, %v6245_v32, 0.0 }
 0xf4b   :  { %2076 = vadd.xlane.f32.xlu1 %v2075_v28  ;;  %v6247_v55 = vpop.eup %6246 }
 0xf4f   :  { %v6249_v62 = vpop.eup %6248 }
 0xf5c   :  { %2106 = vperm.xlu1 %6008, %v2098_v49  }
 0xf60   :  { %1924 = vrot.lane.b32.xlu1 %v6247_v55, %s6536_s19 }
 0xf61   :  { %6010 = vset.pattern.permute.xlu1 %v9314_v54 }
 0xf64   :  { %1926 = vrot.lane.b32.xlu1 %v6249_v62, %s6536_s19 }
 0xfd0   :  { %v2080_v8 = vpop.xlane.xlu1 %2079 }
 0xfd1   :  { %6250 = vrcp.f32 %v2080_v8 }
 0xfd4   :  { %v2077_v37 = vpop.xlane.xlu1 %2076 }
 0xfd5   :  { %6252 = vrcp.f32 %v2077_v37 }
 0xfd8   :  { %v2107_v27 = vpop.permute.xlu1 %2106 }
 0xfd9   :  { %v2110_v0 = vmul.f32 %v2107_v27, %v7600_v58 }
 0xfdc   :  { %v1925_v6 = vpop.permute.xlu1 %1924 }
 0xfdd   :  { %v1930_v39 = vsel %vm9453_vm1, %v1925_v6, 0.0 }
 0xfde   :  { %v6251_v40 = vpop.eup %6250  ;;  %1931 = vadd.xlane.f32.xlu1 %v1930_v39 }
 0xfdf   :  { %v2084_v24 = vmul.f32 %v6251_v40, %v6243_v60 }
 0xfe0   :  { %v1927_v17 = vpop.permute.xlu1 %1926 }
 0xfe1   :  { %v1933_v42 = vsel %vm9454_vm7, %v1927_v17, 0.0  ;;  %v2096_v12 = vmul.f32 %v2093_v59, %v2084_v24 }
 0xfe2   :  { %v6253_v4 = vpop.eup %6252  ;;  %1934 = vadd.xlane.f32.xlu0 %v1933_v42 }
 0xfe3   :  { %v2082_v9 = vmul.f32 %v6253_v4, %v6245_v32  ;;  %v2112_v36 = vadd.f32 %v2110_v0, %v2096_v12 }
 0xfe5   :  { %v2095_v53 = vmul.f32 %v2088_v25, %v2082_v9 }
 0xfe7   :  { %v2111_v46 = vadd.f32 %v2109_v33, %v2095_v53 }
 0xfe9   :  { %5000 = vmatprep.mubr.msk.f32.mxu1 %vm9455_vm9, %v2111_v46 }
 0xfea   :  { %5001 = vmatmul.mubr.msk.f32.vlgmr.msra.gmra.mxu1 %vm9456_vm6, %v2112_v36 }
 0xfeb   :  { %5011 = vmatpush3.msra.mxu1 %v7621_v3  ;;  %5018 = vmatprep.mubr.msk.f32.mxu1 %vm9457_vm8, %v2359_v38 }
 0xfec   :  { %5012 = vmatprep.subr.mxu1 %v7654_v21 }
 0xfed   :  { %5013 = vmatpush3.msra.mxu1 %v7654_v21 }
 0xfee   :  { %5014 = vmatprep.subr.mxu1 %v7661_v29 }
 0xfef   :  { %5015 = vmatpush3.msra.mxu1 %v7661_v29 }
 0xff0   :  { %5016 = vmatprep.subr.mxu1 %v7668_v52 }
 0xff1   :  { %5017 = vmatpush3.msra.mxu1 %v7668_v52 }
 0xff2   :  { %5033 = vmatprep.subr.mxu1 %v7340_v26  ;;  %5019 = vmatmul.mubr.msk.f32.vlgmr.msra.gmra.mxu1 %vm9458_vm0, %v2360_v30 }
 0xff3   :  { %5034 = vmatpush3.msra.mxu1 %v7340_v26  ;;  %v1940_v26 = vadd.f32 1.0, %v1868_v34 }
 0xff4   :  { %5035 = vmatprep.subr.mxu1 %v7354_v2 }
 0xff5   :  { %5036 = vmatpush3.msra.mxu1 %v7354_v2  ;;  %v1941_v2 = vadd.f32 1.0, %v1869_v20 }
 0xff6   :  { %5051 = vmatprep.subr.mxu1 %v7607_v63 }
0x1067   :  { %v1932_v60 = vpop.xlane.xlu1 %1931 }
0x1068   :  { %6254 = vrcp.f32 %v1932_v60 }
0x106b   :  { %v1935_v44 = vpop.xlane.xlu0 %1934 }
0x106c   :  { %6256 = vrcp.f32 %v1935_v44 }
0x1075   :  { %v6255_v35 = vpop.eup %6254 }
0x1076   :  { %v1937_v32 = vmul.f32 %v6255_v35, %v6247_v55 }
0x1078   :  { %2219 = vperm.xlu1 %6010, %v1937_v32  }
0x1079   :  { %v6257_v43 = vpop.eup %6256 }
0x107a   :  { %v1939_v28 = vmul.f32 %v6257_v43, %v6249_v62 }
0x107c   :  { %2223 = vperm.xlu0 %6011, %v1939_v28   ;;  %6012 = vset.pattern.permute.xlu1 %v6539_v22 }
0x107d   :  { %2196 = vperm.xlu1 %6012, %v1937_v32  }
0x1080   :  { %6017 = vset.pattern.permute.xlu0 %v6534_v7 }
0x1081   :  { %6013 = vset.pattern.permute.xlu1 %v6540_v23 }
0x1082   :  { %2207 = vperm.xlu1 %6013, %v1937_v32  }
0x1086   :  { %6014 = vset.pattern.permute.xlu1 %v6539_v22 }
0x1087   :  { %2201 = vperm.xlu1 %6014, %v1939_v28  }
0x108b   :  { %6015 = vset.pattern.permute.xlu1 %v6540_v23 }
0x108c   :  { %2211 = vperm.xlu1 %6015, %v1939_v28  }
0x1090   :  { %6016 = vset.pattern.permute.xlu1 %v6538_v18 }
0x10aa   :  { %v5002_v19 = vpop.f32.mrf.mxu1 }
0x10ac   :  { %v2185_v13 = vpop.f32.mrf.mxu1 }
0x10f3   :  { %v2220_v49 = vpop.permute.xlu1 %2219 }
0x10f4   :  { %v2226_v55 = vmul.f32 %v2220_v49, %v2185_v13 }
0x10f6   :  { %2230 = vrot.lane.b32.xlu1 %v2226_v55, %s6541_s6 }
0x10f7   :  { %v2224_v62 = vpop.permute.xlu0 %2223 }
0x10f8   :  { %v2227_v25 = vmul.f32 %v5002_v19, %v2224_v62  ;;  %v2197_v59 = vpop.permute.xlu1 %2196 }
0x10f9   :  { %v2204_v39 = vmul.f32 %v2197_v59, %v2185_v13 }
0x10fa   :  { %2232 = vrot.lane.b32.xlu1 %v2227_v25, %s6541_s6 }
0x10fd   :  { %v2208_v8 = vpop.permute.xlu1 %2207 }
0x10fe   :  { %2242 = vperm.xlu1 %6016, %v1940_v26   ;;  %v2214_v27 = vmul.f32 %v2208_v8, %v2111_v46 }
0x1100   :  { %v2216_v24 = vadd.f32 %v2214_v27, %v2204_v39 }
0x1102   :  { %2247 = vperm.xlu1 %6016, %v1941_v2   ;;  %v2202_v37 = vpop.permute.xlu1 %2201 }
0x1103   :  { %v2205_v42 = vmul.f32 %v5002_v19, %v2202_v37 }
0x1106   :  { %6018 = vset.pattern.permute.xlu1 %v6534_v7 }
0x1107   :  { %v2212_v6 = vpop.permute.xlu1 %2211 }
0x1108   :  { %v2215_v40 = vmul.f32 %v2212_v6, %v2112_v36 }
0x110a   :  { %v2217_v34 = vadd.f32 %v2215_v40, %v2205_v42 }
0x1168   :  { %v2231_v17 = vpop.permute.xlu1 %2230 }
0x1169   :  { %v2236_v4 = vadd.f32 %v2231_v17, %v2216_v24 }
0x116b   :  { %v7692_v61 = vadd.f32 1e-16, %v2236_v4 }
0x116c   :  { %v2233_v5 = vpop.permute.xlu1 %2232 }
0x116d   :  { %v2237_v57 = vadd.f32 %v2233_v5, %v2217_v34  ;;  %v7695_v20 = vand.u32 2147483647, %v7692_v61  ;;  %vm9305_vm10 = vcmp.eq.f32.partialorder %v7692_v61, 0 }
0x116f   :  { %v7697_v9 = vadd.f32 1e-16, %v2237_v57  ;;  %6258 = vlog2.f32 %v7695_v20  ;;  %vm5466_vm13 = vcmp.gt.f32.partialorder %v7695_v20, 1065353216 }
0x1171   :  { %v7701_v12 = vand.u32 2147483647, %v7697_v9 }
0x1173   :  { %6260 = vlog2.f32 %v7701_v12 }
0x1179   :  { %v7704_v33 = vpop.permute.xlu1 %2242 }
0x117a   :  { %v7707_v53 = vand.u32 2147483647, %v7704_v33  ;;  %v5451_v0 = vtrunc.f32 %v7704_v33  ;;  %vm5450_vm14 = vcmp.lt.f32.partialorder %v7704_v33, 0 }
0x117b   :  { %vm7732_vm12 = vmand %vm5450_vm14, %vm9305_vm10  ;;  %v5482_v37 = vsel %vm5450_vm14, 0, %v6542_v16  ;;  %v5470_v39 = vsel %vm5450_vm14, 2139095040, %v6543_v10 }
0x117c   :  { %v6259_v46 = vpop.eup %6258  ;;  %vm9304_vm2 = vcmp.eq.f32.partialorder %v7707_v53, 2139095040  ;;  %v5455_v36 = vtrunc.f32 %v7707_v53  ;;  %vm5452_vm5 = vcmp.ne.f32.partialorder %v7704_v33, %v5451_v0  ;;  %vm7739_vm4 = vmxor %vm5450_vm14, %vm5466_vm13  ;;  %vm5454_vm6 = vcmp.lt.f32.partialorder %v7707_v53, 1266679808 }
0x117d   :  { %v7712_v60 = vpop.permute.xlu1 %2247  ;;  %v5444_v44 = vmul.f32 %v6259_v46, %v7704_v33  ;;  %vm7722_vm15 = vmor %vm5452_vm5, %vm9304_vm2  ;;  %vm9303_vm5 = vcmp.lt.f32.partialorder %v7692_v61, 0  ;;  %vm5518_vm2 = vcmp.gt.f32.partialorder %v7701_v12, 1065353216  ;;  %v5483_v42 = vxor.u32 2147483648, %v5482_v37 }
0x117e   :  { %v5456_v35 = vcvt.f32.s32 %v5455_v36  ;;  %v7718_v32 = vand.u32 2147483647, %v7712_v60  ;;  %v5503_v19 = vtrunc.f32 %v7712_v60  ;;  %vm5459_vm3 = vmneg %vm7722_vm15 }
0x117f   :  { %6262 = vpow2.f32 %v5444_v44  ;;  %vm5477_vm8 = vmor %vm7732_vm12, %vm7739_vm4  ;;  %vm5514_vm4 = vcmp.lt.f32.partialorder %v7697_v9, 0 }
0x1180   :  { %v6261_v28 = vpop.eup %6260  ;;  %v5457_v38 = vand.u32 1, %v5456_v35  ;;  %v5507_v55 = vtrunc.f32 %v7718_v32  ;;  %vm9302_vm7 = vcmp.eq.f32.partialorder %v7718_v32, 2139095040  ;;  %vm5504_vm9 = vcmp.ne.f32.partialorder %v7712_v60, %v5503_v19 }
0x1181   :  { %v5496_v49 = vmul.f32 %v6261_v28, %v7712_v60  ;;  %vm7761_vm13 = vmor %vm5504_vm9, %vm9302_vm7  ;;  %vm5502_vm9 = vcmp.lt.f32.partialorder %v7712_v60, 0  ;;  %v5478_v17 = vsel %vm5477_vm8, 2139095040, %v6543_v10  ;;  %vm5506_vm14 = vcmp.lt.f32.partialorder %v7718_v32, 1266679808 }
0x1182   :  { %vm5458_vm11 = vcmp.eq.s32.totalorder %v5457_v38, 1  ;;  %v5508_v62 = vcvt.f32.s32 %v5507_v55  ;;  %vm5511_vm7 = vmneg %vm7761_vm13  ;;  %v5534_v57 = vsel %vm5502_vm9, 0, %v6542_v16  ;;  %v5522_v28 = vsel %vm5502_vm9, 2139095040, %v6543_v10 }
0x1183   :  { %vm5460_vm1 = vmand %vm5458_vm11, %vm5459_vm3  ;;  %6264 = vpow2.f32 %v5496_v49  ;;  %vm5465_vm11 = vcmp.lt.s32.totalorder %v7692_v61, 0  ;;  %v5535_v38 = vxor.u32 2147483648, %v5534_v57  ;;  %v5020_v49 = vpop.f32.mrf.mxu1 }
0x1184   :  { %v5509_v25 = vand.u32 1, %v5508_v62  ;;  %vm7754_vm0 = vmand %vm5454_vm6, %vm5460_vm1 }
0x1185   :  { %vm7770_vm3 = vmand %vm9303_vm5, %vm7722_vm15  ;;  %vm5515_vm5 = vcmp.eq.f32.partialorder %v7697_v9, 0  ;;  %v5484_v46 = vsel %vm7754_vm0, %v5483_v42, %v5482_v37  ;;  %v2433_v27 = vpop.f32.mrf.mxu1 }
0x1186   :  { %vm5510_vm1 = vcmp.eq.s32.totalorder %v5509_v25, 1  ;;  %vm7776_vm6 = vmand %vm5465_vm11, %vm7754_vm0  ;;  %vm5487_vm11 = vcmp.ne.f32.partialorder %v7692_v61, %v7692_v61 }
0x1187   :  { %vm7786_vm15 = vmand %vm5510_vm1, %vm5511_vm7  ;;  %vm9479_vm1 = vcmp.eq.f32.partialorder %v7692_v61, 0 }
0x1188   :  { %vm7800_vm10 = vmand %vm5502_vm9, %vm5515_vm5 }
0x1189   :  { %vm7815_vm7 = vmxor %vm5502_vm9, %vm5518_vm2  ;;  %vm5488_vm2 = vcmp.ne.f32.partialorder %v7704_v33, %v7704_v33 }
0x118a   :  { %vm7826_vm12 = vmand %vm5506_vm14, %vm7786_vm15  ;;  %vm5448_vm15 = vcmp.eq.f32.partialorder %v7704_v33, 0  ;;  %vm5467_vm14 = vcmp.eq.f32.partialorder %v7695_v20, 2139095040 }
0x118b   :  { %vm5529_vm8 = vmor %vm7800_vm10, %vm7815_vm7  ;;  %vm9482_vm10 = vcmp.eq.f32.partialorder %v7707_v53, 2139095040  ;;  %vm9483_vm7 = vcmp.lt.f32.partialorder %v7692_v61, 0  ;;  %v5536_v62 = vsel %vm7826_vm12, %v5535_v38, %v5534_v57 }
0x118c   :  { %v6263_v6 = vpop.eup %6262  ;;  %vm5520_vm0 = vmand %vm5514_vm4, %vm7761_vm13  ;;  %v5485_v30 = vsel %vm9483_vm7, %v5484_v46, %v5482_v37  ;;  %v5530_v13 = vsel %vm5529_vm8, 2139095040, %v6543_v10  ;;  %vm5540_vm8 = vcmp.ne.f32.partialorder %v7712_v60, %v7712_v60  ;;  %v5537_v37 = vsel %vm5514_vm4, %v5536_v62, %v5534_v57 }
0x118d   :  { %v5469_v24 = vsel %vm7770_vm3, 2143289344, %v6263_v6  ;;  %vm5479_vm3 = vcmp.eq.f32.partialorder %v7692_v61, 3212836864  ;;  %vm5489_vm13 = vmor %vm5487_vm11, %vm5488_vm2  ;;  %vm5449_vm11 = vcmp.eq.f32.partialorder %v7704_v33, 1065353216  ;;  %vm5539_vm2 = vcmp.ne.f32.partialorder %v7697_v9, %v7697_v9 }
0x118e   :  { %v5471_v34 = vsel %vm9479_vm1, %v5470_v39, %v5469_v24  ;;  %v5480_v44 = vsel %vm5479_vm3, 1065353216, %v5478_v17  ;;  %vm5517_vm1 = vcmp.lt.s32.totalorder %v7697_v9, 0  ;;  %vm5531_vm3 = vcmp.eq.f32.partialorder %v7697_v9, 3212836864 }
0x118f   :  { %v5473_v0 = vxor.u32 2147483648, %v5471_v34  ;;  %v5532_v59 = vsel %vm5531_vm3, 1065353216, %v5530_v13  ;;  %vm5501_vm4 = vcmp.eq.f32.partialorder %v7712_v60, 1065353216 }
0x1190   :  { %v6265_v36 = vpop.eup %6264 }
0x1191   :  { %v5474_v35 = vsel %vm7776_vm6, %v5473_v0, %v5471_v34  ;;  %v5521_v43 = vsel %vm5520_vm0, 2143289344, %v6265_v36  ;;  %vm9484_vm6 = vcmp.eq.f32.partialorder %v7692_v61, 1065353216  ;;  %vm9485_vm0 = vcmp.eq.f32.partialorder %v7718_v32, 2139095040 }
0x1192   :  { %v5481_v20 = vsel %vm9482_vm10, %v5480_v44, %v5474_v35  ;;  %v5523_v19 = vsel %vm5515_vm5, %v5522_v28, %v5521_v43  ;;  %vm5491_vm9 = vmor %vm9484_vm6, %vm5448_vm15  ;;  %vm5500_vm15 = vcmp.eq.f32.partialorder %v7712_v60, 0  ;;  %vm9488_vm6 = vcmask 64512  }
0x1193   :  { %v5486_v55 = vsel %vm5467_vm14, %v5485_v30, %v5481_v20  ;;  %v5525_v53 = vxor.u32 2147483648, %v5523_v19  ;;  %vm5524_vm5 = vmand %vm5517_vm1, %vm7826_vm12  ;;  %vm5519_vm14 = vcmp.eq.f32.partialorder %v7701_v12, 2139095040  ;;  %vm9486_vm12 = vcmask 130048  }
0x1194   :  { %v5490_v25 = vsel %vm5489_vm13, 2143289344, %v5486_v55  ;;  %vm5516_vm1 = vcmp.eq.f32.partialorder %v7697_v9, 1065353216  ;;  %vm5541_vm10 = vmor %vm5539_vm2, %vm5540_vm8 }
0x1195   :  { %v5492_v26 = vsel %vm5491_vm9, 1065353216, %v5490_v25  ;;  %v5526_v2 = vsel %vm5524_vm5, %v5525_v53, %v5523_v19  ;;  %vm5543_vm7 = vmor %vm5516_vm1, %vm5500_vm15 }
0x1196   :  { %v7885_v8 = vsel %vm5449_vm11, %v7692_v61, %v5492_v26  ;;  %v5533_v33 = vsel %vm9485_vm0, %v5532_v59, %v5526_v2  ;;  %v7898_v61 = vld [vmem:[%s9282_s2] ss:$0 sm:$0xff]  ;;  %vm9487_vm13 = vmmov %vm9486_vm12 }
0x1197   :  { %v2252_v6 = vsel %vm9486_vm12, %v7885_v8, 0.0  ;;  %v5538_v39 = vsel %vm5519_vm14, %v5537_v37, %v5533_v33  ;;  %v7901_v12 = vadd.f32 %v7898_v61, %v5020_v49  ;;  %v7905_v24 = vadd.f32 %v7898_v61, %v2433_v27  ;;  %vm9489_vm9 = vmmov %vm9488_vm6 }
0x1198   :  { %2253 = vadd.xlane.f32.xlu1 %v2252_v6  ;;  %v5542_v40 = vsel %vm5541_vm10, 2143289344, %v5538_v39  ;;  %vm9490_vm5 = vmmov %vm9486_vm12 }
0x1199   :  { %v5544_v32 = vsel %vm5543_vm7, 1065353216, %v5542_v40  ;;  %v2445_v4 = vand.u32 2147483647, %v7901_v12  ;;  %v2444_v34 = vand.u32 2147483647, %v7905_v24  ;;  %v2516_v60 = vmul.f32 %v7905_v24, %v7905_v24  ;;  %vm9491_vm2 = vmmov %vm9490_vm5 }
0x119a   :  { %v5545_v17 = vsel %vm5501_vm4, %v7697_v9, %v5544_v32  ;;  %v2517_v36 = vmul.f32 %v7901_v12, %v7901_v12  ;;  %v2443_v25 = vmax.f32 %v7901_v12, 0.0  ;;  %v2442_v33 = vmax.f32 %v7905_v24, 0.0  ;;  %vm9492_vm8 = vmmov %vm9488_vm6 }
0x119b   :  { %v2255_v42 = vsel %vm9487_vm13, %v5545_v17, 0.0  ;;  %v2447_v5 = vsub.f32 0.0, %v2445_v4  ;;  %v2446_v57 = vsub.f32 0.0, %v2444_v34  ;;  %v2518_v9 = vsel %vm9488_vm6, %v2516_v60, 0.0  ;;  %v7940_v60 = vld [vmem:[%s9285_s5 + $0x8] sm:$0xff]  ;;  %vm9493_vm15 = vmmov %vm9488_vm6 }
0x119c   :  { %2256 = vadd.xlane.f32.xlu0 %v2255_v42  ;;  %2519 = vadd.xlane.f32.xlu1 %v2518_v9  ;;  %v2521_v44 = vsel %vm9489_vm9, %v2517_v36, 0.0  ;;  %vm9494_vm10 = vmmov %vm9491_vm2  ;;  %vm9496_vm4 = vcmask 105552  }
0x119d   :  { %v2450_v0 = vmul.f32 1.442695, %v2447_v5  ;;  %v2448_v46 = vmul.f32 1.442695, %v2446_v57  ;;  %vm9495_vm7 = vmmov %vm9491_vm2 }
0x119e   :  { %vm9497_vm13 = vmmov %vm9496_vm4 }
0x119f   :  { %6266 = vpow2.f32 %v2450_v0  ;;  %vm9498_vm6 = vmmov %vm9491_vm2 }
0x11a0   :  { %6268 = vpow2.f32 %v2448_v46  ;;  %2522 = vadd.xlane.f32.xlu1 %v2521_v44  ;;  %vm9499_vm9 = vmmov %vm9491_vm2 }
0x11ac   :  { %v6267_v35 = vpop.eup %6266 }
0x11ad   :  { %v6269_v43 = vpop.eup %6268  ;;  %v2461_v28 = vadd.f32 1.0, %v6267_v35  ;;  %v2464_v20 = vmul.f32 -0.5, %v6267_v35  ;;  %v2467_v13 = vand.u32 2147483647, %v6267_v35 }
0x11ae   :  { %v2452_v38 = vadd.f32 1.0, %v6269_v43  ;;  %v2455_v30 = vmul.f32 -0.5, %v6269_v43  ;;  %v2458_v55 = vand.u32 2147483647, %v6269_v43 }
0x11af   :  { %6270 = vlog2.f32 %v2461_v28  ;;  %v2465_v19 = vadd.f32 1.0, %v2464_v20  ;;  %vm2468_vm3 = vcmp.lt.f32.partialorder %v2467_v13, 0.0004427343 }
0x11b0   :  { %6272 = vlog2.f32 %v2452_v38  ;;  %v2456_v49 = vadd.f32 1.0, %v2455_v30  ;;  %vm2459_vm11 = vcmp.lt.f32.partialorder %v2458_v55, 0.0004427343  ;;  %v4708_v55 = vmul.f32 -1.442695, %v7905_v24 }
0x11b1   :  { %v2466_v53 = vmul.f32 %v6267_v35, %v2465_v19 }
0x11b2   :  { %v2457_v2 = vmul.f32 %v6269_v43, %v2456_v49 }
0x11bc   :  { %v6271_v62 = vpop.eup %6270 }
0x11bd   :  { %v2463_v26 = vmul.f32 0.6931472, %v6271_v62  ;;  %v6273_v59 = vpop.eup %6272 }
0x11be   :  { %v2454_v27 = vmul.f32 0.6931472, %v6273_v59 }
0x11bf   :  { %v2469_v37 = vsel %vm2468_vm3, %v2466_v53, %v2463_v26  ;;  %v4709_v26 = vmul.f32 -1.442695, %v7901_v12  ;;  %vm9500_vm3 = vcmask 23552  }
0x11c0   :  { %v2471_v6 = vadd.f32 %v2469_v37, %v2443_v25  ;;  %v2460_v39 = vsel %vm2459_vm11, %v2457_v2, %v2454_v27  ;;  %vm9501_vm11 = vmmov %vm9500_vm3 }
0x11c1   :  { %v2470_v40 = vadd.f32 %v2460_v39, %v2442_v33 }
0x11c2   :  { %2632 = vperm.xlu1 %6018, %v2471_v6  }
0x11c3   :  { %2627 = vperm.xlu0 %6017, %v2470_v40  }
0x11c6   :  { %6019 = vset.pattern.permute.xlu1 %v9316_v45 }
0x11c7   :  { %6020 = vset.pattern.permute.xlu0 %v9316_v45 }
0x1221   :  { %v2254_v32 = vpop.xlane.xlu1 %2253 }
0x1222   :  { %v2258_v42 = vadd.f32 1e-16, %v2254_v32 }
0x1224   :  { %6274 = vrcp.f32 %v2258_v42 }
0x1225   :  { %v2257_v4 = vpop.xlane.xlu0 %2256 }
0x1226   :  { %v2259_v34 = vadd.f32 1e-16, %v2257_v4 }
0x1228   :  { %6276 = vrcp.f32 %v2259_v34 }
0x1231   :  { %v6275_v5 = vpop.eup %6274 }
0x1232   :  { %v7926_v57 = vmul.f32 %v6275_v5, %v7885_v8  ;;  %v7949_v8 = vld [vmem:[%s9285_s5] sm:$0xff] }
0x1234   :  { %5007 = vmatprep.mubr.msk.f32.mxu0 %vm9490_vm5, %v7926_v57  ;;  %vm9502_vm5 = vmmov %vm9491_vm2 }
0x1235   :  { %v6277_v0 = vpop.eup %6276 }
0x1236   :  { %v7930_v46 = vmul.f32 %v6277_v0, %v5545_v17 }
0x1238   :  { %5008 = vmatmul.mubr.msk.f32.vlgmr.msra.gmra.mxu0 %vm9491_vm2, %v7930_v46 }
0x1239   :  { %5022 = vmatpush3.msra.mxu0 %v7607_v63  ;;  %5023 = vmatprep.mubr.msk.f32.mxu0 %vm9492_vm8, %v7905_v24  ;;  %v2520_v63 = vpop.xlane.xlu1 %2519  ;;  %vm9503_vm8 = vcmask 261120  }
0x123a   :  { %5026 = vmatprep.subr.mxu0 %v7940_v60  ;;  %vm2526_vm0 = vcmp.eq.f32.partialorder %v2520_v63, inf  ;;  %v2529_v38 = vand.u32 2147483648, %v2520_v63  ;;  %vm2528_vm1 = vcmp.eq.f32.partialorder %v2520_v63, 0.0 }
0x123c   :  { %5024 = vmatmul.mubr.msk.f32.vlgmr.msra.gmra.mxu0 %vm9493_vm15, %v7901_v12  ;;  %vm9504_vm15 = vmmov %vm9503_vm8 }
0x123d   :  { %5027 = vmatpush3.msra.mxu0 %v7940_v60  ;;  %v2523_v17 = vpop.xlane.xlu1 %2522 }
0x123e   :  { %5028 = vmatprep.subr.mxu0 %v7949_v8  ;;  %6278 = vrsqrt.f32 %v2523_v17  ;;  %vm2533_vm14 = vcmp.eq.f32.partialorder %v2523_v17, inf  ;;  %v2536_v43 = vand.u32 2147483648, %v2523_v17  ;;  %vm2535_vm12 = vcmp.eq.f32.partialorder %v2523_v17, 0.0  ;;  %v2628_v4 = vpop.permute.xlu0 %2627 }
0x123f   :  { %5029 = vmatpush3.msra.mxu0 %v7949_v8  ;;  %6280 = vrsqrt.f32 %v2520_v63 }
0x1240   :  { %5040 = vmatprep.subr.mxu0 %v7621_v3 }
0x1241   :  { %v2633_v6 = vpop.permute.xlu1 %2632 }
0x124b   :  { %v6279_v36 = vpop.eup %6278 }
0x124c   :  { %v6281_v9 = vpop.eup %6280  ;;  %v2532_v44 = vmul.f32 %v6279_v36, %v2523_v17  ;;  %v2487_v36 = vsel %vm9497_vm13, %v7901_v12, -inf }
0x124d   :  { %v2525_v35 = vmul.f32 %v6281_v9, %v2520_v63 }
0x124e   :  { %v2534_v28 = vsel %vm2533_vm14, %v2523_v17, %v2532_v44  ;;  %v2484_v17 = vsel %vm9496_vm4, %v7905_v24, -inf }
0x124f   :  { %v2527_v20 = vsel %vm2526_vm0, %v2520_v63, %v2525_v35  ;;  %v2537_v30 = vsel %vm2535_vm12, %v2536_v43, %v2534_v28 }
0x1250   :  { %v2530_v19 = vsel %vm2528_vm1, %v2529_v38, %v2527_v20  ;;  %v2539_v13 = vmax.f32 %v2537_v30, 1e-08 }
0x1251   :  { %v2538_v49 = vmax.f32 %v2530_v19, 1e-08 }
0x1252   :  { %6282 = vrcp.f32 %v2539_v13 }
0x1253   :  { %6284 = vrcp.f32 %v2538_v49 }
0x1254   :  { %6286 = vpow2.f32 %v4708_v55 }
0x1255   :  { %6288 = vpow2.f32 %v4709_v26 }
0x125f   :  { %v6283_v2 = vpop.eup %6282 }
0x1260   :  { %v6285_v27 = vpop.eup %6284 }
0x1261   :  { %v6287_v40 = vpop.eup %6286 }
0x1262   :  { %v2478_v0 = vadd.f32 1.0, %v6287_v40  ;;  %v6289_v9 = vpop.eup %6288 }
0x1263   :  { %v2479_v44 = vadd.f32 1.0, %v6289_v9 }
0x1264   :  { %6290 = vrcp.f32 %v2478_v0 }
0x1265   :  { %6292 = vrcp.f32 %v2479_v44 }
0x1271   :  { %v6291_v35 = vpop.eup %6290 }
0x1272   :  { %v2671_v43 = vsub.f32 1.0, %v6291_v35  ;;  %v6293_v28 = vpop.eup %6292 }
0x12f8   :  { %v7955_v53 = vpop.f32.mrf.mxu0 }
0x12fa   :  { %v7957_v62 = vpop.f32.mrf.mxu0 }
0x12fc   :  { %v5025_v59 = vpop.f32.mrf.mxu0 }
0x12fd   :  { %v2624_v37 = vmul.f32 %v6283_v2, %v5025_v59 }
0x12fe   :  { %v2612_v39 = vpop.f32.mrf.mxu0 }
0x12ff   :  { %v2623_v32 = vmul.f32 %v6285_v27, %v2612_v39  ;;  %v2636_v42 = vmul.f32 %v2633_v6, %v2624_v37 }
0x1301   :  { %v2635_v34 = vmul.f32 %v2628_v4, %v2623_v32  ;;  %v2640_v5 = vsel %vm9494_vm10, %v2636_v42, -inf }
0x1302   :  { %2641 = vmax.xlane.f32.xlu0 %v2640_v5 }
0x1303   :  { %v2637_v63 = vsel %vm9495_vm7, %v2635_v34, -inf }
0x1304   :  { %2638 = vmax.xlane.f32.xlu1 %v2637_v63 }
0x1308   :  { %2485 = vmax.xlane.f32.xlu1 %v2484_v17 }
0x130c   :  { %2488 = vmax.xlane.f32.xlu1 %v2487_v36 }
0x1318   :  { %2675 = vperm.xlu0 %6020, %v2671_v43  }
0x131c   :  { %6022 = vset.pattern.permute.xlu0 %v9314_v54 }
0x131d   :  { %2661 = vperm.xlu1 %6019, %v6291_v35  }
0x1321   :  { %2666 = vperm.xlu1 %6019, %v6293_v28  }
0x138b   :  { %v2642_v38 = vpop.xlane.xlu0 %2641 }
0x138c   :  { %v2644_v20 = vsub.f32 %v2636_v42, %v2642_v38  ;;  %v2672_v42 = vsub.f32 1.0, %v6293_v28 }
0x138d   :  { %v2639_v30 = vpop.xlane.xlu1 %2638 }
0x138e   :  { %v2647_v19 = vmul.f32 1.442695, %v2644_v20  ;;  %v2643_v13 = vsub.f32 %v2635_v34, %v2639_v30 }
0x1390   :  { %6294 = vpow2.f32 %v2647_v19  ;;  %v2645_v49 = vmul.f32 1.442695, %v2643_v13 }
0x1391   :  { %v2486_v26 = vpop.xlane.xlu1 %2485 }
0x1392   :  { %6296 = vpow2.f32 %v2645_v49  ;;  %v2490_v37 = vsub.f32 %v7905_v24, %v2486_v26 }
0x1393   :  { %v2676_v30 = vpop.permute.xlu0 %2675 }
0x1394   :  { %v2492_v39 = vmul.f32 1.442695, %v2490_v37  ;;  %v2683_v49 = vmul.f32 %v2676_v30, %v7926_v57 }
0x1395   :  { %v2489_v6 = vpop.xlane.xlu1 %2488 }
0x1396   :  { %v2491_v40 = vsub.f32 %v7901_v12, %v2489_v6  ;;  %6298 = vpow2.f32 %v2492_v39 }
0x1398   :  { %v2494_v32 = vmul.f32 1.442695, %v2491_v40  ;;  %v2934_v40 = vld [vmem:[#allocation2 + $0x58] sm:$0xff] }
0x1399   :  { %v2662_v5 = vpop.permute.xlu1 %2661 }
0x139a   :  { %6300 = vpow2.f32 %v2494_v32  ;;  %v8004_v32 = vld [vmem:[%s9283_s3] sm:$0xff] }
0x139d   :  { %v6295_v55 = vpop.eup %6294  ;;  %v2667_v0 = vpop.permute.xlu1 %2666 }
0x139e   :  { %v2652_v2 = vsel %vm9498_vm6, %v6295_v55, 0.0 }
0x139f   :  { %v6297_v59 = vpop.eup %6296  ;;  %2653 = vadd.xlane.f32.xlu1 %v2652_v2 }
0x13a0   :  { %v2649_v27 = vsel %vm9499_vm9, %v6297_v59, 0.0 }
0x13a3   :  { %2650 = vadd.xlane.f32.xlu1 %v2649_v27  ;;  %v6299_v4 = vpop.eup %6298 }
0x13a7   :  { %v6301_v34 = vpop.eup %6300 }
0x13b4   :  { %2680 = vperm.xlu1 %6019, %v2672_v42   ;;  %v8011_v42 = vld [vmem:[%s9284_s4] sm:$0xff] }
0x13b8   :  { %2498 = vrot.lane.b32.xlu1 %v6299_v4, %s6536_s19 }
0x13b9   :  { %6021 = vset.pattern.permute.xlu1 %v9314_v54 }
0x13bc   :  { %2500 = vrot.lane.b32.xlu1 %v6301_v34, %s6536_s19 }
0x1428   :  { %v2654_v63 = vpop.xlane.xlu1 %2653 }
0x1429   :  { %6302 = vrcp.f32 %v2654_v63 }
0x142c   :  { %v2651_v17 = vpop.xlane.xlu1 %2650 }
0x142d   :  { %6304 = vrcp.f32 %v2651_v17 }
0x1430   :  { %v2681_v36 = vpop.permute.xlu1 %2680 }
0x1431   :  { %v2684_v2 = vmul.f32 %v2681_v36, %v7930_v46  ;;  %v2514_v36 = vadd.f32 1.0, %v2442_v33 }
0x1434   :  { %v2499_v9 = vpop.permute.xlu1 %2498 }
0x1435   :  { %v2504_v44 = vsel %vm9500_vm3, %v2499_v9, 0.0  ;;  %v2515_v9 = vadd.f32 1.0, %v2443_v25 }
0x1436   :  { %v6303_v35 = vpop.eup %6302  ;;  %2505 = vadd.xlane.f32.xlu1 %v2504_v44 }
0x1437   :  { %v2658_v43 = vmul.f32 %v6303_v35, %v6295_v55  ;;  %v7990_v55 = vld [vmem:[%s9283_s3 + $0x8] sm:$0xff] }
0x1438   :  { %v2501_v28 = vpop.permute.xlu1 %2500 }
0x1439   :  { %v2507_v38 = vsel %vm9501_vm11, %v2501_v28, 0.0  ;;  %v2670_v13 = vmul.f32 %v2667_v0, %v2658_v43 }
0x143a   :  { %v6305_v20 = vpop.eup %6304  ;;  %2508 = vadd.xlane.f32.xlu0 %v2507_v38 }
0x143b   :  { %v2656_v19 = vmul.f32 %v6305_v20, %v6297_v59  ;;  %v2686_v27 = vadd.f32 %v2684_v2, %v2670_v13 }
0x143d   :  { %v2669_v26 = vmul.f32 %v2662_v5, %v2656_v19 }
0x143f   :  { %v2685_v37 = vadd.f32 %v2683_v49, %v2669_v26 }
0x1441   :  { %5030 = vmatprep.mubr.msk.f32.mxu0 %vm9502_vm5, %v2685_v37 }
0x1442   :  { %5031 = vmatmul.mubr.msk.f32.vlgmr.msra.gmra.mxu0 %vm9491_vm2, %v2686_v27 }
0x1443   :  { %5041 = vmatpush3.msra.mxu0 %v7621_v3 }
0x1444   :  { %5042 = vmatprep.subr.mxu0 %v7654_v21 }
0x1445   :  { %5043 = vmatpush3.msra.mxu0 %v7654_v21 }
0x1446   :  { %5044 = vmatprep.subr.mxu0 %v7661_v29 }
0x1447   :  { %5045 = vmatpush3.msra.mxu0 %v7661_v29 }
0x1448   :  { %5046 = vmatprep.subr.mxu0 %v7668_v52 }
0x1449   :  { %5047 = vmatpush3.msra.mxu0 %v7668_v52  ;;  %v2933_v52 = vld [vmem:[#allocation2 + $0x50] sm:$0xff] }
0x144a   :  { %5063 = vmatprep.subr.mxu0 %v7990_v55  ;;  %5048 = vmatprep.mubr.msk.f32.mxu0 %vm9503_vm8, %v2933_v52 }
0x144b   :  { %5049 = vmatmul.mubr.msk.f32.vlgmr.msra.gmra.mxu0 %vm9504_vm15, %v2934_v40 }
0x144c   :  { %5064 = vmatpush3.msra.mxu0 %v7990_v55 }
0x144d   :  { %5065 = vmatprep.subr.mxu0 %v8004_v32 }
0x144e   :  { %5066 = vmatpush3.msra.mxu0 %v8004_v32 }
0x144f   :  { %5081 = vmatprep.subr.mxu0 %v8011_v42 }
0x14bf   :  { %v2506_v3 = vpop.xlane.xlu1 %2505 }
0x14c0   :  { %6306 = vrcp.f32 %v2506_v3 }
0x14c3   :  { %v2509_v59 = vpop.xlane.xlu0 %2508 }
0x14c4   :  { %6308 = vrcp.f32 %v2509_v59 }
0x14cd   :  { %v6307_v21 = vpop.eup %6306 }
0x14ce   :  { %v2511_v6 = vmul.f32 %v6307_v21, %v6299_v4 }
0x14d0   :  { %2793 = vperm.xlu1 %6021, %v2511_v6  }
0x14d1   :  { %v6309_v39 = vpop.eup %6308 }
0x14d2   :  { %v2513_v29 = vmul.f32 %v6309_v39, %v6301_v34 }
0x14d4   :  { %2797 = vperm.xlu0 %6022, %v2513_v29   ;;  %6023 = vset.pattern.permute.xlu1 %v6539_v22 }
0x14d5   :  { %2770 = vperm.xlu1 %6023, %v2511_v6  }
0x14d8   :  { %6028 = vset.pattern.permute.xlu0 %v6534_v7 }
0x14d9   :  { %6024 = vset.pattern.permute.xlu1 %v6540_v23 }
0x14da   :  { %2781 = vperm.xlu1 %6024, %v2511_v6  }
0x14de   :  { %6025 = vset.pattern.permute.xlu1 %v6539_v22 }
0x14df   :  { %2775 = vperm.xlu1 %6025, %v2513_v29  }
0x14e3   :  { %6026 = vset.pattern.permute.xlu1 %v6540_v23 }
0x14e4   :  { %2785 = vperm.xlu1 %6026, %v2513_v29  }
0x14e8   :  { %6027 = vset.pattern.permute.xlu1 %v6538_v18 }
0x1502   :  { %v5032_v4 = vpop.f32.mrf.mxu0 }
0x1504   :  { %v2759_v34 = vpop.f32.mrf.mxu0 }
0x154b   :  { %v2794_v5 = vpop.permute.xlu1 %2793 }
0x154c   :  { %v2800_v0 = vmul.f32 %v2794_v5, %v2759_v34 }
0x154e   :  { %2804 = vrot.lane.b32.xlu1 %v2800_v0, %s6541_s6 }
0x154f   :  { %v2798_v63 = vpop.permute.xlu0 %2797 }
0x1550   :  { %v2801_v17 = vmul.f32 %v5032_v4, %v2798_v63  ;;  %v2771_v44 = vpop.permute.xlu1 %2770 }
0x1551   :  { %v2778_v20 = vmul.f32 %v2771_v44, %v2759_v34 }
0x1552   :  { %2806 = vrot.lane.b32.xlu1 %v2801_v17, %s6541_s6 }
0x1555   :  { %v2782_v35 = vpop.permute.xlu1 %2781 }
0x1556   :  { %2816 = vperm.xlu1 %6027, %v2514_v36   ;;  %v2788_v28 = vmul.f32 %v2782_v35, %v2685_v37 }
0x1558   :  { %v2790_v19 = vadd.f32 %v2788_v28, %v2778_v20 }
0x155a   :  { %2821 = vperm.xlu1 %6027, %v2515_v9   ;;  %v2776_v43 = vpop.permute.xlu1 %2775 }
0x155b   :  { %v2779_v49 = vmul.f32 %v5032_v4, %v2776_v43 }
0x155e   :  { %6029 = vset.pattern.permute.xlu1 %v6534_v7 }
0x155f   :  { %v2786_v38 = vpop.permute.xlu1 %2785 }
0x1560   :  { %v2789_v30 = vmul.f32 %v2786_v38, %v2686_v27  ;;  %v5050_v38 = vpop.f32.mrf.mxu0 }
0x1562   :  { %v2791_v33 = vadd.f32 %v2789_v30, %v2779_v49 }
0x15c0   :  { %v2805_v13 = vpop.permute.xlu1 %2804 }
0x15c1   :  { %v2810_v26 = vadd.f32 %v2805_v13, %v2790_v19 }
0x15c3   :  { %v8022_v24 = vadd.f32 1e-16, %v2810_v26 }
0x15c4   :  { %v2807_v2 = vpop.permute.xlu1 %2806 }
0x15c5   :  { %v2811_v12 = vadd.f32 %v2807_v2, %v2791_v33  ;;  %v8025_v25 = vand.u32 2147483647, %v8022_v24  ;;  %vm9309_vm10 = vcmp.eq.f32.partialorder %v8022_v24, 0 }
0x15c7   :  { %v8027_v3 = vadd.f32 1e-16, %v2811_v12  ;;  %6310 = vlog2.f32 %v8025_v25  ;;  %vm5570_vm7 = vcmp.gt.f32.partialorder %v8025_v25, 1065353216 }
0x15c9   :  { %v8031_v37 = vand.u32 2147483647, %v8027_v3 }
0x15cb   :  { %6312 = vlog2.f32 %v8031_v37 }
0x15d1   :  { %v8034_v27 = vpop.permute.xlu1 %2816 }
0x15d2   :  { %v8037_v59 = vand.u32 2147483647, %v8034_v27  ;;  %v5555_v21 = vtrunc.f32 %v8034_v27  ;;  %vm5554_vm0 = vcmp.lt.f32.partialorder %v8034_v27, 0 }
0x15d3   :  { %vm8062_vm4 = vmand %vm5554_vm0, %vm9309_vm10  ;;  %v5586_v19 = vsel %vm5554_vm0, 0, %v6542_v16  ;;  %v5574_v26 = vsel %vm5554_vm0, 2139095040, %v6543_v10 }
0x15d4   :  { %v6311_v6 = vpop.eup %6310  ;;  %vm9308_vm14 = vcmp.eq.f32.partialorder %v8037_v59, 2139095040  ;;  %v5559_v39 = vtrunc.f32 %v8037_v59  ;;  %vm5556_vm12 = vcmp.ne.f32.partialorder %v8034_v27, %v5555_v21  ;;  %vm8069_vm13 = vmxor %vm5554_vm0, %vm5570_vm7  ;;  %vm5558_vm2 = vcmp.lt.f32.partialorder %v8037_v59, 1266679808 }
0x15d5   :  { %v8042_v29 = vpop.permute.xlu1 %2821  ;;  %v5548_v52 = vmul.f32 %v6311_v6, %v8034_v27  ;;  %vm8052_vm1 = vmor %vm5556_vm12, %vm9308_vm14  ;;  %vm9307_vm12 = vcmp.lt.f32.partialorder %v8022_v24, 0  ;;  %vm5622_vm14 = vcmp.gt.f32.partialorder %v8031_v37, 1065353216  ;;  %v5587_v21 = vxor.u32 2147483648, %v5586_v19 }
0x15d6   :  { %v5560_v40 = vcvt.f32.s32 %v5559_v39  ;;  %v8048_v4 = vand.u32 2147483647, %v8042_v29  ;;  %v5607_v17 = vtrunc.f32 %v8042_v29  ;;  %vm5563_vm9 = vmneg %vm8052_vm1 }
0x15d7   :  { %6314 = vpow2.f32 %v5548_v52  ;;  %vm5581_vm8 = vmor %vm8062_vm4, %vm8069_vm13  ;;  %vm5618_vm13 = vcmp.lt.f32.partialorder %v8027_v3, 0 }
0x15d8   :  { %v6313_v5 = vpop.eup %6312  ;;  %v5561_v0 = vand.u32 1, %v5560_v40  ;;  %v5611_v44 = vtrunc.f32 %v8048_v4  ;;  %vm9306_vm11 = vcmp.eq.f32.partialorder %v8048_v4, 2139095040  ;;  %vm5608_vm5 = vcmp.ne.f32.partialorder %v8042_v29, %v5607_v17 }
0x15d9   :  { %v5600_v9 = vmul.f32 %v6313_v5, %v8042_v29  ;;  %vm8091_vm7 = vmor %vm5608_vm5, %vm9306_vm11  ;;  %vm5606_vm5 = vcmp.lt.f32.partialorder %v8042_v29, 0  ;;  %v5582_v12 = vsel %vm5581_vm8, 2139095040, %v6543_v10  ;;  %vm5610_vm0 = vcmp.lt.f32.partialorder %v8048_v4, 1266679808 }
0x15da   :  { %vm5562_vm6 = vcmp.eq.s32.totalorder %v5561_v0, 1  ;;  %v5612_v35 = vcvt.f32.s32 %v5611_v44  ;;  %vm5615_vm11 = vmneg %vm8091_vm7  ;;  %v5638_v40 = vsel %vm5606_vm5, 0, %v6542_v16 }
0x15db   :  { %vm5564_vm3 = vmand %vm5562_vm6, %vm5563_vm9  ;;  %6316 = vpow2.f32 %v5600_v9  ;;  %vm5569_vm6 = vcmp.lt.s32.totalorder %v8022_v24, 0  ;;  %v5626_v9 = vsel %vm5606_vm5, 2139095040, %v6543_v10  ;;  %v5639_v44 = vxor.u32 2147483648, %v5638_v40 }
0x15dc   :  { %v5613_v43 = vand.u32 1, %v5612_v35  ;;  %vm8084_vm15 = vmand %vm5558_vm2, %vm5564_vm3 }
0x15dd   :  { %vm8100_vm9 = vmand %vm9307_vm12, %vm8052_vm1  ;;  %vm5619_vm12 = vcmp.eq.f32.partialorder %v8027_v3, 0  ;;  %v5588_v5 = vsel %vm8084_vm15, %v5587_v21, %v5586_v19 }
0x15de   :  { %vm5614_vm3 = vcmp.eq.s32.totalorder %v5613_v43, 1  ;;  %vm8106_vm2 = vmand %vm5569_vm6, %vm8084_vm15  ;;  %vm5591_vm6 = vcmp.ne.f32.partialorder %v8022_v24, %v8022_v24 }
0x15df   :  { %vm8116_vm1 = vmand %vm5614_vm3, %vm5615_vm11  ;;  %vm9525_vm3 = vcmp.eq.f32.partialorder %v8022_v24, 0 }
0x15e0   :  { %vm8130_vm10 = vmand %vm5606_vm5, %vm5619_vm12 }
0x15e1   :  { %vm8145_vm11 = vmxor %vm5606_vm5, %vm5622_vm14  ;;  %vm5592_vm14 = vcmp.ne.f32.partialorder %v8034_v27, %v8034_v27 }
0x15e2   :  { %vm8156_vm4 = vmand %vm5610_vm0, %vm8116_vm1  ;;  %vm5552_vm1 = vcmp.eq.f32.partialorder %v8034_v27, 0  ;;  %vm5571_vm0 = vcmp.eq.f32.partialorder %v8025_v25, 2139095040 }
0x15e3   :  { %vm5633_vm8 = vmor %vm8130_vm10, %vm8145_vm11  ;;  %vm9528_vm10 = vcmp.eq.f32.partialorder %v8037_v59, 2139095040  ;;  %vm9529_vm11 = vcmp.lt.f32.partialorder %v8022_v24, 0  ;;  %v5640_v30 = vsel %vm8156_vm4, %v5639_v44, %v5638_v40 }
0x15e4   :  { %v6315_v49 = vpop.eup %6314  ;;  %vm5624_vm15 = vmand %vm5618_vm13, %vm8091_vm7  ;;  %v5589_v35 = vsel %vm9529_vm11, %v5588_v5, %v5586_v19  ;;  %v5634_v28 = vsel %vm5633_vm8, 2139095040, %v6543_v10  ;;  %vm5644_vm8 = vcmp.ne.f32.partialorder %v8042_v29, %v8042_v29 }
0x15e5   :  { %v5573_v2 = vsel %vm8100_vm9, 2143289344, %v6315_v49  ;;  %vm5583_vm9 = vcmp.eq.f32.partialorder %v8022_v24, 3212836864  ;;  %vm5593_vm7 = vmor %vm5591_vm6, %vm5592_vm14  ;;  %vm5553_vm6 = vcmp.eq.f32.partialorder %v8034_v27, 1065353216  ;;  %vm5643_vm14 = vcmp.ne.f32.partialorder %v8027_v3, %v8027_v3 }
0x15e6   :  { %v5575_v39 = vsel %vm9525_vm3, %v5574_v26, %v5573_v2  ;;  %v5584_v63 = vsel %vm5583_vm9, 1065353216, %v5582_v12  ;;  %vm5621_vm3 = vcmp.lt.s32.totalorder %v8027_v3, 0  ;;  %vm5635_vm9 = vcmp.eq.f32.partialorder %v8027_v3, 3212836864  ;;  %v3007_v12 = vpop.f32.mrf.mxu0 }
0x15e7   :  { %v5577_v34 = vxor.u32 2147483648, %v5575_v39  ;;  %v5636_v26 = vsel %vm5635_vm9, 1065353216, %v5634_v28  ;;  %v5641_v2 = vsel %vm5618_vm13, %v5640_v30, %v5638_v40 }
0x15e8   :  { %v6317_v0 = vpop.eup %6316 }
0x15e9   :  { %v5578_v17 = vsel %vm8106_vm2, %v5577_v34, %v5575_v39  ;;  %v5625_v36 = vsel %vm5624_vm15, 2143289344, %v6317_v0  ;;  %vm9530_vm2 = vcmp.eq.f32.partialorder %v8022_v24, 1065353216  ;;  %vm9531_vm15 = vcmp.eq.f32.partialorder %v8048_v4, 2139095040 }
0x15ea   :  { %v5585_v25 = vsel %vm9528_vm10, %v5584_v63, %v5578_v17  ;;  %v5627_v43 = vsel %vm5619_vm12, %v5626_v9, %v5625_v36  ;;  %vm5595_vm5 = vmor %vm9530_vm2, %vm5552_vm1  ;;  %vm5604_vm1 = vcmp.eq.f32.partialorder %v8042_v29, 0  ;;  %v8230_v4 = vadd.f32 %v7898_v61, %v3007_v12 }
0x15eb   :  { %v5590_v20 = vsel %vm5571_vm0, %v5589_v35, %v5585_v25  ;;  %v5629_v59 = vxor.u32 2147483648, %v5627_v43  ;;  %vm5628_vm12 = vmand %vm5621_vm3, %vm8156_vm4  ;;  %vm5623_vm0 = vcmp.eq.f32.partialorder %v8031_v37, 2139095040  ;;  %vm9532_vm4 = vcmask 130048  }
0x15ec   :  { %v5594_v19 = vsel %vm5593_vm7, 2143289344, %v5590_v20  ;;  %vm5620_vm3 = vcmp.eq.f32.partialorder %v8027_v3, 1065353216  ;;  %vm5645_vm10 = vmor %vm5643_vm14, %vm5644_vm8  ;;  %vm5605_vm7 = vcmp.eq.f32.partialorder %v8042_v29, 1065353216  ;;  %v3018_v5 = vand.u32 2147483647, %v8230_v4 }
0x15ed   :  { %v5596_v13 = vsel %vm5595_vm5, 1065353216, %v5594_v19  ;;  %v5630_v49 = vsel %vm5628_vm12, %v5629_v59, %v5627_v43  ;;  %vm5647_vm11 = vmor %vm5620_vm3, %vm5604_vm1  ;;  %v3090_v29 = vmul.f32 %v8230_v4, %v8230_v4  ;;  %vm9534_vm2 = vcmask 64512  }
0x15ee   :  { %v8215_v33 = vsel %vm5553_vm6, %v8022_v24, %v5596_v13  ;;  %v5637_v27 = vsel %vm9531_vm15, %v5636_v26, %v5630_v49  ;;  %v8226_v24 = vadd.f32 %v7898_v61, %v5050_v38  ;;  %vm9533_vm13 = vmmov %vm9532_vm4  ;;  %v3020_v63 = vsub.f32 0.0, %v3018_v5 }
0x15ef   :  { %v2826_v21 = vsel %vm9532_vm4, %v8215_v33, 0.0  ;;  %v5642_v6 = vsel %vm5623_vm0, %v5641_v2, %v5637_v27  ;;  %vm9535_vm5 = vmmov %vm9534_vm2 }
0x15f0   :  { %2827 = vadd.xlane.f32.xlu1 %v2826_v21  ;;  %v5646_v39 = vsel %vm5645_vm10, 2143289344, %v5642_v6  ;;  %v3019_v34 = vand.u32 2147483647, %v8226_v24  ;;  %v3022_v36 = vmul.f32 1.442695, %v3020_v63  ;;  %v3091_v61 = vmul.f32 %v8226_v24, %v8226_v24  ;;  %vm9536_vm12 = vmmov %vm9532_vm4 }
0x15f1   :  { %v5648_v37 = vsel %vm5647_vm11, 1065353216, %v5646_v39  ;;  %v3017_v26 = vmax.f32 %v8226_v24, 0.0  ;;  %v3016_v21 = vmax.f32 %v8230_v4, 0.0  ;;  %vm9537_vm14 = vmmov %vm9532_vm4 }
0x15f2   :  { %v5649_v52 = vsel %vm5605_vm7, %v8027_v3, %v5648_v37  ;;  %v3021_v0 = vsub.f32 0.0, %v3019_v34  ;;  %v3092_v3 = vsel %vm9534_vm2, %v3090_v29, 0.0  ;;  %v3095_v9 = vsel %vm9535_vm5, %v3091_v61, 0.0  ;;  %vm9538_vm8 = vmmov %vm9534_vm2 }
0x15f3   :  { %v2829_v40 = vsel %vm9533_vm13, %v5649_v52, 0.0  ;;  %vm9539_vm1 = vmmov %vm9534_vm2  ;;  %vm9542_vm7 = vcmask 105552  }
0x15f4   :  { %2830 = vadd.xlane.f32.xlu0 %v2829_v40  ;;  %v3024_v17 = vmul.f32 1.442695, %v3021_v0  ;;  %3096 = vadd.xlane.f32.xlu1 %v3095_v9  ;;  %vm9540_vm10 = vmmov %vm9536_vm12 }
0x15f5   :  { %vm9541_vm11 = vmmov %vm9540_vm10 }
0x15f6   :  { %6318 = vpow2.f32 %v3024_v17  ;;  %vm9543_vm13 = vmmov %vm9542_vm7 }
0x15f7   :  { %6320 = vpow2.f32 %v3022_v36  ;;  %vm9544_vm2 = vmmov %vm9540_vm10 }
0x15f8   :  { %3093 = vadd.xlane.f32.xlu0 %v3092_v3  ;;  %vm9545_vm5 = vmmov %vm9544_vm2 }
0x1603   :  { %v6319_v44 = vpop.eup %6318 }
0x1604   :  { %v6321_v25 = vpop.eup %6320  ;;  %v3035_v35 = vadd.f32 1.0, %v6319_v44  ;;  %v3038_v28 = vmul.f32 -0.5, %v6319_v44  ;;  %v3041_v59 = vand.u32 2147483647, %v6319_v44 }
0x1605   :  { %v3026_v43 = vadd.f32 1.0, %v6321_v25  ;;  %v3029_v38 = vmul.f32 -0.5, %v6321_v25  ;;  %v3032_v19 = vand.u32 2147483647, %v6321_v25 }
0x1606   :  { %6322 = vlog2.f32 %v3035_v35  ;;  %v3039_v20 = vadd.f32 1.0, %v3038_v28  ;;  %vm3042_vm9 = vcmp.lt.f32.partialorder %v3041_v59, 0.0004427343 }
0x1607   :  { %6324 = vlog2.f32 %v3026_v43  ;;  %v3030_v30 = vadd.f32 1.0, %v3029_v38  ;;  %vm3033_vm6 = vcmp.lt.f32.partialorder %v3032_v19, 0.0004427343 }
0x1608   :  { %v3040_v13 = vmul.f32 %v6319_v44, %v3039_v20 }
0x1609   :  { %v3031_v2 = vmul.f32 %v6321_v25, %v3030_v30 }
0x1613   :  { %v6323_v49 = vpop.eup %6322 }
0x1614   :  { %v3037_v27 = vmul.f32 0.6931472, %v6323_v49  ;;  %v6325_v12 = vpop.eup %6324 }
0x1615   :  { %v3028_v39 = vmul.f32 0.6931472, %v6325_v12 }
0x1616   :  { %v3043_v6 = vsel %vm3042_vm9, %v3040_v13, %v3037_v27  ;;  %v4720_v13 = vmul.f32 -1.442695, %v8230_v4  ;;  %vm9546_vm9 = vcmask 23552  }
0x1617   :  { %v3045_v37 = vadd.f32 %v3043_v6, %v3017_v26  ;;  %v3034_v40 = vsel %vm3033_vm6, %v3031_v2, %v3028_v39  ;;  %v4721_v2 = vmul.f32 -1.442695, %v8226_v24  ;;  %vm9547_vm6 = vmmov %vm9546_vm9 }
0x1618   :  { %v3044_v34 = vadd.f32 %v3034_v40, %v3016_v21 }
0x1619   :  { %3206 = vperm.xlu1 %6029, %v3045_v37  }
0x161a   :  { %3201 = vperm.xlu0 %6028, %v3044_v34  }
0x161d   :  { %6030 = vset.pattern.permute.xlu1 %v9316_v45 }
0x161e   :  { %6031 = vset.pattern.permute.xlu0 %v9316_v45 }
0x1679   :  { %v2828_v5 = vpop.xlane.xlu1 %2827 }
0x167a   :  { %v2832_v0 = vadd.f32 1e-16, %v2828_v5 }
0x167c   :  { %6326 = vrcp.f32 %v2832_v0 }
0x167d   :  { %v2831_v63 = vpop.xlane.xlu0 %2830 }
0x167e   :  { %v2833_v17 = vadd.f32 1e-16, %v2831_v63 }
0x1680   :  { %6328 = vrcp.f32 %v2833_v17 }
0x1681   :  { %v3094_v9 = vpop.xlane.xlu0 %3093 }
0x1682   :  { %vm3100_vm15 = vcmp.eq.f32.partialorder %v3094_v9, inf  ;;  %vm3102_vm3 = vcmp.eq.f32.partialorder %v3094_v9, 0.0 }
0x1689   :  { %v6327_v36 = vpop.eup %6326 }
0x168a   :  { %v8251_v29 = vmul.f32 %v6327_v36, %v8215_v33  ;;  %v8271_v33 = vld [vmem:[%s9281_s1 + $0x18] sm:$0xff] }
0x168c   :  { %5037 = vmatprep.mubr.msk.f32.mxu1 %vm9536_vm12, %v8251_v29  ;;  %vm9548_vm12 = vmmov %vm9544_vm2 }
0x168d   :  { %v6329_v61 = vpop.eup %6328 }
0x168e   :  { %v8255_v3 = vmul.f32 %v6329_v61, %v5649_v52  ;;  %v3097_v52 = vpop.xlane.xlu1 %3096 }
0x168f   :  { %6330 = vrsqrt.f32 %v3097_v52  ;;  %vm3107_vm0 = vcmp.eq.f32.partialorder %v3097_v52, inf  ;;  %v3110_v43 = vand.u32 2147483648, %v3097_v52  ;;  %vm3109_vm4 = vcmp.eq.f32.partialorder %v3097_v52, 0.0 }
0x1690   :  { %5038 = vmatmul.mubr.msk.f32.vlgmr.msra.gmra.mxu1 %vm9537_vm14, %v8255_v3  ;;  %6332 = vrsqrt.f32 %v3094_v9  ;;  %vm9549_vm14 = vmmov %vm9544_vm2 }
0x1691   :  { %5052 = vmatpush3.msra.mxu1 %v8011_v42  ;;  %5053 = vmatprep.mubr.msk.f32.mxu1 %vm9538_vm8, %v8230_v4  ;;  %vm9550_vm8 = vcmask 261120  }
0x1692   :  { %5056 = vmatprep.subr.mxu1 %v7940_v60 }
0x1694   :  { %5054 = vmatmul.mubr.msk.f32.vlgmr.msra.gmra.mxu1 %vm9539_vm1, %v8226_v24  ;;  %v3207_v40 = vpop.permute.xlu1 %3206  ;;  %vm9551_vm1 = vmmov %vm9550_vm8 }
0x1695   :  { %5057 = vmatpush3.msra.mxu1 %v7940_v60  ;;  %v3202_v17 = vpop.permute.xlu0 %3201 }
0x1696   :  { %5058 = vmatprep.subr.mxu1 %v7949_v8 }
0x1697   :  { %5059 = vmatpush3.msra.mxu1 %v7949_v8  ;;  %v3103_v8 = vand.u32 2147483648, %v3094_v9 }
0x1698   :  { %5070 = vmatprep.subr.mxu1 %v8271_v33 }
0x169c   :  { %v6331_v44 = vpop.eup %6330 }
0x169d   :  { %v6333_v25 = vpop.eup %6332  ;;  %v3106_v35 = vmul.f32 %v6331_v44, %v3097_v52  ;;  %v3058_v44 = vsel %vm9542_vm7, %v8230_v4, -inf }
0x169e   :  { %v3099_v60 = vmul.f32 %v6333_v25, %v3094_v9  ;;  %v3061_v25 = vsel %vm9543_vm13, %v8226_v24, -inf }
0x169f   :  { %v3108_v28 = vsel %vm3107_vm0, %v3097_v52, %v3106_v35 }
0x16a0   :  { %v3101_v38 = vsel %vm3100_vm15, %v3094_v9, %v3099_v60  ;;  %v3111_v20 = vsel %vm3109_vm4, %v3110_v43, %v3108_v28 }
0x16a1   :  { %v3104_v59 = vsel %vm3102_vm3, %v3103_v8, %v3101_v38  ;;  %v3113_v30 = vmax.f32 %v3111_v20, 1e-08 }
0x16a2   :  { %v3112_v19 = vmax.f32 %v3104_v59, 1e-08 }
0x16a3   :  { %6334 = vrcp.f32 %v3113_v30 }
0x16a4   :  { %6336 = vrcp.f32 %v3112_v19 }
0x16a5   :  { %6338 = vpow2.f32 %v4720_v13 }
0x16a6   :  { %6340 = vpow2.f32 %v4721_v2 }
0x16b0   :  { %v6335_v12 = vpop.eup %6334 }
0x16b1   :  { %v6337_v37 = vpop.eup %6336 }
0x16b2   :  { %v6339_v5 = vpop.eup %6338 }
0x16b3   :  { %v3052_v52 = vadd.f32 1.0, %v6339_v5  ;;  %v6341_v35 = vpop.eup %6340 }
0x16b4   :  { %v3053_v60 = vadd.f32 1.0, %v6341_v35 }
0x16b5   :  { %6342 = vrcp.f32 %v3052_v52 }
0x16b6   :  { %6344 = vrcp.f32 %v3053_v60 }
0x16c2   :  { %v6343_v43 = vpop.eup %6342 }
0x16c3   :  { %v3245_v28 = vsub.f32 1.0, %v6343_v43  ;;  %v6345_v8 = vpop.eup %6344 }
0x1750   :  { %v8275_v49 = vpop.f32.mrf.mxu1 }
0x1752   :  { %v8277_v27 = vpop.f32.mrf.mxu1 }
0x1754   :  { %v5055_v6 = vpop.f32.mrf.mxu1 }
0x1755   :  { %v3198_v39 = vmul.f32 %v6335_v12, %v5055_v6 }
0x1756   :  { %v3186_v34 = vpop.f32.mrf.mxu1 }
0x1757   :  { %v3197_v0 = vmul.f32 %v6337_v37, %v3186_v34  ;;  %v3210_v63 = vmul.f32 %v3207_v40, %v3198_v39 }
0x1759   :  { %v3209_v36 = vmul.f32 %v3202_v17, %v3197_v0  ;;  %v3214_v61 = vsel %vm9540_vm10, %v3210_v63, -inf  ;;  %v3246_v17 = vsub.f32 1.0, %v6345_v8 }
0x175a   :  { %3215 = vmax.xlane.f32.xlu0 %v3214_v61 }
0x175b   :  { %v3211_v9 = vsel %vm9541_vm11, %v3209_v36, -inf }
0x175c   :  { %3212 = vmax.xlane.f32.xlu1 %v3211_v9 }
0x1760   :  { %3059 = vmax.xlane.f32.xlu1 %v3058_v44 }
0x1764   :  { %3062 = vmax.xlane.f32.xlu1 %v3061_v25 }
0x1770   :  { %3249 = vperm.xlu0 %6031, %v3245_v28  }
0x1774   :  { %6033 = vset.pattern.permute.xlu0 %v9314_v54 }
0x1775   :  { %3235 = vperm.xlu1 %6030, %v6343_v43  }
0x1779   :  { %3240 = vperm.xlu1 %6030, %v6345_v8  }
0x17e3   :  { %v3216_v38 = vpop.xlane.xlu0 %3215 }
0x17e4   :  { %v3218_v20 = vsub.f32 %v3210_v63, %v3216_v38 }
0x17e5   :  { %v3213_v59 = vpop.xlane.xlu1 %3212 }
0x17e6   :  { %v3221_v30 = vmul.f32 1.442695, %v3218_v20  ;;  %v3217_v19 = vsub.f32 %v3209_v36, %v3213_v59 }
0x17e8   :  { %6346 = vpow2.f32 %v3221_v30  ;;  %v3219_v13 = vmul.f32 1.442695, %v3217_v19 }
0x17e9   :  { %v3060_v12 = vpop.xlane.xlu1 %3059 }
0x17ea   :  { %6348 = vpow2.f32 %v3219_v13  ;;  %v3064_v37 = vsub.f32 %v8230_v4, %v3060_v12 }
0x17eb   :  { %v3250_v30 = vpop.permute.xlu0 %3249 }
0x17ec   :  { %v3066_v5 = vmul.f32 1.442695, %v3064_v37  ;;  %v3257_v12 = vmul.f32 %v3250_v30, %v8251_v29 }
0x17ed   :  { %v3063_v34 = vpop.xlane.xlu1 %3062 }
0x17ee   :  { %v3065_v0 = vsub.f32 %v8226_v24, %v3063_v34  ;;  %6350 = vpow2.f32 %v3066_v5  ;;  %v8318_v5 = vld [vmem:[%s9281_s1] sm:$0xff] }
0x17f0   :  { %v3068_v63 = vmul.f32 1.442695, %v3065_v0 }
0x17f1   :  { %v3236_v52 = vpop.permute.xlu1 %3235 }
0x17f2   :  { %6352 = vpow2.f32 %v3068_v63 }
0x17f5   :  { %v6347_v2 = vpop.eup %6346  ;;  %v3241_v9 = vpop.permute.xlu1 %3240 }
0x17f6   :  { %v3226_v6 = vsel %vm9544_vm2, %v6347_v2, 0.0 }
0x17f7   :  { %v6349_v39 = vpop.eup %6348  ;;  %3227 = vadd.xlane.f32.xlu1 %v3226_v6 }
0x17f8   :  { %v3223_v40 = vsel %vm9545_vm5, %v6349_v39, 0.0 }
0x17fb   :  { %3224 = vadd.xlane.f32.xlu1 %v3223_v40  ;;  %v6351_v36 = vpop.eup %6350 }
0x17ff   :  { %v6353_v61 = vpop.eup %6352 }
0x180c   :  { %3254 = vperm.xlu1 %6030, %v3246_v17  }
0x1810   :  { %3072 = vrot.lane.b32.xlu1 %v6351_v36, %s6536_s19 }
0x1811   :  { %6032 = vset.pattern.permute.xlu1 %v9314_v54 }
0x1814   :  { %3074 = vrot.lane.b32.xlu1 %v6353_v61, %s6536_s19 }
0x1880   :  { %v3228_v44 = vpop.xlane.xlu1 %3227 }
0x1881   :  { %6354 = vrcp.f32 %v3228_v44 }
0x1884   :  { %v3225_v25 = vpop.xlane.xlu1 %3224 }
0x1885   :  { %6356 = vrcp.f32 %v3225_v25  ;;  %v3507_v25 = vld [vmem:[#allocation2 + $0x60] sm:$0xff] }
0x1888   :  { %v3255_v35 = vpop.permute.xlu1 %3254 }
0x1889   :  { %v3258_v37 = vmul.f32 %v3255_v35, %v8255_v3  ;;  %v3508_v35 = vld [vmem:[#allocation2 + $0x68] sm:$0xff] }
0x188c   :  { %v3073_v60 = vpop.permute.xlu1 %3072 }
0x188d   :  { %v3078_v43 = vsel %vm9546_vm9, %v3073_v60, 0.0 }
0x188e   :  { %v6355_v28 = vpop.eup %6354  ;;  %3079 = vadd.xlane.f32.xlu1 %v3078_v43 }
0x188f   :  { %v3232_v8 = vmul.f32 %v6355_v28, %v6347_v2  ;;  %v8304_v2 = vld [vmem:[%s9281_s1 + $0x10] sm:$0xff] }
0x1890   :  { %v3075_v38 = vpop.permute.xlu1 %3074 }
0x1891   :  { %v3081_v20 = vsel %vm9547_vm6, %v3075_v38, 0.0  ;;  %v3244_v13 = vmul.f32 %v3241_v9, %v3232_v8 }
0x1892   :  { %v6357_v59 = vpop.eup %6356  ;;  %3082 = vadd.xlane.f32.xlu0 %v3081_v20 }
0x1893   :  { %v3230_v19 = vmul.f32 %v6357_v59, %v6349_v39  ;;  %v3260_v34 = vadd.f32 %v3258_v37, %v3244_v13  ;;  %v8311_v39 = vld [vmem:[%s9281_s1 + $0x8] sm:$0xff] }
0x1895   :  { %v3243_v6 = vmul.f32 %v3236_v52, %v3230_v19 }
0x1897   :  { %v3259_v40 = vadd.f32 %v3257_v12, %v3243_v6 }
0x1899   :  { %5060 = vmatprep.mubr.msk.f32.mxu1 %vm9548_vm12, %v3259_v40 }
0x189a   :  { %5061 = vmatmul.mubr.msk.f32.vlgmr.msra.gmra.mxu1 %vm9549_vm14, %v3260_v34 }
0x189b   :  { %5071 = vmatpush3.msra.mxu1 %v8271_v33  ;;  %5078 = vmatprep.mubr.msk.f32.mxu1 %vm9550_vm8, %v3507_v25 }
0x189c   :  { %5072 = vmatprep.subr.mxu1 %v8304_v2 }
0x189d   :  { %5073 = vmatpush3.msra.mxu1 %v8304_v2 }
0x189e   :  { %5074 = vmatprep.subr.mxu1 %v8311_v39 }
0x189f   :  { %5075 = vmatpush3.msra.mxu1 %v8311_v39 }
0x18a0   :  { %5076 = vmatprep.subr.mxu1 %v8318_v5 }
0x18a1   :  { %5077 = vmatpush3.msra.mxu1 %v8318_v5 }
0x18a2   :  { %5093 = vmatprep.subr.mxu1 %v7990_v55  ;;  %5079 = vmatmul.mubr.msk.f32.vlgmr.msra.gmra.mxu1 %vm9551_vm1, %v3508_v35 }
0x18a3   :  { %5094 = vmatpush3.msra.mxu1 %v7990_v55  ;;  %v3088_v55 = vadd.f32 1.0, %v3016_v21 }
0x18a4   :  { %5095 = vmatprep.subr.mxu1 %v8004_v32 }
0x18a5   :  { %5096 = vmatpush3.msra.mxu1 %v8004_v32  ;;  %v3089_v32 = vadd.f32 1.0, %v3017_v26 }
0x18a6   :  { %5111 = vmatprep.subr.mxu1 %v8011_v42 }
0x1917   :  { %v3080_v0 = vpop.xlane.xlu1 %3079 }
0x1918   :  { %6358 = vrcp.f32 %v3080_v0 }
0x191b   :  { %v3083_v63 = vpop.xlane.xlu0 %3082 }
0x191c   :  { %6360 = vrcp.f32 %v3083_v63 }
0x1925   :  { %v6359_v17 = vpop.eup %6358 }
0x1926   :  { %v3085_v52 = vmul.f32 %v6359_v17, %v6351_v36 }
0x1928   :  { %3367 = vperm.xlu1 %6032, %v3085_v52  }
0x1929   :  { %v6361_v9 = vpop.eup %6360 }
0x192a   :  { %v3087_v44 = vmul.f32 %v6361_v9, %v6353_v61 }
0x192c   :  { %3371 = vperm.xlu0 %6033, %v3087_v44   ;;  %6034 = vset.pattern.permute.xlu1 %v6539_v22 }
0x192d   :  { %3344 = vperm.xlu1 %6034, %v3085_v52  }
0x1930   :  { %6040 = vset.pattern.permute.xlu0 %v6534_v7 }
0x1931   :  { %6035 = vset.pattern.permute.xlu1 %v6540_v23 }
0x1932   :  { %3355 = vperm.xlu1 %6035, %v3085_v52  }
0x1936   :  { %6036 = vset.pattern.permute.xlu1 %v6539_v22 }
0x1937   :  { %3349 = vperm.xlu1 %6036, %v3087_v44  }
0x193b   :  { %6037 = vset.pattern.permute.xlu1 %v6540_v23 }
0x193c   :  { %3359 = vperm.xlu1 %6037, %v3087_v44  }
0x1940   :  { %6038 = vset.pattern.permute.xlu1 %v6538_v18 }
0x195a   :  { %v5062_v36 = vpop.f32.mrf.mxu1 }
0x195c   :  { %v3333_v61 = vpop.f32.mrf.mxu1 }
0x19a3   :  { %v3368_v60 = vpop.permute.xlu1 %3367 }
0x19a4   :  { %v3374_v43 = vmul.f32 %v3368_v60, %v3333_v61 }
0x19a6   :  { %3378 = vrot.lane.b32.xlu1 %v3374_v43, %s6541_s6 }
0x19a7   :  { %v3372_v28 = vpop.permute.xlu0 %3371 }
0x19a8   :  { %v3375_v8 = vmul.f32 %v5062_v36, %v3372_v28  ;;  %v3345_v42 = vpop.permute.xlu1 %3344 }
0x19a9   :  { %v3352_v19 = vmul.f32 %v3345_v42, %v3333_v61 }
0x19aa   :  { %3380 = vrot.lane.b32.xlu1 %v3375_v8, %s6541_s6 }
0x19ad   :  { %v3356_v38 = vpop.permute.xlu1 %3355 }
0x19ae   :  { %3390 = vperm.xlu1 %6038, %v3088_v55   ;;  %v3362_v59 = vmul.f32 %v3356_v38, %v3259_v40 }
0x19b0   :  { %v3364_v12 = vadd.f32 %v3362_v59, %v3352_v19 }
0x19b2   :  { %3395 = vperm.xlu1 %6038, %v3089_v32   ;;  %v3350_v20 = vpop.permute.xlu1 %3349 }
0x19b3   :  { %v3353_v37 = vmul.f32 %v5062_v36, %v3350_v20 }
0x19b6   :  { %6039 = vset.pattern.permute.xlu1 %v6534_v7 }
0x19b7   :  { %v3360_v30 = vpop.permute.xlu1 %3359 }
0x19b8   :  { %v3363_v13 = vmul.f32 %v3360_v30, %v3260_v34 }
0x19ba   :  { %v3365_v21 = vadd.f32 %v3363_v13, %v3353_v37 }
0x1a18   :  { %v3379_v6 = vpop.permute.xlu1 %3378 }
0x1a19   :  { %v3384_v0 = vadd.f32 %v3379_v6, %v3364_v12  ;;  %v5080_v6 = vpop.f32.mrf.mxu1 }
0x1a1b   :  { %v8342_v4 = vadd.f32 1e-16, %v3384_v0 }
0x1a1c   :  { %v3381_v63 = vpop.permute.xlu1 %3380 }
0x1a1d   :  { %v3385_v24 = vadd.f32 %v3381_v63, %v3365_v21  ;;  %v8345_v26 = vand.u32 2147483647, %v8342_v4  ;;  %vm9313_vm10 = vcmp.eq.f32.partialorder %v8342_v4, 0 }
0x1a1f   :  { %v8347_v17 = vadd.f32 1e-16, %v3385_v24  ;;  %6362 = vlog2.f32 %v8345_v26  ;;  %vm5674_vm11 = vcmp.gt.f32.partialorder %v8345_v26, 1065353216 }
0x1a21   :  { %v8351_v40 = vand.u32 2147483647, %v8347_v17 }
0x1a23   :  { %6364 = vlog2.f32 %v8351_v40 }
0x1a29   :  { %v8354_v34 = vpop.permute.xlu1 %3390 }
0x1a2a   :  { %v8357_v52 = vand.u32 2147483647, %v8354_v34  ;;  %v5659_v9 = vtrunc.f32 %v8354_v34  ;;  %vm5658_vm15 = vcmp.lt.f32.partialorder %v8354_v34, 0 }
0x1a2b   :  { %vm8382_vm7 = vmand %vm5658_vm15, %vm9313_vm10  ;;  %v5690_v37 = vsel %vm5658_vm15, 0, %v6542_v16  ;;  %v5678_v63 = vsel %vm5658_vm15, 2139095040, %v6543_v10 }
0x1a2c   :  { %v6363_v44 = vpop.eup %6362  ;;  %vm9312_vm0 = vcmp.eq.f32.partialorder %v8357_v52, 2139095040  ;;  %v5663_v25 = vtrunc.f32 %v8357_v52  ;;  %vm5660_vm4 = vcmp.ne.f32.partialorder %v8354_v34, %v5659_v9  ;;  %vm8389_vm13 = vmxor %vm5658_vm15, %vm5674_vm11  ;;  %vm5662_vm14 = vcmp.lt.f32.partialorder %v8357_v52, 1266679808 }
0x1a2d   :  { %v8362_v35 = vpop.permute.xlu1 %3395  ;;  %v5652_v36 = vmul.f32 %v6363_v44, %v8354_v34  ;;  %vm8372_vm3 = vmor %vm5660_vm4, %vm9312_vm0  ;;  %vm9311_vm4 = vcmp.lt.f32.partialorder %v8342_v4, 0  ;;  %vm5726_vm0 = vcmp.gt.f32.partialorder %v8351_v40, 1065353216 }
0x1a2e   :  { %v5664_v61 = vcvt.f32.s32 %v5663_v25  ;;  %v8368_v60 = vand.u32 2147483647, %v8362_v35  ;;  %v5711_v32 = vtrunc.f32 %v8362_v35  ;;  %vm5667_vm5 = vmneg %vm8372_vm3  ;;  %v5691_v25 = vxor.u32 2147483648, %v5690_v37 }
0x1a2f   :  { %6366 = vpow2.f32 %v5652_v36  ;;  %vm5685_vm8 = vmor %vm8382_vm7, %vm8389_vm13  ;;  %vm5722_vm13 = vcmp.lt.f32.partialorder %v8347_v17, 0  ;;  %v3581_v36 = vpop.f32.mrf.mxu1 }
0x1a30   :  { %v6365_v28 = vpop.eup %6364  ;;  %v5665_v8 = vand.u32 1, %v5664_v61  ;;  %v5715_v20 = vtrunc.f32 %v8368_v60  ;;  %vm9310_vm6 = vcmp.eq.f32.partialorder %v8368_v60, 2139095040  ;;  %vm5712_vm12 = vcmp.ne.f32.partialorder %v8362_v35, %v5711_v32 }
0x1a31   :  { %v5704_v38 = vmul.f32 %v6365_v28, %v8362_v35  ;;  %vm8411_vm11 = vmor %vm5712_vm12, %vm9310_vm6  ;;  %vm5710_vm12 = vcmp.lt.f32.partialorder %v8362_v35, 0  ;;  %v5686_v44 = vsel %vm5685_vm8, 2139095040, %v6543_v10  ;;  %vm5714_vm15 = vcmp.lt.f32.partialorder %v8368_v60, 1266679808 }
0x1a32   :  { %vm5666_vm2 = vcmp.eq.s32.totalorder %v5665_v8, 1  ;;  %v5716_v59 = vcvt.f32.s32 %v5715_v20  ;;  %vm5719_vm6 = vmneg %vm8411_vm11  ;;  %v5742_v28 = vsel %vm5710_vm12, 0, %v6542_v16 }
0x1a33   :  { %vm5668_vm9 = vmand %vm5666_vm2, %vm5667_vm5  ;;  %6368 = vpow2.f32 %v5704_v38  ;;  %vm5673_vm2 = vcmp.lt.s32.totalorder %v8342_v4, 0 }
0x1a34   :  { %v5717_v30 = vand.u32 1, %v5716_v59  ;;  %vm8404_vm1 = vmand %vm5662_vm14, %vm5668_vm9  ;;  %v5730_v59 = vsel %vm5710_vm12, 2139095040, %v6543_v10 }
0x1a35   :  { %vm8420_vm5 = vmand %vm9311_vm4, %vm8372_vm3  ;;  %vm5723_vm4 = vcmp.eq.f32.partialorder %v8347_v17, 0  ;;  %v5692_v55 = vsel %vm8404_vm1, %v5691_v25, %v5690_v37 }
0x1a36   :  { %vm5718_vm9 = vcmp.eq.s32.totalorder %v5717_v30, 1  ;;  %vm8426_vm14 = vmand %vm5673_vm2, %vm8404_vm1  ;;  %vm5695_vm2 = vcmp.ne.f32.partialorder %v8342_v4, %v8342_v4  ;;  %v5743_v30 = vxor.u32 2147483648, %v5742_v28 }
0x1a37   :  { %vm8436_vm3 = vmand %vm5718_vm9, %vm5719_vm6  ;;  %vm9572_vm9 = vcmp.eq.f32.partialorder %v8342_v4, 0 }
0x1a38   :  { %vm8450_vm10 = vmand %vm5710_vm12, %vm5723_vm4 }
0x1a39   :  { %vm8465_vm6 = vmxor %vm5710_vm12, %vm5726_vm0  ;;  %vm5696_vm0 = vcmp.ne.f32.partialorder %v8354_v34, %v8354_v34 }
0x1a3a   :  { %vm8476_vm7 = vmand %vm5714_vm15, %vm8436_vm3  ;;  %vm5656_vm3 = vcmp.eq.f32.partialorder %v8354_v34, 0  ;;  %vm5675_vm15 = vcmp.eq.f32.partialorder %v8345_v26, 2139095040 }
0x1a3b   :  { %vm5737_vm8 = vmor %vm8450_vm10, %vm8465_vm6  ;;  %vm9575_vm10 = vcmp.eq.f32.partialorder %v8357_v52, 2139095040  ;;  %vm9576_vm6 = vcmp.lt.f32.partialorder %v8342_v4, 0 }
0x1a3c   :  { %v6367_v21 = vpop.eup %6366  ;;  %vm5728_vm1 = vmand %vm5722_vm13, %vm8411_vm11  ;;  %v5693_v19 = vsel %vm9576_vm6, %v5692_v55, %v5690_v37  ;;  %v5738_v12 = vsel %vm5737_vm8, 2139095040, %v6543_v10  ;;  %v5744_v37 = vsel %vm8476_vm7, %v5743_v30, %v5742_v28  ;;  %vm5748_vm8 = vcmp.ne.f32.partialorder %v8362_v35, %v8362_v35 }
0x1a3d   :  { %v5677_v9 = vsel %vm8420_vm5, 2143289344, %v6367_v21  ;;  %vm5687_vm5 = vcmp.eq.f32.partialorder %v8342_v4, 3212836864  ;;  %vm5697_vm11 = vmor %vm5695_vm2, %vm5696_vm0  ;;  %vm5657_vm2 = vcmp.eq.f32.partialorder %v8354_v34, 1065353216  ;;  %vm5747_vm0 = vcmp.ne.f32.partialorder %v8347_v17, %v8347_v17 }
0x1a3e   :  { %v5679_v61 = vsel %vm9572_vm9, %v5678_v63, %v5677_v9  ;;  %v5688_v42 = vsel %vm5687_vm5, 1065353216, %v5686_v44  ;;  %vm5725_vm9 = vcmp.lt.s32.totalorder %v8347_v17, 0  ;;  %vm5739_vm5 = vcmp.eq.f32.partialorder %v8347_v17, 3212836864 }
0x1a3f   :  { %v5681_v8 = vxor.u32 2147483648, %v5679_v61  ;;  %v5740_v9 = vsel %vm5739_vm5, 1065353216, %v5738_v12  ;;  %v5745_v25 = vsel %vm5722_vm13, %v5744_v37, %v5742_v28  ;;  %vm5709_vm13 = vcmp.eq.f32.partialorder %v8362_v35, 1065353216 }
0x1a40   :  { %v6369_v32 = vpop.eup %6368 }
0x1a41   :  { %v5682_v38 = vsel %vm8426_vm14, %v5681_v8, %v5679_v61  ;;  %v5729_v20 = vsel %vm5728_vm1, 2143289344, %v6369_v32  ;;  %vm9577_vm14 = vcmp.eq.f32.partialorder %v8342_v4, 1065353216  ;;  %vm9578_vm1 = vcmp.eq.f32.partialorder %v8368_v60, 2139095040 }
0x1a42   :  { %v5689_v26 = vsel %vm9575_vm10, %v5688_v42, %v5682_v38  ;;  %v5731_v13 = vsel %vm5723_vm4, %v5730_v59, %v5729_v20  ;;  %vm5699_vm12 = vmor %vm9577_vm14, %vm5656_vm3  ;;  %vm5708_vm3 = vcmp.eq.f32.partialorder %v8362_v35, 0  ;;  %vm9581_vm14 = vcmask 64512  }
0x1a43   :  { %v5694_v0 = vsel %vm5675_vm15, %v5693_v19, %v5689_v26  ;;  %v5733_v52 = vxor.u32 2147483648, %v5731_v13  ;;  %vm5732_vm4 = vmand %vm5725_vm9, %vm8476_vm7  ;;  %vm5727_vm15 = vcmp.eq.f32.partialorder %v8351_v40, 2139095040  ;;  %vm9579_vm7 = vcmask 130048  }
0x1a44   :  { %v5698_v21 = vsel %vm5697_vm11, 2143289344, %v5694_v0  ;;  %vm5724_vm9 = vcmp.eq.f32.partialorder %v8347_v17, 1065353216  ;;  %vm5749_vm10 = vmor %vm5747_vm0, %vm5748_vm8 }
0x1a45   :  { %v5700_v63 = vsel %vm5699_vm12, 1065353216, %v5698_v21  ;;  %v5734_v24 = vsel %vm5732_vm4, %v5733_v52, %v5731_v13  ;;  %vm5751_vm6 = vmor %vm5724_vm9, %vm5708_vm3 }
0x1a46   :  { %v8535_v44 = vsel %vm5657_vm2, %v8342_v4, %v5700_v63  ;;  %v5741_v34 = vsel %vm9578_vm1, %v5740_v9, %v5734_v24  ;;  %v8548_v4 = vld [vmem:[%s9282_s2] ss:$0 sm:$0xff]  ;;  %vm9580_vm11 = vmmov %vm9579_vm7 }
0x1a47   :  { %v3400_v61 = vsel %vm9579_vm7, %v8535_v44, 0.0  ;;  %v5746_v43 = vsel %vm5727_vm15, %v5745_v25, %v5741_v34  ;;  %v8551_v40 = vadd.f32 %v8548_v4, %v5080_v6  ;;  %v8555_v28 = vadd.f32 %v8548_v4, %v3581_v36  ;;  %vm9582_vm12 = vmmov %vm9581_vm14 }
0x1a48   :  { %3401 = vadd.xlane.f32.xlu1 %v3400_v61  ;;  %v5750_v8 = vsel %vm5749_vm10, 2143289344, %v5746_v43  ;;  %vm9583_vm4 = vmmov %vm9579_vm7 }
0x1a49   :  { %v5752_v60 = vsel %vm5751_vm6, 1065353216, %v5750_v8  ;;  %v3593_v42 = vand.u32 2147483647, %v8551_v40  ;;  %v3592_v38 = vand.u32 2147483647, %v8555_v28  ;;  %v3665_v35 = vmul.f32 %v8551_v40, %v8551_v40  ;;  %vm9584_vm0 = vmmov %vm9583_vm4 }
0x1a4a   :  { %v5753_v55 = vsel %vm5709_vm13, %v8347_v17, %v5752_v60  ;;  %v3664_v19 = vmul.f32 %v8555_v28, %v8555_v28  ;;  %v3590_v61 = vmax.f32 %v8555_v28, 0.0  ;;  %vm9585_vm8 = vmmov %vm9582_vm12  ;;  %vm9589_vm13 = vcmask 105552  }
0x1a4b   :  { %v3403_v32 = vsel %vm9580_vm11, %v5753_v55, 0.0  ;;  %v3595_v20 = vsub.f32 0.0, %v3593_v42  ;;  %v3594_v59 = vsub.f32 0.0, %v3592_v38  ;;  %v3669_v17 = vsel %vm9581_vm14, %v3665_v35, 0.0  ;;  %vm9586_vm3 = vmmov %vm9585_vm8 }
0x1a4c   :  { %3404 = vadd.xlane.f32.xlu0 %v3403_v32  ;;  %v3666_v13 = vsel %vm9582_vm12, %v3664_v19, 0.0  ;;  %v3591_v32 = vmax.f32 %v8551_v40, 0.0  ;;  %vm9587_vm10 = vmmov %vm9584_vm0 }
0x1a4d   :  { %v3598_v30 = vmul.f32 1.442695, %v3595_v20  ;;  %v3596_v26 = vmul.f32 1.442695, %v3594_v59  ;;  %3667 = vadd.xlane.f32.xlu1 %v3666_v13  ;;  %vm9588_vm6 = vmmov %vm9584_vm0 }
0x1a4e   :  { %vm9590_vm11 = vmmov %vm9589_vm13 }
0x1a4f   :  { %6370 = vpow2.f32 %v3598_v30  ;;  %vm9591_vm14 = vmmov %vm9584_vm0 }
0x1a50   :  { %6372 = vpow2.f32 %v3596_v26  ;;  %3670 = vadd.xlane.f32.xlu0 %v3669_v17  ;;  %vm9592_vm12 = vmmov %vm9584_vm0 }
0x1a5c   :  { %v6371_v12 = vpop.eup %6370 }
0x1a5d   :  { %v6373_v6 = vpop.eup %6372  ;;  %v3609_v52 = vadd.f32 1.0, %v6371_v12  ;;  %v3612_v21 = vmul.f32 -0.5, %v6371_v12  ;;  %v3615_v34 = vand.u32 2147483647, %v6371_v12 }
0x1a5e   :  { %v3600_v0 = vadd.f32 1.0, %v6373_v6  ;;  %v3603_v37 = vmul.f32 -0.5, %v6373_v6  ;;  %v3606_v24 = vand.u32 2147483647, %v6373_v6 }
0x1a5f   :  { %v3613_v9 = vadd.f32 1.0, %v3612_v21  ;;  %vm3616_vm2 = vcmp.lt.f32.partialorder %v3615_v34, 0.0004427343 }
0x1a60   :  { %6374 = vlog2.f32 %v3600_v0  ;;  %v3604_v63 = vadd.f32 1.0, %v3603_v37  ;;  %vm3607_vm5 = vcmp.lt.f32.partialorder %v3606_v24, 0.0004427343 }
0x1a61   :  { %6376 = vlog2.f32 %v3609_v52  ;;  %v3614_v8 = vmul.f32 %v6371_v12, %v3613_v9  ;;  %v8587_v52 = vld [vmem:[%s9284_s4] sm:$0xff] }
0x1a62   :  { %v3605_v25 = vmul.f32 %v6373_v6, %v3604_v63 }
0x1a6d   :  { %v6375_v36 = vpop.eup %6374 }
0x1a6e   :  { %v3602_v43 = vmul.f32 0.6931472, %v6375_v36  ;;  %v6377_v60 = vpop.eup %6376 }
0x1a6f   :  { %v3611_v38 = vmul.f32 0.6931472, %v6377_v60 }
0x1a70   :  { %v3608_v42 = vsel %vm3607_vm5, %v3605_v25, %v3602_v43  ;;  %vm9593_vm5 = vcmask 23552  }
0x1a71   :  { %v3618_v20 = vadd.f32 %v3608_v42, %v3590_v61  ;;  %v3617_v59 = vsel %vm3616_vm2, %v3614_v8, %v3611_v38  ;;  %vm9594_vm2 = vmmov %vm9593_vm5 }
0x1a72   :  { %v3619_v30 = vadd.f32 %v3617_v59, %v3591_v32  ;;  %v4732_v59 = vmul.f32 -1.442695, %v8555_v28 }
0x1a73   :  { %3775 = vperm.xlu1 %6039, %v3618_v20  }
0x1a74   :  { %3780 = vperm.xlu0 %6040, %v3619_v30  }
0x1a77   :  { %6041 = vset.pattern.permute.xlu1 %v9316_v45 }
0x1a78   :  { %6042 = vset.pattern.permute.xlu0 %v9316_v45 }
0x1ad1   :  { %v3402_v26 = vpop.xlane.xlu1 %3401 }
0x1ad2   :  { %v3406_v35 = vadd.f32 1e-16, %v3402_v26 }
0x1ad4   :  { %6378 = vrcp.f32 %v3406_v35  ;;  %v4733_v35 = vmul.f32 -1.442695, %v8551_v40 }
0x1ad5   :  { %v3405_v19 = vpop.xlane.xlu0 %3404 }
0x1ad6   :  { %v3407_v17 = vadd.f32 1e-16, %v3405_v19  ;;  %v3668_v21 = vpop.xlane.xlu1 %3667 }
0x1ad7   :  { %vm3674_vm1 = vcmp.eq.f32.partialorder %v3668_v21, inf  ;;  %v3677_v43 = vand.u32 2147483648, %v3668_v21  ;;  %vm3676_vm9 = vcmp.eq.f32.partialorder %v3668_v21, 0.0 }
0x1ad8   :  { %6380 = vrcp.f32 %v3407_v17 }
0x1ad9   :  { %v3671_v37 = vpop.xlane.xlu0 %3670 }
0x1ada   :  { %6382 = vrsqrt.f32 %v3671_v37  ;;  %vm3681_vm15 = vcmp.eq.f32.partialorder %v3671_v37, inf  ;;  %v3684_v25 = vand.u32 2147483648, %v3671_v37  ;;  %vm3683_vm7 = vcmp.eq.f32.partialorder %v3671_v37, 0.0 }
0x1adb   :  { %6384 = vrsqrt.f32 %v3668_v21 }
0x1ae1   :  { %v6379_v13 = vpop.eup %6378 }
0x1ae2   :  { %v8576_v12 = vmul.f32 %v6379_v13, %v8535_v44  ;;  %v8595_v44 = vld [vmem:[%s9285_s5 + $0x8] sm:$0xff] }
0x1ae4   :  { %5067 = vmatprep.mubr.msk.f32.mxu0 %vm9583_vm4, %v8576_v12  ;;  %vm9595_vm4 = vmmov %vm9584_vm0 }
0x1ae5   :  { %v6381_v6 = vpop.eup %6380 }
0x1ae6   :  { %v8580_v0 = vmul.f32 %v6381_v6, %v5753_v55  ;;  %v8604_v55 = vld [vmem:[%s9285_s5] sm:$0xff] }
0x1ae7   :  { %v6383_v63 = vpop.eup %6382 }
0x1ae8   :  { %5068 = vmatmul.mubr.msk.f32.vlgmr.msra.gmra.mxu0 %vm9584_vm0, %v8580_v0  ;;  %v6385_v24 = vpop.eup %6384  ;;  %v3680_v9 = vmul.f32 %v6383_v63, %v3671_v37 }
0x1ae9   :  { %5082 = vmatpush3.msra.mxu0 %v8587_v52  ;;  %5083 = vmatprep.mubr.msk.f32.mxu0 %vm9585_vm8, %v8555_v28  ;;  %v3673_v34 = vmul.f32 %v6385_v24, %v3668_v21  ;;  %vm9596_vm8 = vcmask 261120  }
0x1aea   :  { %5086 = vmatprep.subr.mxu0 %v8595_v44  ;;  %v3682_v36 = vsel %vm3681_vm15, %v3671_v37, %v3680_v9 }
0x1aeb   :  { %v3675_v8 = vsel %vm3674_vm1, %v3668_v21, %v3673_v34  ;;  %v3685_v60 = vsel %vm3683_vm7, %v3684_v25, %v3682_v36 }
0x1aec   :  { %5084 = vmatmul.mubr.msk.f32.vlgmr.msra.gmra.mxu0 %vm9586_vm3, %v8551_v40  ;;  %v3678_v42 = vsel %vm3676_vm9, %v3677_v43, %v3675_v8  ;;  %v3687_v38 = vmax.f32 %v3685_v60, 1e-08  ;;  %v3632_v60 = vsel %vm9589_vm13, %v8555_v28, -inf  ;;  %vm9597_vm3 = vmmov %vm9596_vm8 }
0x1aed   :  { %5087 = vmatpush3.msra.mxu0 %v8595_v44  ;;  %v3686_v20 = vmax.f32 %v3678_v42, 1e-08  ;;  %v3635_v42 = vsel %vm9590_vm11, %v8551_v40, -inf }
0x1aee   :  { %5088 = vmatprep.subr.mxu0 %v8604_v55  ;;  %6386 = vrcp.f32 %v3687_v38  ;;  %v3776_v34 = vpop.permute.xlu1 %3775 }
0x1aef   :  { %5089 = vmatpush3.msra.mxu0 %v8604_v55  ;;  %6388 = vrcp.f32 %v3686_v20  ;;  %v3781_v37 = vpop.permute.xlu0 %3780 }
0x1af0   :  { %5100 = vmatprep.subr.mxu0 %v8271_v33  ;;  %6390 = vpow2.f32 %v4732_v59 }
0x1af1   :  { %6392 = vpow2.f32 %v4733_v35 }
0x1afb   :  { %v6387_v19 = vpop.eup %6386 }
0x1afc   :  { %v6389_v6 = vpop.eup %6388 }
0x1afd   :  { %v6391_v63 = vpop.eup %6390 }
0x1afe   :  { %v3626_v43 = vadd.f32 1.0, %v6391_v63  ;;  %v6393_v38 = vpop.eup %6392 }
0x1aff   :  { %v3627_v20 = vadd.f32 1.0, %v6393_v38 }
0x1b00   :  { %6394 = vrcp.f32 %v3626_v43 }
0x1b01   :  { %6396 = vrcp.f32 %v3627_v20 }
0x1b0d   :  { %v6395_v59 = vpop.eup %6394 }
0x1b0e   :  { %v3819_v35 = vsub.f32 1.0, %v6395_v59 }
0x1ba8   :  { %v8610_v30 = vpop.f32.mrf.mxu0 }
0x1baa   :  { %v8612_v26 = vpop.f32.mrf.mxu0 }
0x1bac   :  { %v5085_v17 = vpop.f32.mrf.mxu0 }
0x1bad   :  { %v3772_v13 = vmul.f32 %v6387_v19, %v5085_v17  ;;  %v6397_v19 = vpop.eup %6396 }
0x1bae   :  { %v3760_v21 = vpop.f32.mrf.mxu0  ;;  %v3820_v20 = vsub.f32 1.0, %v6397_v19 }
0x1baf   :  { %v3784_v24 = vmul.f32 %v3781_v37, %v3772_v13  ;;  %v3771_v9 = vmul.f32 %v6389_v6, %v3760_v21 }
0x1bb1   :  { %v3783_v25 = vmul.f32 %v3776_v34, %v3771_v9  ;;  %v3788_v36 = vsel %vm9587_vm10, %v3784_v24, -inf }
0x1bb2   :  { %3789 = vmax.xlane.f32.xlu0 %v3788_v36 }
0x1bb3   :  { %v3785_v8 = vsel %vm9588_vm6, %v3783_v25, -inf }
0x1bb4   :  { %3786 = vmax.xlane.f32.xlu1 %v3785_v8 }
0x1bb8   :  { %3633 = vmax.xlane.f32.xlu1 %v3632_v60 }
0x1bbc   :  { %3636 = vmax.xlane.f32.xlu1 %v3635_v42 }
0x1bc8   :  { %3823 = vperm.xlu0 %6042, %v3819_v35  }
0x1bcc   :  { %6044 = vset.pattern.permute.xlu0 %v9314_v54 }
0x1bcd   :  { %3809 = vperm.xlu1 %6041, %v6395_v59  }
0x1bd1   :  { %3814 = vperm.xlu1 %6041, %v6397_v19  }
0x1c3b   :  { %v3790_v17 = vpop.xlane.xlu0 %3789 }
0x1c3c   :  { %v3792_v13 = vsub.f32 %v3784_v24, %v3790_v17 }
0x1c3d   :  { %v3787_v6 = vpop.xlane.xlu1 %3786 }
0x1c3e   :  { %v3795_v37 = vmul.f32 1.442695, %v3792_v13  ;;  %v3791_v21 = vsub.f32 %v3783_v25, %v3787_v6 }
0x1c40   :  { %6398 = vpow2.f32 %v3795_v37  ;;  %v3793_v63 = vmul.f32 1.442695, %v3791_v21 }
0x1c41   :  { %v3634_v34 = vpop.xlane.xlu1 %3633 }
0x1c42   :  { %6400 = vpow2.f32 %v3793_v63  ;;  %v3638_v8 = vsub.f32 %v8555_v28, %v3634_v34 }
0x1c44   :  { %v3640_v38 = vmul.f32 1.442695, %v3638_v8 }
0x1c45   :  { %v3637_v42 = vpop.xlane.xlu1 %3636 }
0x1c46   :  { %v3639_v24 = vsub.f32 %v8551_v40, %v3637_v42  ;;  %6402 = vpow2.f32 %v3640_v38  ;;  %v3824_v38 = vpop.permute.xlu0 %3823 }
0x1c48   :  { %v3642_v25 = vmul.f32 1.442695, %v3639_v24 }
0x1c49   :  { %v3810_v17 = vpop.permute.xlu1 %3809 }
0x1c4a   :  { %6404 = vpow2.f32 %v3642_v25 }
0x1c4d   :  { %v6399_v9 = vpop.eup %6398  ;;  %v3815_v13 = vpop.permute.xlu1 %3814 }
0x1c4e   :  { %v3800_v36 = vsel %vm9591_vm14, %v6399_v9, 0.0 }
0x1c4f   :  { %v6401_v43 = vpop.eup %6400  ;;  %3801 = vadd.xlane.f32.xlu1 %v3800_v36 }
0x1c50   :  { %v3797_v60 = vsel %vm9592_vm12, %v6401_v43, 0.0 }
0x1c53   :  { %3798 = vadd.xlane.f32.xlu1 %v3797_v60  ;;  %v6403_v59 = vpop.eup %6402 }
0x1c57   :  { %v6405_v35 = vpop.eup %6404 }
0x1c64   :  { %3828 = vperm.xlu1 %6041, %v3820_v20   ;;  %v3831_v20 = vmul.f32 %v3824_v38, %v8576_v12 }
0x1c68   :  { %3646 = vrot.lane.b32.xlu1 %v6403_v59, %s6536_s19 }
0x1c69   :  { %6043 = vset.pattern.permute.xlu1 %v9314_v54 }
0x1c6c   :  { %3648 = vrot.lane.b32.xlu1 %v6405_v35, %s6536_s19 }
0x1cd8   :  { %v3802_v6 = vpop.xlane.xlu1 %3801 }
0x1cd9   :  { %6406 = vrcp.f32 %v3802_v6 }
0x1cdc   :  { %v3799_v37 = vpop.xlane.xlu1 %3798 }
0x1cdd   :  { %6408 = vrcp.f32 %v3799_v37 }
0x1ce0   :  { %v3829_v21 = vpop.permute.xlu1 %3828 }
0x1ce1   :  { %v3832_v37 = vmul.f32 %v3829_v21, %v8580_v0 }
0x1ce4   :  { %v3647_v63 = vpop.permute.xlu1 %3646 }
0x1ce5   :  { %v3652_v34 = vsel %vm9593_vm5, %v3647_v63, 0.0 }
0x1ce6   :  { %v6407_v19 = vpop.eup %6406  ;;  %3653 = vadd.xlane.f32.xlu1 %v3652_v34 }
0x1ce7   :  { %v3806_v36 = vmul.f32 %v6407_v19, %v6399_v9  ;;  %v6507_v9 = vld [vmem:[%s9283_s3 + $0x8] sm:$0xff] }
0x1ce8   :  { %v3649_v8 = vpop.permute.xlu1 %3648 }
0x1ce9   :  { %v3655_v60 = vsel %vm9594_vm2, %v3649_v8, 0.0  ;;  %v3818_v25 = vmul.f32 %v3815_v13, %v3806_v36 }
0x1cea   :  { %v6409_v42 = vpop.eup %6408  ;;  %3656 = vadd.xlane.f32.xlu0 %v3655_v60  ;;  %v3662_v60 = vadd.f32 1.0, %v3590_v61 }
0x1ceb   :  { %v3804_v24 = vmul.f32 %v6409_v42, %v6401_v43  ;;  %v3834_v45 = vadd.f32 %v3832_v37, %v3818_v25  ;;  %v3663_v42 = vadd.f32 1.0, %v3591_v32 }
0x1ced   :  { %v3817_v6 = vmul.f32 %v3810_v17, %v3804_v24 }
0x1cef   :  { %v3833_v54 = vadd.f32 %v3831_v20, %v3817_v6 }
0x1cf1   :  { %5090 = vmatprep.mubr.msk.f32.mxu0 %vm9595_vm4, %v3833_v54 }
0x1cf2   :  { %5091 = vmatmul.mubr.msk.f32.vlgmr.msra.gmra.mxu0 %vm9584_vm0, %v3834_v45 }
0x1cf3   :  { %5101 = vmatpush3.msra.mxu0 %v8271_v33 }
0x1cf4   :  { %5102 = vmatprep.subr.mxu0 %v8304_v2 }
0x1cf5   :  { %5103 = vmatpush3.msra.mxu0 %v8304_v2 }
0x1cf6   :  { %5104 = vmatprep.subr.mxu0 %v8311_v39 }
0x1cf7   :  { %5105 = vmatpush3.msra.mxu0 %v8311_v39  ;;  %v4081_v39 = vld [vmem:[#allocation2 + $0x70] sm:$0xff] }
0x1cf8   :  { %5106 = vmatprep.subr.mxu0 %v8318_v5  ;;  %5108 = vmatprep.mubr.msk.f32.mxu0 %vm9596_vm8, %v4081_v39 }
0x1cf9   :  { %5107 = vmatpush3.msra.mxu0 %v8318_v5  ;;  %v4082_v5 = vld [vmem:[#allocation2 + $0x78] sm:$0xff] }
0x1cfa   :  { %5123 = vmatprep.subr.mxu0 %v6507_v9  ;;  %5109 = vmatmul.mubr.msk.f32.vlgmr.msra.gmra.mxu0 %vm9597_vm3, %v4082_v5 }
0x1cfb   :  { %5124 = vmatpush3.msra.mxu0 %v6507_v9 }
0x1d6f   :  { %v3654_v43 = vpop.xlane.xlu1 %3653 }
0x1d70   :  { %6410 = vrcp.f32 %v3654_v43 }
0x1d73   :  { %v3657_v33 = vpop.xlane.xlu0 %3656 }
0x1d74   :  { %6412 = vrcp.f32 %v3657_v33 }
0x1d7d   :  { %v6411_v17 = vpop.eup %6410 }
0x1d7e   :  { %v3659_v13 = vmul.f32 %v6411_v17, %v6403_v59  ;;  %v6508_v59 = vld [vmem:[%s9283_s3] sm:$0xff] }
0x1d7f   :  { %5125 = vmatprep.subr.mxu0 %v6508_v59 }
0x1d80   :  { %3941 = vperm.xlu1 %6043, %v3659_v13   ;;  %5126 = vmatpush3.msra.mxu0 %v6508_v59 }
0x1d81   :  { %v6413_v2 = vpop.eup %6412 }
0x1d82   :  { %v3661_v21 = vmul.f32 %v6413_v2, %v6405_v35 }
0x1d84   :  { %3945 = vperm.xlu0 %6044, %v3661_v21   ;;  %6045 = vset.pattern.permute.xlu1 %v6539_v22 }
0x1d85   :  { %3918 = vperm.xlu1 %6045, %v3659_v13  }
0x1d88   :  { %6051 = vset.pattern.permute.xlu0 %v6534_v7 }
0x1d89   :  { %6046 = vset.pattern.permute.xlu1 %v6540_v23 }
0x1d8a   :  { %3929 = vperm.xlu1 %6046, %v3659_v13  }
0x1d8e   :  { %6047 = vset.pattern.permute.xlu1 %v6539_v22 }
0x1d8f   :  { %3923 = vperm.xlu1 %6047, %v3661_v21  }
0x1d93   :  { %6048 = vset.pattern.permute.xlu1 %v6540_v23 }
0x1d94   :  { %3933 = vperm.xlu1 %6048, %v3661_v21  }
0x1d98   :  { %6049 = vset.pattern.permute.xlu1 %v6538_v18 }
0x1db2   :  { %v5092_v35 = vpop.f32.mrf.mxu0 }
0x1db4   :  { %v3907_v63 = vpop.f32.mrf.mxu0 }
0x1dfb   :  { %v3942_v34 = vpop.permute.xlu1 %3941 }
0x1dfc   :  { %v3948_v19 = vmul.f32 %v3942_v34, %v3907_v63 }
0x1dfe   :  { %3952 = vrot.lane.b32.xlu1 %v3948_v19, %s6541_s6 }
0x1dff   :  { %v3946_v36 = vpop.permute.xlu0 %3945 }
0x1e00   :  { %v3949_v8 = vmul.f32 %v5092_v35, %v3946_v36  ;;  %v3919_v38 = vpop.permute.xlu1 %3918 }
0x1e01   :  { %v3926_v37 = vmul.f32 %v3919_v38, %v3907_v63 }
0x1e02   :  { %3954 = vrot.lane.b32.xlu1 %v3949_v8, %s6541_s6 }
0x1e05   :  { %v3930_v24 = vpop.permute.xlu1 %3929 }
0x1e06   :  { %3964 = vperm.xlu1 %6049, %v3662_v60   ;;  %v3936_v20 = vmul.f32 %v3930_v24, %v3833_v54 }
0x1e08   :  { %v3938_v43 = vadd.f32 %v3936_v20, %v3926_v37 }
0x1e0a   :  { %3969 = vperm.xlu1 %6049, %v3663_v42   ;;  %v3924_v25 = vpop.permute.xlu1 %3923 }
0x1e0b   :  { %v3927_v17 = vmul.f32 %v5092_v35, %v3924_v25 }
0x1e0e   :  { %6050 = vset.pattern.permute.xlu1 %v6534_v7 }
0x1e0f   :  { %v3934_v6 = vpop.permute.xlu1 %3933 }
0x1e10   :  { %v3937_v9 = vmul.f32 %v3934_v6, %v3834_v45 }
0x1e12   :  { %v3939_v61 = vadd.f32 %v3937_v9, %v3927_v17 }
0x1e70   :  { %v3953_v33 = vpop.permute.xlu1 %3952 }
0x1e71   :  { %v3958_v13 = vadd.f32 %v3953_v33, %v3938_v43 }
0x1e73   :  { %v8663_v28 = vadd.f32 1e-16, %v3958_v13 }
0x1e74   :  { %v3955_v2 = vpop.permute.xlu1 %3954 }
0x1e75   :  { %v3959_v40 = vadd.f32 %v3955_v2, %v3939_v61  ;;  %v8666_v32 = vand.u32 2147483647, %v8663_v28  ;;  %vm9321_vm10 = vcmp.eq.f32.partialorder %v8663_v28, 0  ;;  %v5110_v61 = vpop.f32.mrf.mxu0 }
0x1e77   :  { %v8668_v7 = vadd.f32 1e-16, %v3959_v40  ;;  %6414 = vlog2.f32 %v8666_v32  ;;  %vm5778_vm6 = vcmp.gt.f32.partialorder %v8666_v32, 1065353216 }
0x1e79   :  { %v8672_v54 = vand.u32 2147483647, %v8668_v7 }
0x1e7b   :  { %6416 = vlog2.f32 %v8672_v54 }
0x1e81   :  { %v8675_v45 = vpop.permute.xlu1 %3964 }
0x1e82   :  { %v8678_v21 = vand.u32 2147483647, %v8675_v45  ;;  %v5763_v39 = vtrunc.f32 %v8675_v45  ;;  %vm5762_vm1 = vcmp.lt.f32.partialorder %v8675_v45, 0 }
0x1e83   :  { %vm8703_vm13 = vmand %vm5762_vm1, %vm9321_vm10  ;;  %v5794_v13 = vsel %vm5762_vm1, 0, %v6542_v16  ;;  %v5782_v40 = vsel %vm5762_vm1, 2139095040, %v6543_v10 }
0x1e84   :  { %v6415_v5 = vpop.eup %6414  ;;  %vm9320_vm15 = vcmp.eq.f32.partialorder %v8678_v21, 2139095040  ;;  %v5767_v59 = vtrunc.f32 %v8678_v21  ;;  %vm5764_vm7 = vcmp.ne.f32.partialorder %v8675_v45, %v5763_v39  ;;  %vm8710_vm11 = vmxor %vm5762_vm1, %vm5778_vm6  ;;  %vm5766_vm0 = vcmp.lt.f32.partialorder %v8678_v21, 1266679808 }
0x1e85   :  { %v8683_v35 = vpop.permute.xlu1 %3969  ;;  %v5756_v63 = vmul.f32 %v6415_v5, %v8675_v45  ;;  %vm8693_vm9 = vmor %vm5764_vm7, %vm9320_vm15  ;;  %vm9319_vm7 = vcmp.lt.f32.partialorder %v8663_v28, 0  ;;  %vm5830_vm15 = vcmp.gt.f32.partialorder %v8672_v54, 1065353216 }
0x1e86   :  { %v5768_v34 = vcvt.f32.s32 %v5767_v59  ;;  %v8689_v19 = vand.u32 2147483647, %v8683_v35  ;;  %v5815_v38 = vtrunc.f32 %v8683_v35  ;;  %vm5771_vm12 = vmneg %vm8693_vm9 }
0x1e87   :  { %6418 = vpow2.f32 %v5756_v63  ;;  %vm5789_vm8 = vmor %vm8703_vm13, %vm8710_vm11  ;;  %v5795_v63 = vxor.u32 2147483648, %v5794_v13  ;;  %vm5826_vm11 = vcmp.lt.f32.partialorder %v8668_v7, 0 }
0x1e88   :  { %v6417_v8 = vpop.eup %6416  ;;  %v5769_v60 = vand.u32 1, %v5768_v34  ;;  %v5819_v20 = vtrunc.f32 %v8689_v19  ;;  %vm9318_vm2 = vcmp.eq.f32.partialorder %v8689_v19, 2139095040  ;;  %vm5816_vm4 = vcmp.ne.f32.partialorder %v8683_v35, %v5815_v38 }
0x1e89   :  { %v5808_v25 = vmul.f32 %v6417_v8, %v8683_v35  ;;  %vm8732_vm6 = vmor %vm5816_vm4, %vm9318_vm2  ;;  %vm5814_vm4 = vcmp.lt.f32.partialorder %v8683_v35, 0  ;;  %v5790_v59 = vsel %vm5789_vm8, 2139095040, %v6543_v10  ;;  %vm5818_vm1 = vcmp.lt.f32.partialorder %v8689_v19, 1266679808 }
0x1e8a   :  { %vm5770_vm14 = vcmp.eq.s32.totalorder %v5769_v60, 1  ;;  %v5820_v6 = vcvt.f32.s32 %v5819_v20  ;;  %vm5823_vm2 = vmneg %vm8732_vm6  ;;  %v5846_v60 = vsel %vm5814_vm4, 0, %v6542_v16 }
0x1e8b   :  { %vm5772_vm5 = vmand %vm5770_vm14, %vm5771_vm12  ;;  %6420 = vpow2.f32 %v5808_v25  ;;  %vm5777_vm14 = vcmp.lt.s32.totalorder %v8663_v28, 0  ;;  %v5847_v9 = vxor.u32 2147483648, %v5846_v60 }
0x1e8c   :  { %v5821_v37 = vand.u32 1, %v5820_v6  ;;  %vm8725_vm3 = vmand %vm5766_vm0, %vm5772_vm5 }
0x1e8d   :  { %vm8741_vm12 = vmand %vm9319_vm7, %vm8693_vm9  ;;  %vm5827_vm7 = vcmp.eq.f32.partialorder %v8668_v7, 0  ;;  %v5796_v38 = vsel %vm8725_vm3, %v5795_v63, %v5794_v13 }
0x1e8e   :  { %vm5822_vm5 = vcmp.eq.s32.totalorder %v5821_v37, 1  ;;  %vm8747_vm0 = vmand %vm5777_vm14, %vm8725_vm3  ;;  %vm5799_vm14 = vcmp.ne.f32.partialorder %v8663_v28, %v8663_v28  ;;  %v5834_v37 = vsel %vm5814_vm4, 2139095040, %v6543_v10 }
0x1e8f   :  { %vm8757_vm9 = vmand %vm5822_vm5, %vm5823_vm2  ;;  %vm9618_vm5 = vcmp.eq.f32.partialorder %v8663_v28, 0 }
0x1e90   :  { %vm8771_vm10 = vmand %vm5814_vm4, %vm5827_vm7 }
0x1e91   :  { %vm8786_vm2 = vmxor %vm5814_vm4, %vm5830_vm15  ;;  %vm5800_vm15 = vcmp.ne.f32.partialorder %v8675_v45, %v8675_v45 }
0x1e92   :  { %vm8797_vm13 = vmand %vm5818_vm1, %vm8757_vm9  ;;  %vm5760_vm9 = vcmp.eq.f32.partialorder %v8675_v45, 0  ;;  %vm5779_vm1 = vcmp.eq.f32.partialorder %v8666_v32, 2139095040 }
0x1e93   :  { %vm5841_vm8 = vmor %vm8771_vm10, %vm8786_vm2  ;;  %vm9621_vm10 = vcmp.eq.f32.partialorder %v8678_v21, 2139095040  ;;  %vm9622_vm2 = vcmp.lt.f32.partialorder %v8663_v28, 0 }
0x1e94   :  { %v6419_v2 = vpop.eup %6418  ;;  %vm5832_vm3 = vmand %vm5826_vm11, %vm8732_vm6  ;;  %v5797_v33 = vsel %vm9622_vm2, %v5796_v38, %v5794_v13  ;;  %v5842_v17 = vsel %vm5841_vm8, 2139095040, %v6543_v10  ;;  %v5848_v13 = vsel %vm8797_vm13, %v5847_v9, %v5846_v60  ;;  %vm5852_vm8 = vcmp.ne.f32.partialorder %v8683_v35, %v8683_v35 }
0x1e95   :  { %v5781_v5 = vsel %vm8741_vm12, 2143289344, %v6419_v2  ;;  %vm5791_vm12 = vcmp.eq.f32.partialorder %v8663_v28, 3212836864  ;;  %vm5801_vm6 = vmor %vm5799_vm14, %vm5800_vm15  ;;  %vm5761_vm14 = vcmp.eq.f32.partialorder %v8675_v45, 1065353216  ;;  %vm5851_vm15 = vcmp.ne.f32.partialorder %v8668_v7, %v8668_v7 }
0x1e96   :  { %v5783_v36 = vsel %vm9618_vm5, %v5782_v40, %v5781_v5  ;;  %v5792_v25 = vsel %vm5791_vm12, 1065353216, %v5790_v59  ;;  %vm5829_vm5 = vcmp.lt.s32.totalorder %v8668_v7, 0  ;;  %vm5843_vm12 = vcmp.eq.f32.partialorder %v8668_v7, 3212836864 }
0x1e97   :  { %v5785_v42 = vxor.u32 2147483648, %v5783_v36  ;;  %v5844_v59 = vsel %vm5843_vm12, 1065353216, %v5842_v17  ;;  %v5849_v34 = vsel %vm5826_vm11, %v5848_v13, %v5846_v60 }
0x1e98   :  { %v6421_v24 = vpop.eup %6420 }
0x1e99   :  { %v5786_v20 = vsel %vm8747_vm0, %v5785_v42, %v5783_v36  ;;  %v5833_v6 = vsel %vm5832_vm3, 2143289344, %v6421_v24  ;;  %vm9623_vm0 = vcmp.eq.f32.partialorder %v8663_v28, 1065353216  ;;  %vm9624_vm3 = vcmp.eq.f32.partialorder %v8689_v19, 2139095040  ;;  %v4155_v36 = vpop.f32.mrf.mxu0 }
0x1e9a   :  { %v5793_v32 = vsel %vm9621_vm10, %v5792_v25, %v5786_v20  ;;  %v5835_v43 = vsel %vm5827_vm7, %v5834_v37, %v5833_v6  ;;  %vm5803_vm4 = vmor %vm9623_vm0, %vm5760_vm9  ;;  %vm5812_vm9 = vcmp.eq.f32.partialorder %v8683_v35, 0  ;;  %v8871_v19 = vadd.f32 %v8548_v4, %v4155_v36 }
0x1e9b   :  { %v5798_v2 = vsel %vm5779_vm1, %v5797_v33, %v5793_v32  ;;  %v5837_v21 = vxor.u32 2147483648, %v5835_v43  ;;  %vm5836_vm7 = vmand %vm5829_vm5, %vm8797_vm13  ;;  %vm5831_vm1 = vcmp.eq.f32.partialorder %v8672_v54, 2139095040  ;;  %vm9625_vm13 = vcmask 130048  }
0x1e9c   :  { %v5802_v40 = vsel %vm5801_vm6, 2143289344, %v5798_v2  ;;  %vm5828_vm5 = vcmp.eq.f32.partialorder %v8668_v7, 1065353216  ;;  %vm5853_vm10 = vmor %vm5851_vm15, %vm5852_vm8  ;;  %vm5813_vm6 = vcmp.eq.f32.partialorder %v8683_v35, 1065353216  ;;  %v4166_v20 = vand.u32 2147483647, %v8871_v19 }
0x1e9d   :  { %v5804_v39 = vsel %vm5803_vm4, 1065353216, %v5802_v40  ;;  %v5838_v5 = vsel %vm5836_vm7, %v5837_v21, %v5835_v43  ;;  %vm5855_vm2 = vmor %vm5828_vm5, %vm5812_vm9  ;;  %vm9627_vm0 = vcmask 64512   ;;  %v4164_v36 = vmax.f32 %v8871_v19, 0.0 }
0x1e9e   :  { %v8856_v63 = vsel %vm5761_vm14, %v8663_v28, %v5804_v39  ;;  %v5845_v45 = vsel %vm9624_vm3, %v5844_v59, %v5838_v5  ;;  %v8867_v28 = vadd.f32 %v8548_v4, %v5110_v61  ;;  %vm9626_vm11 = vmmov %vm9625_vm13  ;;  %v4168_v37 = vsub.f32 0.0, %v4166_v20 }
0x1e9f   :  { %v3974_v8 = vsel %vm9625_vm13, %v8856_v63, 0.0  ;;  %v5850_v42 = vsel %vm5831_vm1, %v5849_v34, %v5845_v45  ;;  %v4238_v4 = vmul.f32 %v8871_v19, %v8871_v19  ;;  %vm9628_vm4 = vmmov %vm9627_vm0 }
0x1ea0   :  { %3975 = vadd.xlane.f32.xlu1 %v3974_v8  ;;  %v5854_v38 = vsel %vm5853_vm10, 2143289344, %v5850_v42  ;;  %v4167_v25 = vand.u32 2147483647, %v8867_v28  ;;  %v4170_v32 = vmul.f32 1.442695, %v4168_v37  ;;  %v4239_v35 = vmul.f32 %v8867_v28, %v8867_v28  ;;  %vm9630_vm7 = vmmov %vm9626_vm11 }
0x1ea1   :  { %v5856_v54 = vsel %vm5855_vm2, 1065353216, %v5854_v38  ;;  %v4240_v33 = vsel %vm9628_vm4, %v4238_v4, 0.0  ;;  %vm9631_vm15 = vmmov %vm9630_vm7 }
0x1ea2   :  { %v5857_v60 = vsel %vm5813_vm6, %v8668_v7, %v5856_v54  ;;  %v4169_v6 = vsub.f32 0.0, %v4167_v25  ;;  %v4243_v7 = vsel %vm9627_vm0, %v4239_v35, 0.0  ;;  %v4165_v54 = vmax.f32 %v8867_v28, 0.0  ;;  %vm9632_vm8 = vmmov %vm9627_vm0 }
0x1ea3   :  { %v3977_v24 = vsel %vm9626_vm11, %v5857_v60, 0.0  ;;  %vm9633_vm9 = vmmov %vm9627_vm0  ;;  %vm9636_vm6 = vcmask 105552  }
0x1ea4   :  { %3978 = vadd.xlane.f32.xlu0 %v3977_v24  ;;  %v4172_v9 = vmul.f32 1.442695, %v4169_v6  ;;  %4241 = vadd.xlane.f32.xlu1 %v4240_v33  ;;  %vm9634_vm10 = vmmov %vm9630_vm7 }
0x1ea5   :  { %vm9635_vm2 = vmmov %vm9630_vm7 }
0x1ea6   :  { %6422 = vpow2.f32 %v4172_v9  ;;  %v9629_v9 = vmov 9   ;;  %vm9637_vm11 = vmmov %vm9636_vm6 }
0x1ea7   :  { %6424 = vpow2.f32 %v4170_v32  ;;  %vm9639_vm0 = vmmov %vm9635_vm2 }
0x1ea8   :  { %4244 = vadd.xlane.f32.xlu0 %v4243_v7  ;;  %vm9640_vm4 = vmmov %vm9639_vm0 }
0x1eb3   :  { %v6423_v43 = vpop.eup %6422 }
0x1eb4   :  { %v6425_v17 = vpop.eup %6424  ;;  %v4183_v2 = vadd.f32 1.0, %v6423_v43  ;;  %v4186_v13 = vmul.f32 -0.5, %v6423_v43  ;;  %v4189_v59 = vand.u32 2147483647, %v6423_v43 }
0x1eb5   :  { %v4174_v61 = vadd.f32 1.0, %v6425_v17  ;;  %v4177_v21 = vmul.f32 -0.5, %v6425_v17  ;;  %v4180_v39 = vand.u32 2147483647, %v6425_v17 }
0x1eb6   :  { %v4187_v5 = vadd.f32 1.0, %v4186_v13  ;;  %vm4190_vm14 = vcmp.lt.f32.partialorder %v4189_v59, 0.0004427343 }
0x1eb7   :  { %6426 = vlog2.f32 %v4174_v61  ;;  %v4178_v40 = vadd.f32 1.0, %v4177_v21  ;;  %vm4181_vm12 = vcmp.lt.f32.partialorder %v4180_v39, 0.0004427343 }
0x1eb8   :  { %6428 = vlog2.f32 %v4183_v2  ;;  %v4188_v42 = vmul.f32 %v6423_v43, %v4187_v5 }
0x1eb9   :  { %v4179_v45 = vmul.f32 %v6425_v17, %v4178_v40 }
0x1ec4   :  { %v6427_v34 = vpop.eup %6426 }
0x1ec5   :  { %v4176_v8 = vmul.f32 0.6931472, %v6427_v34  ;;  %v6429_v38 = vpop.eup %6428 }
0x1ec6   :  { %v4185_v25 = vmul.f32 0.6931472, %v6429_v38 }
0x1ec7   :  { %v4182_v24 = vsel %vm4181_vm12, %v4179_v45, %v4176_v8  ;;  %v4744_v8 = vmul.f32 -1.442695, %v8871_v19  ;;  %vm9641_vm12 = vcmask 23552  }
0x1ec8   :  { %v4192_v20 = vadd.f32 %v4182_v24, %v4164_v36  ;;  %v4191_v6 = vsel %vm4190_vm14, %v4188_v42, %v4185_v25  ;;  %v4745_v24 = vmul.f32 -1.442695, %v8867_v28  ;;  %vm9642_vm14 = vmmov %vm9641_vm12 }
0x1ec9   :  { %v4193_v37 = vadd.f32 %v4191_v6, %v4165_v54 }
0x1eca   :  { %4349 = vperm.xlu1 %6050, %v4192_v20  }
0x1ecb   :  { %4354 = vperm.xlu0 %6051, %v4193_v37  }
0x1ece   :  { %6052 = vset.pattern.permute.xlu1 %v9629_v9 }
0x1ecf   :  { %6053 = vset.pattern.permute.xlu0 %v9629_v9 }
0x1f29   :  { %v3976_v32 = vpop.xlane.xlu1 %3975 }
0x1f2a   :  { %v3980_v35 = vadd.f32 1e-16, %v3976_v32 }
0x1f2c   :  { %6430 = vrcp.f32 %v3980_v35 }
0x1f2d   :  { %v3979_v4 = vpop.xlane.xlu0 %3978 }
0x1f2e   :  { %v3981_v7 = vadd.f32 1e-16, %v3979_v4 }
0x1f30   :  { %6432 = vrcp.f32 %v3981_v7 }
0x1f39   :  { %v6431_v33 = vpop.eup %6430 }
0x1f3a   :  { %v8892_v43 = vmul.f32 %v6431_v33, %v8856_v63  ;;  %v4245_v63 = vpop.xlane.xlu0 %4244 }
0x1f3b   :  { %6434 = vrsqrt.f32 %v4245_v63  ;;  %vm4255_vm1 = vcmp.eq.f32.partialorder %v4245_v63, inf  ;;  %v4258_v40 = vand.u32 2147483648, %v4245_v63  ;;  %vm4257_vm13 = vcmp.eq.f32.partialorder %v4245_v63, 0.0 }
0x1f3c   :  { %5097 = vmatprep.mubr.msk.f32.mxu1 %vm9630_vm7, %v8892_v43  ;;  %vm9643_vm7 = vmmov %vm9639_vm0 }
0x1f3d   :  { %v6433_v17 = vpop.eup %6432 }
0x1f3e   :  { %v8896_v61 = vmul.f32 %v6433_v17, %v5857_v60  ;;  %v4242_v60 = vpop.xlane.xlu1 %4241 }
0x1f3f   :  { %6436 = vrsqrt.f32 %v4242_v60  ;;  %vm4248_vm3 = vcmp.eq.f32.partialorder %v4242_v60, inf  ;;  %v4251_v5 = vand.u32 2147483648, %v4242_v60  ;;  %vm4250_vm5 = vcmp.eq.f32.partialorder %v4242_v60, 0.0 }
0x1f40   :  { %5098 = vmatmul.mubr.msk.f32.vlgmr.msra.gmra.mxu1 %vm9631_vm15, %v8896_v61  ;;  %vm9644_vm15 = vmmov %vm9639_vm0 }
0x1f41   :  { %5112 = vmatpush3.msra.mxu1 %v8587_v52  ;;  %5113 = vmatprep.mubr.msk.f32.mxu1 %vm9632_vm8, %v8871_v19 }
0x1f42   :  { %5116 = vmatprep.subr.mxu1 %v8595_v44 }
0x1f44   :  { %5114 = vmatmul.mubr.msk.f32.vlgmr.msra.gmra.mxu1 %vm9633_vm9, %v8867_v28 }
0x1f45   :  { %5117 = vmatpush3.msra.mxu1 %v8595_v44  ;;  %v4350_v33 = vpop.permute.xlu1 %4349 }
0x1f46   :  { %5118 = vmatprep.subr.mxu1 %v8604_v55  ;;  %v4355_v9 = vpop.permute.xlu0 %4354 }
0x1f47   :  { %5119 = vmatpush3.msra.mxu1 %v8604_v55 }
0x1f48   :  { %v6435_v2 = vpop.eup %6434 }
0x1f49   :  { %v4254_v21 = vmul.f32 %v6435_v2, %v4245_v63 }
0x1f4b   :  { %v4256_v39 = vsel %vm4255_vm1, %v4245_v63, %v4254_v21  ;;  %v4209_v21 = vsel %vm9637_vm11, %v8867_v28, -inf }
0x1f4c   :  { %v6437_v52 = vpop.eup %6436  ;;  %v4259_v44 = vsel %vm4257_vm13, %v4258_v40, %v4256_v39 }
0x1f4d   :  { %v4247_v13 = vmul.f32 %v6437_v52, %v4242_v60  ;;  %v4261_v34 = vmax.f32 %v4259_v44, 1e-08  ;;  %v4206_v52 = vsel %vm9636_vm6, %v8871_v19, -inf }
0x1f4f   :  { %v4249_v59 = vsel %vm4248_vm3, %v4242_v60, %v4247_v13  ;;  %6438 = vrcp.f32 %v4261_v34 }
0x1f50   :  { %v4252_v45 = vsel %vm4250_vm5, %v4251_v5, %v4249_v59  ;;  %v9638_v59 = vmov 12  }
0x1f51   :  { %v4260_v55 = vmax.f32 %v4252_v45, 1e-08 }
0x1f53   :  { %6440 = vrcp.f32 %v4260_v55 }
0x1f54   :  { %6442 = vpow2.f32 %v4744_v8 }
0x1f55   :  { %6444 = vpow2.f32 %v4745_v24 }
0x1f5c   :  { %v6439_v25 = vpop.eup %6438 }
0x1f60   :  { %v6441_v37 = vpop.eup %6440 }
0x1f61   :  { %v6443_v35 = vpop.eup %6442 }
0x1f62   :  { %v4200_v60 = vadd.f32 1.0, %v6443_v35  ;;  %v6445_v13 = vpop.eup %6444 }
0x1f63   :  { %v4201_v40 = vadd.f32 1.0, %v6445_v13 }
0x1f64   :  { %6446 = vrcp.f32 %v4200_v60 }
0x1f65   :  { %6448 = vrcp.f32 %v4201_v40 }
0x1f71   :  { %v6447_v39 = vpop.eup %6446 }
0x1f72   :  { %v4393_v5 = vsub.f32 1.0, %v6447_v39  ;;  %v6449_v44 = vpop.eup %6448 }
0x2000   :  { %v8910_v42 = vpop.f32.mrf.mxu1 }
0x2002   :  { %v8912_v38 = vpop.f32.mrf.mxu1 }
0x2004   :  { %v5115_v20 = vpop.f32.mrf.mxu1 }
0x2005   :  { %v4346_v6 = vmul.f32 %v6439_v25, %v5115_v20 }
0x2006   :  { %v4334_v32 = vpop.f32.mrf.mxu1 }
0x2007   :  { %v4358_v4 = vmul.f32 %v4355_v9, %v4346_v6  ;;  %v4345_v7 = vmul.f32 %v6441_v37, %v4334_v32 }
0x2009   :  { %v4357_v17 = vmul.f32 %v4350_v33, %v4345_v7  ;;  %v4362_v63 = vsel %vm9634_vm10, %v4358_v4, -inf }
0x200a   :  { %4363 = vmax.xlane.f32.xlu0 %v4362_v63  ;;  %v4394_v63 = vsub.f32 1.0, %v6449_v44 }
0x200b   :  { %v4359_v2 = vsel %vm9635_vm2, %v4357_v17, -inf }
0x200c   :  { %4360 = vmax.xlane.f32.xlu1 %v4359_v2 }
0x2010   :  { %4207 = vmax.xlane.f32.xlu1 %v4206_v52 }
0x2014   :  { %4210 = vmax.xlane.f32.xlu1 %v4209_v21 }
0x2020   :  { %4397 = vperm.xlu0 %6053, %v4393_v5  }
0x2024   :  { %6055 = vset.pattern.permute.xlu0 %v9638_v59 }
0x2025   :  { %4383 = vperm.xlu1 %6052, %v6447_v39  }
0x2029   :  { %4388 = vperm.xlu1 %6052, %v6449_v44  }
0x2093   :  { %v4364_v45 = vpop.xlane.xlu0 %4363 }
0x2094   :  { %v4366_v34 = vsub.f32 %v4358_v4, %v4364_v45 }
0x2095   :  { %v4361_v55 = vpop.xlane.xlu1 %4360 }
0x2096   :  { %v4369_v8 = vmul.f32 1.442695, %v4366_v34  ;;  %v4365_v24 = vsub.f32 %v4357_v17, %v4361_v55 }
0x2098   :  { %6450 = vpow2.f32 %v4369_v8  ;;  %v4367_v25 = vmul.f32 1.442695, %v4365_v24 }
0x2099   :  { %v4208_v6 = vpop.xlane.xlu1 %4207 }
0x209a   :  { %6452 = vpow2.f32 %v4367_v25  ;;  %v4212_v32 = vsub.f32 %v8871_v19, %v4208_v6 }
0x209b   :  { %v4398_v24 = vpop.permute.xlu0 %4397 }
0x209c   :  { %v4214_v33 = vmul.f32 1.442695, %v4212_v32 }
0x209d   :  { %v4211_v7 = vpop.xlane.xlu1 %4210 }
0x209e   :  { %v4213_v4 = vsub.f32 %v8867_v28, %v4211_v7  ;;  %6454 = vpow2.f32 %v4214_v33 }
0x20a0   :  { %v4216_v17 = vmul.f32 1.442695, %v4213_v4 }
0x20a1   :  { %v4384_v52 = vpop.permute.xlu1 %4383 }
0x20a2   :  { %6456 = vpow2.f32 %v4216_v17 }
0x20a5   :  { %v6451_v20 = vpop.eup %6450  ;;  %v4389_v21 = vpop.permute.xlu1 %4388 }
0x20a6   :  { %v4374_v37 = vsel %vm9639_vm0, %v6451_v20, 0.0 }
0x20a7   :  { %v6453_v9 = vpop.eup %6452  ;;  %4375 = vadd.xlane.f32.xlu1 %v4374_v37  ;;  %v4405_v37 = vmul.f32 %v4398_v24, %v8892_v43 }
0x20a8   :  { %v4371_v35 = vsel %vm9640_vm4, %v6453_v9, 0.0 }
0x20ab   :  { %4372 = vadd.xlane.f32.xlu1 %v4371_v35  ;;  %v6455_v60 = vpop.eup %6454 }
0x20af   :  { %v6457_v2 = vpop.eup %6456 }
0x20bc   :  { %4402 = vperm.xlu1 %6052, %v4394_v63  }
0x20c0   :  { %4220 = vrot.lane.b32.xlu1 %v6455_v60, %s6536_s19 }
0x20c1   :  { %6054 = vset.pattern.permute.xlu1 %v9638_v59 }
0x20c4   :  { %4222 = vrot.lane.b32.xlu1 %v6457_v2, %s6536_s19 }
0x2130   :  { %v4376_v13 = vpop.xlane.xlu1 %4375 }
0x2131   :  { %6458 = vrcp.f32 %v4376_v13 }
0x2134   :  { %v4373_v40 = vpop.xlane.xlu1 %4372 }
0x2135   :  { %6460 = vrcp.f32 %v4373_v40 }
0x2138   :  { %v4403_v39 = vpop.permute.xlu1 %4402 }
0x2139   :  { %v4406_v35 = vmul.f32 %v4403_v39, %v8896_v61 }
0x213c   :  { %v4221_v5 = vpop.permute.xlu1 %4220 }
0x213d   :  { %v4226_v45 = vsel %vm9641_vm12, %v4221_v5, 0.0  ;;  %v4236_v5 = vadd.f32 1.0, %v4164_v36 }
0x213e   :  { %v6459_v44 = vpop.eup %6458  ;;  %4227 = vadd.xlane.f32.xlu1 %v4226_v45 }
0x213f   :  { %v4380_v34 = vmul.f32 %v6459_v44, %v6451_v20 }
0x2140   :  { %v4223_v55 = vpop.permute.xlu1 %4222 }
0x2141   :  { %v4229_v8 = vsel %vm9642_vm14, %v4223_v55, 0.0  ;;  %v4392_v6 = vmul.f32 %v4389_v21, %v4380_v34 }
0x2142   :  { %v6461_v59 = vpop.eup %6460  ;;  %4230 = vadd.xlane.f32.xlu0 %v4229_v8 }
0x2143   :  { %v4378_v25 = vmul.f32 %v6461_v59, %v6453_v9  ;;  %v4408_v33 = vadd.f32 %v4406_v35, %v4392_v6 }
0x2145   :  { %v4391_v32 = vmul.f32 %v4384_v52, %v4378_v25 }
0x2147   :  { %v4407_v7 = vadd.f32 %v4405_v37, %v4391_v32 }
0x2149   :  { %5120 = vmatprep.mubr.msk.f32.mxu1 %vm9643_vm7, %v4407_v7 }
0x214a   :  { %5121 = vmatmul.mubr.msk.f32.vlgmr.msra.gmra.mxu1 %vm9644_vm15, %v4408_v33 }
0x21c7   :  { %v4228_v20 = vpop.xlane.xlu1 %4227 }
0x21c8   :  { %6462 = vrcp.f32 %v4228_v20 }
0x21cb   :  { %v4231_v4 = vpop.xlane.xlu0 %4230 }
0x21cc   :  { %6464 = vrcp.f32 %v4231_v4 }
0x21d5   :  { %v6463_v17 = vpop.eup %6462 }
0x21d6   :  { %v4233_v63 = vmul.f32 %v6463_v17, %v6455_v60 }
0x21d8   :  { %4515 = vperm.xlu1 %6054, %v4233_v63  }
0x21d9   :  { %v6465_v9 = vpop.eup %6464 }
0x21da   :  { %v4235_v21 = vmul.f32 %v6465_v9, %v6457_v2 }
0x21dc   :  { %4519 = vperm.xlu0 %6055, %v4235_v21   ;;  %6056 = vset.pattern.permute.xlu1 %v6539_v22 }
0x21dd   :  { %4492 = vperm.xlu1 %6056, %v4233_v63  }
0x21e0   :  { %6061 = vset.pattern.permute.xlu0 %v6538_v18 }
0x21e1   :  { %6057 = vset.pattern.permute.xlu1 %v6540_v23 }
0x21e2   :  { %4503 = vperm.xlu1 %6057, %v4233_v63  }
0x21e6   :  { %6058 = vset.pattern.permute.xlu1 %v6539_v22  ;;  %v4237_v22 = vadd.f32 1.0, %v4165_v54 }
0x21e7   :  { %4497 = vperm.xlu1 %6058, %v4235_v21  }
0x21eb   :  { %6059 = vset.pattern.permute.xlu1 %v6540_v23 }
0x21ec   :  { %4507 = vperm.xlu1 %6059, %v4235_v21  }
0x21f0   :  { %6060 = vset.pattern.permute.xlu1 %v6538_v18 }
0x220a   :  { %v5122_v60 = vpop.f32.mrf.mxu1 }
0x220c   :  { %v4481_v52 = vpop.f32.mrf.mxu1 }
0x2253   :  { %v4516_v2 = vpop.permute.xlu1 %4515 }
0x2254   :  { %v4522_v13 = vmul.f32 %v4516_v2, %v4481_v52 }
0x2256   :  { %4526 = vrot.lane.b32.xlu1 %v4522_v13, %s6541_s6 }
0x2257   :  { %v4520_v40 = vpop.permute.xlu0 %4519 }
0x2258   :  { %v4523_v39 = vmul.f32 %v5122_v60, %v4520_v40  ;;  %v4493_v23 = vpop.permute.xlu1 %4492 }
0x2259   :  { %v4500_v55 = vmul.f32 %v4493_v23, %v4481_v52 }
0x225a   :  { %4528 = vrot.lane.b32.xlu1 %v4523_v39, %s6541_s6 }
0x225d   :  { %v4504_v18 = vpop.permute.xlu1 %4503 }
0x225e   :  { %4538 = vperm.xlu1 %6060, %v4236_v5   ;;  %v4510_v44 = vmul.f32 %v4504_v18, %v4407_v7 }
0x2260   :  { %v4512_v59 = vadd.f32 %v4510_v44, %v4500_v55 }
0x2262   :  { %4543 = vperm.xlu1 %6060, %v4237_v22   ;;  %v4498_v45 = vpop.permute.xlu1 %4497 }
0x2263   :  { %v4501_v25 = vmul.f32 %v5122_v60, %v4498_v45 }
0x2267   :  { %v4508_v34 = vpop.permute.xlu1 %4507 }
0x2268   :  { %v4511_v8 = vmul.f32 %v4508_v34, %v4408_v33 }
0x226a   :  { %v4513_v19 = vadd.f32 %v4511_v8, %v4501_v25 }
0x22c8   :  { %v4527_v24 = vpop.permute.xlu1 %4526 }
0x22c9   :  { %v4532_v6 = vadd.f32 %v4527_v24, %v4512_v59 }
0x22cb   :  { %v8947_v37 = vadd.f32 1e-16, %v4532_v6 }
0x22cc   :  { %v4529_v36 = vpop.permute.xlu1 %4528 }
0x22cd   :  { %v4533_v32 = vadd.f32 %v4529_v36, %v4513_v19  ;;  %v8950_v28 = vand.u32 2147483647, %v8947_v37  ;;  %vm9325_vm13 = vcmp.eq.f32.partialorder %v8947_v37, 0 }
0x22cf   :  { %v8952_v54 = vadd.f32 1e-16, %v4533_v32  ;;  %6466 = vlog2.f32 %v8950_v28  ;;  %vm5882_vm5 = vcmp.gt.f32.partialorder %v8950_v28, 1065353216 }
0x22d1   :  { %v8956_v35 = vand.u32 2147483647, %v8952_v54 }
0x22d3   :  { %6468 = vlog2.f32 %v8956_v35 }
0x22d9   :  { %v8959_v7 = vpop.permute.xlu1 %4538 }
0x22da   :  { %v8962_v33 = vand.u32 2147483647, %v8959_v7  ;;  %v5867_v20 = vtrunc.f32 %v8959_v7  ;;  %vm5866_vm9 = vcmp.lt.f32.partialorder %v8959_v7, 0 }
0x22db   :  { %vm8987_vm10 = vmand %vm5866_vm9, %vm9325_vm13  ;;  %v5898_v59 = vsel %vm5866_vm9, 0, %v6542_v16  ;;  %v5886_v6 = vsel %vm5866_vm9, 2139095040, %v6543_v10 }
0x22dc   :  { %v6467_v4 = vpop.eup %6466  ;;  %vm9324_vm8 = vcmp.eq.f32.partialorder %v8962_v33, 2139095040  ;;  %v5871_v17 = vtrunc.f32 %v8962_v33  ;;  %vm5868_vm1 = vcmp.ne.f32.partialorder %v8959_v7, %v5867_v20  ;;  %vm8994_vm2 = vmxor %vm5866_vm9, %vm5882_vm5  ;;  %vm5870_vm14 = vcmp.lt.f32.partialorder %v8962_v33, 1266679808 }
0x22dd   :  { %v8967_v63 = vpop.permute.xlu1 %4543  ;;  %v5860_v9 = vmul.f32 %v6467_v4, %v8959_v7  ;;  %vm8977_vm3 = vmor %vm5868_vm1, %vm9324_vm8  ;;  %vm9323_vm1 = vcmp.lt.f32.partialorder %v8947_v37, 0  ;;  %vm5934_vm8 = vcmp.gt.f32.partialorder %v8956_v35, 1065353216  ;;  %v5899_v20 = vxor.u32 2147483648, %v5898_v59 }
0x22de   :  { %v5872_v21 = vcvt.f32.s32 %v5871_v17  ;;  %v8973_v60 = vand.u32 2147483647, %v8967_v63  ;;  %v5919_v39 = vtrunc.f32 %v8967_v63  ;;  %vm5875_vm11 = vmneg %vm8977_vm3 }
0x22df   :  { %6470 = vpow2.f32 %v5860_v9  ;;  %vm5893_vm7 = vmor %vm8987_vm10, %vm8994_vm2  ;;  %vm5930_vm2 = vcmp.lt.f32.partialorder %v8952_v54, 0 }
0x22e0   :  { %v6469_v2 = vpop.eup %6468  ;;  %v5873_v13 = vand.u32 1, %v5872_v21  ;;  %v5923_v23 = vtrunc.f32 %v8973_v60  ;;  %vm9322_vm4 = vcmp.eq.f32.partialorder %v8973_v60, 2139095040  ;;  %vm5920_vm12 = vcmp.ne.f32.partialorder %v8967_v63, %v5919_v39 }
0x22e1   :  { %v5912_v22 = vmul.f32 %v6469_v2, %v8967_v63  ;;  %vm9016_vm5 = vmor %vm5920_vm12, %vm9322_vm4  ;;  %vm5918_vm12 = vcmp.lt.f32.partialorder %v8967_v63, 0  ;;  %v5894_v32 = vsel %vm5893_vm7, 2139095040, %v6543_v10  ;;  %vm5922_vm9 = vcmp.lt.f32.partialorder %v8973_v60, 1266679808 }
0x22e2   :  { %vm5874_vm6 = vcmp.eq.s32.totalorder %v5873_v13, 1  ;;  %v5924_v18 = vcvt.f32.s32 %v5923_v23  ;;  %vm5927_vm4 = vmneg %vm9016_vm5  ;;  %v5950_v21 = vsel %vm5918_vm12, 0, %v6542_v16  ;;  %v5938_v5 = vsel %vm5918_vm12, 2139095040, %v6543_v10 }
0x22e3   :  { %vm5876_vm0 = vmand %vm5874_vm6, %vm5875_vm11  ;;  %6472 = vpow2.f32 %v5912_v22  ;;  %vm5881_vm6 = vcmp.lt.s32.totalorder %v8947_v37, 0  ;;  %v5951_v22 = vxor.u32 2147483648, %v5950_v21 }
0x22e4   :  { %v5925_v45 = vand.u32 1, %v5924_v18  ;;  %vm9009_vm15 = vmand %vm5870_vm14, %vm5876_vm0 }
0x22e5   :  { %vm9025_vm11 = vmand %vm9323_vm1, %vm8977_vm3  ;;  %vm5931_vm1 = vcmp.eq.f32.partialorder %v8952_v54, 0  ;;  %v5900_v2 = vsel %vm9009_vm15, %v5899_v20, %v5898_v59 }
0x22e6   :  { %vm5926_vm0 = vcmp.eq.s32.totalorder %v5925_v45, 1  ;;  %vm9031_vm14 = vmand %vm5881_vm6, %vm9009_vm15  ;;  %vm5903_vm6 = vcmp.ne.f32.partialorder %v8947_v37, %v8947_v37 }
0x22e7   :  { %vm9041_vm3 = vmand %vm5926_vm0, %vm5927_vm4  ;;  %vm9665_vm0 = vcmp.eq.f32.partialorder %v8947_v37, 0 }
0x22e8   :  { %vm9055_vm13 = vmand %vm5918_vm12, %vm5931_vm1 }
0x22e9   :  { %vm9070_vm4 = vmxor %vm5918_vm12, %vm5934_vm8  ;;  %vm5904_vm8 = vcmp.ne.f32.partialorder %v8959_v7, %v8959_v7 }
0x22ea   :  { %vm9081_vm10 = vmand %vm5922_vm9, %vm9041_vm3  ;;  %vm5864_vm3 = vcmp.eq.f32.partialorder %v8959_v7, 0  ;;  %vm5883_vm9 = vcmp.eq.f32.partialorder %v8950_v28, 2139095040 }
0x22eb   :  { %vm5945_vm7 = vmor %vm9055_vm13, %vm9070_vm4  ;;  %vm9668_vm13 = vcmp.eq.f32.partialorder %v8962_v33, 2139095040  ;;  %vm9669_vm4 = vcmp.lt.f32.partialorder %v8947_v37, 0  ;;  %v5952_v34 = vsel %vm9081_vm10, %v5951_v22, %v5950_v21 }
0x22ec   :  { %v6471_v25 = vpop.eup %6470  ;;  %vm5936_vm15 = vmand %vm5930_vm2, %vm9016_vm5  ;;  %v5901_v23 = vsel %vm9669_vm4, %v5900_v2, %v5898_v59  ;;  %v5946_v45 = vsel %vm5945_vm7, 2139095040, %v6543_v10  ;;  %vm5916_vm7 = vcmp.eq.f32.partialorder %v8967_v63, 0 }
0x22ed   :  { %v5885_v36 = vsel %vm9025_vm11, 2143289344, %v6471_v25  ;;  %vm5895_vm11 = vcmp.eq.f32.partialorder %v8947_v37, 3212836864  ;;  %vm5905_vm5 = vmor %vm5903_vm6, %vm5904_vm8  ;;  %vm5955_vm6 = vcmp.ne.f32.partialorder %v8952_v54, %v8952_v54  ;;  %vm5956_vm8 = vcmp.ne.f32.partialorder %v8967_v63, %v8967_v63 }
0x22ee   :  { %v5887_v17 = vsel %vm9665_vm0, %v5886_v6, %v5885_v36  ;;  %v5896_v16 = vsel %vm5895_vm11, 1065353216, %v5894_v32  ;;  %vm5933_vm0 = vcmp.lt.s32.totalorder %v8952_v54, 0  ;;  %vm5947_vm11 = vcmp.eq.f32.partialorder %v8952_v54, 3212836864 }
0x22ef   :  { %v5889_v52 = vxor.u32 2147483648, %v5887_v17  ;;  %v5948_v59 = vsel %vm5947_vm11, 1065353216, %v5946_v45  ;;  %v5953_v25 = vsel %vm5930_vm2, %v5952_v34, %v5950_v21  ;;  %vm631_vm2 = vcmask 195584  }
0x22f0   :  { %v6473_v13 = vpop.eup %6472 }
0x22f1   :  { %v5890_v40 = vsel %vm9031_vm14, %v5889_v52, %v5887_v17  ;;  %v5937_v39 = vsel %vm5936_vm15, 2143289344, %v6473_v13  ;;  %vm9670_vm14 = vcmp.eq.f32.partialorder %v8947_v37, 1065353216  ;;  %vm5865_vm15 = vcmp.eq.f32.partialorder %v8959_v7, 1065353216 }
0x22f2   :  { %v5897_v28 = vsel %vm9668_vm13, %v5896_v16, %v5890_v40  ;;  %v5939_v18 = vsel %vm5931_vm1, %v5938_v5, %v5937_v39  ;;  %vm5907_vm12 = vmor %vm9670_vm14, %vm5864_vm3  ;;  %vm5935_vm3 = vcmp.eq.f32.partialorder %v8956_v35, 2139095040 }
0x22f3   :  { %v5902_v44 = vsel %vm5883_vm9, %v5901_v23, %v5897_v28  ;;  %v5941_v33 = vxor.u32 2147483648, %v5939_v18  ;;  %vm5940_vm1 = vmand %vm5933_vm0, %vm9081_vm10  ;;  %vm9671_vm9 = vcmp.eq.f32.partialorder %v8973_v60, 2139095040  ;;  %vm9672_vm10 = vcmask 130048  }
0x22f4   :  { %v5906_v55 = vsel %vm5905_vm5, 2143289344, %v5902_v44  ;;  %vm5932_vm0 = vcmp.eq.f32.partialorder %v8952_v54, 1065353216  ;;  %vm5957_vm13 = vmor %vm5955_vm6, %vm5956_vm8  ;;  %vm5917_vm5 = vcmp.eq.f32.partialorder %v8967_v63, 1065353216 }
0x22f5   :  { %v5908_v10 = vsel %vm5907_vm12, 1065353216, %v5906_v55  ;;  %v5942_v8 = vsel %vm5940_vm1, %v5941_v33, %v5939_v18  ;;  %vm5959_vm4 = vmor %vm5932_vm0, %vm5916_vm7  ;;  %vm9674_vm12 = vcmask 64512  }
0x22f6   :  { %v9140_v24 = vsel %vm5865_vm15, %v8947_v37, %v5908_v10  ;;  %v5949_v7 = vsel %vm9671_vm9, %v5948_v59, %v5942_v8  ;;  %vm9673_vm14 = vmmov %vm9672_vm10 }
0x22f7   :  { %v4548_v6 = vsel %vm9672_vm10, %v9140_v24, 0.0  ;;  %v5954_v19 = vsel %vm5935_vm3, %v5953_v25, %v5949_v7  ;;  %vm9675_vm11 = vmmov %vm9674_vm12 }
0x22f8   :  { %4549 = vadd.xlane.f32.xlu1 %v4548_v6  ;;  %v5958_v36 = vsel %vm5957_vm13, 2143289344, %v5954_v19  ;;  %vm9676_vm15 = vmmov %vm9675_vm11 }
0x22f9   :  { %v5960_v37 = vsel %vm5959_vm4, 1065353216, %v5958_v36  ;;  %vm9677_vm1 = vmmov %vm9675_vm11 }
0x22fa   :  { %v5961_v35 = vsel %vm5917_vm5, %v8952_v54, %v5960_v37  ;;  %vm9678_vm6 = vmmov %vm9677_vm1 }
0x22fb   :  { %v4551_v60 = vsel %vm9673_vm14, %v5961_v35, 0.0  ;;  %vm9679_vm8 = vmmov %vm9677_vm1 }
0x22fc   :  { %4552 = vadd.xlane.f32.xlu0 %v4551_v60  ;;  %vm9680_vm7 = vmmov %vm9677_vm1 }
0x22fd   :  { %vm9681_vm3 = vmmov %vm9672_vm10 }
0x22fe   :  { %vm9682_vm9 = vmmov %vm9677_vm1 }
0x22ff   :  { %vm9683_vm10 = vmmov %vm9677_vm1 }
0x2300   :  { %vm9684_vm0 = vmmov %vm9681_vm3 }
0x2301   :  { %vm9685_vm13 = vmmov %vm9677_vm1 }
0x2302   :  { %vm9686_vm4 = vmmov %vm9677_vm1 }
0x2303   :  { %vm9687_vm5 = vmmov %vm9677_vm1 }
0x2304   :  { %vm9688_vm14 = vmmov %vm9677_vm1 }
0x2309   :  { %623 = vrot.lane.b32.xlu1 %v6941_v1, %s6533_s28 }
0x230d   :  { %1197 = vrot.lane.b32.xlu1 %v7276_v50, %s6533_s28 }
0x2311   :  { %1199 = vrot.lane.b32.xlu1 %v7280_v56, %s6533_s28 }
0x2312   :  { %625 = vrot.lane.b32.xlu0 %v6946_v41, %s6533_s28 }
0x2315   :  { %1771 = vrot.lane.b32.xlu1 %v7596_v48, %s6533_s28 }
0x2316   :  { %1773 = vrot.lane.b32.xlu0 %v7600_v58, %s6533_s28 }
0x2319   :  { %2345 = vrot.lane.b32.xlu1 %v7926_v57, %s6533_s28 }
0x231a   :  { %2347 = vrot.lane.b32.xlu0 %v7930_v46, %s6533_s28 }
0x231d   :  { %2919 = vrot.lane.b32.xlu1 %v8251_v29, %s6533_s28 }
0x231e   :  { %2921 = vrot.lane.b32.xlu0 %v8255_v3, %s6533_s28 }
0x2321   :  { %3493 = vrot.lane.b32.xlu1 %v8576_v12, %s6533_s28 }
0x2322   :  { %3495 = vrot.lane.b32.xlu0 %v8580_v0, %s6533_s28 }
0x2325   :  { %4067 = vrot.lane.b32.xlu1 %v8892_v43, %s6533_s28 }
0x2326   :  { %4069 = vrot.lane.b32.xlu0 %v8896_v61, %s6533_s28 }
0x2381   :  { %v4550_v1 = vpop.xlane.xlu1 %4549 }
0x2382   :  { %v4554_v41 = vadd.f32 1e-16, %v4550_v1 }
0x2384   :  { %6474 = vrcp.f32 %v4554_v41 }
0x2385   :  { %v4553_v50 = vpop.xlane.xlu0 %4552  ;;  %v624_v56 = vpop.permute.xlu1 %623 }
0x2386   :  { %v4555_v48 = vadd.f32 1e-16, %v4553_v50  ;;  %v629_v58 = vsel %vm9674_vm12, %v6963_v15, %v624_v56  ;;  %vm9689_vm12 = vmmov %vm9677_vm1 }
0x2387   :  { %v632_v57 = vsel %vm631_vm2, %v629_v58, 0.0 }
0x2388   :  { %6476 = vrcp.f32 %v4555_v48  ;;  %634 = vst [vmem:[%s9287_s7] sm:$0xff] %v632_v57 }
0x2389   :  { %v626_v46 = vpop.permute.xlu0 %625  ;;  %v1198_v29 = vpop.permute.xlu1 %1197 }
0x238a   :  { %v630_v3 = vsel %vm9675_vm11, %v6961_v14, %v626_v46  ;;  %v1203_v12 = vsel %vm9676_vm15, %v7307_v11, %v1198_v29  ;;  %vm9690_vm11 = vmmov %vm9677_vm1 }
0x238b   :  { %v633_v0 = vsel %vm631_vm2, %v630_v3, 0.0  ;;  %v1205_v43 = vsel %vm631_vm2, %v1203_v12, 0.0  ;;  %vm9691_vm15 = vmmov %vm9677_vm1 }
0x238c   :  { %635 = vst [vmem:[%s9287_s7 + $0x8] sm:$0xff] %v633_v0  ;;  %4680 = vst [vmem:[%s9287_s7 + $0x10] sm:$0xff] %v1205_v43 }
0x238d   :  { %v1774_v15 = vpop.permute.xlu0 %1773  ;;  %v1200_v61 = vpop.permute.xlu1 %1199 }
0x238e   :  { %v1778_v14 = vsel %vm9677_vm1, %v7625_v51, %v1774_v15  ;;  %v1204_v11 = vsel %vm9678_vm6, %v7305_v47, %v1200_v61 }
0x238f   :  { %v1780_v54 = vsel %vm631_vm2, %v1778_v14, 0.0  ;;  %v1206_v63 = vsel %vm631_vm2, %v1204_v11, 0.0 }
0x2390   :  { %4693 = vst [vmem:[%s9287_s7 + $0x28] sm:$0xff] %v1780_v54  ;;  %4681 = vst [vmem:[%s9287_s7 + $0x18] sm:$0xff] %v1206_v63 }
0x2391   :  { %v6475_v32 = vpop.eup %6474  ;;  %v2348_v20 = vpop.permute.xlu0 %2347 }
0x2392   :  { %v1772_v4 = vpop.permute.xlu1 %1771  ;;  %v2352_v51 = vsel %vm9679_vm8, %v7955_v53, %v2348_v20  ;;  %v4557_v17 = vmul.f32 %v6475_v32, %v9140_v24 }
0x2393   :  { %v1777_v47 = vsel %vm9680_vm7, %v7627_v31, %v1772_v4  ;;  %v2354_v9 = vsel %vm631_vm2, %v2352_v51, 0.0 }
0x2394   :  { %v1779_v21 = vsel %vm631_vm2, %v1777_v47, 0.0  ;;  %4705 = vst [vmem:[%s9287_s7 + $0x38] sm:$0xff] %v2354_v9  ;;  %4641 = vrot.lane.b32.xlu1 %v4557_v17, %s6533_s28  ;;  %5127 = vmatprep.mubr.msk.f32.mxu0 %vm9681_vm3, %v4557_v17 }
0x2395   :  { %4692 = vst [vmem:[%s9287_s7 + $0x20] sm:$0xff] %v1779_v21  ;;  %v6477_v53 = vpop.eup %6476  ;;  %v2922_v31 = vpop.permute.xlu0 %2921 }
0x2396   :  { %v2346_v52 = vpop.permute.xlu1 %2345  ;;  %v2926_v2 = vsel %vm9682_vm9, %v8275_v49, %v2922_v31  ;;  %v4559_v16 = vmul.f32 %v6477_v53, %v5961_v35 }
0x2397   :  { %v2351_v13 = vsel %vm9683_vm10, %v7957_v62, %v2346_v52  ;;  %v2928_v40 = vsel %vm631_vm2, %v2926_v2, 0.0 }
0x2398   :  { %v2353_v39 = vsel %vm631_vm2, %v2351_v13, 0.0  ;;  %4717 = vst [vmem:[%s9287_s7 + $0x48] sm:$0xff] %v2928_v40  ;;  %4643 = vrot.lane.b32.xlu0 %v4559_v16, %s6533_s28  ;;  %5128 = vmatmul.mubr.msk.f32.vlgmr.msra.gmra.mxu0 %vm9684_vm0, %v4559_v16 }
0x2399   :  { %4704 = vst [vmem:[%s9287_s7 + $0x30] sm:$0xff] %v2353_v39  ;;  %v3496_v49 = vpop.permute.xlu0 %3495 }
0x239a   :  { %v2920_v5 = vpop.permute.xlu1 %2919  ;;  %v3500_v62 = vsel %vm9685_vm13, %v8610_v30, %v3496_v49 }
0x239b   :  { %v2925_v22 = vsel %vm9686_vm4, %v8277_v27, %v2920_v5  ;;  %v3502_v28 = vsel %vm631_vm2, %v3500_v62, 0.0 }
0x239c   :  { %v2927_v23 = vsel %vm631_vm2, %v2925_v22, 0.0  ;;  %4729 = vst [vmem:[%s9287_s7 + $0x58] sm:$0xff] %v3502_v28 }
0x239d   :  { %4716 = vst [vmem:[%s9287_s7 + $0x40] sm:$0xff] %v2927_v23  ;;  %v4070_v18 = vpop.permute.xlu0 %4069 }
0x239e   :  { %v3494_v45 = vpop.permute.xlu1 %3493  ;;  %v4074_v30 = vsel %vm9687_vm5, %v8910_v42, %v4070_v18 }
0x239f   :  { %v3499_v27 = vsel %vm9688_vm14, %v8612_v26, %v3494_v45  ;;  %v4076_v44 = vsel %vm631_vm2, %v4074_v30, 0.0 }
0x23a0   :  { %v3501_v33 = vsel %vm631_vm2, %v3499_v27, 0.0  ;;  %4741 = vst [vmem:[%s9287_s7 + $0x68] sm:$0xff] %v4076_v44 }
0x23a1   :  { %4728 = vst [vmem:[%s9287_s7 + $0x50] sm:$0xff] %v3501_v33 }
0x23a2   :  { %v4068_v34 = vpop.permute.xlu1 %4067 }
0x23a3   :  { %v4073_v55 = vsel %vm9689_vm12, %v8912_v38, %v4068_v34 }
0x23a4   :  { %v4075_v42 = vsel %vm631_vm2, %v4073_v55, 0.0 }
0x23a5   :  { %4740 = vst [vmem:[%s9287_s7 + $0x60] sm:$0xff] %v4075_v42 }
0x2406   :  { %v4642_v59 = vpop.permute.xlu1 %4641 }
0x240a   :  { %v4644_v26 = vpop.permute.xlu0 %4643 }
0x2458   :  { %v5129_v10 = vpop.f32.mrf.mxu0 }
0x2459   :  { %v4648_v8 = vsel %vm9690_vm11, %v5129_v10, %v4644_v26 }
0x245a   :  { %v4650_v24 = vsel %vm631_vm2, %v4648_v8, 0.0  ;;  %v4632_v7 = vpop.f32.mrf.mxu0 }
0x245b   :  { %4753 = vst [vmem:[%s9287_s7 + $0x78] sm:$0xff] %v4650_v24  ;;  %v4647_v38 = vsel %vm9691_vm15, %v4632_v7, %v4642_v59 }
0x245c   :  { %v4649_v25 = vsel %vm631_vm2, %v4647_v38, 0.0 }
0x245d   :  { %4752 = vst [vmem:[%s9287_s7 + $0x70] sm:$0xff] %v4649_v25 }
0x245e   :  { %4658 = vsyncpa [#allocation3], 1 }

</bundles_post_ra>
